<compile_context>
chip_gen: v5e
topology: v5e:2x2
jax: 0.10.0
libtpu: 0.0.40
codegen_flags: <defaults>
</compile_context>

<pallas_src>
import functools
import math

import jax
import jax.numpy as jnp
from jax import lax
from jax.experimental import pallas as pl
from jax.experimental.pallas import tpu as pltpu


def _round_up(v, m):
    return (v + m - 1) // m * m


def _adaptive_dilated_kernel(x_ref, rate_ref, w_ref, b_ref, o_ref, *,
                             K, stride, C_in, H_in, W_in, WIN_H,
                             TILE_OH, TILE_W):
    """One grid step = (batch n, TILE_OH output rows, TILE_W output columns).

    x_ref    : (H_in, C_in, W_in)        bf16 padded image of this batch item
    rate_ref : (TILE_OH, TILE_W)         f32 per-output-pixel dilation rate
    w_ref    : (K*K, C_out, C_in)        bf16 taps
    b_ref    : (C_out, 1)                f32
    o_ref    : (C_out, TILE_OH, TILE_W)  f32
    """
    C_out = w_ref.shape[1]
    oh0 = pl.program_id(1) * TILE_OH
    ow0 = pl.program_id(2) * TILE_W
    fs = jnp.float32(stride)

    # Hoisted per-tile constants (do not rebuild broadcasts inside loops).
    ow_f = (ow0 + lax.broadcasted_iota(jnp.int32, (1, TILE_W), 1)).astype(jnp.float32)
    iw_f = lax.broadcasted_iota(jnp.int32, (W_in, 1), 0).astype(jnp.float32)
    bias = b_ref[...]                                           # (C_out, 1)

    for t in range(TILE_OH):
        oh = oh0 + t                                            # int32 scalar
        # Static-height input-row window reachable by this output row; the
        # start is clamped so the window always stays inside the padded image
        # (rows outside the window / image contribute zero by construction).
        row_start = jnp.clip(oh * stride, 0, H_in - WIN_H)
        xs = jnp.concatenate([x_ref[row_start + i] for i in range(WIN_H)],
                             axis=0)                            # (WIN_H*C_in, W_in) bf16

        r = rate_ref[pl.ds(t, 1), :]                            # (1, TILE_W)
        pw_base = ow_f * fs

        # Horizontal gather per kw: hat-function selection weights feed one
        # MXU matmul with contraction W_in (bilinear interpolation along W).
        g = []
        for kw in range(K):
            pw = pw_base + jnp.float32(kw) * r                  # (1, TILE_W)
            ww = jnp.maximum(0.0, 1.0 - jnp.abs(iw_f - pw))     # (W_in, TILE_W)
            g.append(jnp.dot(xs, ww.astype(jnp.bfloat16),
                             preferred_element_type=jnp.float32))   # (WIN_H*C_in, TILE_W)

        ph_base = (oh * stride).astype(jnp.float32)
        rs_f = row_start.astype(jnp.float32)

        acc = jnp.zeros((C_out, TILE_W), jnp.float32)
        for kh in range(K):
            ph = ph_base + jnp.float32(kh) * r                  # (1, TILE_W)
            dh = rs_f - ph
            # Vertical bilinear weights for the WIN_H window rows (tiny).
            whs = [jnp.maximum(0.0, 1.0 - jnp.abs(dh + jnp.float32(i)))
                   for i in range(WIN_H)]
            for kw in range(K):
                gk = g[kw]
                tap = gk[0:C_in, :] * whs[0]
                for i in range(1, WIN_H):
                    tap = tap + gk[i * C_in:(i + 1) * C_in, :] * whs[i]
                # Per-tap channel mix on the MXU with f32 accumulation
                # (avoids sublane-misaligned concatenation of taps).
                acc = acc + jnp.dot(w_ref[kh * K + kw], tap.astype(jnp.bfloat16),
                                    preferred_element_type=jnp.float32)
        o_ref[:, t, :] = acc + bias


def adaptive_dilated_conv2d_forward(x_pad, weight, rate_map, bias, stride, *,
                                    max_rate=1.0, tile_oh=8, tile_w=256):
    """x_pad: (N, C_in, Hp, Wp) already padded.  weight: (C_out, C_in, K, K).
    rate_map: (H_out, W_out).  bias: (C_out,).  Returns (N, C_out, H_out, W_out)."""
    N, C_in, H_in, W_in = x_pad.shape
    C_out, _, K, _ = weight.shape
    H_out = (H_in - (K - 1) - 1) // stride + 1
    W_out = (W_in - (K - 1) - 1) // stride + 1

    assert max(H_in, W_in) < (1 << 24), "f32 coordinate math needs dims < 2^24"

    # Static input-row window height reachable by one output row.
    WIN_H = min(int(math.ceil((K - 1) * float(max_rate))) + 2, H_in)

    TILE_OH = max(8, (int(tile_oh) // 8) * 8)
    W_pad128 = _round_up(W_out, 128)
    TILE_W = min(max(128, (int(tile_w) // 128) * 128), W_pad128)
    H_pad = _round_up(H_out, TILE_OH)
    W_pad = _round_up(W_out, TILE_W)

    # (N, C, H, W) -> (N, H, C, W): whole-row loads inside the kernel are
    # dynamic indices on the leading (untiled) dim of the per-batch block.
    x_slab = jnp.transpose(x_pad, (0, 2, 1, 3)).astype(jnp.bfloat16)

    # TODO(synk): behaviour of the proprietary op for rates outside
    # [0, max_rate] is unknown; clamp so the static row window covers samples.
    rate = jnp.clip(rate_map.astype(jnp.float32), 0.0, float(max_rate))
    rate = jnp.pad(rate, ((0, H_pad - H_out), (0, W_pad - W_out)),
                   constant_values=1.0)

    # weight[o, c, kh, kw] -> w3[kh*K + kw, o, c]
    w3 = jnp.transpose(weight, (2, 3, 0, 1)).reshape(K * K, C_out, C_in)
    w3 = w3.astype(jnp.bfloat16)
    b2 = bias.reshape(C_out, 1).astype(jnp.float32)

    kernel = functools.partial(
        _adaptive_dilated_kernel, K=K, stride=stride, C_in=C_in, H_in=H_in,
        W_in=W_in, WIN_H=WIN_H, TILE_OH=TILE_OH, TILE_W=TILE_W)

    n_row_tiles = H_pad // TILE_OH
    n_col_tiles = W_pad // TILE_W
    grid = (N, n_row_tiles, n_col_tiles)

    # --- VMEM budget derived from actual block sizes (double-buffered specs +
    #     in-kernel working set), capped by the chip's VMEM capacity. ---
    xb = H_in * _round_up(C_in, 16) * _round_up(W_in, 128) * 2
    rb = TILE_OH * TILE_W * 4
    wb = K * K * _round_up(C_out, 16) * _round_up(C_in, 128) * 2
    bb = _round_up(C_out, 8) * 128 * 4
    ob = _round_up(C_out, 8) * TILE_OH * TILE_W * 4
    work = (K * _round_up(W_in, 8) * TILE_W * 6                      # ww f32+bf16
            + K * WIN_H * C_in * TILE_W * 4                          # g
            + 8 * _round_up(C_out, 8) * TILE_W * 4                   # acc/taps
            + 2 * WIN_H * _round_up(C_in, 16) * _round_up(W_in, 128) * 2)  # xs
    est = 2 * (xb + rb + wb + bb + ob) + work + (4 << 20)
    try:
        vmem_cap = pltpu.get_tpu_info().vmem_capacity_bytes
    except Exception:  # best-effort hardware query; conservative fallback
        vmem_cap = 64 * 1024 * 1024
    vmem_limit = int(min(max(est, 32 * 1024 * 1024), int(vmem_cap * 0.85)))

    # --- Cost estimate (x is fetched once per batch, not once per tile). ---
    rows = N * H_pad * n_col_tiles
    gather_flops = rows * K * 2 * WIN_H * C_in * W_in * TILE_W
    mix_flops = rows * K * K * 2 * (WIN_H * C_in + C_out * C_in) * TILE_W
    bytes_accessed = (2 * N * H_in * C_in * W_in + 4 * H_pad * W_pad
                      + 2 * K * K * C_out * C_in + 4 * C_out
                      + 4 * N * C_out * H_pad * W_pad)

    out = pl.pallas_call(
        kernel,
        out_shape=jax.ShapeDtypeStruct((N, C_out, H_pad, W_pad), jnp.float32),
        grid=grid,
        in_specs=[
            pl.BlockSpec((None, H_in, C_in, W_in), lambda n, i, j: (n, 0, 0, 0)),
            pl.BlockSpec((TILE_OH, TILE_W), lambda n, i, j: (i, j)),
            pl.BlockSpec((K * K, C_out, C_in), lambda n, i, j: (0, 0, 0)),
            pl.BlockSpec((C_out, 1), lambda n, i, j: (0, 0)),
        ],
        out_specs=pl.BlockSpec((None, C_out, TILE_OH, TILE_W),
                               lambda n, i, j: (n, 0, i, j)),
        compiler_params=pltpu.CompilerParams(
            dimension_semantics=("parallel", "parallel", "parallel"),
            vmem_limit_bytes=vmem_limit),
        cost_estimate=pl.CostEstimate(flops=gather_flops + mix_flops,
                                      transcendentals=0,
                                      bytes_accessed=bytes_accessed),
    )(x_slab, rate, w3, b2)

    # Drop H/W padding; layout is already NCHW (no transpose needed).
    return out[:, :, :H_out, :W_out]


class BasicAdaptiveDilatedConv2D:
    """JAX/Pallas port of the PyTorch module (forward only)."""

    def __init__(self, in_channels, out_channels, kernel_size,
                 stride=1, scale=100, dilation=1, *, key,
                 tile_oh=8, tile_w=256):
        self.kernel_size = kernel_size
        self.stride = stride
        self.pad = kernel_size // 2
        self.tile_oh = tile_oh
        self.tile_w = tile_w
        # Static bound on the (learnable) rate map used to size the row window.
        self.max_rate = max(1.0, float(dilation))
        # deterministic xavier-uniform init (matches nn.init.xavier_uniform_)
        fan_in = in_channels * kernel_size * kernel_size
        fan_out = out_channels * kernel_size * kernel_size
        limit = (6.0 / (fan_in + fan_out)) ** 0.5
        self.weight = jax.random.uniform(
            key, (out_channels, in_channels, kernel_size, kernel_size),
            dtype=jnp.float32, minval=-limit, maxval=limit)
        self.rates = jnp.ones((1, 1, scale, scale), jnp.float32) * dilation
        self.bias = jnp.zeros((out_channels,), jnp.float32)

    def __call__(self, x):
        # pad like F.pad(x, [p, p, p, p])
        p = self.pad
        x_pad = jnp.pad(x, ((0, 0), (0, 0), (p, p), (p, p)))
        Hp, Wp = x_pad.shape[2], x_pad.shape[3]
        K, s = self.kernel_size, self.stride
        h_out = (Hp - (K - 1) - 1) // s + 1
        w_out = (Wp - (K - 1) - 1) // s + 1
        # F.interpolate(..., mode='nearest') of the (scale, scale) rate grid
        sH, sW = self.rates.shape[2], self.rates.shape[3]
        hi = (jnp.arange(h_out) * sH // h_out).astype(jnp.int32)
        wi = (jnp.arange(w_out) * sW // w_out).astype(jnp.int32)
        rate_map = self.rates[0, 0][hi][:, wi]                    # (h_out, w_out)
        return adaptive_dilated_conv2d_forward(
            x_pad, self.weight, rate_map, self.bias, self.stride,
            max_rate=self.max_rate, tile_oh=self.tile_oh, tile_w=self.tile_w)


if __name__ == "__main__":
    key = jax.random.PRNGKey(0)
    kx, kw = jax.random.split(key)

    N, C_in, H, W = 2, 4, 16, 16
    C_out, K = 8, 3

    x = jax.random.normal(kx, (N, C_in, H, W), dtype=jnp.float32)
    mod = BasicAdaptiveDilatedConv2D(C_in, C_out, K, stride=1, scale=100,
                                     dilation=1, key=kw)

    out = jax.block_until_ready(mod(x))

    # Reference: with constant rate == 1 this is exactly Conv2d(padding=K//2).
    # The kernel feeds the MXU bf16 operands (f32 accumulation), so quantize
    # the reference inputs/weights the same way to isolate kernel-logic error.
    xq = x.astype(jnp.bfloat16).astype(jnp.float32)
    wq = mod.weight.astype(jnp.bfloat16).astype(jnp.float32)
    ref = lax.conv_general_dilated(
        xq, wq, window_strides=(1, 1),
        padding=[(K // 2, K // 2), (K // 2, K // 2)],
        dimension_numbers=("NCHW", "OIHW", "NCHW"),
        precision=lax.Precision.HIGHEST,
    ) + mod.bias[None, :, None, None]

    assert out.shape == (N, C_out, H, W), out.shape
    max_err = float(jnp.max(jnp.abs(out - ref)))
    assert jnp.allclose(out, ref, atol=2e-3, rtol=2e-3), max_err

    print("KERNEL_OK")
</pallas_src>

<mosaic_0001>
module attributes {stable_mosaic.version = 11 : i64} {
  func.func @_adaptive_dilated_kernel(%arg0: i32, %arg1: i32, %arg2: i32, %arg3: memref<1x18x4x18xbf16, #tpu.memory_space<vmem>>, %arg4: memref<8x128xf32, #tpu.memory_space<vmem>>, %arg5: memref<9x8x4xbf16, #tpu.memory_space<vmem>>, %arg6: memref<8x1xf32, #tpu.memory_space<vmem>>, %arg7: memref<1x8x8x128xf32, #tpu.memory_space<vmem>>) attributes {dimension_semantics = [#tpu.dimension_semantics<parallel>, #tpu.dimension_semantics<parallel>, #tpu.dimension_semantics<parallel>], iteration_bounds = array<i64: 2, 2, 1>, scalar_prefetch = 0 : i64, scratch_operands = 0 : i64, tpu.core_type = #tpu.core_type<tc>, window_params = [{transform_indices = @transform_0, window_bounds = array<i64: 1, 18, 4, 18>}, {transform_indices = @transform_1, window_bounds = array<i64: 8, 128>}, {pipeline_mode = #tpu.pipeline_mode<synchronous>, transform_indices = @transform_2, window_bounds = array<i64: 9, 8, 4>}, {pipeline_mode = #tpu.pipeline_mode<synchronous>, transform_indices = @transform_3, window_bounds = array<i64: 8, 1>}, {transform_indices = @transform_4, window_bounds = array<i64: 1, 8, 8, 128>}]} {
    %c8_i32 = arith.constant 8 : i32
    %0 = arith.muli %arg1, %c8_i32 : i32
    %c128_i32 = arith.constant 128 : i32
    %1 = arith.muli %arg2, %c128_i32 : i32
    %2 = tpu.iota {dimensions = array<i32: 1>} : vector<1x128xi32>
    %3 = vector.broadcast %1 : i32 to vector<1x128xi32>
    %4 = arith.addi %3, %2 : vector<1x128xi32>
    %5 = arith.sitofp %4 : vector<1x128xi32> to vector<1x128xf32>
    %6 = tpu.iota {dimensions = array<i32: 0>} : vector<18x1xi32>
    %7 = arith.sitofp %6 : vector<18x1xi32> to vector<18x1xf32>
    %c0 = arith.constant 0 : index
    %c0_0 = arith.constant 0 : index
    %8 = vector.load %arg6[%c0, %c0_0] : memref<8x1xf32, #tpu.memory_space<vmem>>, vector<8x1xf32>
    %c0_i32 = arith.constant 0 : i32
    %9 = arith.addi %0, %c0_i32 : i32
    %c1_i32 = arith.constant 1 : i32
    %10 = arith.muli %9, %c1_i32 : i32
    %c0_i32_1 = arith.constant 0 : i32
    %c14_i32 = arith.constant 14 : i32
    %11 = arith.maxsi %c0_i32_1, %10 : i32
    %12 = arith.minsi %c14_i32, %11 : i32
    %c0_i32_2 = arith.constant 0 : i32
    %13 = arith.addi %12, %c0_i32_2 : i32
    %c0_3 = arith.constant 0 : index
    %14 = arith.index_cast %13 : i32 to index
    %c0_4 = arith.constant 0 : index
    %c0_5 = arith.constant 0 : index
    %15 = vector.load %arg3[%c0_3, %14, %c0_4, %c0_5] : memref<1x18x4x18xbf16, #tpu.memory_space<vmem>>, vector<1x1x4x18xbf16>
    %16 = vector.shape_cast %15 : vector<1x1x4x18xbf16> to vector<4x18xbf16>
    %c1_i32_6 = arith.constant 1 : i32
    %17 = arith.addi %12, %c1_i32_6 : i32
    %c0_7 = arith.constant 0 : index
    %18 = arith.index_cast %17 : i32 to index
    %c0_8 = arith.constant 0 : index
    %c0_9 = arith.constant 0 : index
    %19 = vector.load %arg3[%c0_7, %18, %c0_8, %c0_9] : memref<1x18x4x18xbf16, #tpu.memory_space<vmem>>, vector<1x1x4x18xbf16>
    %20 = vector.shape_cast %19 : vector<1x1x4x18xbf16> to vector<4x18xbf16>
    %c2_i32 = arith.constant 2 : i32
    %21 = arith.addi %12, %c2_i32 : i32
    %c0_10 = arith.constant 0 : index
    %22 = arith.index_cast %21 : i32 to index
    %c0_11 = arith.constant 0 : index
    %c0_12 = arith.constant 0 : index
    %23 = vector.load %arg3[%c0_10, %22, %c0_11, %c0_12] : memref<1x18x4x18xbf16, #tpu.memory_space<vmem>>, vector<1x1x4x18xbf16>
    %24 = vector.shape_cast %23 : vector<1x1x4x18xbf16> to vector<4x18xbf16>
    %c3_i32 = arith.constant 3 : i32
    %25 = arith.addi %12, %c3_i32 : i32
    %c0_13 = arith.constant 0 : index
    %26 = arith.index_cast %25 : i32 to index
    %c0_14 = arith.constant 0 : index
    %c0_15 = arith.constant 0 : index
    %27 = vector.load %arg3[%c0_13, %26, %c0_14, %c0_15] : memref<1x18x4x18xbf16, #tpu.memory_space<vmem>>, vector<1x1x4x18xbf16>
    %28 = vector.shape_cast %27 : vector<1x1x4x18xbf16> to vector<4x18xbf16>
    %29 = tpu.concatenate %16, %20, %24, %28 in 0 : vector<4x18xbf16>, vector<4x18xbf16>, vector<4x18xbf16>, vector<4x18xbf16> -> vector<16x18xbf16>
    %c0_16 = arith.constant 0 : index
    %c0_17 = arith.constant 0 : index
    %30 = vector.load %arg4[%c0_16, %c0_17] : memref<8x128xf32, #tpu.memory_space<vmem>>, vector<1x128xf32>
    %cst = arith.constant 1.000000e+00 : f32
    %31 = vector.broadcast %cst : f32 to vector<1x128xf32>
    %32 = arith.mulf %5, %31 : vector<1x128xf32>
    %cst_18 = arith.constant 0.000000e+00 : f32
    %33 = vector.broadcast %cst_18 : f32 to vector<1x128xf32>
    %34 = arith.mulf %33, %30 : vector<1x128xf32>
    %35 = arith.addf %32, %34 : vector<1x128xf32>
    %36 = vector.broadcast %7 : vector<18x1xf32> to vector<18x128xf32>
    %37 = vector.broadcast %35 : vector<1x128xf32> to vector<18x128xf32>
    %38 = arith.subf %36, %37 : vector<18x128xf32>
    %39 = math.absf %38 : vector<18x128xf32>
    %cst_19 = arith.constant 1.000000e+00 : f32
    %40 = vector.broadcast %cst_19 : f32 to vector<18x128xf32>
    %41 = arith.subf %40, %39 : vector<18x128xf32>
    %cst_20 = arith.constant 0.000000e+00 : f32
    %42 = vector.broadcast %cst_20 : f32 to vector<18x128xf32>
    %43 = arith.maximumf %42, %41 : vector<18x128xf32>
    %44 = arith.truncf %43 : vector<18x128xf32> to vector<18x128xbf16>
    %cst_21 = arith.constant dense<0.000000e+00> : vector<16x128xf32>
    %45 = tpu.matmul %29, %44, %cst_21 {dimension_numbers = #tpu.dot_dimension_numbers<[1], [0], [0], [1], [0, 0, 1, 1], [], []>} : vector<16x18xbf16>, vector<18x128xbf16>, vector<16x128xf32> -> vector<16x128xf32>
    %cst_22 = arith.constant 1.000000e+00 : f32
    %46 = vector.broadcast %cst_22 : f32 to vector<1x128xf32>
    %47 = arith.mulf %46, %30 : vector<1x128xf32>
    %48 = arith.addf %32, %47 : vector<1x128xf32>
    %49 = vector.broadcast %7 : vector<18x1xf32> to vector<18x128xf32>
    %50 = vector.broadcast %48 : vector<1x128xf32> to vector<18x128xf32>
    %51 = arith.subf %49, %50 : vector<18x128xf32>
    %52 = math.absf %51 : vector<18x128xf32>
    %cst_23 = arith.constant 1.000000e+00 : f32
    %53 = vector.broadcast %cst_23 : f32 to vector<18x128xf32>
    %54 = arith.subf %53, %52 : vector<18x128xf32>
    %cst_24 = arith.constant 0.000000e+00 : f32
    %55 = vector.broadcast %cst_24 : f32 to vector<18x128xf32>
    %56 = arith.maximumf %55, %54 : vector<18x128xf32>
    %57 = arith.truncf %56 : vector<18x128xf32> to vector<18x128xbf16>
    %cst_25 = arith.constant dense<0.000000e+00> : vector<16x128xf32>
    %58 = tpu.matmul %29, %57, %cst_25 {dimension_numbers = #tpu.dot_dimension_numbers<[1], [0], [0], [1], [0, 0, 1, 1], [], []>} : vector<16x18xbf16>, vector<18x128xbf16>, vector<16x128xf32> -> vector<16x128xf32>
    %cst_26 = arith.constant 2.000000e+00 : f32
    %59 = vector.broadcast %cst_26 : f32 to vector<1x128xf32>
    %60 = arith.mulf %59, %30 : vector<1x128xf32>
    %61 = arith.addf %32, %60 : vector<1x128xf32>
    %62 = vector.broadcast %7 : vector<18x1xf32> to vector<18x128xf32>
    %63 = vector.broadcast %61 : vector<1x128xf32> to vector<18x128xf32>
    %64 = arith.subf %62, %63 : vector<18x128xf32>
    %65 = math.absf %64 : vector<18x128xf32>
    %cst_27 = arith.constant 1.000000e+00 : f32
    %66 = vector.broadcast %cst_27 : f32 to vector<18x128xf32>
    %67 = arith.subf %66, %65 : vector<18x128xf32>
    %cst_28 = arith.constant 0.000000e+00 : f32
    %68 = vector.broadcast %cst_28 : f32 to vector<18x128xf32>
    %69 = arith.maximumf %68, %67 : vector<18x128xf32>
    %70 = arith.truncf %69 : vector<18x128xf32> to vector<18x128xbf16>
    %cst_29 = arith.constant dense<0.000000e+00> : vector<16x128xf32>
    %71 = tpu.matmul %29, %70, %cst_29 {dimension_numbers = #tpu.dot_dimension_numbers<[1], [0], [0], [1], [0, 0, 1, 1], [], []>} : vector<16x18xbf16>, vector<18x128xbf16>, vector<16x128xf32> -> vector<16x128xf32>
    %c1_i32_30 = arith.constant 1 : i32
    %72 = arith.muli %9, %c1_i32_30 : i32
    %73 = arith.sitofp %72 : i32 to f32
    %74 = arith.sitofp %12 : i32 to f32
    %cst_31 = arith.constant 0.000000e+00 : f32
    %75 = vector.broadcast %cst_31 : f32 to vector<8x128xf32>
    %cst_32 = arith.constant 0.000000e+00 : f32
    %76 = vector.broadcast %cst_32 : f32 to vector<1x128xf32>
    %77 = arith.mulf %76, %30 : vector<1x128xf32>
    %78 = vector.broadcast %73 : f32 to vector<1x128xf32>
    %79 = arith.addf %78, %77 : vector<1x128xf32>
    %80 = vector.broadcast %74 : f32 to vector<1x128xf32>
    %81 = arith.subf %80, %79 : vector<1x128xf32>
    %cst_33 = arith.constant 0.000000e+00 : f32
    %82 = vector.broadcast %cst_33 : f32 to vector<1x128xf32>
    %83 = arith.addf %81, %82 : vector<1x128xf32>
    %84 = math.absf %83 : vector<1x128xf32>
    %cst_34 = arith.constant 1.000000e+00 : f32
    %85 = vector.broadcast %cst_34 : f32 to vector<1x128xf32>
    %86 = arith.subf %85, %84 : vector<1x128xf32>
    %cst_35 = arith.constant 0.000000e+00 : f32
    %87 = vector.broadcast %cst_35 : f32 to vector<1x128xf32>
    %88 = arith.maximumf %87, %86 : vector<1x128xf32>
    %cst_36 = arith.constant 1.000000e+00 : f32
    %89 = vector.broadcast %cst_36 : f32 to vector<1x128xf32>
    %90 = arith.addf %81, %89 : vector<1x128xf32>
    %91 = math.absf %90 : vector<1x128xf32>
    %cst_37 = arith.constant 1.000000e+00 : f32
    %92 = vector.broadcast %cst_37 : f32 to vector<1x128xf32>
    %93 = arith.subf %92, %91 : vector<1x128xf32>
    %cst_38 = arith.constant 0.000000e+00 : f32
    %94 = vector.broadcast %cst_38 : f32 to vector<1x128xf32>
    %95 = arith.maximumf %94, %93 : vector<1x128xf32>
    %cst_39 = arith.constant 2.000000e+00 : f32
    %96 = vector.broadcast %cst_39 : f32 to vector<1x128xf32>
    %97 = arith.addf %81, %96 : vector<1x128xf32>
    %98 = math.absf %97 : vector<1x128xf32>
    %cst_40 = arith.constant 1.000000e+00 : f32
    %99 = vector.broadcast %cst_40 : f32 to vector<1x128xf32>
    %100 = arith.subf %99, %98 : vector<1x128xf32>
    %cst_41 = arith.constant 0.000000e+00 : f32
    %101 = vector.broadcast %cst_41 : f32 to vector<1x128xf32>
    %102 = arith.maximumf %101, %100 : vector<1x128xf32>
    %cst_42 = arith.constant 3.000000e+00 : f32
    %103 = vector.broadcast %cst_42 : f32 to vector<1x128xf32>
    %104 = arith.addf %81, %103 : vector<1x128xf32>
    %105 = math.absf %104 : vector<1x128xf32>
    %cst_43 = arith.constant 1.000000e+00 : f32
    %106 = vector.broadcast %cst_43 : f32 to vector<1x128xf32>
    %107 = arith.subf %106, %105 : vector<1x128xf32>
    %cst_44 = arith.constant 0.000000e+00 : f32
    %108 = vector.broadcast %cst_44 : f32 to vector<1x128xf32>
    %109 = arith.maximumf %108, %107 : vector<1x128xf32>
    %110 = vector.extract_strided_slice %45 {offsets = [0, 0], sizes = [4, 128], strides = [1, 1]} : vector<16x128xf32> to vector<4x128xf32>
    %111 = vector.broadcast %88 : vector<1x128xf32> to vector<4x128xf32>
    %112 = arith.mulf %110, %111 : vector<4x128xf32>
    %113 = vector.extract_strided_slice %45 {offsets = [4, 0], sizes = [4, 128], strides = [1, 1]} : vector<16x128xf32> to vector<4x128xf32>
    %114 = vector.broadcast %95 : vector<1x128xf32> to vector<4x128xf32>
    %115 = arith.mulf %113, %114 : vector<4x128xf32>
    %116 = arith.addf %112, %115 : vector<4x128xf32>
    %117 = vector.extract_strided_slice %45 {offsets = [8, 0], sizes = [4, 128], strides = [1, 1]} : vector<16x128xf32> to vector<4x128xf32>
    %118 = vector.broadcast %102 : vector<1x128xf32> to vector<4x128xf32>
    %119 = arith.mulf %117, %118 : vector<4x128xf32>
    %120 = arith.addf %116, %119 : vector<4x128xf32>
    %121 = vector.extract_strided_slice %45 {offsets = [12, 0], sizes = [4, 128], strides = [1, 1]} : vector<16x128xf32> to vector<4x128xf32>
    %122 = vector.broadcast %109 : vector<1x128xf32> to vector<4x128xf32>
    %123 = arith.mulf %121, %122 : vector<4x128xf32>
    %124 = arith.addf %120, %123 : vector<4x128xf32>
    %c0_45 = arith.constant 0 : index
    %c0_46 = arith.constant 0 : index
    %c0_47 = arith.constant 0 : index
    %125 = vector.load %arg5[%c0_45, %c0_46, %c0_47] : memref<9x8x4xbf16, #tpu.memory_space<vmem>>, vector<1x8x4xbf16>
    %126 = vector.shape_cast %125 : vector<1x8x4xbf16> to vector<8x4xbf16>
    %127 = arith.truncf %124 : vector<4x128xf32> to vector<4x128xbf16>
    %cst_48 = arith.constant dense<0.000000e+00> : vector<8x128xf32>
    %128 = tpu.matmul %126, %127, %cst_48 {dimension_numbers = #tpu.dot_dimension_numbers<[1], [0], [0], [1], [0, 0, 1, 1], [], []>} : vector<8x4xbf16>, vector<4x128xbf16>, vector<8x128xf32> -> vector<8x128xf32>
    %129 = arith.addf %75, %128 : vector<8x128xf32>
    %130 = vector.extract_strided_slice %58 {offsets = [0, 0], sizes = [4, 128], strides = [1, 1]} : vector<16x128xf32> to vector<4x128xf32>
    %131 = vector.broadcast %88 : vector<1x128xf32> to vector<4x128xf32>
    %132 = arith.mulf %130, %131 : vector<4x128xf32>
    %133 = vector.extract_strided_slice %58 {offsets = [4, 0], sizes = [4, 128], strides = [1, 1]} : vector<16x128xf32> to vector<4x128xf32>
    %134 = vector.broadcast %95 : vector<1x128xf32> to vector<4x128xf32>
    %135 = arith.mulf %133, %134 : vector<4x128xf32>
    %136 = arith.addf %132, %135 : vector<4x128xf32>
    %137 = vector.extract_strided_slice %58 {offsets = [8, 0], sizes = [4, 128], strides = [1, 1]} : vector<16x128xf32> to vector<4x128xf32>
    %138 = vector.broadcast %102 : vector<1x128xf32> to vector<4x128xf32>
    %139 = arith.mulf %137, %138 : vector<4x128xf32>
    %140 = arith.addf %136, %139 : vector<4x128xf32>
    %141 = vector.extract_strided_slice %58 {offsets = [12, 0], sizes = [4, 128], strides = [1, 1]} : vector<16x128xf32> to vector<4x128xf32>
    %142 = vector.broadcast %109 : vector<1x128xf32> to vector<4x128xf32>
    %143 = arith.mulf %141, %142 : vector<4x128xf32>
    %144 = arith.addf %140, %143 : vector<4x128xf32>
    %c1 = arith.constant 1 : index
    %c0_49 = arith.constant 0 : index
    %c0_50 = arith.constant 0 : index
    %145 = vector.load %arg5[%c1, %c0_49, %c0_50] : memref<9x8x4xbf16, #tpu.memory_space<vmem>>, vector<1x8x4xbf16>
    %146 = vector.shape_cast %145 : vector<1x8x4xbf16> to vector<8x4xbf16>
    %147 = arith.truncf %144 : vector<4x128xf32> to vector<4x128xbf16>
    %cst_51 = arith.constant dense<0.000000e+00> : vector<8x128xf32>
    %148 = tpu.matmul %146, %147, %cst_51 {dimension_numbers = #tpu.dot_dimension_numbers<[1], [0], [0], [1], [0, 0, 1, 1], [], []>} : vector<8x4xbf16>, vector<4x128xbf16>, vector<8x128xf32> -> vector<8x128xf32>
    %149 = arith.addf %129, %148 : vector<8x128xf32>
    %150 = vector.extract_strided_slice %71 {offsets = [0, 0], sizes = [4, 128], strides = [1, 1]} : vector<16x128xf32> to vector<4x128xf32>
    %151 = vector.broadcast %88 : vector<1x128xf32> to vector<4x128xf32>
    %152 = arith.mulf %150, %151 : vector<4x128xf32>
    %153 = vector.extract_strided_slice %71 {offsets = [4, 0], sizes = [4, 128], strides = [1, 1]} : vector<16x128xf32> to vector<4x128xf32>
    %154 = vector.broadcast %95 : vector<1x128xf32> to vector<4x128xf32>
    %155 = arith.mulf %153, %154 : vector<4x128xf32>
    %156 = arith.addf %152, %155 : vector<4x128xf32>
    %157 = vector.extract_strided_slice %71 {offsets = [8, 0], sizes = [4, 128], strides = [1, 1]} : vector<16x128xf32> to vector<4x128xf32>
    %158 = vector.broadcast %102 : vector<1x128xf32> to vector<4x128xf32>
    %159 = arith.mulf %157, %158 : vector<4x128xf32>
    %160 = arith.addf %156, %159 : vector<4x128xf32>
    %161 = vector.extract_strided_slice %71 {offsets = [12, 0], sizes = [4, 128], strides = [1, 1]} : vector<16x128xf32> to vector<4x128xf32>
    %162 = vector.broadcast %109 : vector<1x128xf32> to vector<4x128xf32>
    %163 = arith.mulf %161, %162 : vector<4x128xf32>
    %164 = arith.addf %160, %163 : vector<4x128xf32>
    %c2 = arith.constant 2 : index
    %c0_52 = arith.constant 0 : index
    %c0_53 = arith.constant 0 : index
    %165 = vector.load %arg5[%c2, %c0_52, %c0_53] : memref<9x8x4xbf16, #tpu.memory_space<vmem>>, vector<1x8x4xbf16>
    %166 = vector.shape_cast %165 : vector<1x8x4xbf16> to vector<8x4xbf16>
    %167 = arith.truncf %164 : vector<4x128xf32> to vector<4x128xbf16>
    %cst_54 = arith.constant dense<0.000000e+00> : vector<8x128xf32>
    %168 = tpu.matmul %166, %167, %cst_54 {dimension_numbers = #tpu.dot_dimension_numbers<[1], [0], [0], [1], [0, 0, 1, 1], [], []>} : vector<8x4xbf16>, vector<4x128xbf16>, vector<8x128xf32> -> vector<8x128xf32>
    %169 = arith.addf %149, %168 : vector<8x128xf32>
    %cst_55 = arith.constant 1.000000e+00 : f32
    %170 = vector.broadcast %cst_55 : f32 to vector<1x128xf32>
    %171 = arith.mulf %170, %30 : vector<1x128xf32>
    %172 = vector.broadcast %73 : f32 to vector<1x128xf32>
    %173 = arith.addf %172, %171 : vector<1x128xf32>
    %174 = vector.broadcast %74 : f32 to vector<1x128xf32>
    %175 = arith.subf %174, %173 : vector<1x128xf32>
    %cst_56 = arith.constant 0.000000e+00 : f32
    %176 = vector.broadcast %cst_56 : f32 to vector<1x128xf32>
    %177 = arith.addf %175, %176 : vector<1x128xf32>
    %178 = math.absf %177 : vector<1x128xf32>
    %cst_57 = arith.constant 1.000000e+00 : f32
    %179 = vector.broadcast %cst_57 : f32 to vector<1x128xf32>
    %180 = arith.subf %179, %178 : vector<1x128xf32>
    %cst_58 = arith.constant 0.000000e+00 : f32
    %181 = vector.broadcast %cst_58 : f32 to vector<1x128xf32>
    %182 = arith.maximumf %181, %180 : vector<1x128xf32>
    %cst_59 = arith.constant 1.000000e+00 : f32
    %183 = vector.broadcast %cst_59 : f32 to vector<1x128xf32>
    %184 = arith.addf %175, %183 : vector<1x128xf32>
    %185 = math.absf %184 : vector<1x128xf32>
    %cst_60 = arith.constant 1.000000e+00 : f32
    %186 = vector.broadcast %cst_60 : f32 to vector<1x128xf32>
    %187 = arith.subf %186, %185 : vector<1x128xf32>
    %cst_61 = arith.constant 0.000000e+00 : f32
    %188 = vector.broadcast %cst_61 : f32 to vector<1x128xf32>
    %189 = arith.maximumf %188, %187 : vector<1x128xf32>
    %cst_62 = arith.constant 2.000000e+00 : f32
    %190 = vector.broadcast %cst_62 : f32 to vector<1x128xf32>
    %191 = arith.addf %175, %190 : vector<1x128xf32>
    %192 = math.absf %191 : vector<1x128xf32>
    %cst_63 = arith.constant 1.000000e+00 : f32
    %193 = vector.broadcast %cst_63 : f32 to vector<1x128xf32>
    %194 = arith.subf %193, %192 : vector<1x128xf32>
    %cst_64 = arith.constant 0.000000e+00 : f32
    %195 = vector.broadcast %cst_64 : f32 to vector<1x128xf32>
    %196 = arith.maximumf %195, %194 : vector<1x128xf32>
    %cst_65 = arith.constant 3.000000e+00 : f32
    %197 = vector.broadcast %cst_65 : f32 to vector<1x128xf32>
    %198 = arith.addf %175, %197 : vector<1x128xf32>
    %199 = math.absf %198 : vector<1x128xf32>
    %cst_66 = arith.constant 1.000000e+00 : f32
    %200 = vector.broadcast %cst_66 : f32 to vector<1x128xf32>
    %201 = arith.subf %200, %199 : vector<1x128xf32>
    %cst_67 = arith.constant 0.000000e+00 : f32
    %202 = vector.broadcast %cst_67 : f32 to vector<1x128xf32>
    %203 = arith.maximumf %202, %201 : vector<1x128xf32>
    %204 = vector.extract_strided_slice %45 {offsets = [0, 0], sizes = [4, 128], strides = [1, 1]} : vector<16x128xf32> to vector<4x128xf32>
    %205 = vector.broadcast %182 : vector<1x128xf32> to vector<4x128xf32>
    %206 = arith.mulf %204, %205 : vector<4x128xf32>
    %207 = vector.extract_strided_slice %45 {offsets = [4, 0], sizes = [4, 128], strides = [1, 1]} : vector<16x128xf32> to vector<4x128xf32>
    %208 = vector.broadcast %189 : vector<1x128xf32> to vector<4x128xf32>
    %209 = arith.mulf %207, %208 : vector<4x128xf32>
    %210 = arith.addf %206, %209 : vector<4x128xf32>
    %211 = vector.extract_strided_slice %45 {offsets = [8, 0], sizes = [4, 128], strides = [1, 1]} : vector<16x128xf32> to vector<4x128xf32>
    %212 = vector.broadcast %196 : vector<1x128xf32> to vector<4x128xf32>
    %213 = arith.mulf %211, %212 : vector<4x128xf32>
    %214 = arith.addf %210, %213 : vector<4x128xf32>
    %215 = vector.extract_strided_slice %45 {offsets = [12, 0], sizes = [4, 128], strides = [1, 1]} : vector<16x128xf32> to vector<4x128xf32>
    %216 = vector.broadcast %203 : vector<1x128xf32> to vector<4x128xf32>
    %217 = arith.mulf %215, %216 : vector<4x128xf32>
    %218 = arith.addf %214, %217 : vector<4x128xf32>
    %c3 = arith.constant 3 : index
    %c0_68 = arith.constant 0 : index
    %c0_69 = arith.constant 0 : index
    %219 = vector.load %arg5[%c3, %c0_68, %c0_69] : memref<9x8x4xbf16, #tpu.memory_space<vmem>>, vector<1x8x4xbf16>
    %220 = vector.shape_cast %219 : vector<1x8x4xbf16> to vector<8x4xbf16>
    %221 = arith.truncf %218 : vector<4x128xf32> to vector<4x128xbf16>
    %cst_70 = arith.constant dense<0.000000e+00> : vector<8x128xf32>
    %222 = tpu.matmul %220, %221, %cst_70 {dimension_numbers = #tpu.dot_dimension_numbers<[1], [0], [0], [1], [0, 0, 1, 1], [], []>} : vector<8x4xbf16>, vector<4x128xbf16>, vector<8x128xf32> -> vector<8x128xf32>
    %223 = arith.addf %169, %222 : vector<8x128xf32>
    %224 = vector.extract_strided_slice %58 {offsets = [0, 0], sizes = [4, 128], strides = [1, 1]} : vector<16x128xf32> to vector<4x128xf32>
    %225 = vector.broadcast %182 : vector<1x128xf32> to vector<4x128xf32>
    %226 = arith.mulf %224, %225 : vector<4x128xf32>
    %227 = vector.extract_strided_slice %58 {offsets = [4, 0], sizes = [4, 128], strides = [1, 1]} : vector<16x128xf32> to vector<4x128xf32>
    %228 = vector.broadcast %189 : vector<1x128xf32> to vector<4x128xf32>
    %229 = arith.mulf %227, %228 : vector<4x128xf32>
    %230 = arith.addf %226, %229 : vector<4x128xf32>
    %231 = vector.extract_strided_slice %58 {offsets = [8, 0], sizes = [4, 128], strides = [1, 1]} : vector<16x128xf32> to vector<4x128xf32>
    %232 = vector.broadcast %196 : vector<1x128xf32> to vector<4x128xf32>
    %233 = arith.mulf %231, %232 : vector<4x128xf32>
    %234 = arith.addf %230, %233 : vector<4x128xf32>
    %235 = vector.extract_strided_slice %58 {offsets = [12, 0], sizes = [4, 128], strides = [1, 1]} : vector<16x128xf32> to vector<4x128xf32>
    %236 = vector.broadcast %203 : vector<1x128xf32> to vector<4x128xf32>
    %237 = arith.mulf %235, %236 : vector<4x128xf32>
    %238 = arith.addf %234, %237 : vector<4x128xf32>
    %c4 = arith.constant 4 : index
    %c0_71 = arith.constant 0 : index
    %c0_72 = arith.constant 0 : index
    %239 = vector.load %arg5[%c4, %c0_71, %c0_72] : memref<9x8x4xbf16, #tpu.memory_space<vmem>>, vector<1x8x4xbf16>
    %240 = vector.shape_cast %239 : vector<1x8x4xbf16> to vector<8x4xbf16>
    %241 = arith.truncf %238 : vector<4x128xf32> to vector<4x128xbf16>
    %cst_73 = arith.constant dense<0.000000e+00> : vector<8x128xf32>
    %242 = tpu.matmul %240, %241, %cst_73 {dimension_numbers = #tpu.dot_dimension_numbers<[1], [0], [0], [1], [0, 0, 1, 1], [], []>} : vector<8x4xbf16>, vector<4x128xbf16>, vector<8x128xf32> -> vector<8x128xf32>
    %243 = arith.addf %223, %242 : vector<8x128xf32>
    %244 = vector.extract_strided_slice %71 {offsets = [0, 0], sizes = [4, 128], strides = [1, 1]} : vector<16x128xf32> to vector<4x128xf32>
    %245 = vector.broadcast %182 : vector<1x128xf32> to vector<4x128xf32>
    %246 = arith.mulf %244, %245 : vector<4x128xf32>
    %247 = vector.extract_strided_slice %71 {offsets = [4, 0], sizes = [4, 128], strides = [1, 1]} : vector<16x128xf32> to vector<4x128xf32>
    %248 = vector.broadcast %189 : vector<1x128xf32> to vector<4x128xf32>
    %249 = arith.mulf %247, %248 : vector<4x128xf32>
    %250 = arith.addf %246, %249 : vector<4x128xf32>
    %251 = vector.extract_strided_slice %71 {offsets = [8, 0], sizes = [4, 128], strides = [1, 1]} : vector<16x128xf32> to vector<4x128xf32>
    %252 = vector.broadcast %196 : vector<1x128xf32> to vector<4x128xf32>
    %253 = arith.mulf %251, %252 : vector<4x128xf32>
    %254 = arith.addf %250, %253 : vector<4x128xf32>
    %255 = vector.extract_strided_slice %71 {offsets = [12, 0], sizes = [4, 128], strides = [1, 1]} : vector<16x128xf32> to vector<4x128xf32>
    %256 = vector.broadcast %203 : vector<1x128xf32> to vector<4x128xf32>
    %257 = arith.mulf %255, %256 : vector<4x128xf32>
    %258 = arith.addf %254, %257 : vector<4x128xf32>
    %c5 = arith.constant 5 : index
    %c0_74 = arith.constant 0 : index
    %c0_75 = arith.constant 0 : index
    %259 = vector.load %arg5[%c5, %c0_74, %c0_75] : memref<9x8x4xbf16, #tpu.memory_space<vmem>>, vector<1x8x4xbf16>
    %260 = vector.shape_cast %259 : vector<1x8x4xbf16> to vector<8x4xbf16>
    %261 = arith.truncf %258 : vector<4x128xf32> to vector<4x128xbf16>
    %cst_76 = arith.constant dense<0.000000e+00> : vector<8x128xf32>
    %262 = tpu.matmul %260, %261, %cst_76 {dimension_numbers = #tpu.dot_dimension_numbers<[1], [0], [0], [1], [0, 0, 1, 1], [], []>} : vector<8x4xbf16>, vector<4x128xbf16>, vector<8x128xf32> -> vector<8x128xf32>
    %263 = arith.addf %243, %262 : vector<8x128xf32>
    %cst_77 = arith.constant 2.000000e+00 : f32
    %264 = vector.broadcast %cst_77 : f32 to vector<1x128xf32>
    %265 = arith.mulf %264, %30 : vector<1x128xf32>
    %266 = vector.broadcast %73 : f32 to vector<1x128xf32>
    %267 = arith.addf %266, %265 : vector<1x128xf32>
    %268 = vector.broadcast %74 : f32 to vector<1x128xf32>
    %269 = arith.subf %268, %267 : vector<1x128xf32>
    %cst_78 = arith.constant 0.000000e+00 : f32
    %270 = vector.broadcast %cst_78 : f32 to vector<1x128xf32>
    %271 = arith.addf %269, %270 : vector<1x128xf32>
    %272 = math.absf %271 : vector<1x128xf32>
    %cst_79 = arith.constant 1.000000e+00 : f32
    %273 = vector.broadcast %cst_79 : f32 to vector<1x128xf32>
    %274 = arith.subf %273, %272 : vector<1x128xf32>
    %cst_80 = arith.constant 0.000000e+00 : f32
    %275 = vector.broadcast %cst_80 : f32 to vector<1x128xf32>
    %276 = arith.maximumf %275, %274 : vector<1x128xf32>
    %cst_81 = arith.constant 1.000000e+00 : f32
    %277 = vector.broadcast %cst_81 : f32 to vector<1x128xf32>
    %278 = arith.addf %269, %277 : vector<1x128xf32>
    %279 = math.absf %278 : vector<1x128xf32>
    %cst_82 = arith.constant 1.000000e+00 : f32
    %280 = vector.broadcast %cst_82 : f32 to vector<1x128xf32>
    %281 = arith.subf %280, %279 : vector<1x128xf32>
    %cst_83 = arith.constant 0.000000e+00 : f32
    %282 = vector.broadcast %cst_83 : f32 to vector<1x128xf32>
    %283 = arith.maximumf %282, %281 : vector<1x128xf32>
    %cst_84 = arith.constant 2.000000e+00 : f32
    %284 = vector.broadcast %cst_84 : f32 to vector<1x128xf32>
    %285 = arith.addf %269, %284 : vector<1x128xf32>
    %286 = math.absf %285 : vector<1x128xf32>
    %cst_85 = arith.constant 1.000000e+00 : f32
    %287 = vector.broadcast %cst_85 : f32 to vector<1x128xf32>
    %288 = arith.subf %287, %286 : vector<1x128xf32>
    %cst_86 = arith.constant 0.000000e+00 : f32
    %289 = vector.broadcast %cst_86 : f32 to vector<1x128xf32>
    %290 = arith.maximumf %289, %288 : vector<1x128xf32>
    %cst_87 = arith.constant 3.000000e+00 : f32
    %291 = vector.broadcast %cst_87 : f32 to vector<1x128xf32>
    %292 = arith.addf %269, %291 : vector<1x128xf32>
    %293 = math.absf %292 : vector<1x128xf32>
    %cst_88 = arith.constant 1.000000e+00 : f32
    %294 = vector.broadcast %cst_88 : f32 to vector<1x128xf32>
    %295 = arith.subf %294, %293 : vector<1x128xf32>
    %cst_89 = arith.constant 0.000000e+00 : f32
    %296 = vector.broadcast %cst_89 : f32 to vector<1x128xf32>
    %297 = arith.maximumf %296, %295 : vector<1x128xf32>
    %298 = vector.extract_strided_slice %45 {offsets = [0, 0], sizes = [4, 128], strides = [1, 1]} : vector<16x128xf32> to vector<4x128xf32>
    %299 = vector.broadcast %276 : vector<1x128xf32> to vector<4x128xf32>
    %300 = arith.mulf %298, %299 : vector<4x128xf32>
    %301 = vector.extract_strided_slice %45 {offsets = [4, 0], sizes = [4, 128], strides = [1, 1]} : vector<16x128xf32> to vector<4x128xf32>
    %302 = vector.broadcast %283 : vector<1x128xf32> to vector<4x128xf32>
    %303 = arith.mulf %301, %302 : vector<4x128xf32>
    %304 = arith.addf %300, %303 : vector<4x128xf32>
    %305 = vector.extract_strided_slice %45 {offsets = [8, 0], sizes = [4, 128], strides = [1, 1]} : vector<16x128xf32> to vector<4x128xf32>
    %306 = vector.broadcast %290 : vector<1x128xf32> to vector<4x128xf32>
    %307 = arith.mulf %305, %306 : vector<4x128xf32>
    %308 = arith.addf %304, %307 : vector<4x128xf32>
    %309 = vector.extract_strided_slice %45 {offsets = [12, 0], sizes = [4, 128], strides = [1, 1]} : vector<16x128xf32> to vector<4x128xf32>
    %310 = vector.broadcast %297 : vector<1x128xf32> to vector<4x128xf32>
    %311 = arith.mulf %309, %310 : vector<4x128xf32>
    %312 = arith.addf %308, %311 : vector<4x128xf32>
    %c6 = arith.constant 6 : index
    %c0_90 = arith.constant 0 : index
    %c0_91 = arith.constant 0 : index
    %313 = vector.load %arg5[%c6, %c0_90, %c0_91] : memref<9x8x4xbf16, #tpu.memory_space<vmem>>, vector<1x8x4xbf16>
    %314 = vector.shape_cast %313 : vector<1x8x4xbf16> to vector<8x4xbf16>
    %315 = arith.truncf %312 : vector<4x128xf32> to vector<4x128xbf16>
    %cst_92 = arith.constant dense<0.000000e+00> : vector<8x128xf32>
    %316 = tpu.matmul %314, %315, %cst_92 {dimension_numbers = #tpu.dot_dimension_numbers<[1], [0], [0], [1], [0, 0, 1, 1], [], []>} : vector<8x4xbf16>, vector<4x128xbf16>, vector<8x128xf32> -> vector<8x128xf32>
    %317 = arith.addf %263, %316 : vector<8x128xf32>
    %318 = vector.extract_strided_slice %58 {offsets = [0, 0], sizes = [4, 128], strides = [1, 1]} : vector<16x128xf32> to vector<4x128xf32>
    %319 = vector.broadcast %276 : vector<1x128xf32> to vector<4x128xf32>
    %320 = arith.mulf %318, %319 : vector<4x128xf32>
    %321 = vector.extract_strided_slice %58 {offsets = [4, 0], sizes = [4, 128], strides = [1, 1]} : vector<16x128xf32> to vector<4x128xf32>
    %322 = vector.broadcast %283 : vector<1x128xf32> to vector<4x128xf32>
    %323 = arith.mulf %321, %322 : vector<4x128xf32>
    %324 = arith.addf %320, %323 : vector<4x128xf32>
    %325 = vector.extract_strided_slice %58 {offsets = [8, 0], sizes = [4, 128], strides = [1, 1]} : vector<16x128xf32> to vector<4x128xf32>
    %326 = vector.broadcast %290 : vector<1x128xf32> to vector<4x128xf32>
    %327 = arith.mulf %325, %326 : vector<4x128xf32>
    %328 = arith.addf %324, %327 : vector<4x128xf32>
    %329 = vector.extract_strided_slice %58 {offsets = [12, 0], sizes = [4, 128], strides = [1, 1]} : vector<16x128xf32> to vector<4x128xf32>
    %330 = vector.broadcast %297 : vector<1x128xf32> to vector<4x128xf32>
    %331 = arith.mulf %329, %330 : vector<4x128xf32>
    %332 = arith.addf %328, %331 : vector<4x128xf32>
    %c7 = arith.constant 7 : index
    %c0_93 = arith.constant 0 : index
    %c0_94 = arith.constant 0 : index
    %333 = vector.load %arg5[%c7, %c0_93, %c0_94] : memref<9x8x4xbf16, #tpu.memory_space<vmem>>, vector<1x8x4xbf16>
    %334 = vector.shape_cast %333 : vector<1x8x4xbf16> to vector<8x4xbf16>
    %335 = arith.truncf %332 : vector<4x128xf32> to vector<4x128xbf16>
    %cst_95 = arith.constant dense<0.000000e+00> : vector<8x128xf32>
    %336 = tpu.matmul %334, %335, %cst_95 {dimension_numbers = #tpu.dot_dimension_numbers<[1], [0], [0], [1], [0, 0, 1, 1], [], []>} : vector<8x4xbf16>, vector<4x128xbf16>, vector<8x128xf32> -> vector<8x128xf32>
    %337 = arith.addf %317, %336 : vector<8x128xf32>
    %338 = vector.extract_strided_slice %71 {offsets = [0, 0], sizes = [4, 128], strides = [1, 1]} : vector<16x128xf32> to vector<4x128xf32>
    %339 = vector.broadcast %276 : vector<1x128xf32> to vector<4x128xf32>
    %340 = arith.mulf %338, %339 : vector<4x128xf32>
    %341 = vector.extract_strided_slice %71 {offsets = [4, 0], sizes = [4, 128], strides = [1, 1]} : vector<16x128xf32> to vector<4x128xf32>
    %342 = vector.broadcast %283 : vector<1x128xf32> to vector<4x128xf32>
    %343 = arith.mulf %341, %342 : vector<4x128xf32>
    %344 = arith.addf %340, %343 : vector<4x128xf32>
    %345 = vector.extract_strided_slice %71 {offsets = [8, 0], sizes = [4, 128], strides = [1, 1]} : vector<16x128xf32> to vector<4x128xf32>
    %346 = vector.broadcast %290 : vector<1x128xf32> to vector<4x128xf32>
    %347 = arith.mulf %345, %346 : vector<4x128xf32>
    %348 = arith.addf %344, %347 : vector<4x128xf32>
    %349 = vector.extract_strided_slice %71 {offsets = [12, 0], sizes = [4, 128], strides = [1, 1]} : vector<16x128xf32> to vector<4x128xf32>
    %350 = vector.broadcast %297 : vector<1x128xf32> to vector<4x128xf32>
    %351 = arith.mulf %349, %350 : vector<4x128xf32>
    %352 = arith.addf %348, %351 : vector<4x128xf32>
    %c8 = arith.constant 8 : index
    %c0_96 = arith.constant 0 : index
    %c0_97 = arith.constant 0 : index
    %353 = vector.load %arg5[%c8, %c0_96, %c0_97] : memref<9x8x4xbf16, #tpu.memory_space<vmem>>, vector<1x8x4xbf16>
    %354 = vector.shape_cast %353 : vector<1x8x4xbf16> to vector<8x4xbf16>
    %355 = arith.truncf %352 : vector<4x128xf32> to vector<4x128xbf16>
    %cst_98 = arith.constant dense<0.000000e+00> : vector<8x128xf32>
    %356 = tpu.matmul %354, %355, %cst_98 {dimension_numbers = #tpu.dot_dimension_numbers<[1], [0], [0], [1], [0, 0, 1, 1], [], []>} : vector<8x4xbf16>, vector<4x128xbf16>, vector<8x128xf32> -> vector<8x128xf32>
    %357 = arith.addf %337, %356 : vector<8x128xf32>
    %358 = vector.broadcast %8 : vector<8x1xf32> to vector<8x128xf32>
    %359 = arith.addf %357, %358 : vector<8x128xf32>
    %c0_99 = arith.constant 0 : index
    %c0_100 = arith.constant 0 : index
    %c0_101 = arith.constant 0 : index
    %c0_102 = arith.constant 0 : index
    %360 = vector.load %arg7[%c0_99, %c0_100, %c0_101, %c0_102] : memref<1x8x8x128xf32, #tpu.memory_space<vmem>>, vector<1x8x1x128xf32>
    %361 = vector.shape_cast %360 : vector<1x8x1x128xf32> to vector<8x128xf32>
    %362 = vector.shape_cast %359 : vector<8x128xf32> to vector<1x8x1x128xf32>
    tpu.vector_store %arg7[%c0_99, %c0_100, %c0_101, %c0_102], %362 {strides = array<i32>} : memref<1x8x8x128xf32, #tpu.memory_space<vmem>>, vector<1x8x1x128xf32>,
    %c1_i32_103 = arith.constant 1 : i32
    %363 = arith.addi %0, %c1_i32_103 : i32
    %c1_i32_104 = arith.constant 1 : i32
    %364 = arith.muli %363, %c1_i32_104 : i32
    %c0_i32_105 = arith.constant 0 : i32
    %c14_i32_106 = arith.constant 14 : i32
    %365 = arith.maxsi %c0_i32_105, %364 : i32
    %366 = arith.minsi %c14_i32_106, %365 : i32
    %c0_i32_107 = arith.constant 0 : i32
    %367 = arith.addi %366, %c0_i32_107 : i32
    %c0_108 = arith.constant 0 : index
    %368 = arith.index_cast %367 : i32 to index
    %c0_109 = arith.constant 0 : index
    %c0_110 = arith.constant 0 : index
    %369 = vector.load %arg3[%c0_108, %368, %c0_109, %c0_110] : memref<1x18x4x18xbf16, #tpu.memory_space<vmem>>, vector<1x1x4x18xbf16>
    %370 = vector.shape_cast %369 : vector<1x1x4x18xbf16> to vector<4x18xbf16>
    %c1_i32_111 = arith.constant 1 : i32
    %371 = arith.addi %366, %c1_i32_111 : i32
    %c0_112 = arith.constant 0 : index
    %372 = arith.index_cast %371 : i32 to index
    %c0_113 = arith.constant 0 : index
    %c0_114 = arith.constant 0 : index
    %373 = vector.load %arg3[%c0_112, %372, %c0_113, %c0_114] : memref<1x18x4x18xbf16, #tpu.memory_space<vmem>>, vector<1x1x4x18xbf16>
    %374 = vector.shape_cast %373 : vector<1x1x4x18xbf16> to vector<4x18xbf16>
    %c2_i32_115 = arith.constant 2 : i32
    %375 = arith.addi %366, %c2_i32_115 : i32
    %c0_116 = arith.constant 0 : index
    %376 = arith.index_cast %375 : i32 to index
    %c0_117 = arith.constant 0 : index
    %c0_118 = arith.constant 0 : index
    %377 = vector.load %arg3[%c0_116, %376, %c0_117, %c0_118] : memref<1x18x4x18xbf16, #tpu.memory_space<vmem>>, vector<1x1x4x18xbf16>
    %378 = vector.shape_cast %377 : vector<1x1x4x18xbf16> to vector<4x18xbf16>
    %c3_i32_119 = arith.constant 3 : i32
    %379 = arith.addi %366, %c3_i32_119 : i32
    %c0_120 = arith.constant 0 : index
    %380 = arith.index_cast %379 : i32 to index
    %c0_121 = arith.constant 0 : index
    %c0_122 = arith.constant 0 : index
    %381 = vector.load %arg3[%c0_120, %380, %c0_121, %c0_122] : memref<1x18x4x18xbf16, #tpu.memory_space<vmem>>, vector<1x1x4x18xbf16>
    %382 = vector.shape_cast %381 : vector<1x1x4x18xbf16> to vector<4x18xbf16>
    %383 = tpu.concatenate %370, %374, %378, %382 in 0 : vector<4x18xbf16>, vector<4x18xbf16>, vector<4x18xbf16>, vector<4x18xbf16> -> vector<16x18xbf16>
    %c1_123 = arith.constant 1 : index
    %c0_124 = arith.constant 0 : index
    %384 = vector.load %arg4[%c1_123, %c0_124] : memref<8x128xf32, #tpu.memory_space<vmem>>, vector<1x128xf32>
    %cst_125 = arith.constant 1.000000e+00 : f32
    %385 = vector.broadcast %cst_125 : f32 to vector<1x128xf32>
    %386 = arith.mulf %5, %385 : vector<1x128xf32>
    %cst_126 = arith.constant 0.000000e+00 : f32
    %387 = vector.broadcast %cst_126 : f32 to vector<1x128xf32>
    %388 = arith.mulf %387, %384 : vector<1x128xf32>
    %389 = arith.addf %386, %388 : vector<1x128xf32>
    %390 = vector.broadcast %7 : vector<18x1xf32> to vector<18x128xf32>
    %391 = vector.broadcast %389 : vector<1x128xf32> to vector<18x128xf32>
    %392 = arith.subf %390, %391 : vector<18x128xf32>
    %393 = math.absf %392 : vector<18x128xf32>
    %cst_127 = arith.constant 1.000000e+00 : f32
    %394 = vector.broadcast %cst_127 : f32 to vector<18x128xf32>
    %395 = arith.subf %394, %393 : vector<18x128xf32>
    %cst_128 = arith.constant 0.000000e+00 : f32
    %396 = vector.broadcast %cst_128 : f32 to vector<18x128xf32>
    %397 = arith.maximumf %396, %395 : vector<18x128xf32>
    %398 = arith.truncf %397 : vector<18x128xf32> to vector<18x128xbf16>
    %cst_129 = arith.constant dense<0.000000e+00> : vector<16x128xf32>
    %399 = tpu.matmul %383, %398, %cst_129 {dimension_numbers = #tpu.dot_dimension_numbers<[1], [0], [0], [1], [0, 0, 1, 1], [], []>} : vector<16x18xbf16>, vector<18x128xbf16>, vector<16x128xf32> -> vector<16x128xf32>
    %cst_130 = arith.constant 1.000000e+00 : f32
    %400 = vector.broadcast %cst_130 : f32 to vector<1x128xf32>
    %401 = arith.mulf %400, %384 : vector<1x128xf32>
    %402 = arith.addf %386, %401 : vector<1x128xf32>
    %403 = vector.broadcast %7 : vector<18x1xf32> to vector<18x128xf32>
    %404 = vector.broadcast %402 : vector<1x128xf32> to vector<18x128xf32>
    %405 = arith.subf %403, %404 : vector<18x128xf32>
    %406 = math.absf %405 : vector<18x128xf32>
    %cst_131 = arith.constant 1.000000e+00 : f32
    %407 = vector.broadcast %cst_131 : f32 to vector<18x128xf32>
    %408 = arith.subf %407, %406 : vector<18x128xf32>
    %cst_132 = arith.constant 0.000000e+00 : f32
    %409 = vector.broadcast %cst_132 : f32 to vector<18x128xf32>
    %410 = arith.maximumf %409, %408 : vector<18x128xf32>
    %411 = arith.truncf %410 : vector<18x128xf32> to vector<18x128xbf16>
    %cst_133 = arith.constant dense<0.000000e+00> : vector<16x128xf32>
    %412 = tpu.matmul %383, %411, %cst_133 {dimension_numbers = #tpu.dot_dimension_numbers<[1], [0], [0], [1], [0, 0, 1, 1], [], []>} : vector<16x18xbf16>, vector<18x128xbf16>, vector<16x128xf32> -> vector<16x128xf32>
    %cst_134 = arith.constant 2.000000e+00 : f32
    %413 = vector.broadcast %cst_134 : f32 to vector<1x128xf32>
    %414 = arith.mulf %413, %384 : vector<1x128xf32>
    %415 = arith.addf %386, %414 : vector<1x128xf32>
    %416 = vector.broadcast %7 : vector<18x1xf32> to vector<18x128xf32>
    %417 = vector.broadcast %415 : vector<1x128xf32> to vector<18x128xf32>
    %418 = arith.subf %416, %417 : vector<18x128xf32>
    %419 = math.absf %418 : vector<18x128xf32>
    %cst_135 = arith.constant 1.000000e+00 : f32
    %420 = vector.broadcast %cst_135 : f32 to vector<18x128xf32>
    %421 = arith.subf %420, %419 : vector<18x128xf32>
    %cst_136 = arith.constant 0.000000e+00 : f32
    %422 = vector.broadcast %cst_136 : f32 to vector<18x128xf32>
    %423 = arith.maximumf %422, %421 : vector<18x128xf32>
    %424 = arith.truncf %423 : vector<18x128xf32> to vector<18x128xbf16>
    %cst_137 = arith.constant dense<0.000000e+00> : vector<16x128xf32>
    %425 = tpu.matmul %383, %424, %cst_137 {dimension_numbers = #tpu.dot_dimension_numbers<[1], [0], [0], [1], [0, 0, 1, 1], [], []>} : vector<16x18xbf16>, vector<18x128xbf16>, vector<16x128xf32> -> vector<16x128xf32>
    %c1_i32_138 = arith.constant 1 : i32
    %426 = arith.muli %363, %c1_i32_138 : i32
    %427 = arith.sitofp %426 : i32 to f32
    %428 = arith.sitofp %366 : i32 to f32
    %cst_139 = arith.constant 0.000000e+00 : f32
    %429 = vector.broadcast %cst_139 : f32 to vector<8x128xf32>
    %cst_140 = arith.constant 0.000000e+00 : f32
    %430 = vector.broadcast %cst_140 : f32 to vector<1x128xf32>
    %431 = arith.mulf %430, %384 : vector<1x128xf32>
    %432 = vector.broadcast %427 : f32 to vector<1x128xf32>
    %433 = arith.addf %432, %431 : vector<1x128xf32>
    %434 = vector.broadcast %428 : f32 to vector<1x128xf32>
    %435 = arith.subf %434, %433 : vector<1x128xf32>
    %cst_141 = arith.constant 0.000000e+00 : f32
    %436 = vector.broadcast %cst_141 : f32 to vector<1x128xf32>
    %437 = arith.addf %435, %436 : vector<1x128xf32>
    %438 = math.absf %437 : vector<1x128xf32>
    %cst_142 = arith.constant 1.000000e+00 : f32
    %439 = vector.broadcast %cst_142 : f32 to vector<1x128xf32>
    %440 = arith.subf %439, %438 : vector<1x128xf32>
    %cst_143 = arith.constant 0.000000e+00 : f32
    %441 = vector.broadcast %cst_143 : f32 to vector<1x128xf32>
    %442 = arith.maximumf %441, %440 : vector<1x128xf32>
    %cst_144 = arith.constant 1.000000e+00 : f32
    %443 = vector.broadcast %cst_144 : f32 to vector<1x128xf32>
    %444 = arith.addf %435, %443 : vector<1x128xf32>
    %445 = math.absf %444 : vector<1x128xf32>
    %cst_145 = arith.constant 1.000000e+00 : f32
    %446 = vector.broadcast %cst_145 : f32 to vector<1x128xf32>
    %447 = arith.subf %446, %445 : vector<1x128xf32>
    %cst_146 = arith.constant 0.000000e+00 : f32
    %448 = vector.broadcast %cst_146 : f32 to vector<1x128xf32>
    %449 = arith.maximumf %448, %447 : vector<1x128xf32>
    %cst_147 = arith.constant 2.000000e+00 : f32
    %450 = vector.broadcast %cst_147 : f32 to vector<1x128xf32>
    %451 = arith.addf %435, %450 : vector<1x128xf32>
    %452 = math.absf %451 : vector<1x128xf32>
    %cst_148 = arith.constant 1.000000e+00 : f32
    %453 = vector.broadcast %cst_148 : f32 to vector<1x128xf32>
    %454 = arith.subf %453, %452 : vector<1x128xf32>
    %cst_149 = arith.constant 0.000000e+00 : f32
    %455 = vector.broadcast %cst_149 : f32 to vector<1x128xf32>
    %456 = arith.maximumf %455, %454 : vector<1x128xf32>
    %cst_150 = arith.constant 3.000000e+00 : f32
    %457 = vector.broadcast %cst_150 : f32 to vector<1x128xf32>
    %458 = arith.addf %435, %457 : vector<1x128xf32>
    %459 = math.absf %458 : vector<1x128xf32>
    %cst_151 = arith.constant 1.000000e+00 : f32
    %460 = vector.broadcast %cst_151 : f32 to vector<1x128xf32>
    %461 = arith.subf %460, %459 : vector<1x128xf32>
    %cst_152 = arith.constant 0.000000e+00 : f32
    %462 = vector.broadcast %cst_152 : f32 to vector<1x128xf32>
    %463 = arith.maximumf %462, %461 : vector<1x128xf32>
    %464 = vector.extract_strided_slice %399 {offsets = [0, 0], sizes = [4, 128], strides = [1, 1]} : vector<16x128xf32> to vector<4x128xf32>
    %465 = vector.broadcast %442 : vector<1x128xf32> to vector<4x128xf32>
    %466 = arith.mulf %464, %465 : vector<4x128xf32>
    %467 = vector.extract_strided_slice %399 {offsets = [4, 0], sizes = [4, 128], strides = [1, 1]} : vector<16x128xf32> to vector<4x128xf32>
    %468 = vector.broadcast %449 : vector<1x128xf32> to vector<4x128xf32>
    %469 = arith.mulf %467, %468 : vector<4x128xf32>
    %470 = arith.addf %466, %469 : vector<4x128xf32>
    %471 = vector.extract_strided_slice %399 {offsets = [8, 0], sizes = [4, 128], strides = [1, 1]} : vector<16x128xf32> to vector<4x128xf32>
    %472 = vector.broadcast %456 : vector<1x128xf32> to vector<4x128xf32>
    %473 = arith.mulf %471, %472 : vector<4x128xf32>
    %474 = arith.addf %470, %473 : vector<4x128xf32>
    %475 = vector.extract_strided_slice %399 {offsets = [12, 0], sizes = [4, 128], strides = [1, 1]} : vector<16x128xf32> to vector<4x128xf32>
    %476 = vector.broadcast %463 : vector<1x128xf32> to vector<4x128xf32>
    %477 = arith.mulf %475, %476 : vector<4x128xf32>
    %478 = arith.addf %474, %477 : vector<4x128xf32>
    %c0_153 = arith.constant 0 : index
    %c0_154 = arith.constant 0 : index
    %c0_155 = arith.constant 0 : index
    %479 = vector.load %arg5[%c0_153, %c0_154, %c0_155] : memref<9x8x4xbf16, #tpu.memory_space<vmem>>, vector<1x8x4xbf16>
    %480 = vector.shape_cast %479 : vector<1x8x4xbf16> to vector<8x4xbf16>
    %481 = arith.truncf %478 : vector<4x128xf32> to vector<4x128xbf16>
    %cst_156 = arith.constant dense<0.000000e+00> : vector<8x128xf32>
    %482 = tpu.matmul %480, %481, %cst_156 {dimension_numbers = #tpu.dot_dimension_numbers<[1], [0], [0], [1], [0, 0, 1, 1], [], []>} : vector<8x4xbf16>, vector<4x128xbf16>, vector<8x128xf32> -> vector<8x128xf32>
    %483 = arith.addf %429, %482 : vector<8x128xf32>
    %484 = vector.extract_strided_slice %412 {offsets = [0, 0], sizes = [4, 128], strides = [1, 1]} : vector<16x128xf32> to vector<4x128xf32>
    %485 = vector.broadcast %442 : vector<1x128xf32> to vector<4x128xf32>
    %486 = arith.mulf %484, %485 : vector<4x128xf32>
    %487 = vector.extract_strided_slice %412 {offsets = [4, 0], sizes = [4, 128], strides = [1, 1]} : vector<16x128xf32> to vector<4x128xf32>
    %488 = vector.broadcast %449 : vector<1x128xf32> to vector<4x128xf32>
    %489 = arith.mulf %487, %488 : vector<4x128xf32>
    %490 = arith.addf %486, %489 : vector<4x128xf32>
    %491 = vector.extract_strided_slice %412 {offsets = [8, 0], sizes = [4, 128], strides = [1, 1]} : vector<16x128xf32> to vector<4x128xf32>
    %492 = vector.broadcast %456 : vector<1x128xf32> to vector<4x128xf32>
    %493 = arith.mulf %491, %492 : vector<4x128xf32>
    %494 = arith.addf %490, %493 : vector<4x128xf32>
    %495 = vector.extract_strided_slice %412 {offsets = [12, 0], sizes = [4, 128], strides = [1, 1]} : vector<16x128xf32> to vector<4x128xf32>
    %496 = vector.broadcast %463 : vector<1x128xf32> to vector<4x128xf32>
    %497 = arith.mulf %495, %496 : vector<4x128xf32>
    %498 = arith.addf %494, %497 : vector<4x128xf32>
    %c1_157 = arith.constant 1 : index
    %c0_158 = arith.constant 0 : index
    %c0_159 = arith.constant 0 : index
    %499 = vector.load %arg5[%c1_157, %c0_158, %c0_159] : memref<9x8x4xbf16, #tpu.memory_space<vmem>>, vector<1x8x4xbf16>
    %500 = vector.shape_cast %499 : vector<1x8x4xbf16> to vector<8x4xbf16>
    %501 = arith.truncf %498 : vector<4x128xf32> to vector<4x128xbf16>
    %cst_160 = arith.constant dense<0.000000e+00> : vector<8x128xf32>
    %502 = tpu.matmul %500, %501, %cst_160 {dimension_numbers = #tpu.dot_dimension_numbers<[1], [0], [0], [1], [0, 0, 1, 1], [], []>} : vector<8x4xbf16>, vector<4x128xbf16>, vector<8x128xf32> -> vector<8x128xf32>
    %503 = arith.addf %483, %502 : vector<8x128xf32>
    %504 = vector.extract_strided_slice %425 {offsets = [0, 0], sizes = [4, 128], strides = [1, 1]} : vector<16x128xf32> to vector<4x128xf32>
    %505 = vector.broadcast %442 : vector<1x128xf32> to vector<4x128xf32>
    %506 = arith.mulf %504, %505 : vector<4x128xf32>
    %507 = vector.extract_strided_slice %425 {offsets = [4, 0], sizes = [4, 128], strides = [1, 1]} : vector<16x128xf32> to vector<4x128xf32>
    %508 = vector.broadcast %449 : vector<1x128xf32> to vector<4x128xf32>
    %509 = arith.mulf %507, %508 : vector<4x128xf32>
    %510 = arith.addf %506, %509 : vector<4x128xf32>
    %511 = vector.extract_strided_slice %425 {offsets = [8, 0], sizes = [4, 128], strides = [1, 1]} : vector<16x128xf32> to vector<4x128xf32>
    %512 = vector.broadcast %456 : vector<1x128xf32> to vector<4x128xf32>
    %513 = arith.mulf %511, %512 : vector<4x128xf32>
    %514 = arith.addf %510, %513 : vector<4x128xf32>
    %515 = vector.extract_strided_slice %425 {offsets = [12, 0], sizes = [4, 128], strides = [1, 1]} : vector<16x128xf32> to vector<4x128xf32>
    %516 = vector.broadcast %463 : vector<1x128xf32> to vector<4x128xf32>
    %517 = arith.mulf %515, %516 : vector<4x128xf32>
    %518 = arith.addf %514, %517 : vector<4x128xf32>
    %c2_161 = arith.constant 2 : index
    %c0_162 = arith.constant 0 : index
    %c0_163 = arith.constant 0 : index
    %519 = vector.load %arg5[%c2_161, %c0_162, %c0_163] : memref<9x8x4xbf16, #tpu.memory_space<vmem>>, vector<1x8x4xbf16>
    %520 = vector.shape_cast %519 : vector<1x8x4xbf16> to vector<8x4xbf16>
    %521 = arith.truncf %518 : vector<4x128xf32> to vector<4x128xbf16>
    %cst_164 = arith.constant dense<0.000000e+00> : vector<8x128xf32>
    %522 = tpu.matmul %520, %521, %cst_164 {dimension_numbers = #tpu.dot_dimension_numbers<[1], [0], [0], [1], [0, 0, 1, 1], [], []>} : vector<8x4xbf16>, vector<4x128xbf16>, vector<8x128xf32> -> vector<8x128xf32>
    %523 = arith.addf %503, %522 : vector<8x128xf32>
    %cst_165 = arith.constant 1.000000e+00 : f32
    %524 = vector.broadcast %cst_165 : f32 to vector<1x128xf32>
    %525 = arith.mulf %524, %384 : vector<1x128xf32>
    %526 = vector.broadcast %427 : f32 to vector<1x128xf32>
    %527 = arith.addf %526, %525 : vector<1x128xf32>
    %528 = vector.broadcast %428 : f32 to vector<1x128xf32>
    %529 = arith.subf %528, %527 : vector<1x128xf32>
    %cst_166 = arith.constant 0.000000e+00 : f32
    %530 = vector.broadcast %cst_166 : f32 to vector<1x128xf32>
    %531 = arith.addf %529, %530 : vector<1x128xf32>
    %532 = math.absf %531 : vector<1x128xf32>
    %cst_167 = arith.constant 1.000000e+00 : f32
    %533 = vector.broadcast %cst_167 : f32 to vector<1x128xf32>
    %534 = arith.subf %533, %532 : vector<1x128xf32>
    %cst_168 = arith.constant 0.000000e+00 : f32
    %535 = vector.broadcast %cst_168 : f32 to vector<1x128xf32>
    %536 = arith.maximumf %535, %534 : vector<1x128xf32>
    %cst_169 = arith.constant 1.000000e+00 : f32
    %537 = vector.broadcast %cst_169 : f32 to vector<1x128xf32>
    %538 = arith.addf %529, %537 : vector<1x128xf32>
    %539 = math.absf %538 : vector<1x128xf32>
    %cst_170 = arith.constant 1.000000e+00 : f32
    %540 = vector.broadcast %cst_170 : f32 to vector<1x128xf32>
    %541 = arith.subf %540, %539 : vector<1x128xf32>
    %cst_171 = arith.constant 0.000000e+00 : f32
    %542 = vector.broadcast %cst_171 : f32 to vector<1x128xf32>
    %543 = arith.maximumf %542, %541 : vector<1x128xf32>
    %cst_172 = arith.constant 2.000000e+00 : f32
    %544 = vector.broadcast %cst_172 : f32 to vector<1x128xf32>
    %545 = arith.addf %529, %544 : vector<1x128xf32>
    %546 = math.absf %545 : vector<1x128xf32>
    %cst_173 = arith.constant 1.000000e+00 : f32
    %547 = vector.broadcast %cst_173 : f32 to vector<1x128xf32>
    %548 = arith.subf %547, %546 : vector<1x128xf32>
    %cst_174 = arith.constant 0.000000e+00 : f32
    %549 = vector.broadcast %cst_174 : f32 to vector<1x128xf32>
    %550 = arith.maximumf %549, %548 : vector<1x128xf32>
    %cst_175 = arith.constant 3.000000e+00 : f32
    %551 = vector.broadcast %cst_175 : f32 to vector<1x128xf32>
    %552 = arith.addf %529, %551 : vector<1x128xf32>
    %553 = math.absf %552 : vector<1x128xf32>
    %cst_176 = arith.constant 1.000000e+00 : f32
    %554 = vector.broadcast %cst_176 : f32 to vector<1x128xf32>
    %555 = arith.subf %554, %553 : vector<1x128xf32>
    %cst_177 = arith.constant 0.000000e+00 : f32
    %556 = vector.broadcast %cst_177 : f32 to vector<1x128xf32>
    %557 = arith.maximumf %556, %555 : vector<1x128xf32>
    %558 = vector.extract_strided_slice %399 {offsets = [0, 0], sizes = [4, 128], strides = [1, 1]} : vector<16x128xf32> to vector<4x128xf32>
    %559 = vector.broadcast %536 : vector<1x128xf32> to vector<4x128xf32>
    %560 = arith.mulf %558, %559 : vector<4x128xf32>
    %561 = vector.extract_strided_slice %399 {offsets = [4, 0], sizes = [4, 128], strides = [1, 1]} : vector<16x128xf32> to vector<4x128xf32>
    %562 = vector.broadcast %543 : vector<1x128xf32> to vector<4x128xf32>
    %563 = arith.mulf %561, %562 : vector<4x128xf32>
    %564 = arith.addf %560, %563 : vector<4x128xf32>
    %565 = vector.extract_strided_slice %399 {offsets = [8, 0], sizes = [4, 128], strides = [1, 1]} : vector<16x128xf32> to vector<4x128xf32>
    %566 = vector.broadcast %550 : vector<1x128xf32> to vector<4x128xf32>
    %567 = arith.mulf %565, %566 : vector<4x128xf32>
    %568 = arith.addf %564, %567 : vector<4x128xf32>
    %569 = vector.extract_strided_slice %399 {offsets = [12, 0], sizes = [4, 128], strides = [1, 1]} : vector<16x128xf32> to vector<4x128xf32>
    %570 = vector.broadcast %557 : vector<1x128xf32> to vector<4x128xf32>
    %571 = arith.mulf %569, %570 : vector<4x128xf32>
    %572 = arith.addf %568, %571 : vector<4x128xf32>
    %c3_178 = arith.constant 3 : index
    %c0_179 = arith.constant 0 : index
    %c0_180 = arith.constant 0 : index
    %573 = vector.load %arg5[%c3_178, %c0_179, %c0_180] : memref<9x8x4xbf16, #tpu.memory_space<vmem>>, vector<1x8x4xbf16>
    %574 = vector.shape_cast %573 : vector<1x8x4xbf16> to vector<8x4xbf16>
    %575 = arith.truncf %572 : vector<4x128xf32> to vector<4x128xbf16>
    %cst_181 = arith.constant dense<0.000000e+00> : vector<8x128xf32>
    %576 = tpu.matmul %574, %575, %cst_181 {dimension_numbers = #tpu.dot_dimension_numbers<[1], [0], [0], [1], [0, 0, 1, 1], [], []>} : vector<8x4xbf16>, vector<4x128xbf16>, vector<8x128xf32> -> vector<8x128xf32>
    %577 = arith.addf %523, %576 : vector<8x128xf32>
    %578 = vector.extract_strided_slice %412 {offsets = [0, 0], sizes = [4, 128], strides = [1, 1]} : vector<16x128xf32> to vector<4x128xf32>
    %579 = vector.broadcast %536 : vector<1x128xf32> to vector<4x128xf32>
    %580 = arith.mulf %578, %579 : vector<4x128xf32>
    %581 = vector.extract_strided_slice %412 {offsets = [4, 0], sizes = [4, 128], strides = [1, 1]} : vector<16x128xf32> to vector<4x128xf32>
    %582 = vector.broadcast %543 : vector<1x128xf32> to vector<4x128xf32>
    %583 = arith.mulf %581, %582 : vector<4x128xf32>
    %584 = arith.addf %580, %583 : vector<4x128xf32>
    %585 = vector.extract_strided_slice %412 {offsets = [8, 0], sizes = [4, 128], strides = [1, 1]} : vector<16x128xf32> to vector<4x128xf32>
    %586 = vector.broadcast %550 : vector<1x128xf32> to vector<4x128xf32>
    %587 = arith.mulf %585, %586 : vector<4x128xf32>
    %588 = arith.addf %584, %587 : vector<4x128xf32>
    %589 = vector.extract_strided_slice %412 {offsets = [12, 0], sizes = [4, 128], strides = [1, 1]} : vector<16x128xf32> to vector<4x128xf32>
    %590 = vector.broadcast %557 : vector<1x128xf32> to vector<4x128xf32>
    %591 = arith.mulf %589, %590 : vector<4x128xf32>
    %592 = arith.addf %588, %591 : vector<4x128xf32>
    %c4_182 = arith.constant 4 : index
    %c0_183 = arith.constant 0 : index
    %c0_184 = arith.constant 0 : index
    %593 = vector.load %arg5[%c4_182, %c0_183, %c0_184] : memref<9x8x4xbf16, #tpu.memory_space<vmem>>, vector<1x8x4xbf16>
    %594 = vector.shape_cast %593 : vector<1x8x4xbf16> to vector<8x4xbf16>
    %595 = arith.truncf %592 : vector<4x128xf32> to vector<4x128xbf16>
    %cst_185 = arith.constant dense<0.000000e+00> : vector<8x128xf32>
    %596 = tpu.matmul %594, %595, %cst_185 {dimension_numbers = #tpu.dot_dimension_numbers<[1], [0], [0], [1], [0, 0, 1, 1], [], []>} : vector<8x4xbf16>, vector<4x128xbf16>, vector<8x128xf32> -> vector<8x128xf32>
    %597 = arith.addf %577, %596 : vector<8x128xf32>
    %598 = vector.extract_strided_slice %425 {offsets = [0, 0], sizes = [4, 128], strides = [1, 1]} : vector<16x128xf32> to vector<4x128xf32>
    %599 = vector.broadcast %536 : vector<1x128xf32> to vector<4x128xf32>
    %600 = arith.mulf %598, %599 : vector<4x128xf32>
    %601 = vector.extract_strided_slice %425 {offsets = [4, 0], sizes = [4, 128], strides = [1, 1]} : vector<16x128xf32> to vector<4x128xf32>
    %602 = vector.broadcast %543 : vector<1x128xf32> to vector<4x128xf32>
    %603 = arith.mulf %601, %602 : vector<4x128xf32>
    %604 = arith.addf %600, %603 : vector<4x128xf32>
    %605 = vector.extract_strided_slice %425 {offsets = [8, 0], sizes = [4, 128], strides = [1, 1]} : vector<16x128xf32> to vector<4x128xf32>
    %606 = vector.broadcast %550 : vector<1x128xf32> to vector<4x128xf32>
    %607 = arith.mulf %605, %606 : vector<4x128xf32>
    %608 = arith.addf %604, %607 : vector<4x128xf32>
    %609 = vector.extract_strided_slice %425 {offsets = [12, 0], sizes = [4, 128], strides = [1, 1]} : vector<16x128xf32> to vector<4x128xf32>
    %610 = vector.broadcast %557 : vector<1x128xf32> to vector<4x128xf32>
    %611 = arith.mulf %609, %610 : vector<4x128xf32>
    %612 = arith.addf %608, %611 : vector<4x128xf32>
    %c5_186 = arith.constant 5 : index
    %c0_187 = arith.constant 0 : index
    %c0_188 = arith.constant 0 : index
    %613 = vector.load %arg5[%c5_186, %c0_187, %c0_188] : memref<9x8x4xbf16, #tpu.memory_space<vmem>>, vector<1x8x4xbf16>
    %614 = vector.shape_cast %613 : vector<1x8x4xbf16> to vector<8x4xbf16>
    %615 = arith.truncf %612 : vector<4x128xf32> to vector<4x128xbf16>
    %cst_189 = arith.constant dense<0.000000e+00> : vector<8x128xf32>
    %616 = tpu.matmul %614, %615, %cst_189 {dimension_numbers = #tpu.dot_dimension_numbers<[1], [0], [0], [1], [0, 0, 1, 1], [], []>} : vector<8x4xbf16>, vector<4x128xbf16>, vector<8x128xf32> -> vector<8x128xf32>
    %617 = arith.addf %597, %616 : vector<8x128xf32>
    %cst_190 = arith.constant 2.000000e+00 : f32
    %618 = vector.broadcast %cst_190 : f32 to vector<1x128xf32>
    %619 = arith.mulf %618, %384 : vector<1x128xf32>
    %620 = vector.broadcast %427 : f32 to vector<1x128xf32>
    %621 = arith.addf %620, %619 : vector<1x128xf32>
    %622 = vector.broadcast %428 : f32 to vector<1x128xf32>
    %623 = arith.subf %622, %621 : vector<1x128xf32>
    %cst_191 = arith.constant 0.000000e+00 : f32
    %624 = vector.broadcast %cst_191 : f32 to vector<1x128xf32>
    %625 = arith.addf %623, %624 : vector<1x128xf32>
    %626 = math.absf %625 : vector<1x128xf32>
    %cst_192 = arith.constant 1.000000e+00 : f32
    %627 = vector.broadcast %cst_192 : f32 to vector<1x128xf32>
    %628 = arith.subf %627, %626 : vector<1x128xf32>
    %cst_193 = arith.constant 0.000000e+00 : f32
    %629 = vector.broadcast %cst_193 : f32 to vector<1x128xf32>
    %630 = arith.maximumf %629, %628 : vector<1x128xf32>
    %cst_194 = arith.constant 1.000000e+00 : f32
    %631 = vector.broadcast %cst_194 : f32 to vector<1x128xf32>
    %632 = arith.addf %623, %631 : vector<1x128xf32>
    %633 = math.absf %632 : vector<1x128xf32>
    %cst_195 = arith.constant 1.000000e+00 : f32
    %634 = vector.broadcast %cst_195 : f32 to vector<1x128xf32>
    %635 = arith.subf %634, %633 : vector<1x128xf32>
    %cst_196 = arith.constant 0.000000e+00 : f32
    %636 = vector.broadcast %cst_196 : f32 to vector<1x128xf32>
    %637 = arith.maximumf %636, %635 : vector<1x128xf32>
    %cst_197 = arith.constant 2.000000e+00 : f32
    %638 = vector.broadcast %cst_197 : f32 to vector<1x128xf32>
    %639 = arith.addf %623, %638 : vector<1x128xf32>
    %640 = math.absf %639 : vector<1x128xf32>
    %cst_198 = arith.constant 1.000000e+00 : f32
    %641 = vector.broadcast %cst_198 : f32 to vector<1x128xf32>
    %642 = arith.subf %641, %640 : vector<1x128xf32>
    %cst_199 = arith.constant 0.000000e+00 : f32
    %643 = vector.broadcast %cst_199 : f32 to vector<1x128xf32>
    %644 = arith.maximumf %643, %642 : vector<1x128xf32>
    %cst_200 = arith.constant 3.000000e+00 : f32
    %645 = vector.broadcast %cst_200 : f32 to vector<1x128xf32>
    %646 = arith.addf %623, %645 : vector<1x128xf32>
    %647 = math.absf %646 : vector<1x128xf32>
    %cst_201 = arith.constant 1.000000e+00 : f32
    %648 = vector.broadcast %cst_201 : f32 to vector<1x128xf32>
    %649 = arith.subf %648, %647 : vector<1x128xf32>
    %cst_202 = arith.constant 0.000000e+00 : f32
    %650 = vector.broadcast %cst_202 : f32 to vector<1x128xf32>
    %651 = arith.maximumf %650, %649 : vector<1x128xf32>
    %652 = vector.extract_strided_slice %399 {offsets = [0, 0], sizes = [4, 128], strides = [1, 1]} : vector<16x128xf32> to vector<4x128xf32>
    %653 = vector.broadcast %630 : vector<1x128xf32> to vector<4x128xf32>
    %654 = arith.mulf %652, %653 : vector<4x128xf32>
    %655 = vector.extract_strided_slice %399 {offsets = [4, 0], sizes = [4, 128], strides = [1, 1]} : vector<16x128xf32> to vector<4x128xf32>
    %656 = vector.broadcast %637 : vector<1x128xf32> to vector<4x128xf32>
    %657 = arith.mulf %655, %656 : vector<4x128xf32>
    %658 = arith.addf %654, %657 : vector<4x128xf32>
    %659 = vector.extract_strided_slice %399 {offsets = [8, 0], sizes = [4, 128], strides = [1, 1]} : vector<16x128xf32> to vector<4x128xf32>
    %660 = vector.broadcast %644 : vector<1x128xf32> to vector<4x128xf32>
    %661 = arith.mulf %659, %660 : vector<4x128xf32>
    %662 = arith.addf %658, %661 : vector<4x128xf32>
    %663 = vector.extract_strided_slice %399 {offsets = [12, 0], sizes = [4, 128], strides = [1, 1]} : vector<16x128xf32> to vector<4x128xf32>
    %664 = vector.broadcast %651 : vector<1x128xf32> to vector<4x128xf32>
    %665 = arith.mulf %663, %664 : vector<4x128xf32>
    %666 = arith.addf %662, %665 : vector<4x128xf32>
    %c6_203 = arith.constant 6 : index
    %c0_204 = arith.constant 0 : index
    %c0_205 = arith.constant 0 : index
    %667 = vector.load %arg5[%c6_203, %c0_204, %c0_205] : memref<9x8x4xbf16, #tpu.memory_space<vmem>>, vector<1x8x4xbf16>
    %668 = vector.shape_cast %667 : vector<1x8x4xbf16> to vector<8x4xbf16>
    %669 = arith.truncf %666 : vector<4x128xf32> to vector<4x128xbf16>
    %cst_206 = arith.constant dense<0.000000e+00> : vector<8x128xf32>
    %670 = tpu.matmul %668, %669, %cst_206 {dimension_numbers = #tpu.dot_dimension_numbers<[1], [0], [0], [1], [0, 0, 1, 1], [], []>} : vector<8x4xbf16>, vector<4x128xbf16>, vector<8x128xf32> -> vector<8x128xf32>
    %671 = arith.addf %617, %670 : vector<8x128xf32>
    %672 = vector.extract_strided_slice %412 {offsets = [0, 0], sizes = [4, 128], strides = [1, 1]} : vector<16x128xf32> to vector<4x128xf32>
    %673 = vector.broadcast %630 : vector<1x128xf32> to vector<4x128xf32>
    %674 = arith.mulf %672, %673 : vector<4x128xf32>
    %675 = vector.extract_strided_slice %412 {offsets = [4, 0], sizes = [4, 128], strides = [1, 1]} : vector<16x128xf32> to vector<4x128xf32>
    %676 = vector.broadcast %637 : vector<1x128xf32> to vector<4x128xf32>
    %677 = arith.mulf %675, %676 : vector<4x128xf32>
    %678 = arith.addf %674, %677 : vector<4x128xf32>
    %679 = vector.extract_strided_slice %412 {offsets = [8, 0], sizes = [4, 128], strides = [1, 1]} : vector<16x128xf32> to vector<4x128xf32>
    %680 = vector.broadcast %644 : vector<1x128xf32> to vector<4x128xf32>
    %681 = arith.mulf %679, %680 : vector<4x128xf32>
    %682 = arith.addf %678, %681 : vector<4x128xf32>
    %683 = vector.extract_strided_slice %412 {offsets = [12, 0], sizes = [4, 128], strides = [1, 1]} : vector<16x128xf32> to vector<4x128xf32>
    %684 = vector.broadcast %651 : vector<1x128xf32> to vector<4x128xf32>
    %685 = arith.mulf %683, %684 : vector<4x128xf32>
    %686 = arith.addf %682, %685 : vector<4x128xf32>
    %c7_207 = arith.constant 7 : index
    %c0_208 = arith.constant 0 : index
    %c0_209 = arith.constant 0 : index
    %687 = vector.load %arg5[%c7_207, %c0_208, %c0_209] : memref<9x8x4xbf16, #tpu.memory_space<vmem>>, vector<1x8x4xbf16>
    %688 = vector.shape_cast %687 : vector<1x8x4xbf16> to vector<8x4xbf16>
    %689 = arith.truncf %686 : vector<4x128xf32> to vector<4x128xbf16>
    %cst_210 = arith.constant dense<0.000000e+00> : vector<8x128xf32>
    %690 = tpu.matmul %688, %689, %cst_210 {dimension_numbers = #tpu.dot_dimension_numbers<[1], [0], [0], [1], [0, 0, 1, 1], [], []>} : vector<8x4xbf16>, vector<4x128xbf16>, vector<8x128xf32> -> vector<8x128xf32>
    %691 = arith.addf %671, %690 : vector<8x128xf32>
    %692 = vector.extract_strided_slice %425 {offsets = [0, 0], sizes = [4, 128], strides = [1, 1]} : vector<16x128xf32> to vector<4x128xf32>
    %693 = vector.broadcast %630 : vector<1x128xf32> to vector<4x128xf32>
    %694 = arith.mulf %692, %693 : vector<4x128xf32>
    %695 = vector.extract_strided_slice %425 {offsets = [4, 0], sizes = [4, 128], strides = [1, 1]} : vector<16x128xf32> to vector<4x128xf32>
    %696 = vector.broadcast %637 : vector<1x128xf32> to vector<4x128xf32>
    %697 = arith.mulf %695, %696 : vector<4x128xf32>
    %698 = arith.addf %694, %697 : vector<4x128xf32>
    %699 = vector.extract_strided_slice %425 {offsets = [8, 0], sizes = [4, 128], strides = [1, 1]} : vector<16x128xf32> to vector<4x128xf32>
    %700 = vector.broadcast %644 : vector<1x128xf32> to vector<4x128xf32>
    %701 = arith.mulf %699, %700 : vector<4x128xf32>
    %702 = arith.addf %698, %701 : vector<4x128xf32>
    %703 = vector.extract_strided_slice %425 {offsets = [12, 0], sizes = [4, 128], strides = [1, 1]} : vector<16x128xf32> to vector<4x128xf32>
    %704 = vector.broadcast %651 : vector<1x128xf32> to vector<4x128xf32>
    %705 = arith.mulf %703, %704 : vector<4x128xf32>
    %706 = arith.addf %702, %705 : vector<4x128xf32>
    %c8_211 = arith.constant 8 : index
    %c0_212 = arith.constant 0 : index
    %c0_213 = arith.constant 0 : index
    %707 = vector.load %arg5[%c8_211, %c0_212, %c0_213] : memref<9x8x4xbf16, #tpu.memory_space<vmem>>, vector<1x8x4xbf16>
    %708 = vector.shape_cast %707 : vector<1x8x4xbf16> to vector<8x4xbf16>
    %709 = arith.truncf %706 : vector<4x128xf32> to vector<4x128xbf16>
    %cst_214 = arith.constant dense<0.000000e+00> : vector<8x128xf32>
    %710 = tpu.matmul %708, %709, %cst_214 {dimension_numbers = #tpu.dot_dimension_numbers<[1], [0], [0], [1], [0, 0, 1, 1], [], []>} : vector<8x4xbf16>, vector<4x128xbf16>, vector<8x128xf32> -> vector<8x128xf32>
    %711 = arith.addf %691, %710 : vector<8x128xf32>
    %712 = vector.broadcast %8 : vector<8x1xf32> to vector<8x128xf32>
    %713 = arith.addf %711, %712 : vector<8x128xf32>
    %c0_215 = arith.constant 0 : index
    %c0_216 = arith.constant 0 : index
    %c1_217 = arith.constant 1 : index
    %c0_218 = arith.constant 0 : index
    %714 = vector.load %arg7[%c0_215, %c0_216, %c1_217, %c0_218] : memref<1x8x8x128xf32, #tpu.memory_space<vmem>>, vector<1x8x1x128xf32>
    %715 = vector.shape_cast %714 : vector<1x8x1x128xf32> to vector<8x128xf32>
    %716 = vector.shape_cast %713 : vector<8x128xf32> to vector<1x8x1x128xf32>
    tpu.vector_store %arg7[%c0_215, %c0_216, %c1_217, %c0_218], %716 {strides = array<i32>} : memref<1x8x8x128xf32, #tpu.memory_space<vmem>>, vector<1x8x1x128xf32>,
    %c2_i32_219 = arith.constant 2 : i32
    %717 = arith.addi %0, %c2_i32_219 : i32
    %c1_i32_220 = arith.constant 1 : i32
    %718 = arith.muli %717, %c1_i32_220 : i32
    %c0_i32_221 = arith.constant 0 : i32
    %c14_i32_222 = arith.constant 14 : i32
    %719 = arith.maxsi %c0_i32_221, %718 : i32
    %720 = arith.minsi %c14_i32_222, %719 : i32
    %c0_i32_223 = arith.constant 0 : i32
    %721 = arith.addi %720, %c0_i32_223 : i32
    %c0_224 = arith.constant 0 : index
    %722 = arith.index_cast %721 : i32 to index
    %c0_225 = arith.constant 0 : index
    %c0_226 = arith.constant 0 : index
    %723 = vector.load %arg3[%c0_224, %722, %c0_225, %c0_226] : memref<1x18x4x18xbf16, #tpu.memory_space<vmem>>, vector<1x1x4x18xbf16>
    %724 = vector.shape_cast %723 : vector<1x1x4x18xbf16> to vector<4x18xbf16>
    %c1_i32_227 = arith.constant 1 : i32
    %725 = arith.addi %720, %c1_i32_227 : i32
    %c0_228 = arith.constant 0 : index
    %726 = arith.index_cast %725 : i32 to index
    %c0_229 = arith.constant 0 : index
    %c0_230 = arith.constant 0 : index
    %727 = vector.load %arg3[%c0_228, %726, %c0_229, %c0_230] : memref<1x18x4x18xbf16, #tpu.memory_space<vmem>>, vector<1x1x4x18xbf16>
    %728 = vector.shape_cast %727 : vector<1x1x4x18xbf16> to vector<4x18xbf16>
    %c2_i32_231 = arith.constant 2 : i32
    %729 = arith.addi %720, %c2_i32_231 : i32
    %c0_232 = arith.constant 0 : index
    %730 = arith.index_cast %729 : i32 to index
    %c0_233 = arith.constant 0 : index
    %c0_234 = arith.constant 0 : index
    %731 = vector.load %arg3[%c0_232, %730, %c0_233, %c0_234] : memref<1x18x4x18xbf16, #tpu.memory_space<vmem>>, vector<1x1x4x18xbf16>
    %732 = vector.shape_cast %731 : vector<1x1x4x18xbf16> to vector<4x18xbf16>
    %c3_i32_235 = arith.constant 3 : i32
    %733 = arith.addi %720, %c3_i32_235 : i32
    %c0_236 = arith.constant 0 : index
    %734 = arith.index_cast %733 : i32 to index
    %c0_237 = arith.constant 0 : index
    %c0_238 = arith.constant 0 : index
    %735 = vector.load %arg3[%c0_236, %734, %c0_237, %c0_238] : memref<1x18x4x18xbf16, #tpu.memory_space<vmem>>, vector<1x1x4x18xbf16>
    %736 = vector.shape_cast %735 : vector<1x1x4x18xbf16> to vector<4x18xbf16>
    %737 = tpu.concatenate %724, %728, %732, %736 in 0 : vector<4x18xbf16>, vector<4x18xbf16>, vector<4x18xbf16>, vector<4x18xbf16> -> vector<16x18xbf16>
    %c2_239 = arith.constant 2 : index
    %c0_240 = arith.constant 0 : index
    %738 = vector.load %arg4[%c2_239, %c0_240] : memref<8x128xf32, #tpu.memory_space<vmem>>, vector<1x128xf32>
    %cst_241 = arith.constant 1.000000e+00 : f32
    %739 = vector.broadcast %cst_241 : f32 to vector<1x128xf32>
    %740 = arith.mulf %5, %739 : vector<1x128xf32>
    %cst_242 = arith.constant 0.000000e+00 : f32
    %741 = vector.broadcast %cst_242 : f32 to vector<1x128xf32>
    %742 = arith.mulf %741, %738 : vector<1x128xf32>
    %743 = arith.addf %740, %742 : vector<1x128xf32>
    %744 = vector.broadcast %7 : vector<18x1xf32> to vector<18x128xf32>
    %745 = vector.broadcast %743 : vector<1x128xf32> to vector<18x128xf32>
    %746 = arith.subf %744, %745 : vector<18x128xf32>
    %747 = math.absf %746 : vector<18x128xf32>
    %cst_243 = arith.constant 1.000000e+00 : f32
    %748 = vector.broadcast %cst_243 : f32 to vector<18x128xf32>
    %749 = arith.subf %748, %747 : vector<18x128xf32>
    %cst_244 = arith.constant 0.000000e+00 : f32
    %750 = vector.broadcast %cst_244 : f32 to vector<18x128xf32>
    %751 = arith.maximumf %750, %749 : vector<18x128xf32>
    %752 = arith.truncf %751 : vector<18x128xf32> to vector<18x128xbf16>
    %cst_245 = arith.constant dense<0.000000e+00> : vector<16x128xf32>
    %753 = tpu.matmul %737, %752, %cst_245 {dimension_numbers = #tpu.dot_dimension_numbers<[1], [0], [0], [1], [0, 0, 1, 1], [], []>} : vector<16x18xbf16>, vector<18x128xbf16>, vector<16x128xf32> -> vector<16x128xf32>
    %cst_246 = arith.constant 1.000000e+00 : f32
    %754 = vector.broadcast %cst_246 : f32 to vector<1x128xf32>
    %755 = arith.mulf %754, %738 : vector<1x128xf32>
    %756 = arith.addf %740, %755 : vector<1x128xf32>
    %757 = vector.broadcast %7 : vector<18x1xf32> to vector<18x128xf32>
    %758 = vector.broadcast %756 : vector<1x128xf32> to vector<18x128xf32>
    %759 = arith.subf %757, %758 : vector<18x128xf32>
    %760 = math.absf %759 : vector<18x128xf32>
    %cst_247 = arith.constant 1.000000e+00 : f32
    %761 = vector.broadcast %cst_247 : f32 to vector<18x128xf32>
    %762 = arith.subf %761, %760 : vector<18x128xf32>
    %cst_248 = arith.constant 0.000000e+00 : f32
    %763 = vector.broadcast %cst_248 : f32 to vector<18x128xf32>
    %764 = arith.maximumf %763, %762 : vector<18x128xf32>
    %765 = arith.truncf %764 : vector<18x128xf32> to vector<18x128xbf16>
    %cst_249 = arith.constant dense<0.000000e+00> : vector<16x128xf32>
    %766 = tpu.matmul %737, %765, %cst_249 {dimension_numbers = #tpu.dot_dimension_numbers<[1], [0], [0], [1], [0, 0, 1, 1], [], []>} : vector<16x18xbf16>, vector<18x128xbf16>, vector<16x128xf32> -> vector<16x128xf32>
    %cst_250 = arith.constant 2.000000e+00 : f32
    %767 = vector.broadcast %cst_250 : f32 to vector<1x128xf32>
    %768 = arith.mulf %767, %738 : vector<1x128xf32>
    %769 = arith.addf %740, %768 : vector<1x128xf32>
    %770 = vector.broadcast %7 : vector<18x1xf32> to vector<18x128xf32>
    %771 = vector.broadcast %769 : vector<1x128xf32> to vector<18x128xf32>
    %772 = arith.subf %770, %771 : vector<18x128xf32>
    %773 = math.absf %772 : vector<18x128xf32>
    %cst_251 = arith.constant 1.000000e+00 : f32
    %774 = vector.broadcast %cst_251 : f32 to vector<18x128xf32>
    %775 = arith.subf %774, %773 : vector<18x128xf32>
    %cst_252 = arith.constant 0.000000e+00 : f32
    %776 = vector.broadcast %cst_252 : f32 to vector<18x128xf32>
    %777 = arith.maximumf %776, %775 : vector<18x128xf32>
    %778 = arith.truncf %777 : vector<18x128xf32> to vector<18x128xbf16>
    %cst_253 = arith.constant dense<0.000000e+00> : vector<16x128xf32>
    %779 = tpu.matmul %737, %778, %cst_253 {dimension_numbers = #tpu.dot_dimension_numbers<[1], [0], [0], [1], [0, 0, 1, 1], [], []>} : vector<16x18xbf16>, vector<18x128xbf16>, vector<16x128xf32> -> vector<16x128xf32>
    %c1_i32_254 = arith.constant 1 : i32
    %780 = arith.muli %717, %c1_i32_254 : i32
    %781 = arith.sitofp %780 : i32 to f32
    %782 = arith.sitofp %720 : i32 to f32
    %cst_255 = arith.constant 0.000000e+00 : f32
    %783 = vector.broadcast %cst_255 : f32 to vector<8x128xf32>
    %cst_256 = arith.constant 0.000000e+00 : f32
    %784 = vector.broadcast %cst_256 : f32 to vector<1x128xf32>
    %785 = arith.mulf %784, %738 : vector<1x128xf32>
    %786 = vector.broadcast %781 : f32 to vector<1x128xf32>
    %787 = arith.addf %786, %785 : vector<1x128xf32>
    %788 = vector.broadcast %782 : f32 to vector<1x128xf32>
    %789 = arith.subf %788, %787 : vector<1x128xf32>
    %cst_257 = arith.constant 0.000000e+00 : f32
    %790 = vector.broadcast %cst_257 : f32 to vector<1x128xf32>
    %791 = arith.addf %789, %790 : vector<1x128xf32>
    %792 = math.absf %791 : vector<1x128xf32>
    %cst_258 = arith.constant 1.000000e+00 : f32
    %793 = vector.broadcast %cst_258 : f32 to vector<1x128xf32>
    %794 = arith.subf %793, %792 : vector<1x128xf32>
    %cst_259 = arith.constant 0.000000e+00 : f32
    %795 = vector.broadcast %cst_259 : f32 to vector<1x128xf32>
    %796 = arith.maximumf %795, %794 : vector<1x128xf32>
    %cst_260 = arith.constant 1.000000e+00 : f32
    %797 = vector.broadcast %cst_260 : f32 to vector<1x128xf32>
    %798 = arith.addf %789, %797 : vector<1x128xf32>
    %799 = math.absf %798 : vector<1x128xf32>
    %cst_261 = arith.constant 1.000000e+00 : f32
    %800 = vector.broadcast %cst_261 : f32 to vector<1x128xf32>
    %801 = arith.subf %800, %799 : vector<1x128xf32>
    %cst_262 = arith.constant 0.000000e+00 : f32
    %802 = vector.broadcast %cst_262 : f32 to vector<1x128xf32>
    %803 = arith.maximumf %802, %801 : vector<1x128xf32>
    %cst_263 = arith.constant 2.000000e+00 : f32
    %804 = vector.broadcast %cst_263 : f32 to vector<1x128xf32>
    %805 = arith.addf %789, %804 : vector<1x128xf32>
    %806 = math.absf %805 : vector<1x128xf32>
    %cst_264 = arith.constant 1.000000e+00 : f32
    %807 = vector.broadcast %cst_264 : f32 to vector<1x128xf32>
    %808 = arith.subf %807, %806 : vector<1x128xf32>
    %cst_265 = arith.constant 0.000000e+00 : f32
    %809 = vector.broadcast %cst_265 : f32 to vector<1x128xf32>
    %810 = arith.maximumf %809, %808 : vector<1x128xf32>
    %cst_266 = arith.constant 3.000000e+00 : f32
    %811 = vector.broadcast %cst_266 : f32 to vector<1x128xf32>
    %812 = arith.addf %789, %811 : vector<1x128xf32>
    %813 = math.absf %812 : vector<1x128xf32>
    %cst_267 = arith.constant 1.000000e+00 : f32
    %814 = vector.broadcast %cst_267 : f32 to vector<1x128xf32>
    %815 = arith.subf %814, %813 : vector<1x128xf32>
    %cst_268 = arith.constant 0.000000e+00 : f32
    %816 = vector.broadcast %cst_268 : f32 to vector<1x128xf32>
    %817 = arith.maximumf %816, %815 : vector<1x128xf32>
    %818 = vector.extract_strided_slice %753 {offsets = [0, 0], sizes = [4, 128], strides = [1, 1]} : vector<16x128xf32> to vector<4x128xf32>
    %819 = vector.broadcast %796 : vector<1x128xf32> to vector<4x128xf32>
    %820 = arith.mulf %818, %819 : vector<4x128xf32>
    %821 = vector.extract_strided_slice %753 {offsets = [4, 0], sizes = [4, 128], strides = [1, 1]} : vector<16x128xf32> to vector<4x128xf32>
    %822 = vector.broadcast %803 : vector<1x128xf32> to vector<4x128xf32>
    %823 = arith.mulf %821, %822 : vector<4x128xf32>
    %824 = arith.addf %820, %823 : vector<4x128xf32>
    %825 = vector.extract_strided_slice %753 {offsets = [8, 0], sizes = [4, 128], strides = [1, 1]} : vector<16x128xf32> to vector<4x128xf32>
    %826 = vector.broadcast %810 : vector<1x128xf32> to vector<4x128xf32>
    %827 = arith.mulf %825, %826 : vector<4x128xf32>
    %828 = arith.addf %824, %827 : vector<4x128xf32>
    %829 = vector.extract_strided_slice %753 {offsets = [12, 0], sizes = [4, 128], strides = [1, 1]} : vector<16x128xf32> to vector<4x128xf32>
    %830 = vector.broadcast %817 : vector<1x128xf32> to vector<4x128xf32>
    %831 = arith.mulf %829, %830 : vector<4x128xf32>
    %832 = arith.addf %828, %831 : vector<4x128xf32>
    %c0_269 = arith.constant 0 : index
    %c0_270 = arith.constant 0 : index
    %c0_271 = arith.constant 0 : index
    %833 = vector.load %arg5[%c0_269, %c0_270, %c0_271] : memref<9x8x4xbf16, #tpu.memory_space<vmem>>, vector<1x8x4xbf16>
    %834 = vector.shape_cast %833 : vector<1x8x4xbf16> to vector<8x4xbf16>
    %835 = arith.truncf %832 : vector<4x128xf32> to vector<4x128xbf16>
    %cst_272 = arith.constant dense<0.000000e+00> : vector<8x128xf32>
    %836 = tpu.matmul %834, %835, %cst_272 {dimension_numbers = #tpu.dot_dimension_numbers<[1], [0], [0], [1], [0, 0, 1, 1], [], []>} : vector<8x4xbf16>, vector<4x128xbf16>, vector<8x128xf32> -> vector<8x128xf32>
    %837 = arith.addf %783, %836 : vector<8x128xf32>
    %838 = vector.extract_strided_slice %766 {offsets = [0, 0], sizes = [4, 128], strides = [1, 1]} : vector<16x128xf32> to vector<4x128xf32>
    %839 = vector.broadcast %796 : vector<1x128xf32> to vector<4x128xf32>
    %840 = arith.mulf %838, %839 : vector<4x128xf32>
    %841 = vector.extract_strided_slice %766 {offsets = [4, 0], sizes = [4, 128], strides = [1, 1]} : vector<16x128xf32> to vector<4x128xf32>
    %842 = vector.broadcast %803 : vector<1x128xf32> to vector<4x128xf32>
    %843 = arith.mulf %841, %842 : vector<4x128xf32>
    %844 = arith.addf %840, %843 : vector<4x128xf32>
    %845 = vector.extract_strided_slice %766 {offsets = [8, 0], sizes = [4, 128], strides = [1, 1]} : vector<16x128xf32> to vector<4x128xf32>
    %846 = vector.broadcast %810 : vector<1x128xf32> to vector<4x128xf32>
    %847 = arith.mulf %845, %846 : vector<4x128xf32>
    %848 = arith.addf %844, %847 : vector<4x128xf32>
    %849 = vector.extract_strided_slice %766 {offsets = [12, 0], sizes = [4, 128], strides = [1, 1]} : vector<16x128xf32> to vector<4x128xf32>
    %850 = vector.broadcast %817 : vector<1x128xf32> to vector<4x128xf32>
    %851 = arith.mulf %849, %850 : vector<4x128xf32>
    %852 = arith.addf %848, %851 : vector<4x128xf32>
    %c1_273 = arith.constant 1 : index
    %c0_274 = arith.constant 0 : index
    %c0_275 = arith.constant 0 : index
    %853 = vector.load %arg5[%c1_273, %c0_274, %c0_275] : memref<9x8x4xbf16, #tpu.memory_space<vmem>>, vector<1x8x4xbf16>
    %854 = vector.shape_cast %853 : vector<1x8x4xbf16> to vector<8x4xbf16>
    %855 = arith.truncf %852 : vector<4x128xf32> to vector<4x128xbf16>
    %cst_276 = arith.constant dense<0.000000e+00> : vector<8x128xf32>
    %856 = tpu.matmul %854, %855, %cst_276 {dimension_numbers = #tpu.dot_dimension_numbers<[1], [0], [0], [1], [0, 0, 1, 1], [], []>} : vector<8x4xbf16>, vector<4x128xbf16>, vector<8x128xf32> -> vector<8x128xf32>
    %857 = arith.addf %837, %856 : vector<8x128xf32>
    %858 = vector.extract_strided_slice %779 {offsets = [0, 0], sizes = [4, 128], strides = [1, 1]} : vector<16x128xf32> to vector<4x128xf32>
    %859 = vector.broadcast %796 : vector<1x128xf32> to vector<4x128xf32>
    %860 = arith.mulf %858, %859 : vector<4x128xf32>
    %861 = vector.extract_strided_slice %779 {offsets = [4, 0], sizes = [4, 128], strides = [1, 1]} : vector<16x128xf32> to vector<4x128xf32>
    %862 = vector.broadcast %803 : vector<1x128xf32> to vector<4x128xf32>
    %863 = arith.mulf %861, %862 : vector<4x128xf32>
    %864 = arith.addf %860, %863 : vector<4x128xf32>
    %865 = vector.extract_strided_slice %779 {offsets = [8, 0], sizes = [4, 128], strides = [1, 1]} : vector<16x128xf32> to vector<4x128xf32>
    %866 = vector.broadcast %810 : vector<1x128xf32> to vector<4x128xf32>
    %867 = arith.mulf %865, %866 : vector<4x128xf32>
    %868 = arith.addf %864, %867 : vector<4x128xf32>
    %869 = vector.extract_strided_slice %779 {offsets = [12, 0], sizes = [4, 128], strides = [1, 1]} : vector<16x128xf32> to vector<4x128xf32>
    %870 = vector.broadcast %817 : vector<1x128xf32> to vector<4x128xf32>
    %871 = arith.mulf %869, %870 : vector<4x128xf32>
    %872 = arith.addf %868, %871 : vector<4x128xf32>
    %c2_277 = arith.constant 2 : index
    %c0_278 = arith.constant 0 : index
    %c0_279 = arith.constant 0 : index
    %873 = vector.load %arg5[%c2_277, %c0_278, %c0_279] : memref<9x8x4xbf16, #tpu.memory_space<vmem>>, vector<1x8x4xbf16>
    %874 = vector.shape_cast %873 : vector<1x8x4xbf16> to vector<8x4xbf16>
    %875 = arith.truncf %872 : vector<4x128xf32> to vector<4x128xbf16>
    %cst_280 = arith.constant dense<0.000000e+00> : vector<8x128xf32>
    %876 = tpu.matmul %874, %875, %cst_280 {dimension_numbers = #tpu.dot_dimension_numbers<[1], [0], [0], [1], [0, 0, 1, 1], [], []>} : vector<8x4xbf16>, vector<4x128xbf16>, vector<8x128xf32> -> vector<8x128xf32>
    %877 = arith.addf %857, %876 : vector<8x128xf32>
    %cst_281 = arith.constant 1.000000e+00 : f32
    %878 = vector.broadcast %cst_281 : f32 to vector<1x128xf32>
    %879 = arith.mulf %878, %738 : vector<1x128xf32>
    %880 = vector.broadcast %781 : f32 to vector<1x128xf32>
    %881 = arith.addf %880, %879 : vector<1x128xf32>
    %882 = vector.broadcast %782 : f32 to vector<1x128xf32>
    %883 = arith.subf %882, %881 : vector<1x128xf32>
    %cst_282 = arith.constant 0.000000e+00 : f32
    %884 = vector.broadcast %cst_282 : f32 to vector<1x128xf32>
    %885 = arith.addf %883, %884 : vector<1x128xf32>
    %886 = math.absf %885 : vector<1x128xf32>
    %cst_283 = arith.constant 1.000000e+00 : f32
    %887 = vector.broadcast %cst_283 : f32 to vector<1x128xf32>
    %888 = arith.subf %887, %886 : vector<1x128xf32>
    %cst_284 = arith.constant 0.000000e+00 : f32
    %889 = vector.broadcast %cst_284 : f32 to vector<1x128xf32>
    %890 = arith.maximumf %889, %888 : vector<1x128xf32>
    %cst_285 = arith.constant 1.000000e+00 : f32
    %891 = vector.broadcast %cst_285 : f32 to vector<1x128xf32>
    %892 = arith.addf %883, %891 : vector<1x128xf32>
    %893 = math.absf %892 : vector<1x128xf32>
    %cst_286 = arith.constant 1.000000e+00 : f32
    %894 = vector.broadcast %cst_286 : f32 to vector<1x128xf32>
    %895 = arith.subf %894, %893 : vector<1x128xf32>
    %cst_287 = arith.constant 0.000000e+00 : f32
    %896 = vector.broadcast %cst_287 : f32 to vector<1x128xf32>
    %897 = arith.maximumf %896, %895 : vector<1x128xf32>
    %cst_288 = arith.constant 2.000000e+00 : f32
    %898 = vector.broadcast %cst_288 : f32 to vector<1x128xf32>
    %899 = arith.addf %883, %898 : vector<1x128xf32>
    %900 = math.absf %899 : vector<1x128xf32>
    %cst_289 = arith.constant 1.000000e+00 : f32
    %901 = vector.broadcast %cst_289 : f32 to vector<1x128xf32>
    %902 = arith.subf %901, %900 : vector<1x128xf32>
    %cst_290 = arith.constant 0.000000e+00 : f32
    %903 = vector.broadcast %cst_290 : f32 to vector<1x128xf32>
    %904 = arith.maximumf %903, %902 : vector<1x128xf32>
    %cst_291 = arith.constant 3.000000e+00 : f32
    %905 = vector.broadcast %cst_291 : f32 to vector<1x128xf32>
    %906 = arith.addf %883, %905 : vector<1x128xf32>
    %907 = math.absf %906 : vector<1x128xf32>
    %cst_292 = arith.constant 1.000000e+00 : f32
    %908 = vector.broadcast %cst_292 : f32 to vector<1x128xf32>
    %909 = arith.subf %908, %907 : vector<1x128xf32>
    %cst_293 = arith.constant 0.000000e+00 : f32
    %910 = vector.broadcast %cst_293 : f32 to vector<1x128xf32>
    %911 = arith.maximumf %910, %909 : vector<1x128xf32>
    %912 = vector.extract_strided_slice %753 {offsets = [0, 0], sizes = [4, 128], strides = [1, 1]} : vector<16x128xf32> to vector<4x128xf32>
    %913 = vector.broadcast %890 : vector<1x128xf32> to vector<4x128xf32>
    %914 = arith.mulf %912, %913 : vector<4x128xf32>
    %915 = vector.extract_strided_slice %753 {offsets = [4, 0], sizes = [4, 128], strides = [1, 1]} : vector<16x128xf32> to vector<4x128xf32>
    %916 = vector.broadcast %897 : vector<1x128xf32> to vector<4x128xf32>
    %917 = arith.mulf %915, %916 : vector<4x128xf32>
    %918 = arith.addf %914, %917 : vector<4x128xf32>
    %919 = vector.extract_strided_slice %753 {offsets = [8, 0], sizes = [4, 128], strides = [1, 1]} : vector<16x128xf32> to vector<4x128xf32>
    %920 = vector.broadcast %904 : vector<1x128xf32> to vector<4x128xf32>
    %921 = arith.mulf %919, %920 : vector<4x128xf32>
    %922 = arith.addf %918, %921 : vector<4x128xf32>
    %923 = vector.extract_strided_slice %753 {offsets = [12, 0], sizes = [4, 128], strides = [1, 1]} : vector<16x128xf32> to vector<4x128xf32>
    %924 = vector.broadcast %911 : vector<1x128xf32> to vector<4x128xf32>
    %925 = arith.mulf %923, %924 : vector<4x128xf32>
    %926 = arith.addf %922, %925 : vector<4x128xf32>
    %c3_294 = arith.constant 3 : index
    %c0_295 = arith.constant 0 : index
    %c0_296 = arith.constant 0 : index
    %927 = vector.load %arg5[%c3_294, %c0_295, %c0_296] : memref<9x8x4xbf16, #tpu.memory_space<vmem>>, vector<1x8x4xbf16>
    %928 = vector.shape_cast %927 : vector<1x8x4xbf16> to vector<8x4xbf16>
    %929 = arith.truncf %926 : vector<4x128xf32> to vector<4x128xbf16>
    %cst_297 = arith.constant dense<0.000000e+00> : vector<8x128xf32>
    %930 = tpu.matmul %928, %929, %cst_297 {dimension_numbers = #tpu.dot_dimension_numbers<[1], [0], [0], [1], [0, 0, 1, 1], [], []>} : vector<8x4xbf16>, vector<4x128xbf16>, vector<8x128xf32> -> vector<8x128xf32>
    %931 = arith.addf %877, %930 : vector<8x128xf32>
    %932 = vector.extract_strided_slice %766 {offsets = [0, 0], sizes = [4, 128], strides = [1, 1]} : vector<16x128xf32> to vector<4x128xf32>
    %933 = vector.broadcast %890 : vector<1x128xf32> to vector<4x128xf32>
    %934 = arith.mulf %932, %933 : vector<4x128xf32>
    %935 = vector.extract_strided_slice %766 {offsets = [4, 0], sizes = [4, 128], strides = [1, 1]} : vector<16x128xf32> to vector<4x128xf32>
    %936 = vector.broadcast %897 : vector<1x128xf32> to vector<4x128xf32>
    %937 = arith.mulf %935, %936 : vector<4x128xf32>
    %938 = arith.addf %934, %937 : vector<4x128xf32>
    %939 = vector.extract_strided_slice %766 {offsets = [8, 0], sizes = [4, 128], strides = [1, 1]} : vector<16x128xf32> to vector<4x128xf32>
    %940 = vector.broadcast %904 : vector<1x128xf32> to vector<4x128xf32>
    %941 = arith.mulf %939, %940 : vector<4x128xf32>
    %942 = arith.addf %938, %941 : vector<4x128xf32>
    %943 = vector.extract_strided_slice %766 {offsets = [12, 0], sizes = [4, 128], strides = [1, 1]} : vector<16x128xf32> to vector<4x128xf32>
    %944 = vector.broadcast %911 : vector<1x128xf32> to vector<4x128xf32>
    %945 = arith.mulf %943, %944 : vector<4x128xf32>
    %946 = arith.addf %942, %945 : vector<4x128xf32>
    %c4_298 = arith.constant 4 : index
    %c0_299 = arith.constant 0 : index
    %c0_300 = arith.constant 0 : index
    %947 = vector.load %arg5[%c4_298, %c0_299, %c0_300] : memref<9x8x4xbf16, #tpu.memory_space<vmem>>, vector<1x8x4xbf16>
    %948 = vector.shape_cast %947 : vector<1x8x4xbf16> to vector<8x4xbf16>
    %949 = arith.truncf %946 : vector<4x128xf32> to vector<4x128xbf16>
    %cst_301 = arith.constant dense<0.000000e+00> : vector<8x128xf32>
    %950 = tpu.matmul %948, %949, %cst_301 {dimension_numbers = #tpu.dot_dimension_numbers<[1], [0], [0], [1], [0, 0, 1, 1], [], []>} : vector<8x4xbf16>, vector<4x128xbf16>, vector<8x128xf32> -> vector<8x128xf32>
    %951 = arith.addf %931, %950 : vector<8x128xf32>
    %952 = vector.extract_strided_slice %779 {offsets = [0, 0], sizes = [4, 128], strides = [1, 1]} : vector<16x128xf32> to vector<4x128xf32>
    %953 = vector.broadcast %890 : vector<1x128xf32> to vector<4x128xf32>
    %954 = arith.mulf %952, %953 : vector<4x128xf32>
    %955 = vector.extract_strided_slice %779 {offsets = [4, 0], sizes = [4, 128], strides = [1, 1]} : vector<16x128xf32> to vector<4x128xf32>
    %956 = vector.broadcast %897 : vector<1x128xf32> to vector<4x128xf32>
    %957 = arith.mulf %955, %956 : vector<4x128xf32>
    %958 = arith.addf %954, %957 : vector<4x128xf32>
    %959 = vector.extract_strided_slice %779 {offsets = [8, 0], sizes = [4, 128], strides = [1, 1]} : vector<16x128xf32> to vector<4x128xf32>
    %960 = vector.broadcast %904 : vector<1x128xf32> to vector<4x128xf32>
    %961 = arith.mulf %959, %960 : vector<4x128xf32>
    %962 = arith.addf %958, %961 : vector<4x128xf32>
    %963 = vector.extract_strided_slice %779 {offsets = [12, 0], sizes = [4, 128], strides = [1, 1]} : vector<16x128xf32> to vector<4x128xf32>
    %964 = vector.broadcast %911 : vector<1x128xf32> to vector<4x128xf32>
    %965 = arith.mulf %963, %964 : vector<4x128xf32>
    %966 = arith.addf %962, %965 : vector<4x128xf32>
    %c5_302 = arith.constant 5 : index
    %c0_303 = arith.constant 0 : index
    %c0_304 = arith.constant 0 : index
    %967 = vector.load %arg5[%c5_302, %c0_303, %c0_304] : memref<9x8x4xbf16, #tpu.memory_space<vmem>>, vector<1x8x4xbf16>
    %968 = vector.shape_cast %967 : vector<1x8x4xbf16> to vector<8x4xbf16>
    %969 = arith.truncf %966 : vector<4x128xf32> to vector<4x128xbf16>
    %cst_305 = arith.constant dense<0.000000e+00> : vector<8x128xf32>
    %970 = tpu.matmul %968, %969, %cst_305 {dimension_numbers = #tpu.dot_dimension_numbers<[1], [0], [0], [1], [0, 0, 1, 1], [], []>} : vector<8x4xbf16>, vector<4x128xbf16>, vector<8x128xf32> -> vector<8x128xf32>
    %971 = arith.addf %951, %970 : vector<8x128xf32>
    %cst_306 = arith.constant 2.000000e+00 : f32
    %972 = vector.broadcast %cst_306 : f32 to vector<1x128xf32>
    %973 = arith.mulf %972, %738 : vector<1x128xf32>
    %974 = vector.broadcast %781 : f32 to vector<1x128xf32>
    %975 = arith.addf %974, %973 : vector<1x128xf32>
    %976 = vector.broadcast %782 : f32 to vector<1x128xf32>
    %977 = arith.subf %976, %975 : vector<1x128xf32>
    %cst_307 = arith.constant 0.000000e+00 : f32
    %978 = vector.broadcast %cst_307 : f32 to vector<1x128xf32>
    %979 = arith.addf %977, %978 : vector<1x128xf32>
    %980 = math.absf %979 : vector<1x128xf32>
    %cst_308 = arith.constant 1.000000e+00 : f32
    %981 = vector.broadcast %cst_308 : f32 to vector<1x128xf32>
    %982 = arith.subf %981, %980 : vector<1x128xf32>
    %cst_309 = arith.constant 0.000000e+00 : f32
    %983 = vector.broadcast %cst_309 : f32 to vector<1x128xf32>
    %984 = arith.maximumf %983, %982 : vector<1x128xf32>
    %cst_310 = arith.constant 1.000000e+00 : f32
    %985 = vector.broadcast %cst_310 : f32 to vector<1x128xf32>
    %986 = arith.addf %977, %985 : vector<1x128xf32>
    %987 = math.absf %986 : vector<1x128xf32>
    %cst_311 = arith.constant 1.000000e+00 : f32
    %988 = vector.broadcast %cst_311 : f32 to vector<1x128xf32>
    %989 = arith.subf %988, %987 : vector<1x128xf32>
    %cst_312 = arith.constant 0.000000e+00 : f32
    %990 = vector.broadcast %cst_312 : f32 to vector<1x128xf32>
    %991 = arith.maximumf %990, %989 : vector<1x128xf32>
    %cst_313 = arith.constant 2.000000e+00 : f32
    %992 = vector.broadcast %cst_313 : f32 to vector<1x128xf32>
    %993 = arith.addf %977, %992 : vector<1x128xf32>
    %994 = math.absf %993 : vector<1x128xf32>
    %cst_314 = arith.constant 1.000000e+00 : f32
    %995 = vector.broadcast %cst_314 : f32 to vector<1x128xf32>
    %996 = arith.subf %995, %994 : vector<1x128xf32>
    %cst_315 = arith.constant 0.000000e+00 : f32
    %997 = vector.broadcast %cst_315 : f32 to vector<1x128xf32>
    %998 = arith.maximumf %997, %996 : vector<1x128xf32>
    %cst_316 = arith.constant 3.000000e+00 : f32
    %999 = vector.broadcast %cst_316 : f32 to vector<1x128xf32>
    %1000 = arith.addf %977, %999 : vector<1x128xf32>
    %1001 = math.absf %1000 : vector<1x128xf32>
    %cst_317 = arith.constant 1.000000e+00 : f32
    %1002 = vector.broadcast %cst_317 : f32 to vector<1x128xf32>
    %1003 = arith.subf %1002, %1001 : vector<1x128xf32>
    %cst_318 = arith.constant 0.000000e+00 : f32
    %1004 = vector.broadcast %cst_318 : f32 to vector<1x128xf32>
    %1005 = arith.maximumf %1004, %1003 : vector<1x128xf32>
    %1006 = vector.extract_strided_slice %753 {offsets = [0, 0], sizes = [4, 128], strides = [1, 1]} : vector<16x128xf32> to vector<4x128xf32>
    %1007 = vector.broadcast %984 : vector<1x128xf32> to vector<4x128xf32>
    %1008 = arith.mulf %1006, %1007 : vector<4x128xf32>
    %1009 = vector.extract_strided_slice %753 {offsets = [4, 0], sizes = [4, 128], strides = [1, 1]} : vector<16x128xf32> to vector<4x128xf32>
    %1010 = vector.broadcast %991 : vector<1x128xf32> to vector<4x128xf32>
    %1011 = arith.mulf %1009, %1010 : vector<4x128xf32>
    %1012 = arith.addf %1008, %1011 : vector<4x128xf32>
    %1013 = vector.extract_strided_slice %753 {offsets = [8, 0], sizes = [4, 128], strides = [1, 1]} : vector<16x128xf32> to vector<4x128xf32>
    %1014 = vector.broadcast %998 : vector<1x128xf32> to vector<4x128xf32>
    %1015 = arith.mulf %1013, %1014 : vector<4x128xf32>
    %1016 = arith.addf %1012, %1015 : vector<4x128xf32>
    %1017 = vector.extract_strided_slice %753 {offsets = [12, 0], sizes = [4, 128], strides = [1, 1]} : vector<16x128xf32> to vector<4x128xf32>
    %1018 = vector.broadcast %1005 : vector<1x128xf32> to vector<4x128xf32>
    %1019 = arith.mulf %1017, %1018 : vector<4x128xf32>
    %1020 = arith.addf %1016, %1019 : vector<4x128xf32>
    %c6_319 = arith.constant 6 : index
    %c0_320 = arith.constant 0 : index
    %c0_321 = arith.constant 0 : index
    %1021 = vector.load %arg5[%c6_319, %c0_320, %c0_321] : memref<9x8x4xbf16, #tpu.memory_space<vmem>>, vector<1x8x4xbf16>
    %1022 = vector.shape_cast %1021 : vector<1x8x4xbf16> to vector<8x4xbf16>
    %1023 = arith.truncf %1020 : vector<4x128xf32> to vector<4x128xbf16>
    %cst_322 = arith.constant dense<0.000000e+00> : vector<8x128xf32>
    %1024 = tpu.matmul %1022, %1023, %cst_322 {dimension_numbers = #tpu.dot_dimension_numbers<[1], [0], [0], [1], [0, 0, 1, 1], [], []>} : vector<8x4xbf16>, vector<4x128xbf16>, vector<8x128xf32> -> vector<8x128xf32>
    %1025 = arith.addf %971, %1024 : vector<8x128xf32>
    %1026 = vector.extract_strided_slice %766 {offsets = [0, 0], sizes = [4, 128], strides = [1, 1]} : vector<16x128xf32> to vector<4x128xf32>
    %1027 = vector.broadcast %984 : vector<1x128xf32> to vector<4x128xf32>
    %1028 = arith.mulf %1026, %1027 : vector<4x128xf32>
    %1029 = vector.extract_strided_slice %766 {offsets = [4, 0], sizes = [4, 128], strides = [1, 1]} : vector<16x128xf32> to vector<4x128xf32>
    %1030 = vector.broadcast %991 : vector<1x128xf32> to vector<4x128xf32>
    %1031 = arith.mulf %1029, %1030 : vector<4x128xf32>
    %1032 = arith.addf %1028, %1031 : vector<4x128xf32>
    %1033 = vector.extract_strided_slice %766 {offsets = [8, 0], sizes = [4, 128], strides = [1, 1]} : vector<16x128xf32> to vector<4x128xf32>
    %1034 = vector.broadcast %998 : vector<1x128xf32> to vector<4x128xf32>
    %1035 = arith.mulf %1033, %1034 : vector<4x128xf32>
    %1036 = arith.addf %1032, %1035 : vector<4x128xf32>
    %1037 = vector.extract_strided_slice %766 {offsets = [12, 0], sizes = [4, 128], strides = [1, 1]} : vector<16x128xf32> to vector<4x128xf32>
    %1038 = vector.broadcast %1005 : vector<1x128xf32> to vector<4x128xf32>
    %1039 = arith.mulf %1037, %1038 : vector<4x128xf32>
    %1040 = arith.addf %1036, %1039 : vector<4x128xf32>
    %c7_323 = arith.constant 7 : index
    %c0_324 = arith.constant 0 : index
    %c0_325 = arith.constant 0 : index
    %1041 = vector.load %arg5[%c7_323, %c0_324, %c0_325] : memref<9x8x4xbf16, #tpu.memory_space<vmem>>, vector<1x8x4xbf16>
    %1042 = vector.shape_cast %1041 : vector<1x8x4xbf16> to vector<8x4xbf16>
    %1043 = arith.truncf %1040 : vector<4x128xf32> to vector<4x128xbf16>
    %cst_326 = arith.constant dense<0.000000e+00> : vector<8x128xf32>
    %1044 = tpu.matmul %1042, %1043, %cst_326 {dimension_numbers = #tpu.dot_dimension_numbers<[1], [0], [0], [1], [0, 0, 1, 1], [], []>} : vector<8x4xbf16>, vector<4x128xbf16>, vector<8x128xf32> -> vector<8x128xf32>
    %1045 = arith.addf %1025, %1044 : vector<8x128xf32>
    %1046 = vector.extract_strided_slice %779 {offsets = [0, 0], sizes = [4, 128], strides = [1, 1]} : vector<16x128xf32> to vector<4x128xf32>
    %1047 = vector.broadcast %984 : vector<1x128xf32> to vector<4x128xf32>
    %1048 = arith.mulf %1046, %1047 : vector<4x128xf32>
    %1049 = vector.extract_strided_slice %779 {offsets = [4, 0], sizes = [4, 128], strides = [1, 1]} : vector<16x128xf32> to vector<4x128xf32>
    %1050 = vector.broadcast %991 : vector<1x128xf32> to vector<4x128xf32>
    %1051 = arith.mulf %1049, %1050 : vector<4x128xf32>
    %1052 = arith.addf %1048, %1051 : vector<4x128xf32>
    %1053 = vector.extract_strided_slice %779 {offsets = [8, 0], sizes = [4, 128], strides = [1, 1]} : vector<16x128xf32> to vector<4x128xf32>
    %1054 = vector.broadcast %998 : vector<1x128xf32> to vector<4x128xf32>
    %1055 = arith.mulf %1053, %1054 : vector<4x128xf32>
    %1056 = arith.addf %1052, %1055 : vector<4x128xf32>
    %1057 = vector.extract_strided_slice %779 {offsets = [12, 0], sizes = [4, 128], strides = [1, 1]} : vector<16x128xf32> to vector<4x128xf32>
    %1058 = vector.broadcast %1005 : vector<1x128xf32> to vector<4x128xf32>
    %1059 = arith.mulf %1057, %1058 : vector<4x128xf32>
    %1060 = arith.addf %1056, %1059 : vector<4x128xf32>
    %c8_327 = arith.constant 8 : index
    %c0_328 = arith.constant 0 : index
    %c0_329 = arith.constant 0 : index
    %1061 = vector.load %arg5[%c8_327, %c0_328, %c0_329] : memref<9x8x4xbf16, #tpu.memory_space<vmem>>, vector<1x8x4xbf16>
    %1062 = vector.shape_cast %1061 : vector<1x8x4xbf16> to vector<8x4xbf16>
    %1063 = arith.truncf %1060 : vector<4x128xf32> to vector<4x128xbf16>
    %cst_330 = arith.constant dense<0.000000e+00> : vector<8x128xf32>
    %1064 = tpu.matmul %1062, %1063, %cst_330 {dimension_numbers = #tpu.dot_dimension_numbers<[1], [0], [0], [1], [0, 0, 1, 1], [], []>} : vector<8x4xbf16>, vector<4x128xbf16>, vector<8x128xf32> -> vector<8x128xf32>
    %1065 = arith.addf %1045, %1064 : vector<8x128xf32>
    %1066 = vector.broadcast %8 : vector<8x1xf32> to vector<8x128xf32>
    %1067 = arith.addf %1065, %1066 : vector<8x128xf32>
    %c0_331 = arith.constant 0 : index
    %c0_332 = arith.constant 0 : index
    %c2_333 = arith.constant 2 : index
    %c0_334 = arith.constant 0 : index
    %1068 = vector.load %arg7[%c0_331, %c0_332, %c2_333, %c0_334] : memref<1x8x8x128xf32, #tpu.memory_space<vmem>>, vector<1x8x1x128xf32>
    %1069 = vector.shape_cast %1068 : vector<1x8x1x128xf32> to vector<8x128xf32>
    %1070 = vector.shape_cast %1067 : vector<8x128xf32> to vector<1x8x1x128xf32>
    tpu.vector_store %arg7[%c0_331, %c0_332, %c2_333, %c0_334], %1070 {strides = array<i32>} : memref<1x8x8x128xf32, #tpu.memory_space<vmem>>, vector<1x8x1x128xf32>,
    %c3_i32_335 = arith.constant 3 : i32
    %1071 = arith.addi %0, %c3_i32_335 : i32
    %c1_i32_336 = arith.constant 1 : i32
    %1072 = arith.muli %1071, %c1_i32_336 : i32
    %c0_i32_337 = arith.constant 0 : i32
    %c14_i32_338 = arith.constant 14 : i32
    %1073 = arith.maxsi %c0_i32_337, %1072 : i32
    %1074 = arith.minsi %c14_i32_338, %1073 : i32
    %c0_i32_339 = arith.constant 0 : i32
    %1075 = arith.addi %1074, %c0_i32_339 : i32
    %c0_340 = arith.constant 0 : index
    %1076 = arith.index_cast %1075 : i32 to index
    %c0_341 = arith.constant 0 : index
    %c0_342 = arith.constant 0 : index
    %1077 = vector.load %arg3[%c0_340, %1076, %c0_341, %c0_342] : memref<1x18x4x18xbf16, #tpu.memory_space<vmem>>, vector<1x1x4x18xbf16>
    %1078 = vector.shape_cast %1077 : vector<1x1x4x18xbf16> to vector<4x18xbf16>
    %c1_i32_343 = arith.constant 1 : i32
    %1079 = arith.addi %1074, %c1_i32_343 : i32
    %c0_344 = arith.constant 0 : index
    %1080 = arith.index_cast %1079 : i32 to index
    %c0_345 = arith.constant 0 : index
    %c0_346 = arith.constant 0 : index
    %1081 = vector.load %arg3[%c0_344, %1080, %c0_345, %c0_346] : memref<1x18x4x18xbf16, #tpu.memory_space<vmem>>, vector<1x1x4x18xbf16>
    %1082 = vector.shape_cast %1081 : vector<1x1x4x18xbf16> to vector<4x18xbf16>
    %c2_i32_347 = arith.constant 2 : i32
    %1083 = arith.addi %1074, %c2_i32_347 : i32
    %c0_348 = arith.constant 0 : index
    %1084 = arith.index_cast %1083 : i32 to index
    %c0_349 = arith.constant 0 : index
    %c0_350 = arith.constant 0 : index
    %1085 = vector.load %arg3[%c0_348, %1084, %c0_349, %c0_350] : memref<1x18x4x18xbf16, #tpu.memory_space<vmem>>, vector<1x1x4x18xbf16>
    %1086 = vector.shape_cast %1085 : vector<1x1x4x18xbf16> to vector<4x18xbf16>
    %c3_i32_351 = arith.constant 3 : i32
    %1087 = arith.addi %1074, %c3_i32_351 : i32
    %c0_352 = arith.constant 0 : index
    %1088 = arith.index_cast %1087 : i32 to index
    %c0_353 = arith.constant 0 : index
    %c0_354 = arith.constant 0 : index
    %1089 = vector.load %arg3[%c0_352, %1088, %c0_353, %c0_354] : memref<1x18x4x18xbf16, #tpu.memory_space<vmem>>, vector<1x1x4x18xbf16>
    %1090 = vector.shape_cast %1089 : vector<1x1x4x18xbf16> to vector<4x18xbf16>
    %1091 = tpu.concatenate %1078, %1082, %1086, %1090 in 0 : vector<4x18xbf16>, vector<4x18xbf16>, vector<4x18xbf16>, vector<4x18xbf16> -> vector<16x18xbf16>
    %c3_355 = arith.constant 3 : index
    %c0_356 = arith.constant 0 : index
    %1092 = vector.load %arg4[%c3_355, %c0_356] : memref<8x128xf32, #tpu.memory_space<vmem>>, vector<1x128xf32>
    %cst_357 = arith.constant 1.000000e+00 : f32
    %1093 = vector.broadcast %cst_357 : f32 to vector<1x128xf32>
    %1094 = arith.mulf %5, %1093 : vector<1x128xf32>
    %cst_358 = arith.constant 0.000000e+00 : f32
    %1095 = vector.broadcast %cst_358 : f32 to vector<1x128xf32>
    %1096 = arith.mulf %1095, %1092 : vector<1x128xf32>
    %1097 = arith.addf %1094, %1096 : vector<1x128xf32>
    %1098 = vector.broadcast %7 : vector<18x1xf32> to vector<18x128xf32>
    %1099 = vector.broadcast %1097 : vector<1x128xf32> to vector<18x128xf32>
    %1100 = arith.subf %1098, %1099 : vector<18x128xf32>
    %1101 = math.absf %1100 : vector<18x128xf32>
    %cst_359 = arith.constant 1.000000e+00 : f32
    %1102 = vector.broadcast %cst_359 : f32 to vector<18x128xf32>
    %1103 = arith.subf %1102, %1101 : vector<18x128xf32>
    %cst_360 = arith.constant 0.000000e+00 : f32
    %1104 = vector.broadcast %cst_360 : f32 to vector<18x128xf32>
    %1105 = arith.maximumf %1104, %1103 : vector<18x128xf32>
    %1106 = arith.truncf %1105 : vector<18x128xf32> to vector<18x128xbf16>
    %cst_361 = arith.constant dense<0.000000e+00> : vector<16x128xf32>
    %1107 = tpu.matmul %1091, %1106, %cst_361 {dimension_numbers = #tpu.dot_dimension_numbers<[1], [0], [0], [1], [0, 0, 1, 1], [], []>} : vector<16x18xbf16>, vector<18x128xbf16>, vector<16x128xf32> -> vector<16x128xf32>
    %cst_362 = arith.constant 1.000000e+00 : f32
    %1108 = vector.broadcast %cst_362 : f32 to vector<1x128xf32>
    %1109 = arith.mulf %1108, %1092 : vector<1x128xf32>
    %1110 = arith.addf %1094, %1109 : vector<1x128xf32>
    %1111 = vector.broadcast %7 : vector<18x1xf32> to vector<18x128xf32>
    %1112 = vector.broadcast %1110 : vector<1x128xf32> to vector<18x128xf32>
    %1113 = arith.subf %1111, %1112 : vector<18x128xf32>
    %1114 = math.absf %1113 : vector<18x128xf32>
    %cst_363 = arith.constant 1.000000e+00 : f32
    %1115 = vector.broadcast %cst_363 : f32 to vector<18x128xf32>
    %1116 = arith.subf %1115, %1114 : vector<18x128xf32>
    %cst_364 = arith.constant 0.000000e+00 : f32
    %1117 = vector.broadcast %cst_364 : f32 to vector<18x128xf32>
    %1118 = arith.maximumf %1117, %1116 : vector<18x128xf32>
    %1119 = arith.truncf %1118 : vector<18x128xf32> to vector<18x128xbf16>
    %cst_365 = arith.constant dense<0.000000e+00> : vector<16x128xf32>
    %1120 = tpu.matmul %1091, %1119, %cst_365 {dimension_numbers = #tpu.dot_dimension_numbers<[1], [0], [0], [1], [0, 0, 1, 1], [], []>} : vector<16x18xbf16>, vector<18x128xbf16>, vector<16x128xf32> -> vector<16x128xf32>
    %cst_366 = arith.constant 2.000000e+00 : f32
    %1121 = vector.broadcast %cst_366 : f32 to vector<1x128xf32>
    %1122 = arith.mulf %1121, %1092 : vector<1x128xf32>
    %1123 = arith.addf %1094, %1122 : vector<1x128xf32>
    %1124 = vector.broadcast %7 : vector<18x1xf32> to vector<18x128xf32>
    %1125 = vector.broadcast %1123 : vector<1x128xf32> to vector<18x128xf32>
    %1126 = arith.subf %1124, %1125 : vector<18x128xf32>
    %1127 = math.absf %1126 : vector<18x128xf32>
    %cst_367 = arith.constant 1.000000e+00 : f32
    %1128 = vector.broadcast %cst_367 : f32 to vector<18x128xf32>
    %1129 = arith.subf %1128, %1127 : vector<18x128xf32>
    %cst_368 = arith.constant 0.000000e+00 : f32
    %1130 = vector.broadcast %cst_368 : f32 to vector<18x128xf32>
    %1131 = arith.maximumf %1130, %1129 : vector<18x128xf32>
    %1132 = arith.truncf %1131 : vector<18x128xf32> to vector<18x128xbf16>
    %cst_369 = arith.constant dense<0.000000e+00> : vector<16x128xf32>
    %1133 = tpu.matmul %1091, %1132, %cst_369 {dimension_numbers = #tpu.dot_dimension_numbers<[1], [0], [0], [1], [0, 0, 1, 1], [], []>} : vector<16x18xbf16>, vector<18x128xbf16>, vector<16x128xf32> -> vector<16x128xf32>
    %c1_i32_370 = arith.constant 1 : i32
    %1134 = arith.muli %1071, %c1_i32_370 : i32
    %1135 = arith.sitofp %1134 : i32 to f32
    %1136 = arith.sitofp %1074 : i32 to f32
    %cst_371 = arith.constant 0.000000e+00 : f32
    %1137 = vector.broadcast %cst_371 : f32 to vector<8x128xf32>
    %cst_372 = arith.constant 0.000000e+00 : f32
    %1138 = vector.broadcast %cst_372 : f32 to vector<1x128xf32>
    %1139 = arith.mulf %1138, %1092 : vector<1x128xf32>
    %1140 = vector.broadcast %1135 : f32 to vector<1x128xf32>
    %1141 = arith.addf %1140, %1139 : vector<1x128xf32>
    %1142 = vector.broadcast %1136 : f32 to vector<1x128xf32>
    %1143 = arith.subf %1142, %1141 : vector<1x128xf32>
    %cst_373 = arith.constant 0.000000e+00 : f32
    %1144 = vector.broadcast %cst_373 : f32 to vector<1x128xf32>
    %1145 = arith.addf %1143, %1144 : vector<1x128xf32>
    %1146 = math.absf %1145 : vector<1x128xf32>
    %cst_374 = arith.constant 1.000000e+00 : f32
    %1147 = vector.broadcast %cst_374 : f32 to vector<1x128xf32>
    %1148 = arith.subf %1147, %1146 : vector<1x128xf32>
    %cst_375 = arith.constant 0.000000e+00 : f32
    %1149 = vector.broadcast %cst_375 : f32 to vector<1x128xf32>
    %1150 = arith.maximumf %1149, %1148 : vector<1x128xf32>
    %cst_376 = arith.constant 1.000000e+00 : f32
    %1151 = vector.broadcast %cst_376 : f32 to vector<1x128xf32>
    %1152 = arith.addf %1143, %1151 : vector<1x128xf32>
    %1153 = math.absf %1152 : vector<1x128xf32>
    %cst_377 = arith.constant 1.000000e+00 : f32
    %1154 = vector.broadcast %cst_377 : f32 to vector<1x128xf32>
    %1155 = arith.subf %1154, %1153 : vector<1x128xf32>
    %cst_378 = arith.constant 0.000000e+00 : f32
    %1156 = vector.broadcast %cst_378 : f32 to vector<1x128xf32>
    %1157 = arith.maximumf %1156, %1155 : vector<1x128xf32>
    %cst_379 = arith.constant 2.000000e+00 : f32
    %1158 = vector.broadcast %cst_379 : f32 to vector<1x128xf32>
    %1159 = arith.addf %1143, %1158 : vector<1x128xf32>
    %1160 = math.absf %1159 : vector<1x128xf32>
    %cst_380 = arith.constant 1.000000e+00 : f32
    %1161 = vector.broadcast %cst_380 : f32 to vector<1x128xf32>
    %1162 = arith.subf %1161, %1160 : vector<1x128xf32>
    %cst_381 = arith.constant 0.000000e+00 : f32
    %1163 = vector.broadcast %cst_381 : f32 to vector<1x128xf32>
    %1164 = arith.maximumf %1163, %1162 : vector<1x128xf32>
    %cst_382 = arith.constant 3.000000e+00 : f32
    %1165 = vector.broadcast %cst_382 : f32 to vector<1x128xf32>
    %1166 = arith.addf %1143, %1165 : vector<1x128xf32>
    %1167 = math.absf %1166 : vector<1x128xf32>
    %cst_383 = arith.constant 1.000000e+00 : f32
    %1168 = vector.broadcast %cst_383 : f32 to vector<1x128xf32>
    %1169 = arith.subf %1168, %1167 : vector<1x128xf32>
    %cst_384 = arith.constant 0.000000e+00 : f32
    %1170 = vector.broadcast %cst_384 : f32 to vector<1x128xf32>
    %1171 = arith.maximumf %1170, %1169 : vector<1x128xf32>
    %1172 = vector.extract_strided_slice %1107 {offsets = [0, 0], sizes = [4, 128], strides = [1, 1]} : vector<16x128xf32> to vector<4x128xf32>
    %1173 = vector.broadcast %1150 : vector<1x128xf32> to vector<4x128xf32>
    %1174 = arith.mulf %1172, %1173 : vector<4x128xf32>
    %1175 = vector.extract_strided_slice %1107 {offsets = [4, 0], sizes = [4, 128], strides = [1, 1]} : vector<16x128xf32> to vector<4x128xf32>
    %1176 = vector.broadcast %1157 : vector<1x128xf32> to vector<4x128xf32>
    %1177 = arith.mulf %1175, %1176 : vector<4x128xf32>
    %1178 = arith.addf %1174, %1177 : vector<4x128xf32>
    %1179 = vector.extract_strided_slice %1107 {offsets = [8, 0], sizes = [4, 128], strides = [1, 1]} : vector<16x128xf32> to vector<4x128xf32>
    %1180 = vector.broadcast %1164 : vector<1x128xf32> to vector<4x128xf32>
    %1181 = arith.mulf %1179, %1180 : vector<4x128xf32>
    %1182 = arith.addf %1178, %1181 : vector<4x128xf32>
    %1183 = vector.extract_strided_slice %1107 {offsets = [12, 0], sizes = [4, 128], strides = [1, 1]} : vector<16x128xf32> to vector<4x128xf32>
    %1184 = vector.broadcast %1171 : vector<1x128xf32> to vector<4x128xf32>
    %1185 = arith.mulf %1183, %1184 : vector<4x128xf32>
    %1186 = arith.addf %1182, %1185 : vector<4x128xf32>
    %c0_385 = arith.constant 0 : index
    %c0_386 = arith.constant 0 : index
    %c0_387 = arith.constant 0 : index
    %1187 = vector.load %arg5[%c0_385, %c0_386, %c0_387] : memref<9x8x4xbf16, #tpu.memory_space<vmem>>, vector<1x8x4xbf16>
    %1188 = vector.shape_cast %1187 : vector<1x8x4xbf16> to vector<8x4xbf16>
    %1189 = arith.truncf %1186 : vector<4x128xf32> to vector<4x128xbf16>
    %cst_388 = arith.constant dense<0.000000e+00> : vector<8x128xf32>
    %1190 = tpu.matmul %1188, %1189, %cst_388 {dimension_numbers = #tpu.dot_dimension_numbers<[1], [0], [0], [1], [0, 0, 1, 1], [], []>} : vector<8x4xbf16>, vector<4x128xbf16>, vector<8x128xf32> -> vector<8x128xf32>
    %1191 = arith.addf %1137, %1190 : vector<8x128xf32>
    %1192 = vector.extract_strided_slice %1120 {offsets = [0, 0], sizes = [4, 128], strides = [1, 1]} : vector<16x128xf32> to vector<4x128xf32>
    %1193 = vector.broadcast %1150 : vector<1x128xf32> to vector<4x128xf32>
    %1194 = arith.mulf %1192, %1193 : vector<4x128xf32>
    %1195 = vector.extract_strided_slice %1120 {offsets = [4, 0], sizes = [4, 128], strides = [1, 1]} : vector<16x128xf32> to vector<4x128xf32>
    %1196 = vector.broadcast %1157 : vector<1x128xf32> to vector<4x128xf32>
    %1197 = arith.mulf %1195, %1196 : vector<4x128xf32>
    %1198 = arith.addf %1194, %1197 : vector<4x128xf32>
    %1199 = vector.extract_strided_slice %1120 {offsets = [8, 0], sizes = [4, 128], strides = [1, 1]} : vector<16x128xf32> to vector<4x128xf32>
    %1200 = vector.broadcast %1164 : vector<1x128xf32> to vector<4x128xf32>
    %1201 = arith.mulf %1199, %1200 : vector<4x128xf32>
    %1202 = arith.addf %1198, %1201 : vector<4x128xf32>
    %1203 = vector.extract_strided_slice %1120 {offsets = [12, 0], sizes = [4, 128], strides = [1, 1]} : vector<16x128xf32> to vector<4x128xf32>
    %1204 = vector.broadcast %1171 : vector<1x128xf32> to vector<4x128xf32>
    %1205 = arith.mulf %1203, %1204 : vector<4x128xf32>
    %1206 = arith.addf %1202, %1205 : vector<4x128xf32>
    %c1_389 = arith.constant 1 : index
    %c0_390 = arith.constant 0 : index
    %c0_391 = arith.constant 0 : index
    %1207 = vector.load %arg5[%c1_389, %c0_390, %c0_391] : memref<9x8x4xbf16, #tpu.memory_space<vmem>>, vector<1x8x4xbf16>
    %1208 = vector.shape_cast %1207 : vector<1x8x4xbf16> to vector<8x4xbf16>
    %1209 = arith.truncf %1206 : vector<4x128xf32> to vector<4x128xbf16>
    %cst_392 = arith.constant dense<0.000000e+00> : vector<8x128xf32>
    %1210 = tpu.matmul %1208, %1209, %cst_392 {dimension_numbers = #tpu.dot_dimension_numbers<[1], [0], [0], [1], [0, 0, 1, 1], [], []>} : vector<8x4xbf16>, vector<4x128xbf16>, vector<8x128xf32> -> vector<8x128xf32>
    %1211 = arith.addf %1191, %1210 : vector<8x128xf32>
    %1212 = vector.extract_strided_slice %1133 {offsets = [0, 0], sizes = [4, 128], strides = [1, 1]} : vector<16x128xf32> to vector<4x128xf32>
    %1213 = vector.broadcast %1150 : vector<1x128xf32> to vector<4x128xf32>
    %1214 = arith.mulf %1212, %1213 : vector<4x128xf32>
    %1215 = vector.extract_strided_slice %1133 {offsets = [4, 0], sizes = [4, 128], strides = [1, 1]} : vector<16x128xf32> to vector<4x128xf32>
    %1216 = vector.broadcast %1157 : vector<1x128xf32> to vector<4x128xf32>
    %1217 = arith.mulf %1215, %1216 : vector<4x128xf32>
    %1218 = arith.addf %1214, %1217 : vector<4x128xf32>
    %1219 = vector.extract_strided_slice %1133 {offsets = [8, 0], sizes = [4, 128], strides = [1, 1]} : vector<16x128xf32> to vector<4x128xf32>
    %1220 = vector.broadcast %1164 : vector<1x128xf32> to vector<4x128xf32>
    %1221 = arith.mulf %1219, %1220 : vector<4x128xf32>
    %1222 = arith.addf %1218, %1221 : vector<4x128xf32>
    %1223 = vector.extract_strided_slice %1133 {offsets = [12, 0], sizes = [4, 128], strides = [1, 1]} : vector<16x128xf32> to vector<4x128xf32>
    %1224 = vector.broadcast %1171 : vector<1x128xf32> to vector<4x128xf32>
    %1225 = arith.mulf %1223, %1224 : vector<4x128xf32>
    %1226 = arith.addf %1222, %1225 : vector<4x128xf32>
    %c2_393 = arith.constant 2 : index
    %c0_394 = arith.constant 0 : index
    %c0_395 = arith.constant 0 : index
    %1227 = vector.load %arg5[%c2_393, %c0_394, %c0_395] : memref<9x8x4xbf16, #tpu.memory_space<vmem>>, vector<1x8x4xbf16>
    %1228 = vector.shape_cast %1227 : vector<1x8x4xbf16> to vector<8x4xbf16>
    %1229 = arith.truncf %1226 : vector<4x128xf32> to vector<4x128xbf16>
    %cst_396 = arith.constant dense<0.000000e+00> : vector<8x128xf32>
    %1230 = tpu.matmul %1228, %1229, %cst_396 {dimension_numbers = #tpu.dot_dimension_numbers<[1], [0], [0], [1], [0, 0, 1, 1], [], []>} : vector<8x4xbf16>, vector<4x128xbf16>, vector<8x128xf32> -> vector<8x128xf32>
    %1231 = arith.addf %1211, %1230 : vector<8x128xf32>
    %cst_397 = arith.constant 1.000000e+00 : f32
    %1232 = vector.broadcast %cst_397 : f32 to vector<1x128xf32>
    %1233 = arith.mulf %1232, %1092 : vector<1x128xf32>
    %1234 = vector.broadcast %1135 : f32 to vector<1x128xf32>
    %1235 = arith.addf %1234, %1233 : vector<1x128xf32>
    %1236 = vector.broadcast %1136 : f32 to vector<1x128xf32>
    %1237 = arith.subf %1236, %1235 : vector<1x128xf32>
    %cst_398 = arith.constant 0.000000e+00 : f32
    %1238 = vector.broadcast %cst_398 : f32 to vector<1x128xf32>
    %1239 = arith.addf %1237, %1238 : vector<1x128xf32>
    %1240 = math.absf %1239 : vector<1x128xf32>
    %cst_399 = arith.constant 1.000000e+00 : f32
    %1241 = vector.broadcast %cst_399 : f32 to vector<1x128xf32>
    %1242 = arith.subf %1241, %1240 : vector<1x128xf32>
    %cst_400 = arith.constant 0.000000e+00 : f32
    %1243 = vector.broadcast %cst_400 : f32 to vector<1x128xf32>
    %1244 = arith.maximumf %1243, %1242 : vector<1x128xf32>
    %cst_401 = arith.constant 1.000000e+00 : f32
    %1245 = vector.broadcast %cst_401 : f32 to vector<1x128xf32>
    %1246 = arith.addf %1237, %1245 : vector<1x128xf32>
    %1247 = math.absf %1246 : vector<1x128xf32>
    %cst_402 = arith.constant 1.000000e+00 : f32
    %1248 = vector.broadcast %cst_402 : f32 to vector<1x128xf32>
    %1249 = arith.subf %1248, %1247 : vector<1x128xf32>
    %cst_403 = arith.constant 0.000000e+00 : f32
    %1250 = vector.broadcast %cst_403 : f32 to vector<1x128xf32>
    %1251 = arith.maximumf %1250, %1249 : vector<1x128xf32>
    %cst_404 = arith.constant 2.000000e+00 : f32
    %1252 = vector.broadcast %cst_404 : f32 to vector<1x128xf32>
    %1253 = arith.addf %1237, %1252 : vector<1x128xf32>
    %1254 = math.absf %1253 : vector<1x128xf32>
    %cst_405 = arith.constant 1.000000e+00 : f32
    %1255 = vector.broadcast %cst_405 : f32 to vector<1x128xf32>
    %1256 = arith.subf %1255, %1254 : vector<1x128xf32>
    %cst_406 = arith.constant 0.000000e+00 : f32
    %1257 = vector.broadcast %cst_406 : f32 to vector<1x128xf32>
    %1258 = arith.maximumf %1257, %1256 : vector<1x128xf32>
    %cst_407 = arith.constant 3.000000e+00 : f32
    %1259 = vector.broadcast %cst_407 : f32 to vector<1x128xf32>
    %1260 = arith.addf %1237, %1259 : vector<1x128xf32>
    %1261 = math.absf %1260 : vector<1x128xf32>
    %cst_408 = arith.constant 1.000000e+00 : f32
    %1262 = vector.broadcast %cst_408 : f32 to vector<1x128xf32>
    %1263 = arith.subf %1262, %1261 : vector<1x128xf32>
    %cst_409 = arith.constant 0.000000e+00 : f32
    %1264 = vector.broadcast %cst_409 : f32 to vector<1x128xf32>
    %1265 = arith.maximumf %1264, %1263 : vector<1x128xf32>
    %1266 = vector.extract_strided_slice %1107 {offsets = [0, 0], sizes = [4, 128], strides = [1, 1]} : vector<16x128xf32> to vector<4x128xf32>
    %1267 = vector.broadcast %1244 : vector<1x128xf32> to vector<4x128xf32>
    %1268 = arith.mulf %1266, %1267 : vector<4x128xf32>
    %1269 = vector.extract_strided_slice %1107 {offsets = [4, 0], sizes = [4, 128], strides = [1, 1]} : vector<16x128xf32> to vector<4x128xf32>
    %1270 = vector.broadcast %1251 : vector<1x128xf32> to vector<4x128xf32>
    %1271 = arith.mulf %1269, %1270 : vector<4x128xf32>
    %1272 = arith.addf %1268, %1271 : vector<4x128xf32>
    %1273 = vector.extract_strided_slice %1107 {offsets = [8, 0], sizes = [4, 128], strides = [1, 1]} : vector<16x128xf32> to vector<4x128xf32>
    %1274 = vector.broadcast %1258 : vector<1x128xf32> to vector<4x128xf32>
    %1275 = arith.mulf %1273, %1274 : vector<4x128xf32>
    %1276 = arith.addf %1272, %1275 : vector<4x128xf32>
    %1277 = vector.extract_strided_slice %1107 {offsets = [12, 0], sizes = [4, 128], strides = [1, 1]} : vector<16x128xf32> to vector<4x128xf32>
    %1278 = vector.broadcast %1265 : vector<1x128xf32> to vector<4x128xf32>
    %1279 = arith.mulf %1277, %1278 : vector<4x128xf32>
    %1280 = arith.addf %1276, %1279 : vector<4x128xf32>
    %c3_410 = arith.constant 3 : index
    %c0_411 = arith.constant 0 : index
    %c0_412 = arith.constant 0 : index
    %1281 = vector.load %arg5[%c3_410, %c0_411, %c0_412] : memref<9x8x4xbf16, #tpu.memory_space<vmem>>, vector<1x8x4xbf16>
    %1282 = vector.shape_cast %1281 : vector<1x8x4xbf16> to vector<8x4xbf16>
    %1283 = arith.truncf %1280 : vector<4x128xf32> to vector<4x128xbf16>
    %cst_413 = arith.constant dense<0.000000e+00> : vector<8x128xf32>
    %1284 = tpu.matmul %1282, %1283, %cst_413 {dimension_numbers = #tpu.dot_dimension_numbers<[1], [0], [0], [1], [0, 0, 1, 1], [], []>} : vector<8x4xbf16>, vector<4x128xbf16>, vector<8x128xf32> -> vector<8x128xf32>
    %1285 = arith.addf %1231, %1284 : vector<8x128xf32>
    %1286 = vector.extract_strided_slice %1120 {offsets = [0, 0], sizes = [4, 128], strides = [1, 1]} : vector<16x128xf32> to vector<4x128xf32>
    %1287 = vector.broadcast %1244 : vector<1x128xf32> to vector<4x128xf32>
    %1288 = arith.mulf %1286, %1287 : vector<4x128xf32>
    %1289 = vector.extract_strided_slice %1120 {offsets = [4, 0], sizes = [4, 128], strides = [1, 1]} : vector<16x128xf32> to vector<4x128xf32>
    %1290 = vector.broadcast %1251 : vector<1x128xf32> to vector<4x128xf32>
    %1291 = arith.mulf %1289, %1290 : vector<4x128xf32>
    %1292 = arith.addf %1288, %1291 : vector<4x128xf32>
    %1293 = vector.extract_strided_slice %1120 {offsets = [8, 0], sizes = [4, 128], strides = [1, 1]} : vector<16x128xf32> to vector<4x128xf32>
    %1294 = vector.broadcast %1258 : vector<1x128xf32> to vector<4x128xf32>
    %1295 = arith.mulf %1293, %1294 : vector<4x128xf32>
    %1296 = arith.addf %1292, %1295 : vector<4x128xf32>
    %1297 = vector.extract_strided_slice %1120 {offsets = [12, 0], sizes = [4, 128], strides = [1, 1]} : vector<16x128xf32> to vector<4x128xf32>
    %1298 = vector.broadcast %1265 : vector<1x128xf32> to vector<4x128xf32>
    %1299 = arith.mulf %1297, %1298 : vector<4x128xf32>
    %1300 = arith.addf %1296, %1299 : vector<4x128xf32>
    %c4_414 = arith.constant 4 : index
    %c0_415 = arith.constant 0 : index
    %c0_416 = arith.constant 0 : index
    %1301 = vector.load %arg5[%c4_414, %c0_415, %c0_416] : memref<9x8x4xbf16, #tpu.memory_space<vmem>>, vector<1x8x4xbf16>
    %1302 = vector.shape_cast %1301 : vector<1x8x4xbf16> to vector<8x4xbf16>
    %1303 = arith.truncf %1300 : vector<4x128xf32> to vector<4x128xbf16>
    %cst_417 = arith.constant dense<0.000000e+00> : vector<8x128xf32>
    %1304 = tpu.matmul %1302, %1303, %cst_417 {dimension_numbers = #tpu.dot_dimension_numbers<[1], [0], [0], [1], [0, 0, 1, 1], [], []>} : vector<8x4xbf16>, vector<4x128xbf16>, vector<8x128xf32> -> vector<8x128xf32>
    %1305 = arith.addf %1285, %1304 : vector<8x128xf32>
    %1306 = vector.extract_strided_slice %1133 {offsets = [0, 0], sizes = [4, 128], strides = [1, 1]} : vector<16x128xf32> to vector<4x128xf32>
    %1307 = vector.broadcast %1244 : vector<1x128xf32> to vector<4x128xf32>
    %1308 = arith.mulf %1306, %1307 : vector<4x128xf32>
    %1309 = vector.extract_strided_slice %1133 {offsets = [4, 0], sizes = [4, 128], strides = [1, 1]} : vector<16x128xf32> to vector<4x128xf32>
    %1310 = vector.broadcast %1251 : vector<1x128xf32> to vector<4x128xf32>
    %1311 = arith.mulf %1309, %1310 : vector<4x128xf32>
    %1312 = arith.addf %1308, %1311 : vector<4x128xf32>
    %1313 = vector.extract_strided_slice %1133 {offsets = [8, 0], sizes = [4, 128], strides = [1, 1]} : vector<16x128xf32> to vector<4x128xf32>
    %1314 = vector.broadcast %1258 : vector<1x128xf32> to vector<4x128xf32>
    %1315 = arith.mulf %1313, %1314 : vector<4x128xf32>
    %1316 = arith.addf %1312, %1315 : vector<4x128xf32>
    %1317 = vector.extract_strided_slice %1133 {offsets = [12, 0], sizes = [4, 128], strides = [1, 1]} : vector<16x128xf32> to vector<4x128xf32>
    %1318 = vector.broadcast %1265 : vector<1x128xf32> to vector<4x128xf32>
    %1319 = arith.mulf %1317, %1318 : vector<4x128xf32>
    %1320 = arith.addf %1316, %1319 : vector<4x128xf32>
    %c5_418 = arith.constant 5 : index
    %c0_419 = arith.constant 0 : index
    %c0_420 = arith.constant 0 : index
    %1321 = vector.load %arg5[%c5_418, %c0_419, %c0_420] : memref<9x8x4xbf16, #tpu.memory_space<vmem>>, vector<1x8x4xbf16>
    %1322 = vector.shape_cast %1321 : vector<1x8x4xbf16> to vector<8x4xbf16>
    %1323 = arith.truncf %1320 : vector<4x128xf32> to vector<4x128xbf16>
    %cst_421 = arith.constant dense<0.000000e+00> : vector<8x128xf32>
    %1324 = tpu.matmul %1322, %1323, %cst_421 {dimension_numbers = #tpu.dot_dimension_numbers<[1], [0], [0], [1], [0, 0, 1, 1], [], []>} : vector<8x4xbf16>, vector<4x128xbf16>, vector<8x128xf32> -> vector<8x128xf32>
    %1325 = arith.addf %1305, %1324 : vector<8x128xf32>
    %cst_422 = arith.constant 2.000000e+00 : f32
    %1326 = vector.broadcast %cst_422 : f32 to vector<1x128xf32>
    %1327 = arith.mulf %1326, %1092 : vector<1x128xf32>
    %1328 = vector.broadcast %1135 : f32 to vector<1x128xf32>
    %1329 = arith.addf %1328, %1327 : vector<1x128xf32>
    %1330 = vector.broadcast %1136 : f32 to vector<1x128xf32>
    %1331 = arith.subf %1330, %1329 : vector<1x128xf32>
    %cst_423 = arith.constant 0.000000e+00 : f32
    %1332 = vector.broadcast %cst_423 : f32 to vector<1x128xf32>
    %1333 = arith.addf %1331, %1332 : vector<1x128xf32>
    %1334 = math.absf %1333 : vector<1x128xf32>
    %cst_424 = arith.constant 1.000000e+00 : f32
    %1335 = vector.broadcast %cst_424 : f32 to vector<1x128xf32>
    %1336 = arith.subf %1335, %1334 : vector<1x128xf32>
    %cst_425 = arith.constant 0.000000e+00 : f32
    %1337 = vector.broadcast %cst_425 : f32 to vector<1x128xf32>
    %1338 = arith.maximumf %1337, %1336 : vector<1x128xf32>
    %cst_426 = arith.constant 1.000000e+00 : f32
    %1339 = vector.broadcast %cst_426 : f32 to vector<1x128xf32>
    %1340 = arith.addf %1331, %1339 : vector<1x128xf32>
    %1341 = math.absf %1340 : vector<1x128xf32>
    %cst_427 = arith.constant 1.000000e+00 : f32
    %1342 = vector.broadcast %cst_427 : f32 to vector<1x128xf32>
    %1343 = arith.subf %1342, %1341 : vector<1x128xf32>
    %cst_428 = arith.constant 0.000000e+00 : f32
    %1344 = vector.broadcast %cst_428 : f32 to vector<1x128xf32>
    %1345 = arith.maximumf %1344, %1343 : vector<1x128xf32>
    %cst_429 = arith.constant 2.000000e+00 : f32
    %1346 = vector.broadcast %cst_429 : f32 to vector<1x128xf32>
    %1347 = arith.addf %1331, %1346 : vector<1x128xf32>
    %1348 = math.absf %1347 : vector<1x128xf32>
    %cst_430 = arith.constant 1.000000e+00 : f32
    %1349 = vector.broadcast %cst_430 : f32 to vector<1x128xf32>
    %1350 = arith.subf %1349, %1348 : vector<1x128xf32>
    %cst_431 = arith.constant 0.000000e+00 : f32
    %1351 = vector.broadcast %cst_431 : f32 to vector<1x128xf32>
    %1352 = arith.maximumf %1351, %1350 : vector<1x128xf32>
    %cst_432 = arith.constant 3.000000e+00 : f32
    %1353 = vector.broadcast %cst_432 : f32 to vector<1x128xf32>
    %1354 = arith.addf %1331, %1353 : vector<1x128xf32>
    %1355 = math.absf %1354 : vector<1x128xf32>
    %cst_433 = arith.constant 1.000000e+00 : f32
    %1356 = vector.broadcast %cst_433 : f32 to vector<1x128xf32>
    %1357 = arith.subf %1356, %1355 : vector<1x128xf32>
    %cst_434 = arith.constant 0.000000e+00 : f32
    %1358 = vector.broadcast %cst_434 : f32 to vector<1x128xf32>
    %1359 = arith.maximumf %1358, %1357 : vector<1x128xf32>
    %1360 = vector.extract_strided_slice %1107 {offsets = [0, 0], sizes = [4, 128], strides = [1, 1]} : vector<16x128xf32> to vector<4x128xf32>
    %1361 = vector.broadcast %1338 : vector<1x128xf32> to vector<4x128xf32>
    %1362 = arith.mulf %1360, %1361 : vector<4x128xf32>
    %1363 = vector.extract_strided_slice %1107 {offsets = [4, 0], sizes = [4, 128], strides = [1, 1]} : vector<16x128xf32> to vector<4x128xf32>
    %1364 = vector.broadcast %1345 : vector<1x128xf32> to vector<4x128xf32>
    %1365 = arith.mulf %1363, %1364 : vector<4x128xf32>
    %1366 = arith.addf %1362, %1365 : vector<4x128xf32>
    %1367 = vector.extract_strided_slice %1107 {offsets = [8, 0], sizes = [4, 128], strides = [1, 1]} : vector<16x128xf32> to vector<4x128xf32>
    %1368 = vector.broadcast %1352 : vector<1x128xf32> to vector<4x128xf32>
    %1369 = arith.mulf %1367, %1368 : vector<4x128xf32>
    %1370 = arith.addf %1366, %1369 : vector<4x128xf32>
    %1371 = vector.extract_strided_slice %1107 {offsets = [12, 0], sizes = [4, 128], strides = [1, 1]} : vector<16x128xf32> to vector<4x128xf32>
    %1372 = vector.broadcast %1359 : vector<1x128xf32> to vector<4x128xf32>
    %1373 = arith.mulf %1371, %1372 : vector<4x128xf32>
    %1374 = arith.addf %1370, %1373 : vector<4x128xf32>
    %c6_435 = arith.constant 6 : index
    %c0_436 = arith.constant 0 : index
    %c0_437 = arith.constant 0 : index
    %1375 = vector.load %arg5[%c6_435, %c0_436, %c0_437] : memref<9x8x4xbf16, #tpu.memory_space<vmem>>, vector<1x8x4xbf16>
    %1376 = vector.shape_cast %1375 : vector<1x8x4xbf16> to vector<8x4xbf16>
    %1377 = arith.truncf %1374 : vector<4x128xf32> to vector<4x128xbf16>
    %cst_438 = arith.constant dense<0.000000e+00> : vector<8x128xf32>
    %1378 = tpu.matmul %1376, %1377, %cst_438 {dimension_numbers = #tpu.dot_dimension_numbers<[1], [0], [0], [1], [0, 0, 1, 1], [], []>} : vector<8x4xbf16>, vector<4x128xbf16>, vector<8x128xf32> -> vector<8x128xf32>
    %1379 = arith.addf %1325, %1378 : vector<8x128xf32>
    %1380 = vector.extract_strided_slice %1120 {offsets = [0, 0], sizes = [4, 128], strides = [1, 1]} : vector<16x128xf32> to vector<4x128xf32>
    %1381 = vector.broadcast %1338 : vector<1x128xf32> to vector<4x128xf32>
    %1382 = arith.mulf %1380, %1381 : vector<4x128xf32>
    %1383 = vector.extract_strided_slice %1120 {offsets = [4, 0], sizes = [4, 128], strides = [1, 1]} : vector<16x128xf32> to vector<4x128xf32>
    %1384 = vector.broadcast %1345 : vector<1x128xf32> to vector<4x128xf32>
    %1385 = arith.mulf %1383, %1384 : vector<4x128xf32>
    %1386 = arith.addf %1382, %1385 : vector<4x128xf32>
    %1387 = vector.extract_strided_slice %1120 {offsets = [8, 0], sizes = [4, 128], strides = [1, 1]} : vector<16x128xf32> to vector<4x128xf32>
    %1388 = vector.broadcast %1352 : vector<1x128xf32> to vector<4x128xf32>
    %1389 = arith.mulf %1387, %1388 : vector<4x128xf32>
    %1390 = arith.addf %1386, %1389 : vector<4x128xf32>
    %1391 = vector.extract_strided_slice %1120 {offsets = [12, 0], sizes = [4, 128], strides = [1, 1]} : vector<16x128xf32> to vector<4x128xf32>
    %1392 = vector.broadcast %1359 : vector<1x128xf32> to vector<4x128xf32>
    %1393 = arith.mulf %1391, %1392 : vector<4x128xf32>
    %1394 = arith.addf %1390, %1393 : vector<4x128xf32>
    %c7_439 = arith.constant 7 : index
    %c0_440 = arith.constant 0 : index
    %c0_441 = arith.constant 0 : index
    %1395 = vector.load %arg5[%c7_439, %c0_440, %c0_441] : memref<9x8x4xbf16, #tpu.memory_space<vmem>>, vector<1x8x4xbf16>
    %1396 = vector.shape_cast %1395 : vector<1x8x4xbf16> to vector<8x4xbf16>
    %1397 = arith.truncf %1394 : vector<4x128xf32> to vector<4x128xbf16>
    %cst_442 = arith.constant dense<0.000000e+00> : vector<8x128xf32>
    %1398 = tpu.matmul %1396, %1397, %cst_442 {dimension_numbers = #tpu.dot_dimension_numbers<[1], [0], [0], [1], [0, 0, 1, 1], [], []>} : vector<8x4xbf16>, vector<4x128xbf16>, vector<8x128xf32> -> vector<8x128xf32>
    %1399 = arith.addf %1379, %1398 : vector<8x128xf32>
    %1400 = vector.extract_strided_slice %1133 {offsets = [0, 0], sizes = [4, 128], strides = [1, 1]} : vector<16x128xf32> to vector<4x128xf32>
    %1401 = vector.broadcast %1338 : vector<1x128xf32> to vector<4x128xf32>
    %1402 = arith.mulf %1400, %1401 : vector<4x128xf32>
    %1403 = vector.extract_strided_slice %1133 {offsets = [4, 0], sizes = [4, 128], strides = [1, 1]} : vector<16x128xf32> to vector<4x128xf32>
    %1404 = vector.broadcast %1345 : vector<1x128xf32> to vector<4x128xf32>
    %1405 = arith.mulf %1403, %1404 : vector<4x128xf32>
    %1406 = arith.addf %1402, %1405 : vector<4x128xf32>
    %1407 = vector.extract_strided_slice %1133 {offsets = [8, 0], sizes = [4, 128], strides = [1, 1]} : vector<16x128xf32> to vector<4x128xf32>
    %1408 = vector.broadcast %1352 : vector<1x128xf32> to vector<4x128xf32>
    %1409 = arith.mulf %1407, %1408 : vector<4x128xf32>
    %1410 = arith.addf %1406, %1409 : vector<4x128xf32>
    %1411 = vector.extract_strided_slice %1133 {offsets = [12, 0], sizes = [4, 128], strides = [1, 1]} : vector<16x128xf32> to vector<4x128xf32>
    %1412 = vector.broadcast %1359 : vector<1x128xf32> to vector<4x128xf32>
    %1413 = arith.mulf %1411, %1412 : vector<4x128xf32>
    %1414 = arith.addf %1410, %1413 : vector<4x128xf32>
    %c8_443 = arith.constant 8 : index
    %c0_444 = arith.constant 0 : index
    %c0_445 = arith.constant 0 : index
    %1415 = vector.load %arg5[%c8_443, %c0_444, %c0_445] : memref<9x8x4xbf16, #tpu.memory_space<vmem>>, vector<1x8x4xbf16>
    %1416 = vector.shape_cast %1415 : vector<1x8x4xbf16> to vector<8x4xbf16>
    %1417 = arith.truncf %1414 : vector<4x128xf32> to vector<4x128xbf16>
    %cst_446 = arith.constant dense<0.000000e+00> : vector<8x128xf32>
    %1418 = tpu.matmul %1416, %1417, %cst_446 {dimension_numbers = #tpu.dot_dimension_numbers<[1], [0], [0], [1], [0, 0, 1, 1], [], []>} : vector<8x4xbf16>, vector<4x128xbf16>, vector<8x128xf32> -> vector<8x128xf32>
    %1419 = arith.addf %1399, %1418 : vector<8x128xf32>
    %1420 = vector.broadcast %8 : vector<8x1xf32> to vector<8x128xf32>
    %1421 = arith.addf %1419, %1420 : vector<8x128xf32>
    %c0_447 = arith.constant 0 : index
    %c0_448 = arith.constant 0 : index
    %c3_449 = arith.constant 3 : index
    %c0_450 = arith.constant 0 : index
    %1422 = vector.load %arg7[%c0_447, %c0_448, %c3_449, %c0_450] : memref<1x8x8x128xf32, #tpu.memory_space<vmem>>, vector<1x8x1x128xf32>
    %1423 = vector.shape_cast %1422 : vector<1x8x1x128xf32> to vector<8x128xf32>
    %1424 = vector.shape_cast %1421 : vector<8x128xf32> to vector<1x8x1x128xf32>
    tpu.vector_store %arg7[%c0_447, %c0_448, %c3_449, %c0_450], %1424 {strides = array<i32>} : memref<1x8x8x128xf32, #tpu.memory_space<vmem>>, vector<1x8x1x128xf32>,
    %c4_i32 = arith.constant 4 : i32
    %1425 = arith.addi %0, %c4_i32 : i32
    %c1_i32_451 = arith.constant 1 : i32
    %1426 = arith.muli %1425, %c1_i32_451 : i32
    %c0_i32_452 = arith.constant 0 : i32
    %c14_i32_453 = arith.constant 14 : i32
    %1427 = arith.maxsi %c0_i32_452, %1426 : i32
    %1428 = arith.minsi %c14_i32_453, %1427 : i32
    %c0_i32_454 = arith.constant 0 : i32
    %1429 = arith.addi %1428, %c0_i32_454 : i32
    %c0_455 = arith.constant 0 : index
    %1430 = arith.index_cast %1429 : i32 to index
    %c0_456 = arith.constant 0 : index
    %c0_457 = arith.constant 0 : index
    %1431 = vector.load %arg3[%c0_455, %1430, %c0_456, %c0_457] : memref<1x18x4x18xbf16, #tpu.memory_space<vmem>>, vector<1x1x4x18xbf16>
    %1432 = vector.shape_cast %1431 : vector<1x1x4x18xbf16> to vector<4x18xbf16>
    %c1_i32_458 = arith.constant 1 : i32
    %1433 = arith.addi %1428, %c1_i32_458 : i32
    %c0_459 = arith.constant 0 : index
    %1434 = arith.index_cast %1433 : i32 to index
    %c0_460 = arith.constant 0 : index
    %c0_461 = arith.constant 0 : index
    %1435 = vector.load %arg3[%c0_459, %1434, %c0_460, %c0_461] : memref<1x18x4x18xbf16, #tpu.memory_space<vmem>>, vector<1x1x4x18xbf16>
    %1436 = vector.shape_cast %1435 : vector<1x1x4x18xbf16> to vector<4x18xbf16>
    %c2_i32_462 = arith.constant 2 : i32
    %1437 = arith.addi %1428, %c2_i32_462 : i32
    %c0_463 = arith.constant 0 : index
    %1438 = arith.index_cast %1437 : i32 to index
    %c0_464 = arith.constant 0 : index
    %c0_465 = arith.constant 0 : index
    %1439 = vector.load %arg3[%c0_463, %1438, %c0_464, %c0_465] : memref<1x18x4x18xbf16, #tpu.memory_space<vmem>>, vector<1x1x4x18xbf16>
    %1440 = vector.shape_cast %1439 : vector<1x1x4x18xbf16> to vector<4x18xbf16>
    %c3_i32_466 = arith.constant 3 : i32
    %1441 = arith.addi %1428, %c3_i32_466 : i32
    %c0_467 = arith.constant 0 : index
    %1442 = arith.index_cast %1441 : i32 to index
    %c0_468 = arith.constant 0 : index
    %c0_469 = arith.constant 0 : index
    %1443 = vector.load %arg3[%c0_467, %1442, %c0_468, %c0_469] : memref<1x18x4x18xbf16, #tpu.memory_space<vmem>>, vector<1x1x4x18xbf16>
    %1444 = vector.shape_cast %1443 : vector<1x1x4x18xbf16> to vector<4x18xbf16>
    %1445 = tpu.concatenate %1432, %1436, %1440, %1444 in 0 : vector<4x18xbf16>, vector<4x18xbf16>, vector<4x18xbf16>, vector<4x18xbf16> -> vector<16x18xbf16>
    %c4_470 = arith.constant 4 : index
    %c0_471 = arith.constant 0 : index
    %1446 = vector.load %arg4[%c4_470, %c0_471] : memref<8x128xf32, #tpu.memory_space<vmem>>, vector<1x128xf32>
    %cst_472 = arith.constant 1.000000e+00 : f32
    %1447 = vector.broadcast %cst_472 : f32 to vector<1x128xf32>
    %1448 = arith.mulf %5, %1447 : vector<1x128xf32>
    %cst_473 = arith.constant 0.000000e+00 : f32
    %1449 = vector.broadcast %cst_473 : f32 to vector<1x128xf32>
    %1450 = arith.mulf %1449, %1446 : vector<1x128xf32>
    %1451 = arith.addf %1448, %1450 : vector<1x128xf32>
    %1452 = vector.broadcast %7 : vector<18x1xf32> to vector<18x128xf32>
    %1453 = vector.broadcast %1451 : vector<1x128xf32> to vector<18x128xf32>
    %1454 = arith.subf %1452, %1453 : vector<18x128xf32>
    %1455 = math.absf %1454 : vector<18x128xf32>
    %cst_474 = arith.constant 1.000000e+00 : f32
    %1456 = vector.broadcast %cst_474 : f32 to vector<18x128xf32>
    %1457 = arith.subf %1456, %1455 : vector<18x128xf32>
    %cst_475 = arith.constant 0.000000e+00 : f32
    %1458 = vector.broadcast %cst_475 : f32 to vector<18x128xf32>
    %1459 = arith.maximumf %1458, %1457 : vector<18x128xf32>
    %1460 = arith.truncf %1459 : vector<18x128xf32> to vector<18x128xbf16>
    %cst_476 = arith.constant dense<0.000000e+00> : vector<16x128xf32>
    %1461 = tpu.matmul %1445, %1460, %cst_476 {dimension_numbers = #tpu.dot_dimension_numbers<[1], [0], [0], [1], [0, 0, 1, 1], [], []>} : vector<16x18xbf16>, vector<18x128xbf16>, vector<16x128xf32> -> vector<16x128xf32>
    %cst_477 = arith.constant 1.000000e+00 : f32
    %1462 = vector.broadcast %cst_477 : f32 to vector<1x128xf32>
    %1463 = arith.mulf %1462, %1446 : vector<1x128xf32>
    %1464 = arith.addf %1448, %1463 : vector<1x128xf32>
    %1465 = vector.broadcast %7 : vector<18x1xf32> to vector<18x128xf32>
    %1466 = vector.broadcast %1464 : vector<1x128xf32> to vector<18x128xf32>
    %1467 = arith.subf %1465, %1466 : vector<18x128xf32>
    %1468 = math.absf %1467 : vector<18x128xf32>
    %cst_478 = arith.constant 1.000000e+00 : f32
    %1469 = vector.broadcast %cst_478 : f32 to vector<18x128xf32>
    %1470 = arith.subf %1469, %1468 : vector<18x128xf32>
    %cst_479 = arith.constant 0.000000e+00 : f32
    %1471 = vector.broadcast %cst_479 : f32 to vector<18x128xf32>
    %1472 = arith.maximumf %1471, %1470 : vector<18x128xf32>
    %1473 = arith.truncf %1472 : vector<18x128xf32> to vector<18x128xbf16>
    %cst_480 = arith.constant dense<0.000000e+00> : vector<16x128xf32>
    %1474 = tpu.matmul %1445, %1473, %cst_480 {dimension_numbers = #tpu.dot_dimension_numbers<[1], [0], [0], [1], [0, 0, 1, 1], [], []>} : vector<16x18xbf16>, vector<18x128xbf16>, vector<16x128xf32> -> vector<16x128xf32>
    %cst_481 = arith.constant 2.000000e+00 : f32
    %1475 = vector.broadcast %cst_481 : f32 to vector<1x128xf32>
    %1476 = arith.mulf %1475, %1446 : vector<1x128xf32>
    %1477 = arith.addf %1448, %1476 : vector<1x128xf32>
    %1478 = vector.broadcast %7 : vector<18x1xf32> to vector<18x128xf32>
    %1479 = vector.broadcast %1477 : vector<1x128xf32> to vector<18x128xf32>
    %1480 = arith.subf %1478, %1479 : vector<18x128xf32>
    %1481 = math.absf %1480 : vector<18x128xf32>
    %cst_482 = arith.constant 1.000000e+00 : f32
    %1482 = vector.broadcast %cst_482 : f32 to vector<18x128xf32>
    %1483 = arith.subf %1482, %1481 : vector<18x128xf32>
    %cst_483 = arith.constant 0.000000e+00 : f32
    %1484 = vector.broadcast %cst_483 : f32 to vector<18x128xf32>
    %1485 = arith.maximumf %1484, %1483 : vector<18x128xf32>
    %1486 = arith.truncf %1485 : vector<18x128xf32> to vector<18x128xbf16>
    %cst_484 = arith.constant dense<0.000000e+00> : vector<16x128xf32>
    %1487 = tpu.matmul %1445, %1486, %cst_484 {dimension_numbers = #tpu.dot_dimension_numbers<[1], [0], [0], [1], [0, 0, 1, 1], [], []>} : vector<16x18xbf16>, vector<18x128xbf16>, vector<16x128xf32> -> vector<16x128xf32>
    %c1_i32_485 = arith.constant 1 : i32
    %1488 = arith.muli %1425, %c1_i32_485 : i32
    %1489 = arith.sitofp %1488 : i32 to f32
    %1490 = arith.sitofp %1428 : i32 to f32
    %cst_486 = arith.constant 0.000000e+00 : f32
    %1491 = vector.broadcast %cst_486 : f32 to vector<8x128xf32>
    %cst_487 = arith.constant 0.000000e+00 : f32
    %1492 = vector.broadcast %cst_487 : f32 to vector<1x128xf32>
    %1493 = arith.mulf %1492, %1446 : vector<1x128xf32>
    %1494 = vector.broadcast %1489 : f32 to vector<1x128xf32>
    %1495 = arith.addf %1494, %1493 : vector<1x128xf32>
    %1496 = vector.broadcast %1490 : f32 to vector<1x128xf32>
    %1497 = arith.subf %1496, %1495 : vector<1x128xf32>
    %cst_488 = arith.constant 0.000000e+00 : f32
    %1498 = vector.broadcast %cst_488 : f32 to vector<1x128xf32>
    %1499 = arith.addf %1497, %1498 : vector<1x128xf32>
    %1500 = math.absf %1499 : vector<1x128xf32>
    %cst_489 = arith.constant 1.000000e+00 : f32
    %1501 = vector.broadcast %cst_489 : f32 to vector<1x128xf32>
    %1502 = arith.subf %1501, %1500 : vector<1x128xf32>
    %cst_490 = arith.constant 0.000000e+00 : f32
    %1503 = vector.broadcast %cst_490 : f32 to vector<1x128xf32>
    %1504 = arith.maximumf %1503, %1502 : vector<1x128xf32>
    %cst_491 = arith.constant 1.000000e+00 : f32
    %1505 = vector.broadcast %cst_491 : f32 to vector<1x128xf32>
    %1506 = arith.addf %1497, %1505 : vector<1x128xf32>
    %1507 = math.absf %1506 : vector<1x128xf32>
    %cst_492 = arith.constant 1.000000e+00 : f32
    %1508 = vector.broadcast %cst_492 : f32 to vector<1x128xf32>
    %1509 = arith.subf %1508, %1507 : vector<1x128xf32>
    %cst_493 = arith.constant 0.000000e+00 : f32
    %1510 = vector.broadcast %cst_493 : f32 to vector<1x128xf32>
    %1511 = arith.maximumf %1510, %1509 : vector<1x128xf32>
    %cst_494 = arith.constant 2.000000e+00 : f32
    %1512 = vector.broadcast %cst_494 : f32 to vector<1x128xf32>
    %1513 = arith.addf %1497, %1512 : vector<1x128xf32>
    %1514 = math.absf %1513 : vector<1x128xf32>
    %cst_495 = arith.constant 1.000000e+00 : f32
    %1515 = vector.broadcast %cst_495 : f32 to vector<1x128xf32>
    %1516 = arith.subf %1515, %1514 : vector<1x128xf32>
    %cst_496 = arith.constant 0.000000e+00 : f32
    %1517 = vector.broadcast %cst_496 : f32 to vector<1x128xf32>
    %1518 = arith.maximumf %1517, %1516 : vector<1x128xf32>
    %cst_497 = arith.constant 3.000000e+00 : f32
    %1519 = vector.broadcast %cst_497 : f32 to vector<1x128xf32>
    %1520 = arith.addf %1497, %1519 : vector<1x128xf32>
    %1521 = math.absf %1520 : vector<1x128xf32>
    %cst_498 = arith.constant 1.000000e+00 : f32
    %1522 = vector.broadcast %cst_498 : f32 to vector<1x128xf32>
    %1523 = arith.subf %1522, %1521 : vector<1x128xf32>
    %cst_499 = arith.constant 0.000000e+00 : f32
    %1524 = vector.broadcast %cst_499 : f32 to vector<1x128xf32>
    %1525 = arith.maximumf %1524, %1523 : vector<1x128xf32>
    %1526 = vector.extract_strided_slice %1461 {offsets = [0, 0], sizes = [4, 128], strides = [1, 1]} : vector<16x128xf32> to vector<4x128xf32>
    %1527 = vector.broadcast %1504 : vector<1x128xf32> to vector<4x128xf32>
    %1528 = arith.mulf %1526, %1527 : vector<4x128xf32>
    %1529 = vector.extract_strided_slice %1461 {offsets = [4, 0], sizes = [4, 128], strides = [1, 1]} : vector<16x128xf32> to vector<4x128xf32>
    %1530 = vector.broadcast %1511 : vector<1x128xf32> to vector<4x128xf32>
    %1531 = arith.mulf %1529, %1530 : vector<4x128xf32>
    %1532 = arith.addf %1528, %1531 : vector<4x128xf32>
    %1533 = vector.extract_strided_slice %1461 {offsets = [8, 0], sizes = [4, 128], strides = [1, 1]} : vector<16x128xf32> to vector<4x128xf32>
    %1534 = vector.broadcast %1518 : vector<1x128xf32> to vector<4x128xf32>
    %1535 = arith.mulf %1533, %1534 : vector<4x128xf32>
    %1536 = arith.addf %1532, %1535 : vector<4x128xf32>
    %1537 = vector.extract_strided_slice %1461 {offsets = [12, 0], sizes = [4, 128], strides = [1, 1]} : vector<16x128xf32> to vector<4x128xf32>
    %1538 = vector.broadcast %1525 : vector<1x128xf32> to vector<4x128xf32>
    %1539 = arith.mulf %1537, %1538 : vector<4x128xf32>
    %1540 = arith.addf %1536, %1539 : vector<4x128xf32>
    %c0_500 = arith.constant 0 : index
    %c0_501 = arith.constant 0 : index
    %c0_502 = arith.constant 0 : index
    %1541 = vector.load %arg5[%c0_500, %c0_501, %c0_502] : memref<9x8x4xbf16, #tpu.memory_space<vmem>>, vector<1x8x4xbf16>
    %1542 = vector.shape_cast %1541 : vector<1x8x4xbf16> to vector<8x4xbf16>
    %1543 = arith.truncf %1540 : vector<4x128xf32> to vector<4x128xbf16>
    %cst_503 = arith.constant dense<0.000000e+00> : vector<8x128xf32>
    %1544 = tpu.matmul %1542, %1543, %cst_503 {dimension_numbers = #tpu.dot_dimension_numbers<[1], [0], [0], [1], [0, 0, 1, 1], [], []>} : vector<8x4xbf16>, vector<4x128xbf16>, vector<8x128xf32> -> vector<8x128xf32>
    %1545 = arith.addf %1491, %1544 : vector<8x128xf32>
    %1546 = vector.extract_strided_slice %1474 {offsets = [0, 0], sizes = [4, 128], strides = [1, 1]} : vector<16x128xf32> to vector<4x128xf32>
    %1547 = vector.broadcast %1504 : vector<1x128xf32> to vector<4x128xf32>
    %1548 = arith.mulf %1546, %1547 : vector<4x128xf32>
    %1549 = vector.extract_strided_slice %1474 {offsets = [4, 0], sizes = [4, 128], strides = [1, 1]} : vector<16x128xf32> to vector<4x128xf32>
    %1550 = vector.broadcast %1511 : vector<1x128xf32> to vector<4x128xf32>
    %1551 = arith.mulf %1549, %1550 : vector<4x128xf32>
    %1552 = arith.addf %1548, %1551 : vector<4x128xf32>
    %1553 = vector.extract_strided_slice %1474 {offsets = [8, 0], sizes = [4, 128], strides = [1, 1]} : vector<16x128xf32> to vector<4x128xf32>
    %1554 = vector.broadcast %1518 : vector<1x128xf32> to vector<4x128xf32>
    %1555 = arith.mulf %1553, %1554 : vector<4x128xf32>
    %1556 = arith.addf %1552, %1555 : vector<4x128xf32>
    %1557 = vector.extract_strided_slice %1474 {offsets = [12, 0], sizes = [4, 128], strides = [1, 1]} : vector<16x128xf32> to vector<4x128xf32>
    %1558 = vector.broadcast %1525 : vector<1x128xf32> to vector<4x128xf32>
    %1559 = arith.mulf %1557, %1558 : vector<4x128xf32>
    %1560 = arith.addf %1556, %1559 : vector<4x128xf32>
    %c1_504 = arith.constant 1 : index
    %c0_505 = arith.constant 0 : index
    %c0_506 = arith.constant 0 : index
    %1561 = vector.load %arg5[%c1_504, %c0_505, %c0_506] : memref<9x8x4xbf16, #tpu.memory_space<vmem>>, vector<1x8x4xbf16>
    %1562 = vector.shape_cast %1561 : vector<1x8x4xbf16> to vector<8x4xbf16>
    %1563 = arith.truncf %1560 : vector<4x128xf32> to vector<4x128xbf16>
    %cst_507 = arith.constant dense<0.000000e+00> : vector<8x128xf32>
    %1564 = tpu.matmul %1562, %1563, %cst_507 {dimension_numbers = #tpu.dot_dimension_numbers<[1], [0], [0], [1], [0, 0, 1, 1], [], []>} : vector<8x4xbf16>, vector<4x128xbf16>, vector<8x128xf32> -> vector<8x128xf32>
    %1565 = arith.addf %1545, %1564 : vector<8x128xf32>
    %1566 = vector.extract_strided_slice %1487 {offsets = [0, 0], sizes = [4, 128], strides = [1, 1]} : vector<16x128xf32> to vector<4x128xf32>
    %1567 = vector.broadcast %1504 : vector<1x128xf32> to vector<4x128xf32>
    %1568 = arith.mulf %1566, %1567 : vector<4x128xf32>
    %1569 = vector.extract_strided_slice %1487 {offsets = [4, 0], sizes = [4, 128], strides = [1, 1]} : vector<16x128xf32> to vector<4x128xf32>
    %1570 = vector.broadcast %1511 : vector<1x128xf32> to vector<4x128xf32>
    %1571 = arith.mulf %1569, %1570 : vector<4x128xf32>
    %1572 = arith.addf %1568, %1571 : vector<4x128xf32>
    %1573 = vector.extract_strided_slice %1487 {offsets = [8, 0], sizes = [4, 128], strides = [1, 1]} : vector<16x128xf32> to vector<4x128xf32>
    %1574 = vector.broadcast %1518 : vector<1x128xf32> to vector<4x128xf32>
    %1575 = arith.mulf %1573, %1574 : vector<4x128xf32>
    %1576 = arith.addf %1572, %1575 : vector<4x128xf32>
    %1577 = vector.extract_strided_slice %1487 {offsets = [12, 0], sizes = [4, 128], strides = [1, 1]} : vector<16x128xf32> to vector<4x128xf32>
    %1578 = vector.broadcast %1525 : vector<1x128xf32> to vector<4x128xf32>
    %1579 = arith.mulf %1577, %1578 : vector<4x128xf32>
    %1580 = arith.addf %1576, %1579 : vector<4x128xf32>
    %c2_508 = arith.constant 2 : index
    %c0_509 = arith.constant 0 : index
    %c0_510 = arith.constant 0 : index
    %1581 = vector.load %arg5[%c2_508, %c0_509, %c0_510] : memref<9x8x4xbf16, #tpu.memory_space<vmem>>, vector<1x8x4xbf16>
    %1582 = vector.shape_cast %1581 : vector<1x8x4xbf16> to vector<8x4xbf16>
    %1583 = arith.truncf %1580 : vector<4x128xf32> to vector<4x128xbf16>
    %cst_511 = arith.constant dense<0.000000e+00> : vector<8x128xf32>
    %1584 = tpu.matmul %1582, %1583, %cst_511 {dimension_numbers = #tpu.dot_dimension_numbers<[1], [0], [0], [1], [0, 0, 1, 1], [], []>} : vector<8x4xbf16>, vector<4x128xbf16>, vector<8x128xf32> -> vector<8x128xf32>
    %1585 = arith.addf %1565, %1584 : vector<8x128xf32>
    %cst_512 = arith.constant 1.000000e+00 : f32
    %1586 = vector.broadcast %cst_512 : f32 to vector<1x128xf32>
    %1587 = arith.mulf %1586, %1446 : vector<1x128xf32>
    %1588 = vector.broadcast %1489 : f32 to vector<1x128xf32>
    %1589 = arith.addf %1588, %1587 : vector<1x128xf32>
    %1590 = vector.broadcast %1490 : f32 to vector<1x128xf32>
    %1591 = arith.subf %1590, %1589 : vector<1x128xf32>
    %cst_513 = arith.constant 0.000000e+00 : f32
    %1592 = vector.broadcast %cst_513 : f32 to vector<1x128xf32>
    %1593 = arith.addf %1591, %1592 : vector<1x128xf32>
    %1594 = math.absf %1593 : vector<1x128xf32>
    %cst_514 = arith.constant 1.000000e+00 : f32
    %1595 = vector.broadcast %cst_514 : f32 to vector<1x128xf32>
    %1596 = arith.subf %1595, %1594 : vector<1x128xf32>
    %cst_515 = arith.constant 0.000000e+00 : f32
    %1597 = vector.broadcast %cst_515 : f32 to vector<1x128xf32>
    %1598 = arith.maximumf %1597, %1596 : vector<1x128xf32>
    %cst_516 = arith.constant 1.000000e+00 : f32
    %1599 = vector.broadcast %cst_516 : f32 to vector<1x128xf32>
    %1600 = arith.addf %1591, %1599 : vector<1x128xf32>
    %1601 = math.absf %1600 : vector<1x128xf32>
    %cst_517 = arith.constant 1.000000e+00 : f32
    %1602 = vector.broadcast %cst_517 : f32 to vector<1x128xf32>
    %1603 = arith.subf %1602, %1601 : vector<1x128xf32>
    %cst_518 = arith.constant 0.000000e+00 : f32
    %1604 = vector.broadcast %cst_518 : f32 to vector<1x128xf32>
    %1605 = arith.maximumf %1604, %1603 : vector<1x128xf32>
    %cst_519 = arith.constant 2.000000e+00 : f32
    %1606 = vector.broadcast %cst_519 : f32 to vector<1x128xf32>
    %1607 = arith.addf %1591, %1606 : vector<1x128xf32>
    %1608 = math.absf %1607 : vector<1x128xf32>
    %cst_520 = arith.constant 1.000000e+00 : f32
    %1609 = vector.broadcast %cst_520 : f32 to vector<1x128xf32>
    %1610 = arith.subf %1609, %1608 : vector<1x128xf32>
    %cst_521 = arith.constant 0.000000e+00 : f32
    %1611 = vector.broadcast %cst_521 : f32 to vector<1x128xf32>
    %1612 = arith.maximumf %1611, %1610 : vector<1x128xf32>
    %cst_522 = arith.constant 3.000000e+00 : f32
    %1613 = vector.broadcast %cst_522 : f32 to vector<1x128xf32>
    %1614 = arith.addf %1591, %1613 : vector<1x128xf32>
    %1615 = math.absf %1614 : vector<1x128xf32>
    %cst_523 = arith.constant 1.000000e+00 : f32
    %1616 = vector.broadcast %cst_523 : f32 to vector<1x128xf32>
    %1617 = arith.subf %1616, %1615 : vector<1x128xf32>
    %cst_524 = arith.constant 0.000000e+00 : f32
    %1618 = vector.broadcast %cst_524 : f32 to vector<1x128xf32>
    %1619 = arith.maximumf %1618, %1617 : vector<1x128xf32>
    %1620 = vector.extract_strided_slice %1461 {offsets = [0, 0], sizes = [4, 128], strides = [1, 1]} : vector<16x128xf32> to vector<4x128xf32>
    %1621 = vector.broadcast %1598 : vector<1x128xf32> to vector<4x128xf32>
    %1622 = arith.mulf %1620, %1621 : vector<4x128xf32>
    %1623 = vector.extract_strided_slice %1461 {offsets = [4, 0], sizes = [4, 128], strides = [1, 1]} : vector<16x128xf32> to vector<4x128xf32>
    %1624 = vector.broadcast %1605 : vector<1x128xf32> to vector<4x128xf32>
    %1625 = arith.mulf %1623, %1624 : vector<4x128xf32>
    %1626 = arith.addf %1622, %1625 : vector<4x128xf32>
    %1627 = vector.extract_strided_slice %1461 {offsets = [8, 0], sizes = [4, 128], strides = [1, 1]} : vector<16x128xf32> to vector<4x128xf32>
    %1628 = vector.broadcast %1612 : vector<1x128xf32> to vector<4x128xf32>
    %1629 = arith.mulf %1627, %1628 : vector<4x128xf32>
    %1630 = arith.addf %1626, %1629 : vector<4x128xf32>
    %1631 = vector.extract_strided_slice %1461 {offsets = [12, 0], sizes = [4, 128], strides = [1, 1]} : vector<16x128xf32> to vector<4x128xf32>
    %1632 = vector.broadcast %1619 : vector<1x128xf32> to vector<4x128xf32>
    %1633 = arith.mulf %1631, %1632 : vector<4x128xf32>
    %1634 = arith.addf %1630, %1633 : vector<4x128xf32>
    %c3_525 = arith.constant 3 : index
    %c0_526 = arith.constant 0 : index
    %c0_527 = arith.constant 0 : index
    %1635 = vector.load %arg5[%c3_525, %c0_526, %c0_527] : memref<9x8x4xbf16, #tpu.memory_space<vmem>>, vector<1x8x4xbf16>
    %1636 = vector.shape_cast %1635 : vector<1x8x4xbf16> to vector<8x4xbf16>
    %1637 = arith.truncf %1634 : vector<4x128xf32> to vector<4x128xbf16>
    %cst_528 = arith.constant dense<0.000000e+00> : vector<8x128xf32>
    %1638 = tpu.matmul %1636, %1637, %cst_528 {dimension_numbers = #tpu.dot_dimension_numbers<[1], [0], [0], [1], [0, 0, 1, 1], [], []>} : vector<8x4xbf16>, vector<4x128xbf16>, vector<8x128xf32> -> vector<8x128xf32>
    %1639 = arith.addf %1585, %1638 : vector<8x128xf32>
    %1640 = vector.extract_strided_slice %1474 {offsets = [0, 0], sizes = [4, 128], strides = [1, 1]} : vector<16x128xf32> to vector<4x128xf32>
    %1641 = vector.broadcast %1598 : vector<1x128xf32> to vector<4x128xf32>
    %1642 = arith.mulf %1640, %1641 : vector<4x128xf32>
    %1643 = vector.extract_strided_slice %1474 {offsets = [4, 0], sizes = [4, 128], strides = [1, 1]} : vector<16x128xf32> to vector<4x128xf32>
    %1644 = vector.broadcast %1605 : vector<1x128xf32> to vector<4x128xf32>
    %1645 = arith.mulf %1643, %1644 : vector<4x128xf32>
    %1646 = arith.addf %1642, %1645 : vector<4x128xf32>
    %1647 = vector.extract_strided_slice %1474 {offsets = [8, 0], sizes = [4, 128], strides = [1, 1]} : vector<16x128xf32> to vector<4x128xf32>
    %1648 = vector.broadcast %1612 : vector<1x128xf32> to vector<4x128xf32>
    %1649 = arith.mulf %1647, %1648 : vector<4x128xf32>
    %1650 = arith.addf %1646, %1649 : vector<4x128xf32>
    %1651 = vector.extract_strided_slice %1474 {offsets = [12, 0], sizes = [4, 128], strides = [1, 1]} : vector<16x128xf32> to vector<4x128xf32>
    %1652 = vector.broadcast %1619 : vector<1x128xf32> to vector<4x128xf32>
    %1653 = arith.mulf %1651, %1652 : vector<4x128xf32>
    %1654 = arith.addf %1650, %1653 : vector<4x128xf32>
    %c4_529 = arith.constant 4 : index
    %c0_530 = arith.constant 0 : index
    %c0_531 = arith.constant 0 : index
    %1655 = vector.load %arg5[%c4_529, %c0_530, %c0_531] : memref<9x8x4xbf16, #tpu.memory_space<vmem>>, vector<1x8x4xbf16>
    %1656 = vector.shape_cast %1655 : vector<1x8x4xbf16> to vector<8x4xbf16>
    %1657 = arith.truncf %1654 : vector<4x128xf32> to vector<4x128xbf16>
    %cst_532 = arith.constant dense<0.000000e+00> : vector<8x128xf32>
    %1658 = tpu.matmul %1656, %1657, %cst_532 {dimension_numbers = #tpu.dot_dimension_numbers<[1], [0], [0], [1], [0, 0, 1, 1], [], []>} : vector<8x4xbf16>, vector<4x128xbf16>, vector<8x128xf32> -> vector<8x128xf32>
    %1659 = arith.addf %1639, %1658 : vector<8x128xf32>
    %1660 = vector.extract_strided_slice %1487 {offsets = [0, 0], sizes = [4, 128], strides = [1, 1]} : vector<16x128xf32> to vector<4x128xf32>
    %1661 = vector.broadcast %1598 : vector<1x128xf32> to vector<4x128xf32>
    %1662 = arith.mulf %1660, %1661 : vector<4x128xf32>
    %1663 = vector.extract_strided_slice %1487 {offsets = [4, 0], sizes = [4, 128], strides = [1, 1]} : vector<16x128xf32> to vector<4x128xf32>
    %1664 = vector.broadcast %1605 : vector<1x128xf32> to vector<4x128xf32>
    %1665 = arith.mulf %1663, %1664 : vector<4x128xf32>
    %1666 = arith.addf %1662, %1665 : vector<4x128xf32>
    %1667 = vector.extract_strided_slice %1487 {offsets = [8, 0], sizes = [4, 128], strides = [1, 1]} : vector<16x128xf32> to vector<4x128xf32>
    %1668 = vector.broadcast %1612 : vector<1x128xf32> to vector<4x128xf32>
    %1669 = arith.mulf %1667, %1668 : vector<4x128xf32>
    %1670 = arith.addf %1666, %1669 : vector<4x128xf32>
    %1671 = vector.extract_strided_slice %1487 {offsets = [12, 0], sizes = [4, 128], strides = [1, 1]} : vector<16x128xf32> to vector<4x128xf32>
    %1672 = vector.broadcast %1619 : vector<1x128xf32> to vector<4x128xf32>
    %1673 = arith.mulf %1671, %1672 : vector<4x128xf32>
    %1674 = arith.addf %1670, %1673 : vector<4x128xf32>
    %c5_533 = arith.constant 5 : index
    %c0_534 = arith.constant 0 : index
    %c0_535 = arith.constant 0 : index
    %1675 = vector.load %arg5[%c5_533, %c0_534, %c0_535] : memref<9x8x4xbf16, #tpu.memory_space<vmem>>, vector<1x8x4xbf16>
    %1676 = vector.shape_cast %1675 : vector<1x8x4xbf16> to vector<8x4xbf16>
    %1677 = arith.truncf %1674 : vector<4x128xf32> to vector<4x128xbf16>
    %cst_536 = arith.constant dense<0.000000e+00> : vector<8x128xf32>
    %1678 = tpu.matmul %1676, %1677, %cst_536 {dimension_numbers = #tpu.dot_dimension_numbers<[1], [0], [0], [1], [0, 0, 1, 1], [], []>} : vector<8x4xbf16>, vector<4x128xbf16>, vector<8x128xf32> -> vector<8x128xf32>
    %1679 = arith.addf %1659, %1678 : vector<8x128xf32>
    %cst_537 = arith.constant 2.000000e+00 : f32
    %1680 = vector.broadcast %cst_537 : f32 to vector<1x128xf32>
    %1681 = arith.mulf %1680, %1446 : vector<1x128xf32>
    %1682 = vector.broadcast %1489 : f32 to vector<1x128xf32>
    %1683 = arith.addf %1682, %1681 : vector<1x128xf32>
    %1684 = vector.broadcast %1490 : f32 to vector<1x128xf32>
    %1685 = arith.subf %1684, %1683 : vector<1x128xf32>
    %cst_538 = arith.constant 0.000000e+00 : f32
    %1686 = vector.broadcast %cst_538 : f32 to vector<1x128xf32>
    %1687 = arith.addf %1685, %1686 : vector<1x128xf32>
    %1688 = math.absf %1687 : vector<1x128xf32>
    %cst_539 = arith.constant 1.000000e+00 : f32
    %1689 = vector.broadcast %cst_539 : f32 to vector<1x128xf32>
    %1690 = arith.subf %1689, %1688 : vector<1x128xf32>
    %cst_540 = arith.constant 0.000000e+00 : f32
    %1691 = vector.broadcast %cst_540 : f32 to vector<1x128xf32>
    %1692 = arith.maximumf %1691, %1690 : vector<1x128xf32>
    %cst_541 = arith.constant 1.000000e+00 : f32
    %1693 = vector.broadcast %cst_541 : f32 to vector<1x128xf32>
    %1694 = arith.addf %1685, %1693 : vector<1x128xf32>
    %1695 = math.absf %1694 : vector<1x128xf32>
    %cst_542 = arith.constant 1.000000e+00 : f32
    %1696 = vector.broadcast %cst_542 : f32 to vector<1x128xf32>
    %1697 = arith.subf %1696, %1695 : vector<1x128xf32>
    %cst_543 = arith.constant 0.000000e+00 : f32
    %1698 = vector.broadcast %cst_543 : f32 to vector<1x128xf32>
    %1699 = arith.maximumf %1698, %1697 : vector<1x128xf32>
    %cst_544 = arith.constant 2.000000e+00 : f32
    %1700 = vector.broadcast %cst_544 : f32 to vector<1x128xf32>
    %1701 = arith.addf %1685, %1700 : vector<1x128xf32>
    %1702 = math.absf %1701 : vector<1x128xf32>
    %cst_545 = arith.constant 1.000000e+00 : f32
    %1703 = vector.broadcast %cst_545 : f32 to vector<1x128xf32>
    %1704 = arith.subf %1703, %1702 : vector<1x128xf32>
    %cst_546 = arith.constant 0.000000e+00 : f32
    %1705 = vector.broadcast %cst_546 : f32 to vector<1x128xf32>
    %1706 = arith.maximumf %1705, %1704 : vector<1x128xf32>
    %cst_547 = arith.constant 3.000000e+00 : f32
    %1707 = vector.broadcast %cst_547 : f32 to vector<1x128xf32>
    %1708 = arith.addf %1685, %1707 : vector<1x128xf32>
    %1709 = math.absf %1708 : vector<1x128xf32>
    %cst_548 = arith.constant 1.000000e+00 : f32
    %1710 = vector.broadcast %cst_548 : f32 to vector<1x128xf32>
    %1711 = arith.subf %1710, %1709 : vector<1x128xf32>
    %cst_549 = arith.constant 0.000000e+00 : f32
    %1712 = vector.broadcast %cst_549 : f32 to vector<1x128xf32>
    %1713 = arith.maximumf %1712, %1711 : vector<1x128xf32>
    %1714 = vector.extract_strided_slice %1461 {offsets = [0, 0], sizes = [4, 128], strides = [1, 1]} : vector<16x128xf32> to vector<4x128xf32>
    %1715 = vector.broadcast %1692 : vector<1x128xf32> to vector<4x128xf32>
    %1716 = arith.mulf %1714, %1715 : vector<4x128xf32>
    %1717 = vector.extract_strided_slice %1461 {offsets = [4, 0], sizes = [4, 128], strides = [1, 1]} : vector<16x128xf32> to vector<4x128xf32>
    %1718 = vector.broadcast %1699 : vector<1x128xf32> to vector<4x128xf32>
    %1719 = arith.mulf %1717, %1718 : vector<4x128xf32>
    %1720 = arith.addf %1716, %1719 : vector<4x128xf32>
    %1721 = vector.extract_strided_slice %1461 {offsets = [8, 0], sizes = [4, 128], strides = [1, 1]} : vector<16x128xf32> to vector<4x128xf32>
    %1722 = vector.broadcast %1706 : vector<1x128xf32> to vector<4x128xf32>
    %1723 = arith.mulf %1721, %1722 : vector<4x128xf32>
    %1724 = arith.addf %1720, %1723 : vector<4x128xf32>
    %1725 = vector.extract_strided_slice %1461 {offsets = [12, 0], sizes = [4, 128], strides = [1, 1]} : vector<16x128xf32> to vector<4x128xf32>
    %1726 = vector.broadcast %1713 : vector<1x128xf32> to vector<4x128xf32>
    %1727 = arith.mulf %1725, %1726 : vector<4x128xf32>
    %1728 = arith.addf %1724, %1727 : vector<4x128xf32>
    %c6_550 = arith.constant 6 : index
    %c0_551 = arith.constant 0 : index
    %c0_552 = arith.constant 0 : index
    %1729 = vector.load %arg5[%c6_550, %c0_551, %c0_552] : memref<9x8x4xbf16, #tpu.memory_space<vmem>>, vector<1x8x4xbf16>
    %1730 = vector.shape_cast %1729 : vector<1x8x4xbf16> to vector<8x4xbf16>
    %1731 = arith.truncf %1728 : vector<4x128xf32> to vector<4x128xbf16>
    %cst_553 = arith.constant dense<0.000000e+00> : vector<8x128xf32>
    %1732 = tpu.matmul %1730, %1731, %cst_553 {dimension_numbers = #tpu.dot_dimension_numbers<[1], [0], [0], [1], [0, 0, 1, 1], [], []>} : vector<8x4xbf16>, vector<4x128xbf16>, vector<8x128xf32> -> vector<8x128xf32>
    %1733 = arith.addf %1679, %1732 : vector<8x128xf32>
    %1734 = vector.extract_strided_slice %1474 {offsets = [0, 0], sizes = [4, 128], strides = [1, 1]} : vector<16x128xf32> to vector<4x128xf32>
    %1735 = vector.broadcast %1692 : vector<1x128xf32> to vector<4x128xf32>
    %1736 = arith.mulf %1734, %1735 : vector<4x128xf32>
    %1737 = vector.extract_strided_slice %1474 {offsets = [4, 0], sizes = [4, 128], strides = [1, 1]} : vector<16x128xf32> to vector<4x128xf32>
    %1738 = vector.broadcast %1699 : vector<1x128xf32> to vector<4x128xf32>
    %1739 = arith.mulf %1737, %1738 : vector<4x128xf32>
    %1740 = arith.addf %1736, %1739 : vector<4x128xf32>
    %1741 = vector.extract_strided_slice %1474 {offsets = [8, 0], sizes = [4, 128], strides = [1, 1]} : vector<16x128xf32> to vector<4x128xf32>
    %1742 = vector.broadcast %1706 : vector<1x128xf32> to vector<4x128xf32>
    %1743 = arith.mulf %1741, %1742 : vector<4x128xf32>
    %1744 = arith.addf %1740, %1743 : vector<4x128xf32>
    %1745 = vector.extract_strided_slice %1474 {offsets = [12, 0], sizes = [4, 128], strides = [1, 1]} : vector<16x128xf32> to vector<4x128xf32>
    %1746 = vector.broadcast %1713 : vector<1x128xf32> to vector<4x128xf32>
    %1747 = arith.mulf %1745, %1746 : vector<4x128xf32>
    %1748 = arith.addf %1744, %1747 : vector<4x128xf32>
    %c7_554 = arith.constant 7 : index
    %c0_555 = arith.constant 0 : index
    %c0_556 = arith.constant 0 : index
    %1749 = vector.load %arg5[%c7_554, %c0_555, %c0_556] : memref<9x8x4xbf16, #tpu.memory_space<vmem>>, vector<1x8x4xbf16>
    %1750 = vector.shape_cast %1749 : vector<1x8x4xbf16> to vector<8x4xbf16>
    %1751 = arith.truncf %1748 : vector<4x128xf32> to vector<4x128xbf16>
    %cst_557 = arith.constant dense<0.000000e+00> : vector<8x128xf32>
    %1752 = tpu.matmul %1750, %1751, %cst_557 {dimension_numbers = #tpu.dot_dimension_numbers<[1], [0], [0], [1], [0, 0, 1, 1], [], []>} : vector<8x4xbf16>, vector<4x128xbf16>, vector<8x128xf32> -> vector<8x128xf32>
    %1753 = arith.addf %1733, %1752 : vector<8x128xf32>
    %1754 = vector.extract_strided_slice %1487 {offsets = [0, 0], sizes = [4, 128], strides = [1, 1]} : vector<16x128xf32> to vector<4x128xf32>
    %1755 = vector.broadcast %1692 : vector<1x128xf32> to vector<4x128xf32>
    %1756 = arith.mulf %1754, %1755 : vector<4x128xf32>
    %1757 = vector.extract_strided_slice %1487 {offsets = [4, 0], sizes = [4, 128], strides = [1, 1]} : vector<16x128xf32> to vector<4x128xf32>
    %1758 = vector.broadcast %1699 : vector<1x128xf32> to vector<4x128xf32>
    %1759 = arith.mulf %1757, %1758 : vector<4x128xf32>
    %1760 = arith.addf %1756, %1759 : vector<4x128xf32>
    %1761 = vector.extract_strided_slice %1487 {offsets = [8, 0], sizes = [4, 128], strides = [1, 1]} : vector<16x128xf32> to vector<4x128xf32>
    %1762 = vector.broadcast %1706 : vector<1x128xf32> to vector<4x128xf32>
    %1763 = arith.mulf %1761, %1762 : vector<4x128xf32>
    %1764 = arith.addf %1760, %1763 : vector<4x128xf32>
    %1765 = vector.extract_strided_slice %1487 {offsets = [12, 0], sizes = [4, 128], strides = [1, 1]} : vector<16x128xf32> to vector<4x128xf32>
    %1766 = vector.broadcast %1713 : vector<1x128xf32> to vector<4x128xf32>
    %1767 = arith.mulf %1765, %1766 : vector<4x128xf32>
    %1768 = arith.addf %1764, %1767 : vector<4x128xf32>
    %c8_558 = arith.constant 8 : index
    %c0_559 = arith.constant 0 : index
    %c0_560 = arith.constant 0 : index
    %1769 = vector.load %arg5[%c8_558, %c0_559, %c0_560] : memref<9x8x4xbf16, #tpu.memory_space<vmem>>, vector<1x8x4xbf16>
    %1770 = vector.shape_cast %1769 : vector<1x8x4xbf16> to vector<8x4xbf16>
    %1771 = arith.truncf %1768 : vector<4x128xf32> to vector<4x128xbf16>
    %cst_561 = arith.constant dense<0.000000e+00> : vector<8x128xf32>
    %1772 = tpu.matmul %1770, %1771, %cst_561 {dimension_numbers = #tpu.dot_dimension_numbers<[1], [0], [0], [1], [0, 0, 1, 1], [], []>} : vector<8x4xbf16>, vector<4x128xbf16>, vector<8x128xf32> -> vector<8x128xf32>
    %1773 = arith.addf %1753, %1772 : vector<8x128xf32>
    %1774 = vector.broadcast %8 : vector<8x1xf32> to vector<8x128xf32>
    %1775 = arith.addf %1773, %1774 : vector<8x128xf32>
    %c0_562 = arith.constant 0 : index
    %c0_563 = arith.constant 0 : index
    %c4_564 = arith.constant 4 : index
    %c0_565 = arith.constant 0 : index
    %1776 = vector.load %arg7[%c0_562, %c0_563, %c4_564, %c0_565] : memref<1x8x8x128xf32, #tpu.memory_space<vmem>>, vector<1x8x1x128xf32>
    %1777 = vector.shape_cast %1776 : vector<1x8x1x128xf32> to vector<8x128xf32>
    %1778 = vector.shape_cast %1775 : vector<8x128xf32> to vector<1x8x1x128xf32>
    tpu.vector_store %arg7[%c0_562, %c0_563, %c4_564, %c0_565], %1778 {strides = array<i32>} : memref<1x8x8x128xf32, #tpu.memory_space<vmem>>, vector<1x8x1x128xf32>,
    %c5_i32 = arith.constant 5 : i32
    %1779 = arith.addi %0, %c5_i32 : i32
    %c1_i32_566 = arith.constant 1 : i32
    %1780 = arith.muli %1779, %c1_i32_566 : i32
    %c0_i32_567 = arith.constant 0 : i32
    %c14_i32_568 = arith.constant 14 : i32
    %1781 = arith.maxsi %c0_i32_567, %1780 : i32
    %1782 = arith.minsi %c14_i32_568, %1781 : i32
    %c0_i32_569 = arith.constant 0 : i32
    %1783 = arith.addi %1782, %c0_i32_569 : i32
    %c0_570 = arith.constant 0 : index
    %1784 = arith.index_cast %1783 : i32 to index
    %c0_571 = arith.constant 0 : index
    %c0_572 = arith.constant 0 : index
    %1785 = vector.load %arg3[%c0_570, %1784, %c0_571, %c0_572] : memref<1x18x4x18xbf16, #tpu.memory_space<vmem>>, vector<1x1x4x18xbf16>
    %1786 = vector.shape_cast %1785 : vector<1x1x4x18xbf16> to vector<4x18xbf16>
    %c1_i32_573 = arith.constant 1 : i32
    %1787 = arith.addi %1782, %c1_i32_573 : i32
    %c0_574 = arith.constant 0 : index
    %1788 = arith.index_cast %1787 : i32 to index
    %c0_575 = arith.constant 0 : index
    %c0_576 = arith.constant 0 : index
    %1789 = vector.load %arg3[%c0_574, %1788, %c0_575, %c0_576] : memref<1x18x4x18xbf16, #tpu.memory_space<vmem>>, vector<1x1x4x18xbf16>
    %1790 = vector.shape_cast %1789 : vector<1x1x4x18xbf16> to vector<4x18xbf16>
    %c2_i32_577 = arith.constant 2 : i32
    %1791 = arith.addi %1782, %c2_i32_577 : i32
    %c0_578 = arith.constant 0 : index
    %1792 = arith.index_cast %1791 : i32 to index
    %c0_579 = arith.constant 0 : index
    %c0_580 = arith.constant 0 : index
    %1793 = vector.load %arg3[%c0_578, %1792, %c0_579, %c0_580] : memref<1x18x4x18xbf16, #tpu.memory_space<vmem>>, vector<1x1x4x18xbf16>
    %1794 = vector.shape_cast %1793 : vector<1x1x4x18xbf16> to vector<4x18xbf16>
    %c3_i32_581 = arith.constant 3 : i32
    %1795 = arith.addi %1782, %c3_i32_581 : i32
    %c0_582 = arith.constant 0 : index
    %1796 = arith.index_cast %1795 : i32 to index
    %c0_583 = arith.constant 0 : index
    %c0_584 = arith.constant 0 : index
    %1797 = vector.load %arg3[%c0_582, %1796, %c0_583, %c0_584] : memref<1x18x4x18xbf16, #tpu.memory_space<vmem>>, vector<1x1x4x18xbf16>
    %1798 = vector.shape_cast %1797 : vector<1x1x4x18xbf16> to vector<4x18xbf16>
    %1799 = tpu.concatenate %1786, %1790, %1794, %1798 in 0 : vector<4x18xbf16>, vector<4x18xbf16>, vector<4x18xbf16>, vector<4x18xbf16> -> vector<16x18xbf16>
    %c5_585 = arith.constant 5 : index
    %c0_586 = arith.constant 0 : index
    %1800 = vector.load %arg4[%c5_585, %c0_586] : memref<8x128xf32, #tpu.memory_space<vmem>>, vector<1x128xf32>
    %cst_587 = arith.constant 1.000000e+00 : f32
    %1801 = vector.broadcast %cst_587 : f32 to vector<1x128xf32>
    %1802 = arith.mulf %5, %1801 : vector<1x128xf32>
    %cst_588 = arith.constant 0.000000e+00 : f32
    %1803 = vector.broadcast %cst_588 : f32 to vector<1x128xf32>
    %1804 = arith.mulf %1803, %1800 : vector<1x128xf32>
    %1805 = arith.addf %1802, %1804 : vector<1x128xf32>
    %1806 = vector.broadcast %7 : vector<18x1xf32> to vector<18x128xf32>
    %1807 = vector.broadcast %1805 : vector<1x128xf32> to vector<18x128xf32>
    %1808 = arith.subf %1806, %1807 : vector<18x128xf32>
    %1809 = math.absf %1808 : vector<18x128xf32>
    %cst_589 = arith.constant 1.000000e+00 : f32
    %1810 = vector.broadcast %cst_589 : f32 to vector<18x128xf32>
    %1811 = arith.subf %1810, %1809 : vector<18x128xf32>
    %cst_590 = arith.constant 0.000000e+00 : f32
    %1812 = vector.broadcast %cst_590 : f32 to vector<18x128xf32>
    %1813 = arith.maximumf %1812, %1811 : vector<18x128xf32>
    %1814 = arith.truncf %1813 : vector<18x128xf32> to vector<18x128xbf16>
    %cst_591 = arith.constant dense<0.000000e+00> : vector<16x128xf32>
    %1815 = tpu.matmul %1799, %1814, %cst_591 {dimension_numbers = #tpu.dot_dimension_numbers<[1], [0], [0], [1], [0, 0, 1, 1], [], []>} : vector<16x18xbf16>, vector<18x128xbf16>, vector<16x128xf32> -> vector<16x128xf32>
    %cst_592 = arith.constant 1.000000e+00 : f32
    %1816 = vector.broadcast %cst_592 : f32 to vector<1x128xf32>
    %1817 = arith.mulf %1816, %1800 : vector<1x128xf32>
    %1818 = arith.addf %1802, %1817 : vector<1x128xf32>
    %1819 = vector.broadcast %7 : vector<18x1xf32> to vector<18x128xf32>
    %1820 = vector.broadcast %1818 : vector<1x128xf32> to vector<18x128xf32>
    %1821 = arith.subf %1819, %1820 : vector<18x128xf32>
    %1822 = math.absf %1821 : vector<18x128xf32>
    %cst_593 = arith.constant 1.000000e+00 : f32
    %1823 = vector.broadcast %cst_593 : f32 to vector<18x128xf32>
    %1824 = arith.subf %1823, %1822 : vector<18x128xf32>
    %cst_594 = arith.constant 0.000000e+00 : f32
    %1825 = vector.broadcast %cst_594 : f32 to vector<18x128xf32>
    %1826 = arith.maximumf %1825, %1824 : vector<18x128xf32>
    %1827 = arith.truncf %1826 : vector<18x128xf32> to vector<18x128xbf16>
    %cst_595 = arith.constant dense<0.000000e+00> : vector<16x128xf32>
    %1828 = tpu.matmul %1799, %1827, %cst_595 {dimension_numbers = #tpu.dot_dimension_numbers<[1], [0], [0], [1], [0, 0, 1, 1], [], []>} : vector<16x18xbf16>, vector<18x128xbf16>, vector<16x128xf32> -> vector<16x128xf32>
    %cst_596 = arith.constant 2.000000e+00 : f32
    %1829 = vector.broadcast %cst_596 : f32 to vector<1x128xf32>
    %1830 = arith.mulf %1829, %1800 : vector<1x128xf32>
    %1831 = arith.addf %1802, %1830 : vector<1x128xf32>
    %1832 = vector.broadcast %7 : vector<18x1xf32> to vector<18x128xf32>
    %1833 = vector.broadcast %1831 : vector<1x128xf32> to vector<18x128xf32>
    %1834 = arith.subf %1832, %1833 : vector<18x128xf32>
    %1835 = math.absf %1834 : vector<18x128xf32>
    %cst_597 = arith.constant 1.000000e+00 : f32
    %1836 = vector.broadcast %cst_597 : f32 to vector<18x128xf32>
    %1837 = arith.subf %1836, %1835 : vector<18x128xf32>
    %cst_598 = arith.constant 0.000000e+00 : f32
    %1838 = vector.broadcast %cst_598 : f32 to vector<18x128xf32>
    %1839 = arith.maximumf %1838, %1837 : vector<18x128xf32>
    %1840 = arith.truncf %1839 : vector<18x128xf32> to vector<18x128xbf16>
    %cst_599 = arith.constant dense<0.000000e+00> : vector<16x128xf32>
    %1841 = tpu.matmul %1799, %1840, %cst_599 {dimension_numbers = #tpu.dot_dimension_numbers<[1], [0], [0], [1], [0, 0, 1, 1], [], []>} : vector<16x18xbf16>, vector<18x128xbf16>, vector<16x128xf32> -> vector<16x128xf32>
    %c1_i32_600 = arith.constant 1 : i32
    %1842 = arith.muli %1779, %c1_i32_600 : i32
    %1843 = arith.sitofp %1842 : i32 to f32
    %1844 = arith.sitofp %1782 : i32 to f32
    %cst_601 = arith.constant 0.000000e+00 : f32
    %1845 = vector.broadcast %cst_601 : f32 to vector<8x128xf32>
    %cst_602 = arith.constant 0.000000e+00 : f32
    %1846 = vector.broadcast %cst_602 : f32 to vector<1x128xf32>
    %1847 = arith.mulf %1846, %1800 : vector<1x128xf32>
    %1848 = vector.broadcast %1843 : f32 to vector<1x128xf32>
    %1849 = arith.addf %1848, %1847 : vector<1x128xf32>
    %1850 = vector.broadcast %1844 : f32 to vector<1x128xf32>
    %1851 = arith.subf %1850, %1849 : vector<1x128xf32>
    %cst_603 = arith.constant 0.000000e+00 : f32
    %1852 = vector.broadcast %cst_603 : f32 to vector<1x128xf32>
    %1853 = arith.addf %1851, %1852 : vector<1x128xf32>
    %1854 = math.absf %1853 : vector<1x128xf32>
    %cst_604 = arith.constant 1.000000e+00 : f32
    %1855 = vector.broadcast %cst_604 : f32 to vector<1x128xf32>
    %1856 = arith.subf %1855, %1854 : vector<1x128xf32>
    %cst_605 = arith.constant 0.000000e+00 : f32
    %1857 = vector.broadcast %cst_605 : f32 to vector<1x128xf32>
    %1858 = arith.maximumf %1857, %1856 : vector<1x128xf32>
    %cst_606 = arith.constant 1.000000e+00 : f32
    %1859 = vector.broadcast %cst_606 : f32 to vector<1x128xf32>
    %1860 = arith.addf %1851, %1859 : vector<1x128xf32>
    %1861 = math.absf %1860 : vector<1x128xf32>
    %cst_607 = arith.constant 1.000000e+00 : f32
    %1862 = vector.broadcast %cst_607 : f32 to vector<1x128xf32>
    %1863 = arith.subf %1862, %1861 : vector<1x128xf32>
    %cst_608 = arith.constant 0.000000e+00 : f32
    %1864 = vector.broadcast %cst_608 : f32 to vector<1x128xf32>
    %1865 = arith.maximumf %1864, %1863 : vector<1x128xf32>
    %cst_609 = arith.constant 2.000000e+00 : f32
    %1866 = vector.broadcast %cst_609 : f32 to vector<1x128xf32>
    %1867 = arith.addf %1851, %1866 : vector<1x128xf32>
    %1868 = math.absf %1867 : vector<1x128xf32>
    %cst_610 = arith.constant 1.000000e+00 : f32
    %1869 = vector.broadcast %cst_610 : f32 to vector<1x128xf32>
    %1870 = arith.subf %1869, %1868 : vector<1x128xf32>
    %cst_611 = arith.constant 0.000000e+00 : f32
    %1871 = vector.broadcast %cst_611 : f32 to vector<1x128xf32>
    %1872 = arith.maximumf %1871, %1870 : vector<1x128xf32>
    %cst_612 = arith.constant 3.000000e+00 : f32
    %1873 = vector.broadcast %cst_612 : f32 to vector<1x128xf32>
    %1874 = arith.addf %1851, %1873 : vector<1x128xf32>
    %1875 = math.absf %1874 : vector<1x128xf32>
    %cst_613 = arith.constant 1.000000e+00 : f32
    %1876 = vector.broadcast %cst_613 : f32 to vector<1x128xf32>
    %1877 = arith.subf %1876, %1875 : vector<1x128xf32>
    %cst_614 = arith.constant 0.000000e+00 : f32
    %1878 = vector.broadcast %cst_614 : f32 to vector<1x128xf32>
    %1879 = arith.maximumf %1878, %1877 : vector<1x128xf32>
    %1880 = vector.extract_strided_slice %1815 {offsets = [0, 0], sizes = [4, 128], strides = [1, 1]} : vector<16x128xf32> to vector<4x128xf32>
    %1881 = vector.broadcast %1858 : vector<1x128xf32> to vector<4x128xf32>
    %1882 = arith.mulf %1880, %1881 : vector<4x128xf32>
    %1883 = vector.extract_strided_slice %1815 {offsets = [4, 0], sizes = [4, 128], strides = [1, 1]} : vector<16x128xf32> to vector<4x128xf32>
    %1884 = vector.broadcast %1865 : vector<1x128xf32> to vector<4x128xf32>
    %1885 = arith.mulf %1883, %1884 : vector<4x128xf32>
    %1886 = arith.addf %1882, %1885 : vector<4x128xf32>
    %1887 = vector.extract_strided_slice %1815 {offsets = [8, 0], sizes = [4, 128], strides = [1, 1]} : vector<16x128xf32> to vector<4x128xf32>
    %1888 = vector.broadcast %1872 : vector<1x128xf32> to vector<4x128xf32>
    %1889 = arith.mulf %1887, %1888 : vector<4x128xf32>
    %1890 = arith.addf %1886, %1889 : vector<4x128xf32>
    %1891 = vector.extract_strided_slice %1815 {offsets = [12, 0], sizes = [4, 128], strides = [1, 1]} : vector<16x128xf32> to vector<4x128xf32>
    %1892 = vector.broadcast %1879 : vector<1x128xf32> to vector<4x128xf32>
    %1893 = arith.mulf %1891, %1892 : vector<4x128xf32>
    %1894 = arith.addf %1890, %1893 : vector<4x128xf32>
    %c0_615 = arith.constant 0 : index
    %c0_616 = arith.constant 0 : index
    %c0_617 = arith.constant 0 : index
    %1895 = vector.load %arg5[%c0_615, %c0_616, %c0_617] : memref<9x8x4xbf16, #tpu.memory_space<vmem>>, vector<1x8x4xbf16>
    %1896 = vector.shape_cast %1895 : vector<1x8x4xbf16> to vector<8x4xbf16>
    %1897 = arith.truncf %1894 : vector<4x128xf32> to vector<4x128xbf16>
    %cst_618 = arith.constant dense<0.000000e+00> : vector<8x128xf32>
    %1898 = tpu.matmul %1896, %1897, %cst_618 {dimension_numbers = #tpu.dot_dimension_numbers<[1], [0], [0], [1], [0, 0, 1, 1], [], []>} : vector<8x4xbf16>, vector<4x128xbf16>, vector<8x128xf32> -> vector<8x128xf32>
    %1899 = arith.addf %1845, %1898 : vector<8x128xf32>
    %1900 = vector.extract_strided_slice %1828 {offsets = [0, 0], sizes = [4, 128], strides = [1, 1]} : vector<16x128xf32> to vector<4x128xf32>
    %1901 = vector.broadcast %1858 : vector<1x128xf32> to vector<4x128xf32>
    %1902 = arith.mulf %1900, %1901 : vector<4x128xf32>
    %1903 = vector.extract_strided_slice %1828 {offsets = [4, 0], sizes = [4, 128], strides = [1, 1]} : vector<16x128xf32> to vector<4x128xf32>
    %1904 = vector.broadcast %1865 : vector<1x128xf32> to vector<4x128xf32>
    %1905 = arith.mulf %1903, %1904 : vector<4x128xf32>
    %1906 = arith.addf %1902, %1905 : vector<4x128xf32>
    %1907 = vector.extract_strided_slice %1828 {offsets = [8, 0], sizes = [4, 128], strides = [1, 1]} : vector<16x128xf32> to vector<4x128xf32>
    %1908 = vector.broadcast %1872 : vector<1x128xf32> to vector<4x128xf32>
    %1909 = arith.mulf %1907, %1908 : vector<4x128xf32>
    %1910 = arith.addf %1906, %1909 : vector<4x128xf32>
    %1911 = vector.extract_strided_slice %1828 {offsets = [12, 0], sizes = [4, 128], strides = [1, 1]} : vector<16x128xf32> to vector<4x128xf32>
    %1912 = vector.broadcast %1879 : vector<1x128xf32> to vector<4x128xf32>
    %1913 = arith.mulf %1911, %1912 : vector<4x128xf32>
    %1914 = arith.addf %1910, %1913 : vector<4x128xf32>
    %c1_619 = arith.constant 1 : index
    %c0_620 = arith.constant 0 : index
    %c0_621 = arith.constant 0 : index
    %1915 = vector.load %arg5[%c1_619, %c0_620, %c0_621] : memref<9x8x4xbf16, #tpu.memory_space<vmem>>, vector<1x8x4xbf16>
    %1916 = vector.shape_cast %1915 : vector<1x8x4xbf16> to vector<8x4xbf16>
    %1917 = arith.truncf %1914 : vector<4x128xf32> to vector<4x128xbf16>
    %cst_622 = arith.constant dense<0.000000e+00> : vector<8x128xf32>
    %1918 = tpu.matmul %1916, %1917, %cst_622 {dimension_numbers = #tpu.dot_dimension_numbers<[1], [0], [0], [1], [0, 0, 1, 1], [], []>} : vector<8x4xbf16>, vector<4x128xbf16>, vector<8x128xf32> -> vector<8x128xf32>
    %1919 = arith.addf %1899, %1918 : vector<8x128xf32>
    %1920 = vector.extract_strided_slice %1841 {offsets = [0, 0], sizes = [4, 128], strides = [1, 1]} : vector<16x128xf32> to vector<4x128xf32>
    %1921 = vector.broadcast %1858 : vector<1x128xf32> to vector<4x128xf32>
    %1922 = arith.mulf %1920, %1921 : vector<4x128xf32>
    %1923 = vector.extract_strided_slice %1841 {offsets = [4, 0], sizes = [4, 128], strides = [1, 1]} : vector<16x128xf32> to vector<4x128xf32>
    %1924 = vector.broadcast %1865 : vector<1x128xf32> to vector<4x128xf32>
    %1925 = arith.mulf %1923, %1924 : vector<4x128xf32>
    %1926 = arith.addf %1922, %1925 : vector<4x128xf32>
    %1927 = vector.extract_strided_slice %1841 {offsets = [8, 0], sizes = [4, 128], strides = [1, 1]} : vector<16x128xf32> to vector<4x128xf32>
    %1928 = vector.broadcast %1872 : vector<1x128xf32> to vector<4x128xf32>
    %1929 = arith.mulf %1927, %1928 : vector<4x128xf32>
    %1930 = arith.addf %1926, %1929 : vector<4x128xf32>
    %1931 = vector.extract_strided_slice %1841 {offsets = [12, 0], sizes = [4, 128], strides = [1, 1]} : vector<16x128xf32> to vector<4x128xf32>
    %1932 = vector.broadcast %1879 : vector<1x128xf32> to vector<4x128xf32>
    %1933 = arith.mulf %1931, %1932 : vector<4x128xf32>
    %1934 = arith.addf %1930, %1933 : vector<4x128xf32>
    %c2_623 = arith.constant 2 : index
    %c0_624 = arith.constant 0 : index
    %c0_625 = arith.constant 0 : index
    %1935 = vector.load %arg5[%c2_623, %c0_624, %c0_625] : memref<9x8x4xbf16, #tpu.memory_space<vmem>>, vector<1x8x4xbf16>
    %1936 = vector.shape_cast %1935 : vector<1x8x4xbf16> to vector<8x4xbf16>
    %1937 = arith.truncf %1934 : vector<4x128xf32> to vector<4x128xbf16>
    %cst_626 = arith.constant dense<0.000000e+00> : vector<8x128xf32>
    %1938 = tpu.matmul %1936, %1937, %cst_626 {dimension_numbers = #tpu.dot_dimension_numbers<[1], [0], [0], [1], [0, 0, 1, 1], [], []>} : vector<8x4xbf16>, vector<4x128xbf16>, vector<8x128xf32> -> vector<8x128xf32>
    %1939 = arith.addf %1919, %1938 : vector<8x128xf32>
    %cst_627 = arith.constant 1.000000e+00 : f32
    %1940 = vector.broadcast %cst_627 : f32 to vector<1x128xf32>
    %1941 = arith.mulf %1940, %1800 : vector<1x128xf32>
    %1942 = vector.broadcast %1843 : f32 to vector<1x128xf32>
    %1943 = arith.addf %1942, %1941 : vector<1x128xf32>
    %1944 = vector.broadcast %1844 : f32 to vector<1x128xf32>
    %1945 = arith.subf %1944, %1943 : vector<1x128xf32>
    %cst_628 = arith.constant 0.000000e+00 : f32
    %1946 = vector.broadcast %cst_628 : f32 to vector<1x128xf32>
    %1947 = arith.addf %1945, %1946 : vector<1x128xf32>
    %1948 = math.absf %1947 : vector<1x128xf32>
    %cst_629 = arith.constant 1.000000e+00 : f32
    %1949 = vector.broadcast %cst_629 : f32 to vector<1x128xf32>
    %1950 = arith.subf %1949, %1948 : vector<1x128xf32>
    %cst_630 = arith.constant 0.000000e+00 : f32
    %1951 = vector.broadcast %cst_630 : f32 to vector<1x128xf32>
    %1952 = arith.maximumf %1951, %1950 : vector<1x128xf32>
    %cst_631 = arith.constant 1.000000e+00 : f32
    %1953 = vector.broadcast %cst_631 : f32 to vector<1x128xf32>
    %1954 = arith.addf %1945, %1953 : vector<1x128xf32>
    %1955 = math.absf %1954 : vector<1x128xf32>
    %cst_632 = arith.constant 1.000000e+00 : f32
    %1956 = vector.broadcast %cst_632 : f32 to vector<1x128xf32>
    %1957 = arith.subf %1956, %1955 : vector<1x128xf32>
    %cst_633 = arith.constant 0.000000e+00 : f32
    %1958 = vector.broadcast %cst_633 : f32 to vector<1x128xf32>
    %1959 = arith.maximumf %1958, %1957 : vector<1x128xf32>
    %cst_634 = arith.constant 2.000000e+00 : f32
    %1960 = vector.broadcast %cst_634 : f32 to vector<1x128xf32>
    %1961 = arith.addf %1945, %1960 : vector<1x128xf32>
    %1962 = math.absf %1961 : vector<1x128xf32>
    %cst_635 = arith.constant 1.000000e+00 : f32
    %1963 = vector.broadcast %cst_635 : f32 to vector<1x128xf32>
    %1964 = arith.subf %1963, %1962 : vector<1x128xf32>
    %cst_636 = arith.constant 0.000000e+00 : f32
    %1965 = vector.broadcast %cst_636 : f32 to vector<1x128xf32>
    %1966 = arith.maximumf %1965, %1964 : vector<1x128xf32>
    %cst_637 = arith.constant 3.000000e+00 : f32
    %1967 = vector.broadcast %cst_637 : f32 to vector<1x128xf32>
    %1968 = arith.addf %1945, %1967 : vector<1x128xf32>
    %1969 = math.absf %1968 : vector<1x128xf32>
    %cst_638 = arith.constant 1.000000e+00 : f32
    %1970 = vector.broadcast %cst_638 : f32 to vector<1x128xf32>
    %1971 = arith.subf %1970, %1969 : vector<1x128xf32>
    %cst_639 = arith.constant 0.000000e+00 : f32
    %1972 = vector.broadcast %cst_639 : f32 to vector<1x128xf32>
    %1973 = arith.maximumf %1972, %1971 : vector<1x128xf32>
    %1974 = vector.extract_strided_slice %1815 {offsets = [0, 0], sizes = [4, 128], strides = [1, 1]} : vector<16x128xf32> to vector<4x128xf32>
    %1975 = vector.broadcast %1952 : vector<1x128xf32> to vector<4x128xf32>
    %1976 = arith.mulf %1974, %1975 : vector<4x128xf32>
    %1977 = vector.extract_strided_slice %1815 {offsets = [4, 0], sizes = [4, 128], strides = [1, 1]} : vector<16x128xf32> to vector<4x128xf32>
    %1978 = vector.broadcast %1959 : vector<1x128xf32> to vector<4x128xf32>
    %1979 = arith.mulf %1977, %1978 : vector<4x128xf32>
    %1980 = arith.addf %1976, %1979 : vector<4x128xf32>
    %1981 = vector.extract_strided_slice %1815 {offsets = [8, 0], sizes = [4, 128], strides = [1, 1]} : vector<16x128xf32> to vector<4x128xf32>
    %1982 = vector.broadcast %1966 : vector<1x128xf32> to vector<4x128xf32>
    %1983 = arith.mulf %1981, %1982 : vector<4x128xf32>
    %1984 = arith.addf %1980, %1983 : vector<4x128xf32>
    %1985 = vector.extract_strided_slice %1815 {offsets = [12, 0], sizes = [4, 128], strides = [1, 1]} : vector<16x128xf32> to vector<4x128xf32>
    %1986 = vector.broadcast %1973 : vector<1x128xf32> to vector<4x128xf32>
    %1987 = arith.mulf %1985, %1986 : vector<4x128xf32>
    %1988 = arith.addf %1984, %1987 : vector<4x128xf32>
    %c3_640 = arith.constant 3 : index
    %c0_641 = arith.constant 0 : index
    %c0_642 = arith.constant 0 : index
    %1989 = vector.load %arg5[%c3_640, %c0_641, %c0_642] : memref<9x8x4xbf16, #tpu.memory_space<vmem>>, vector<1x8x4xbf16>
    %1990 = vector.shape_cast %1989 : vector<1x8x4xbf16> to vector<8x4xbf16>
    %1991 = arith.truncf %1988 : vector<4x128xf32> to vector<4x128xbf16>
    %cst_643 = arith.constant dense<0.000000e+00> : vector<8x128xf32>
    %1992 = tpu.matmul %1990, %1991, %cst_643 {dimension_numbers = #tpu.dot_dimension_numbers<[1], [0], [0], [1], [0, 0, 1, 1], [], []>} : vector<8x4xbf16>, vector<4x128xbf16>, vector<8x128xf32> -> vector<8x128xf32>
    %1993 = arith.addf %1939, %1992 : vector<8x128xf32>
    %1994 = vector.extract_strided_slice %1828 {offsets = [0, 0], sizes = [4, 128], strides = [1, 1]} : vector<16x128xf32> to vector<4x128xf32>
    %1995 = vector.broadcast %1952 : vector<1x128xf32> to vector<4x128xf32>
    %1996 = arith.mulf %1994, %1995 : vector<4x128xf32>
    %1997 = vector.extract_strided_slice %1828 {offsets = [4, 0], sizes = [4, 128], strides = [1, 1]} : vector<16x128xf32> to vector<4x128xf32>
    %1998 = vector.broadcast %1959 : vector<1x128xf32> to vector<4x128xf32>
    %1999 = arith.mulf %1997, %1998 : vector<4x128xf32>
    %2000 = arith.addf %1996, %1999 : vector<4x128xf32>
    %2001 = vector.extract_strided_slice %1828 {offsets = [8, 0], sizes = [4, 128], strides = [1, 1]} : vector<16x128xf32> to vector<4x128xf32>
    %2002 = vector.broadcast %1966 : vector<1x128xf32> to vector<4x128xf32>
    %2003 = arith.mulf %2001, %2002 : vector<4x128xf32>
    %2004 = arith.addf %2000, %2003 : vector<4x128xf32>
    %2005 = vector.extract_strided_slice %1828 {offsets = [12, 0], sizes = [4, 128], strides = [1, 1]} : vector<16x128xf32> to vector<4x128xf32>
    %2006 = vector.broadcast %1973 : vector<1x128xf32> to vector<4x128xf32>
    %2007 = arith.mulf %2005, %2006 : vector<4x128xf32>
    %2008 = arith.addf %2004, %2007 : vector<4x128xf32>
    %c4_644 = arith.constant 4 : index
    %c0_645 = arith.constant 0 : index
    %c0_646 = arith.constant 0 : index
    %2009 = vector.load %arg5[%c4_644, %c0_645, %c0_646] : memref<9x8x4xbf16, #tpu.memory_space<vmem>>, vector<1x8x4xbf16>
    %2010 = vector.shape_cast %2009 : vector<1x8x4xbf16> to vector<8x4xbf16>
    %2011 = arith.truncf %2008 : vector<4x128xf32> to vector<4x128xbf16>
    %cst_647 = arith.constant dense<0.000000e+00> : vector<8x128xf32>
    %2012 = tpu.matmul %2010, %2011, %cst_647 {dimension_numbers = #tpu.dot_dimension_numbers<[1], [0], [0], [1], [0, 0, 1, 1], [], []>} : vector<8x4xbf16>, vector<4x128xbf16>, vector<8x128xf32> -> vector<8x128xf32>
    %2013 = arith.addf %1993, %2012 : vector<8x128xf32>
    %2014 = vector.extract_strided_slice %1841 {offsets = [0, 0], sizes = [4, 128], strides = [1, 1]} : vector<16x128xf32> to vector<4x128xf32>
    %2015 = vector.broadcast %1952 : vector<1x128xf32> to vector<4x128xf32>
    %2016 = arith.mulf %2014, %2015 : vector<4x128xf32>
    %2017 = vector.extract_strided_slice %1841 {offsets = [4, 0], sizes = [4, 128], strides = [1, 1]} : vector<16x128xf32> to vector<4x128xf32>
    %2018 = vector.broadcast %1959 : vector<1x128xf32> to vector<4x128xf32>
    %2019 = arith.mulf %2017, %2018 : vector<4x128xf32>
    %2020 = arith.addf %2016, %2019 : vector<4x128xf32>
    %2021 = vector.extract_strided_slice %1841 {offsets = [8, 0], sizes = [4, 128], strides = [1, 1]} : vector<16x128xf32> to vector<4x128xf32>
    %2022 = vector.broadcast %1966 : vector<1x128xf32> to vector<4x128xf32>
    %2023 = arith.mulf %2021, %2022 : vector<4x128xf32>
    %2024 = arith.addf %2020, %2023 : vector<4x128xf32>
    %2025 = vector.extract_strided_slice %1841 {offsets = [12, 0], sizes = [4, 128], strides = [1, 1]} : vector<16x128xf32> to vector<4x128xf32>
    %2026 = vector.broadcast %1973 : vector<1x128xf32> to vector<4x128xf32>
    %2027 = arith.mulf %2025, %2026 : vector<4x128xf32>
    %2028 = arith.addf %2024, %2027 : vector<4x128xf32>
    %c5_648 = arith.constant 5 : index
    %c0_649 = arith.constant 0 : index
    %c0_650 = arith.constant 0 : index
    %2029 = vector.load %arg5[%c5_648, %c0_649, %c0_650] : memref<9x8x4xbf16, #tpu.memory_space<vmem>>, vector<1x8x4xbf16>
    %2030 = vector.shape_cast %2029 : vector<1x8x4xbf16> to vector<8x4xbf16>
    %2031 = arith.truncf %2028 : vector<4x128xf32> to vector<4x128xbf16>
    %cst_651 = arith.constant dense<0.000000e+00> : vector<8x128xf32>
    %2032 = tpu.matmul %2030, %2031, %cst_651 {dimension_numbers = #tpu.dot_dimension_numbers<[1], [0], [0], [1], [0, 0, 1, 1], [], []>} : vector<8x4xbf16>, vector<4x128xbf16>, vector<8x128xf32> -> vector<8x128xf32>
    %2033 = arith.addf %2013, %2032 : vector<8x128xf32>
    %cst_652 = arith.constant 2.000000e+00 : f32
    %2034 = vector.broadcast %cst_652 : f32 to vector<1x128xf32>
    %2035 = arith.mulf %2034, %1800 : vector<1x128xf32>
    %2036 = vector.broadcast %1843 : f32 to vector<1x128xf32>
    %2037 = arith.addf %2036, %2035 : vector<1x128xf32>
    %2038 = vector.broadcast %1844 : f32 to vector<1x128xf32>
    %2039 = arith.subf %2038, %2037 : vector<1x128xf32>
    %cst_653 = arith.constant 0.000000e+00 : f32
    %2040 = vector.broadcast %cst_653 : f32 to vector<1x128xf32>
    %2041 = arith.addf %2039, %2040 : vector<1x128xf32>
    %2042 = math.absf %2041 : vector<1x128xf32>
    %cst_654 = arith.constant 1.000000e+00 : f32
    %2043 = vector.broadcast %cst_654 : f32 to vector<1x128xf32>
    %2044 = arith.subf %2043, %2042 : vector<1x128xf32>
    %cst_655 = arith.constant 0.000000e+00 : f32
    %2045 = vector.broadcast %cst_655 : f32 to vector<1x128xf32>
    %2046 = arith.maximumf %2045, %2044 : vector<1x128xf32>
    %cst_656 = arith.constant 1.000000e+00 : f32
    %2047 = vector.broadcast %cst_656 : f32 to vector<1x128xf32>
    %2048 = arith.addf %2039, %2047 : vector<1x128xf32>
    %2049 = math.absf %2048 : vector<1x128xf32>
    %cst_657 = arith.constant 1.000000e+00 : f32
    %2050 = vector.broadcast %cst_657 : f32 to vector<1x128xf32>
    %2051 = arith.subf %2050, %2049 : vector<1x128xf32>
    %cst_658 = arith.constant 0.000000e+00 : f32
    %2052 = vector.broadcast %cst_658 : f32 to vector<1x128xf32>
    %2053 = arith.maximumf %2052, %2051 : vector<1x128xf32>
    %cst_659 = arith.constant 2.000000e+00 : f32
    %2054 = vector.broadcast %cst_659 : f32 to vector<1x128xf32>
    %2055 = arith.addf %2039, %2054 : vector<1x128xf32>
    %2056 = math.absf %2055 : vector<1x128xf32>
    %cst_660 = arith.constant 1.000000e+00 : f32
    %2057 = vector.broadcast %cst_660 : f32 to vector<1x128xf32>
    %2058 = arith.subf %2057, %2056 : vector<1x128xf32>
    %cst_661 = arith.constant 0.000000e+00 : f32
    %2059 = vector.broadcast %cst_661 : f32 to vector<1x128xf32>
    %2060 = arith.maximumf %2059, %2058 : vector<1x128xf32>
    %cst_662 = arith.constant 3.000000e+00 : f32
    %2061 = vector.broadcast %cst_662 : f32 to vector<1x128xf32>
    %2062 = arith.addf %2039, %2061 : vector<1x128xf32>
    %2063 = math.absf %2062 : vector<1x128xf32>
    %cst_663 = arith.constant 1.000000e+00 : f32
    %2064 = vector.broadcast %cst_663 : f32 to vector<1x128xf32>
    %2065 = arith.subf %2064, %2063 : vector<1x128xf32>
    %cst_664 = arith.constant 0.000000e+00 : f32
    %2066 = vector.broadcast %cst_664 : f32 to vector<1x128xf32>
    %2067 = arith.maximumf %2066, %2065 : vector<1x128xf32>
    %2068 = vector.extract_strided_slice %1815 {offsets = [0, 0], sizes = [4, 128], strides = [1, 1]} : vector<16x128xf32> to vector<4x128xf32>
    %2069 = vector.broadcast %2046 : vector<1x128xf32> to vector<4x128xf32>
    %2070 = arith.mulf %2068, %2069 : vector<4x128xf32>
    %2071 = vector.extract_strided_slice %1815 {offsets = [4, 0], sizes = [4, 128], strides = [1, 1]} : vector<16x128xf32> to vector<4x128xf32>
    %2072 = vector.broadcast %2053 : vector<1x128xf32> to vector<4x128xf32>
    %2073 = arith.mulf %2071, %2072 : vector<4x128xf32>
    %2074 = arith.addf %2070, %2073 : vector<4x128xf32>
    %2075 = vector.extract_strided_slice %1815 {offsets = [8, 0], sizes = [4, 128], strides = [1, 1]} : vector<16x128xf32> to vector<4x128xf32>
    %2076 = vector.broadcast %2060 : vector<1x128xf32> to vector<4x128xf32>
    %2077 = arith.mulf %2075, %2076 : vector<4x128xf32>
    %2078 = arith.addf %2074, %2077 : vector<4x128xf32>
    %2079 = vector.extract_strided_slice %1815 {offsets = [12, 0], sizes = [4, 128], strides = [1, 1]} : vector<16x128xf32> to vector<4x128xf32>
    %2080 = vector.broadcast %2067 : vector<1x128xf32> to vector<4x128xf32>
    %2081 = arith.mulf %2079, %2080 : vector<4x128xf32>
    %2082 = arith.addf %2078, %2081 : vector<4x128xf32>
    %c6_665 = arith.constant 6 : index
    %c0_666 = arith.constant 0 : index
    %c0_667 = arith.constant 0 : index
    %2083 = vector.load %arg5[%c6_665, %c0_666, %c0_667] : memref<9x8x4xbf16, #tpu.memory_space<vmem>>, vector<1x8x4xbf16>
    %2084 = vector.shape_cast %2083 : vector<1x8x4xbf16> to vector<8x4xbf16>
    %2085 = arith.truncf %2082 : vector<4x128xf32> to vector<4x128xbf16>
    %cst_668 = arith.constant dense<0.000000e+00> : vector<8x128xf32>
    %2086 = tpu.matmul %2084, %2085, %cst_668 {dimension_numbers = #tpu.dot_dimension_numbers<[1], [0], [0], [1], [0, 0, 1, 1], [], []>} : vector<8x4xbf16>, vector<4x128xbf16>, vector<8x128xf32> -> vector<8x128xf32>
    %2087 = arith.addf %2033, %2086 : vector<8x128xf32>
    %2088 = vector.extract_strided_slice %1828 {offsets = [0, 0], sizes = [4, 128], strides = [1, 1]} : vector<16x128xf32> to vector<4x128xf32>
    %2089 = vector.broadcast %2046 : vector<1x128xf32> to vector<4x128xf32>
    %2090 = arith.mulf %2088, %2089 : vector<4x128xf32>
    %2091 = vector.extract_strided_slice %1828 {offsets = [4, 0], sizes = [4, 128], strides = [1, 1]} : vector<16x128xf32> to vector<4x128xf32>
    %2092 = vector.broadcast %2053 : vector<1x128xf32> to vector<4x128xf32>
    %2093 = arith.mulf %2091, %2092 : vector<4x128xf32>
    %2094 = arith.addf %2090, %2093 : vector<4x128xf32>
    %2095 = vector.extract_strided_slice %1828 {offsets = [8, 0], sizes = [4, 128], strides = [1, 1]} : vector<16x128xf32> to vector<4x128xf32>
    %2096 = vector.broadcast %2060 : vector<1x128xf32> to vector<4x128xf32>
    %2097 = arith.mulf %2095, %2096 : vector<4x128xf32>
    %2098 = arith.addf %2094, %2097 : vector<4x128xf32>
    %2099 = vector.extract_strided_slice %1828 {offsets = [12, 0], sizes = [4, 128], strides = [1, 1]} : vector<16x128xf32> to vector<4x128xf32>
    %2100 = vector.broadcast %2067 : vector<1x128xf32> to vector<4x128xf32>
    %2101 = arith.mulf %2099, %2100 : vector<4x128xf32>
    %2102 = arith.addf %2098, %2101 : vector<4x128xf32>
    %c7_669 = arith.constant 7 : index
    %c0_670 = arith.constant 0 : index
    %c0_671 = arith.constant 0 : index
    %2103 = vector.load %arg5[%c7_669, %c0_670, %c0_671] : memref<9x8x4xbf16, #tpu.memory_space<vmem>>, vector<1x8x4xbf16>
    %2104 = vector.shape_cast %2103 : vector<1x8x4xbf16> to vector<8x4xbf16>
    %2105 = arith.truncf %2102 : vector<4x128xf32> to vector<4x128xbf16>
    %cst_672 = arith.constant dense<0.000000e+00> : vector<8x128xf32>
    %2106 = tpu.matmul %2104, %2105, %cst_672 {dimension_numbers = #tpu.dot_dimension_numbers<[1], [0], [0], [1], [0, 0, 1, 1], [], []>} : vector<8x4xbf16>, vector<4x128xbf16>, vector<8x128xf32> -> vector<8x128xf32>
    %2107 = arith.addf %2087, %2106 : vector<8x128xf32>
    %2108 = vector.extract_strided_slice %1841 {offsets = [0, 0], sizes = [4, 128], strides = [1, 1]} : vector<16x128xf32> to vector<4x128xf32>
    %2109 = vector.broadcast %2046 : vector<1x128xf32> to vector<4x128xf32>
    %2110 = arith.mulf %2108, %2109 : vector<4x128xf32>
    %2111 = vector.extract_strided_slice %1841 {offsets = [4, 0], sizes = [4, 128], strides = [1, 1]} : vector<16x128xf32> to vector<4x128xf32>
    %2112 = vector.broadcast %2053 : vector<1x128xf32> to vector<4x128xf32>
    %2113 = arith.mulf %2111, %2112 : vector<4x128xf32>
    %2114 = arith.addf %2110, %2113 : vector<4x128xf32>
    %2115 = vector.extract_strided_slice %1841 {offsets = [8, 0], sizes = [4, 128], strides = [1, 1]} : vector<16x128xf32> to vector<4x128xf32>
    %2116 = vector.broadcast %2060 : vector<1x128xf32> to vector<4x128xf32>
    %2117 = arith.mulf %2115, %2116 : vector<4x128xf32>
    %2118 = arith.addf %2114, %2117 : vector<4x128xf32>
    %2119 = vector.extract_strided_slice %1841 {offsets = [12, 0], sizes = [4, 128], strides = [1, 1]} : vector<16x128xf32> to vector<4x128xf32>
    %2120 = vector.broadcast %2067 : vector<1x128xf32> to vector<4x128xf32>
    %2121 = arith.mulf %2119, %2120 : vector<4x128xf32>
    %2122 = arith.addf %2118, %2121 : vector<4x128xf32>
    %c8_673 = arith.constant 8 : index
    %c0_674 = arith.constant 0 : index
    %c0_675 = arith.constant 0 : index
    %2123 = vector.load %arg5[%c8_673, %c0_674, %c0_675] : memref<9x8x4xbf16, #tpu.memory_space<vmem>>, vector<1x8x4xbf16>
    %2124 = vector.shape_cast %2123 : vector<1x8x4xbf16> to vector<8x4xbf16>
    %2125 = arith.truncf %2122 : vector<4x128xf32> to vector<4x128xbf16>
    %cst_676 = arith.constant dense<0.000000e+00> : vector<8x128xf32>
    %2126 = tpu.matmul %2124, %2125, %cst_676 {dimension_numbers = #tpu.dot_dimension_numbers<[1], [0], [0], [1], [0, 0, 1, 1], [], []>} : vector<8x4xbf16>, vector<4x128xbf16>, vector<8x128xf32> -> vector<8x128xf32>
    %2127 = arith.addf %2107, %2126 : vector<8x128xf32>
    %2128 = vector.broadcast %8 : vector<8x1xf32> to vector<8x128xf32>
    %2129 = arith.addf %2127, %2128 : vector<8x128xf32>
    %c0_677 = arith.constant 0 : index
    %c0_678 = arith.constant 0 : index
    %c5_679 = arith.constant 5 : index
    %c0_680 = arith.constant 0 : index
    %2130 = vector.load %arg7[%c0_677, %c0_678, %c5_679, %c0_680] : memref<1x8x8x128xf32, #tpu.memory_space<vmem>>, vector<1x8x1x128xf32>
    %2131 = vector.shape_cast %2130 : vector<1x8x1x128xf32> to vector<8x128xf32>
    %2132 = vector.shape_cast %2129 : vector<8x128xf32> to vector<1x8x1x128xf32>
    tpu.vector_store %arg7[%c0_677, %c0_678, %c5_679, %c0_680], %2132 {strides = array<i32>} : memref<1x8x8x128xf32, #tpu.memory_space<vmem>>, vector<1x8x1x128xf32>,
    %c6_i32 = arith.constant 6 : i32
    %2133 = arith.addi %0, %c6_i32 : i32
    %c1_i32_681 = arith.constant 1 : i32
    %2134 = arith.muli %2133, %c1_i32_681 : i32
    %c0_i32_682 = arith.constant 0 : i32
    %c14_i32_683 = arith.constant 14 : i32
    %2135 = arith.maxsi %c0_i32_682, %2134 : i32
    %2136 = arith.minsi %c14_i32_683, %2135 : i32
    %c0_i32_684 = arith.constant 0 : i32
    %2137 = arith.addi %2136, %c0_i32_684 : i32
    %c0_685 = arith.constant 0 : index
    %2138 = arith.index_cast %2137 : i32 to index
    %c0_686 = arith.constant 0 : index
    %c0_687 = arith.constant 0 : index
    %2139 = vector.load %arg3[%c0_685, %2138, %c0_686, %c0_687] : memref<1x18x4x18xbf16, #tpu.memory_space<vmem>>, vector<1x1x4x18xbf16>
    %2140 = vector.shape_cast %2139 : vector<1x1x4x18xbf16> to vector<4x18xbf16>
    %c1_i32_688 = arith.constant 1 : i32
    %2141 = arith.addi %2136, %c1_i32_688 : i32
    %c0_689 = arith.constant 0 : index
    %2142 = arith.index_cast %2141 : i32 to index
    %c0_690 = arith.constant 0 : index
    %c0_691 = arith.constant 0 : index
    %2143 = vector.load %arg3[%c0_689, %2142, %c0_690, %c0_691] : memref<1x18x4x18xbf16, #tpu.memory_space<vmem>>, vector<1x1x4x18xbf16>
    %2144 = vector.shape_cast %2143 : vector<1x1x4x18xbf16> to vector<4x18xbf16>
    %c2_i32_692 = arith.constant 2 : i32
    %2145 = arith.addi %2136, %c2_i32_692 : i32
    %c0_693 = arith.constant 0 : index
    %2146 = arith.index_cast %2145 : i32 to index
    %c0_694 = arith.constant 0 : index
    %c0_695 = arith.constant 0 : index
    %2147 = vector.load %arg3[%c0_693, %2146, %c0_694, %c0_695] : memref<1x18x4x18xbf16, #tpu.memory_space<vmem>>, vector<1x1x4x18xbf16>
    %2148 = vector.shape_cast %2147 : vector<1x1x4x18xbf16> to vector<4x18xbf16>
    %c3_i32_696 = arith.constant 3 : i32
    %2149 = arith.addi %2136, %c3_i32_696 : i32
    %c0_697 = arith.constant 0 : index
    %2150 = arith.index_cast %2149 : i32 to index
    %c0_698 = arith.constant 0 : index
    %c0_699 = arith.constant 0 : index
    %2151 = vector.load %arg3[%c0_697, %2150, %c0_698, %c0_699] : memref<1x18x4x18xbf16, #tpu.memory_space<vmem>>, vector<1x1x4x18xbf16>
    %2152 = vector.shape_cast %2151 : vector<1x1x4x18xbf16> to vector<4x18xbf16>
    %2153 = tpu.concatenate %2140, %2144, %2148, %2152 in 0 : vector<4x18xbf16>, vector<4x18xbf16>, vector<4x18xbf16>, vector<4x18xbf16> -> vector<16x18xbf16>
    %c6_700 = arith.constant 6 : index
    %c0_701 = arith.constant 0 : index
    %2154 = vector.load %arg4[%c6_700, %c0_701] : memref<8x128xf32, #tpu.memory_space<vmem>>, vector<1x128xf32>
    %cst_702 = arith.constant 1.000000e+00 : f32
    %2155 = vector.broadcast %cst_702 : f32 to vector<1x128xf32>
    %2156 = arith.mulf %5, %2155 : vector<1x128xf32>
    %cst_703 = arith.constant 0.000000e+00 : f32
    %2157 = vector.broadcast %cst_703 : f32 to vector<1x128xf32>
    %2158 = arith.mulf %2157, %2154 : vector<1x128xf32>
    %2159 = arith.addf %2156, %2158 : vector<1x128xf32>
    %2160 = vector.broadcast %7 : vector<18x1xf32> to vector<18x128xf32>
    %2161 = vector.broadcast %2159 : vector<1x128xf32> to vector<18x128xf32>
    %2162 = arith.subf %2160, %2161 : vector<18x128xf32>
    %2163 = math.absf %2162 : vector<18x128xf32>
    %cst_704 = arith.constant 1.000000e+00 : f32
    %2164 = vector.broadcast %cst_704 : f32 to vector<18x128xf32>
    %2165 = arith.subf %2164, %2163 : vector<18x128xf32>
    %cst_705 = arith.constant 0.000000e+00 : f32
    %2166 = vector.broadcast %cst_705 : f32 to vector<18x128xf32>
    %2167 = arith.maximumf %2166, %2165 : vector<18x128xf32>
    %2168 = arith.truncf %2167 : vector<18x128xf32> to vector<18x128xbf16>
    %cst_706 = arith.constant dense<0.000000e+00> : vector<16x128xf32>
    %2169 = tpu.matmul %2153, %2168, %cst_706 {dimension_numbers = #tpu.dot_dimension_numbers<[1], [0], [0], [1], [0, 0, 1, 1], [], []>} : vector<16x18xbf16>, vector<18x128xbf16>, vector<16x128xf32> -> vector<16x128xf32>
    %cst_707 = arith.constant 1.000000e+00 : f32
    %2170 = vector.broadcast %cst_707 : f32 to vector<1x128xf32>
    %2171 = arith.mulf %2170, %2154 : vector<1x128xf32>
    %2172 = arith.addf %2156, %2171 : vector<1x128xf32>
    %2173 = vector.broadcast %7 : vector<18x1xf32> to vector<18x128xf32>
    %2174 = vector.broadcast %2172 : vector<1x128xf32> to vector<18x128xf32>
    %2175 = arith.subf %2173, %2174 : vector<18x128xf32>
    %2176 = math.absf %2175 : vector<18x128xf32>
    %cst_708 = arith.constant 1.000000e+00 : f32
    %2177 = vector.broadcast %cst_708 : f32 to vector<18x128xf32>
    %2178 = arith.subf %2177, %2176 : vector<18x128xf32>
    %cst_709 = arith.constant 0.000000e+00 : f32
    %2179 = vector.broadcast %cst_709 : f32 to vector<18x128xf32>
    %2180 = arith.maximumf %2179, %2178 : vector<18x128xf32>
    %2181 = arith.truncf %2180 : vector<18x128xf32> to vector<18x128xbf16>
    %cst_710 = arith.constant dense<0.000000e+00> : vector<16x128xf32>
    %2182 = tpu.matmul %2153, %2181, %cst_710 {dimension_numbers = #tpu.dot_dimension_numbers<[1], [0], [0], [1], [0, 0, 1, 1], [], []>} : vector<16x18xbf16>, vector<18x128xbf16>, vector<16x128xf32> -> vector<16x128xf32>
    %cst_711 = arith.constant 2.000000e+00 : f32
    %2183 = vector.broadcast %cst_711 : f32 to vector<1x128xf32>
    %2184 = arith.mulf %2183, %2154 : vector<1x128xf32>
    %2185 = arith.addf %2156, %2184 : vector<1x128xf32>
    %2186 = vector.broadcast %7 : vector<18x1xf32> to vector<18x128xf32>
    %2187 = vector.broadcast %2185 : vector<1x128xf32> to vector<18x128xf32>
    %2188 = arith.subf %2186, %2187 : vector<18x128xf32>
    %2189 = math.absf %2188 : vector<18x128xf32>
    %cst_712 = arith.constant 1.000000e+00 : f32
    %2190 = vector.broadcast %cst_712 : f32 to vector<18x128xf32>
    %2191 = arith.subf %2190, %2189 : vector<18x128xf32>
    %cst_713 = arith.constant 0.000000e+00 : f32
    %2192 = vector.broadcast %cst_713 : f32 to vector<18x128xf32>
    %2193 = arith.maximumf %2192, %2191 : vector<18x128xf32>
    %2194 = arith.truncf %2193 : vector<18x128xf32> to vector<18x128xbf16>
    %cst_714 = arith.constant dense<0.000000e+00> : vector<16x128xf32>
    %2195 = tpu.matmul %2153, %2194, %cst_714 {dimension_numbers = #tpu.dot_dimension_numbers<[1], [0], [0], [1], [0, 0, 1, 1], [], []>} : vector<16x18xbf16>, vector<18x128xbf16>, vector<16x128xf32> -> vector<16x128xf32>
    %c1_i32_715 = arith.constant 1 : i32
    %2196 = arith.muli %2133, %c1_i32_715 : i32
    %2197 = arith.sitofp %2196 : i32 to f32
    %2198 = arith.sitofp %2136 : i32 to f32
    %cst_716 = arith.constant 0.000000e+00 : f32
    %2199 = vector.broadcast %cst_716 : f32 to vector<8x128xf32>
    %cst_717 = arith.constant 0.000000e+00 : f32
    %2200 = vector.broadcast %cst_717 : f32 to vector<1x128xf32>
    %2201 = arith.mulf %2200, %2154 : vector<1x128xf32>
    %2202 = vector.broadcast %2197 : f32 to vector<1x128xf32>
    %2203 = arith.addf %2202, %2201 : vector<1x128xf32>
    %2204 = vector.broadcast %2198 : f32 to vector<1x128xf32>
    %2205 = arith.subf %2204, %2203 : vector<1x128xf32>
    %cst_718 = arith.constant 0.000000e+00 : f32
    %2206 = vector.broadcast %cst_718 : f32 to vector<1x128xf32>
    %2207 = arith.addf %2205, %2206 : vector<1x128xf32>
    %2208 = math.absf %2207 : vector<1x128xf32>
    %cst_719 = arith.constant 1.000000e+00 : f32
    %2209 = vector.broadcast %cst_719 : f32 to vector<1x128xf32>
    %2210 = arith.subf %2209, %2208 : vector<1x128xf32>
    %cst_720 = arith.constant 0.000000e+00 : f32
    %2211 = vector.broadcast %cst_720 : f32 to vector<1x128xf32>
    %2212 = arith.maximumf %2211, %2210 : vector<1x128xf32>
    %cst_721 = arith.constant 1.000000e+00 : f32
    %2213 = vector.broadcast %cst_721 : f32 to vector<1x128xf32>
    %2214 = arith.addf %2205, %2213 : vector<1x128xf32>
    %2215 = math.absf %2214 : vector<1x128xf32>
    %cst_722 = arith.constant 1.000000e+00 : f32
    %2216 = vector.broadcast %cst_722 : f32 to vector<1x128xf32>
    %2217 = arith.subf %2216, %2215 : vector<1x128xf32>
    %cst_723 = arith.constant 0.000000e+00 : f32
    %2218 = vector.broadcast %cst_723 : f32 to vector<1x128xf32>
    %2219 = arith.maximumf %2218, %2217 : vector<1x128xf32>
    %cst_724 = arith.constant 2.000000e+00 : f32
    %2220 = vector.broadcast %cst_724 : f32 to vector<1x128xf32>
    %2221 = arith.addf %2205, %2220 : vector<1x128xf32>
    %2222 = math.absf %2221 : vector<1x128xf32>
    %cst_725 = arith.constant 1.000000e+00 : f32
    %2223 = vector.broadcast %cst_725 : f32 to vector<1x128xf32>
    %2224 = arith.subf %2223, %2222 : vector<1x128xf32>
    %cst_726 = arith.constant 0.000000e+00 : f32
    %2225 = vector.broadcast %cst_726 : f32 to vector<1x128xf32>
    %2226 = arith.maximumf %2225, %2224 : vector<1x128xf32>
    %cst_727 = arith.constant 3.000000e+00 : f32
    %2227 = vector.broadcast %cst_727 : f32 to vector<1x128xf32>
    %2228 = arith.addf %2205, %2227 : vector<1x128xf32>
    %2229 = math.absf %2228 : vector<1x128xf32>
    %cst_728 = arith.constant 1.000000e+00 : f32
    %2230 = vector.broadcast %cst_728 : f32 to vector<1x128xf32>
    %2231 = arith.subf %2230, %2229 : vector<1x128xf32>
    %cst_729 = arith.constant 0.000000e+00 : f32
    %2232 = vector.broadcast %cst_729 : f32 to vector<1x128xf32>
    %2233 = arith.maximumf %2232, %2231 : vector<1x128xf32>
    %2234 = vector.extract_strided_slice %2169 {offsets = [0, 0], sizes = [4, 128], strides = [1, 1]} : vector<16x128xf32> to vector<4x128xf32>
    %2235 = vector.broadcast %2212 : vector<1x128xf32> to vector<4x128xf32>
    %2236 = arith.mulf %2234, %2235 : vector<4x128xf32>
    %2237 = vector.extract_strided_slice %2169 {offsets = [4, 0], sizes = [4, 128], strides = [1, 1]} : vector<16x128xf32> to vector<4x128xf32>
    %2238 = vector.broadcast %2219 : vector<1x128xf32> to vector<4x128xf32>
    %2239 = arith.mulf %2237, %2238 : vector<4x128xf32>
    %2240 = arith.addf %2236, %2239 : vector<4x128xf32>
    %2241 = vector.extract_strided_slice %2169 {offsets = [8, 0], sizes = [4, 128], strides = [1, 1]} : vector<16x128xf32> to vector<4x128xf32>
    %2242 = vector.broadcast %2226 : vector<1x128xf32> to vector<4x128xf32>
    %2243 = arith.mulf %2241, %2242 : vector<4x128xf32>
    %2244 = arith.addf %2240, %2243 : vector<4x128xf32>
    %2245 = vector.extract_strided_slice %2169 {offsets = [12, 0], sizes = [4, 128], strides = [1, 1]} : vector<16x128xf32> to vector<4x128xf32>
    %2246 = vector.broadcast %2233 : vector<1x128xf32> to vector<4x128xf32>
    %2247 = arith.mulf %2245, %2246 : vector<4x128xf32>
    %2248 = arith.addf %2244, %2247 : vector<4x128xf32>
    %c0_730 = arith.constant 0 : index
    %c0_731 = arith.constant 0 : index
    %c0_732 = arith.constant 0 : index
    %2249 = vector.load %arg5[%c0_730, %c0_731, %c0_732] : memref<9x8x4xbf16, #tpu.memory_space<vmem>>, vector<1x8x4xbf16>
    %2250 = vector.shape_cast %2249 : vector<1x8x4xbf16> to vector<8x4xbf16>
    %2251 = arith.truncf %2248 : vector<4x128xf32> to vector<4x128xbf16>
    %cst_733 = arith.constant dense<0.000000e+00> : vector<8x128xf32>
    %2252 = tpu.matmul %2250, %2251, %cst_733 {dimension_numbers = #tpu.dot_dimension_numbers<[1], [0], [0], [1], [0, 0, 1, 1], [], []>} : vector<8x4xbf16>, vector<4x128xbf16>, vector<8x128xf32> -> vector<8x128xf32>
    %2253 = arith.addf %2199, %2252 : vector<8x128xf32>
    %2254 = vector.extract_strided_slice %2182 {offsets = [0, 0], sizes = [4, 128], strides = [1, 1]} : vector<16x128xf32> to vector<4x128xf32>
    %2255 = vector.broadcast %2212 : vector<1x128xf32> to vector<4x128xf32>
    %2256 = arith.mulf %2254, %2255 : vector<4x128xf32>
    %2257 = vector.extract_strided_slice %2182 {offsets = [4, 0], sizes = [4, 128], strides = [1, 1]} : vector<16x128xf32> to vector<4x128xf32>
    %2258 = vector.broadcast %2219 : vector<1x128xf32> to vector<4x128xf32>
    %2259 = arith.mulf %2257, %2258 : vector<4x128xf32>
    %2260 = arith.addf %2256, %2259 : vector<4x128xf32>
    %2261 = vector.extract_strided_slice %2182 {offsets = [8, 0], sizes = [4, 128], strides = [1, 1]} : vector<16x128xf32> to vector<4x128xf32>
    %2262 = vector.broadcast %2226 : vector<1x128xf32> to vector<4x128xf32>
    %2263 = arith.mulf %2261, %2262 : vector<4x128xf32>
    %2264 = arith.addf %2260, %2263 : vector<4x128xf32>
    %2265 = vector.extract_strided_slice %2182 {offsets = [12, 0], sizes = [4, 128], strides = [1, 1]} : vector<16x128xf32> to vector<4x128xf32>
    %2266 = vector.broadcast %2233 : vector<1x128xf32> to vector<4x128xf32>
    %2267 = arith.mulf %2265, %2266 : vector<4x128xf32>
    %2268 = arith.addf %2264, %2267 : vector<4x128xf32>
    %c1_734 = arith.constant 1 : index
    %c0_735 = arith.constant 0 : index
    %c0_736 = arith.constant 0 : index
    %2269 = vector.load %arg5[%c1_734, %c0_735, %c0_736] : memref<9x8x4xbf16, #tpu.memory_space<vmem>>, vector<1x8x4xbf16>
    %2270 = vector.shape_cast %2269 : vector<1x8x4xbf16> to vector<8x4xbf16>
    %2271 = arith.truncf %2268 : vector<4x128xf32> to vector<4x128xbf16>
    %cst_737 = arith.constant dense<0.000000e+00> : vector<8x128xf32>
    %2272 = tpu.matmul %2270, %2271, %cst_737 {dimension_numbers = #tpu.dot_dimension_numbers<[1], [0], [0], [1], [0, 0, 1, 1], [], []>} : vector<8x4xbf16>, vector<4x128xbf16>, vector<8x128xf32> -> vector<8x128xf32>
    %2273 = arith.addf %2253, %2272 : vector<8x128xf32>
    %2274 = vector.extract_strided_slice %2195 {offsets = [0, 0], sizes = [4, 128], strides = [1, 1]} : vector<16x128xf32> to vector<4x128xf32>
    %2275 = vector.broadcast %2212 : vector<1x128xf32> to vector<4x128xf32>
    %2276 = arith.mulf %2274, %2275 : vector<4x128xf32>
    %2277 = vector.extract_strided_slice %2195 {offsets = [4, 0], sizes = [4, 128], strides = [1, 1]} : vector<16x128xf32> to vector<4x128xf32>
    %2278 = vector.broadcast %2219 : vector<1x128xf32> to vector<4x128xf32>
    %2279 = arith.mulf %2277, %2278 : vector<4x128xf32>
    %2280 = arith.addf %2276, %2279 : vector<4x128xf32>
    %2281 = vector.extract_strided_slice %2195 {offsets = [8, 0], sizes = [4, 128], strides = [1, 1]} : vector<16x128xf32> to vector<4x128xf32>
    %2282 = vector.broadcast %2226 : vector<1x128xf32> to vector<4x128xf32>
    %2283 = arith.mulf %2281, %2282 : vector<4x128xf32>
    %2284 = arith.addf %2280, %2283 : vector<4x128xf32>
    %2285 = vector.extract_strided_slice %2195 {offsets = [12, 0], sizes = [4, 128], strides = [1, 1]} : vector<16x128xf32> to vector<4x128xf32>
    %2286 = vector.broadcast %2233 : vector<1x128xf32> to vector<4x128xf32>
    %2287 = arith.mulf %2285, %2286 : vector<4x128xf32>
    %2288 = arith.addf %2284, %2287 : vector<4x128xf32>
    %c2_738 = arith.constant 2 : index
    %c0_739 = arith.constant 0 : index
    %c0_740 = arith.constant 0 : index
    %2289 = vector.load %arg5[%c2_738, %c0_739, %c0_740] : memref<9x8x4xbf16, #tpu.memory_space<vmem>>, vector<1x8x4xbf16>
    %2290 = vector.shape_cast %2289 : vector<1x8x4xbf16> to vector<8x4xbf16>
    %2291 = arith.truncf %2288 : vector<4x128xf32> to vector<4x128xbf16>
    %cst_741 = arith.constant dense<0.000000e+00> : vector<8x128xf32>
    %2292 = tpu.matmul %2290, %2291, %cst_741 {dimension_numbers = #tpu.dot_dimension_numbers<[1], [0], [0], [1], [0, 0, 1, 1], [], []>} : vector<8x4xbf16>, vector<4x128xbf16>, vector<8x128xf32> -> vector<8x128xf32>
    %2293 = arith.addf %2273, %2292 : vector<8x128xf32>
    %cst_742 = arith.constant 1.000000e+00 : f32
    %2294 = vector.broadcast %cst_742 : f32 to vector<1x128xf32>
    %2295 = arith.mulf %2294, %2154 : vector<1x128xf32>
    %2296 = vector.broadcast %2197 : f32 to vector<1x128xf32>
    %2297 = arith.addf %2296, %2295 : vector<1x128xf32>
    %2298 = vector.broadcast %2198 : f32 to vector<1x128xf32>
    %2299 = arith.subf %2298, %2297 : vector<1x128xf32>
    %cst_743 = arith.constant 0.000000e+00 : f32
    %2300 = vector.broadcast %cst_743 : f32 to vector<1x128xf32>
    %2301 = arith.addf %2299, %2300 : vector<1x128xf32>
    %2302 = math.absf %2301 : vector<1x128xf32>
    %cst_744 = arith.constant 1.000000e+00 : f32
    %2303 = vector.broadcast %cst_744 : f32 to vector<1x128xf32>
    %2304 = arith.subf %2303, %2302 : vector<1x128xf32>
    %cst_745 = arith.constant 0.000000e+00 : f32
    %2305 = vector.broadcast %cst_745 : f32 to vector<1x128xf32>
    %2306 = arith.maximumf %2305, %2304 : vector<1x128xf32>
    %cst_746 = arith.constant 1.000000e+00 : f32
    %2307 = vector.broadcast %cst_746 : f32 to vector<1x128xf32>
    %2308 = arith.addf %2299, %2307 : vector<1x128xf32>
    %2309 = math.absf %2308 : vector<1x128xf32>
    %cst_747 = arith.constant 1.000000e+00 : f32
    %2310 = vector.broadcast %cst_747 : f32 to vector<1x128xf32>
    %2311 = arith.subf %2310, %2309 : vector<1x128xf32>
    %cst_748 = arith.constant 0.000000e+00 : f32
    %2312 = vector.broadcast %cst_748 : f32 to vector<1x128xf32>
    %2313 = arith.maximumf %2312, %2311 : vector<1x128xf32>
    %cst_749 = arith.constant 2.000000e+00 : f32
    %2314 = vector.broadcast %cst_749 : f32 to vector<1x128xf32>
    %2315 = arith.addf %2299, %2314 : vector<1x128xf32>
    %2316 = math.absf %2315 : vector<1x128xf32>
    %cst_750 = arith.constant 1.000000e+00 : f32
    %2317 = vector.broadcast %cst_750 : f32 to vector<1x128xf32>
    %2318 = arith.subf %2317, %2316 : vector<1x128xf32>
    %cst_751 = arith.constant 0.000000e+00 : f32
    %2319 = vector.broadcast %cst_751 : f32 to vector<1x128xf32>
    %2320 = arith.maximumf %2319, %2318 : vector<1x128xf32>
    %cst_752 = arith.constant 3.000000e+00 : f32
    %2321 = vector.broadcast %cst_752 : f32 to vector<1x128xf32>
    %2322 = arith.addf %2299, %2321 : vector<1x128xf32>
    %2323 = math.absf %2322 : vector<1x128xf32>
    %cst_753 = arith.constant 1.000000e+00 : f32
    %2324 = vector.broadcast %cst_753 : f32 to vector<1x128xf32>
    %2325 = arith.subf %2324, %2323 : vector<1x128xf32>
    %cst_754 = arith.constant 0.000000e+00 : f32
    %2326 = vector.broadcast %cst_754 : f32 to vector<1x128xf32>
    %2327 = arith.maximumf %2326, %2325 : vector<1x128xf32>
    %2328 = vector.extract_strided_slice %2169 {offsets = [0, 0], sizes = [4, 128], strides = [1, 1]} : vector<16x128xf32> to vector<4x128xf32>
    %2329 = vector.broadcast %2306 : vector<1x128xf32> to vector<4x128xf32>
    %2330 = arith.mulf %2328, %2329 : vector<4x128xf32>
    %2331 = vector.extract_strided_slice %2169 {offsets = [4, 0], sizes = [4, 128], strides = [1, 1]} : vector<16x128xf32> to vector<4x128xf32>
    %2332 = vector.broadcast %2313 : vector<1x128xf32> to vector<4x128xf32>
    %2333 = arith.mulf %2331, %2332 : vector<4x128xf32>
    %2334 = arith.addf %2330, %2333 : vector<4x128xf32>
    %2335 = vector.extract_strided_slice %2169 {offsets = [8, 0], sizes = [4, 128], strides = [1, 1]} : vector<16x128xf32> to vector<4x128xf32>
    %2336 = vector.broadcast %2320 : vector<1x128xf32> to vector<4x128xf32>
    %2337 = arith.mulf %2335, %2336 : vector<4x128xf32>
    %2338 = arith.addf %2334, %2337 : vector<4x128xf32>
    %2339 = vector.extract_strided_slice %2169 {offsets = [12, 0], sizes = [4, 128], strides = [1, 1]} : vector<16x128xf32> to vector<4x128xf32>
    %2340 = vector.broadcast %2327 : vector<1x128xf32> to vector<4x128xf32>
    %2341 = arith.mulf %2339, %2340 : vector<4x128xf32>
    %2342 = arith.addf %2338, %2341 : vector<4x128xf32>
    %c3_755 = arith.constant 3 : index
    %c0_756 = arith.constant 0 : index
    %c0_757 = arith.constant 0 : index
    %2343 = vector.load %arg5[%c3_755, %c0_756, %c0_757] : memref<9x8x4xbf16, #tpu.memory_space<vmem>>, vector<1x8x4xbf16>
    %2344 = vector.shape_cast %2343 : vector<1x8x4xbf16> to vector<8x4xbf16>
    %2345 = arith.truncf %2342 : vector<4x128xf32> to vector<4x128xbf16>
    %cst_758 = arith.constant dense<0.000000e+00> : vector<8x128xf32>
    %2346 = tpu.matmul %2344, %2345, %cst_758 {dimension_numbers = #tpu.dot_dimension_numbers<[1], [0], [0], [1], [0, 0, 1, 1], [], []>} : vector<8x4xbf16>, vector<4x128xbf16>, vector<8x128xf32> -> vector<8x128xf32>
    %2347 = arith.addf %2293, %2346 : vector<8x128xf32>
    %2348 = vector.extract_strided_slice %2182 {offsets = [0, 0], sizes = [4, 128], strides = [1, 1]} : vector<16x128xf32> to vector<4x128xf32>
    %2349 = vector.broadcast %2306 : vector<1x128xf32> to vector<4x128xf32>
    %2350 = arith.mulf %2348, %2349 : vector<4x128xf32>
    %2351 = vector.extract_strided_slice %2182 {offsets = [4, 0], sizes = [4, 128], strides = [1, 1]} : vector<16x128xf32> to vector<4x128xf32>
    %2352 = vector.broadcast %2313 : vector<1x128xf32> to vector<4x128xf32>
    %2353 = arith.mulf %2351, %2352 : vector<4x128xf32>
    %2354 = arith.addf %2350, %2353 : vector<4x128xf32>
    %2355 = vector.extract_strided_slice %2182 {offsets = [8, 0], sizes = [4, 128], strides = [1, 1]} : vector<16x128xf32> to vector<4x128xf32>
    %2356 = vector.broadcast %2320 : vector<1x128xf32> to vector<4x128xf32>
    %2357 = arith.mulf %2355, %2356 : vector<4x128xf32>
    %2358 = arith.addf %2354, %2357 : vector<4x128xf32>
    %2359 = vector.extract_strided_slice %2182 {offsets = [12, 0], sizes = [4, 128], strides = [1, 1]} : vector<16x128xf32> to vector<4x128xf32>
    %2360 = vector.broadcast %2327 : vector<1x128xf32> to vector<4x128xf32>
    %2361 = arith.mulf %2359, %2360 : vector<4x128xf32>
    %2362 = arith.addf %2358, %2361 : vector<4x128xf32>
    %c4_759 = arith.constant 4 : index
    %c0_760 = arith.constant 0 : index
    %c0_761 = arith.constant 0 : index
    %2363 = vector.load %arg5[%c4_759, %c0_760, %c0_761] : memref<9x8x4xbf16, #tpu.memory_space<vmem>>, vector<1x8x4xbf16>
    %2364 = vector.shape_cast %2363 : vector<1x8x4xbf16> to vector<8x4xbf16>
    %2365 = arith.truncf %2362 : vector<4x128xf32> to vector<4x128xbf16>
    %cst_762 = arith.constant dense<0.000000e+00> : vector<8x128xf32>
    %2366 = tpu.matmul %2364, %2365, %cst_762 {dimension_numbers = #tpu.dot_dimension_numbers<[1], [0], [0], [1], [0, 0, 1, 1], [], []>} : vector<8x4xbf16>, vector<4x128xbf16>, vector<8x128xf32> -> vector<8x128xf32>
    %2367 = arith.addf %2347, %2366 : vector<8x128xf32>
    %2368 = vector.extract_strided_slice %2195 {offsets = [0, 0], sizes = [4, 128], strides = [1, 1]} : vector<16x128xf32> to vector<4x128xf32>
    %2369 = vector.broadcast %2306 : vector<1x128xf32> to vector<4x128xf32>
    %2370 = arith.mulf %2368, %2369 : vector<4x128xf32>
    %2371 = vector.extract_strided_slice %2195 {offsets = [4, 0], sizes = [4, 128], strides = [1, 1]} : vector<16x128xf32> to vector<4x128xf32>
    %2372 = vector.broadcast %2313 : vector<1x128xf32> to vector<4x128xf32>
    %2373 = arith.mulf %2371, %2372 : vector<4x128xf32>
    %2374 = arith.addf %2370, %2373 : vector<4x128xf32>
    %2375 = vector.extract_strided_slice %2195 {offsets = [8, 0], sizes = [4, 128], strides = [1, 1]} : vector<16x128xf32> to vector<4x128xf32>
    %2376 = vector.broadcast %2320 : vector<1x128xf32> to vector<4x128xf32>
    %2377 = arith.mulf %2375, %2376 : vector<4x128xf32>
    %2378 = arith.addf %2374, %2377 : vector<4x128xf32>
    %2379 = vector.extract_strided_slice %2195 {offsets = [12, 0], sizes = [4, 128], strides = [1, 1]} : vector<16x128xf32> to vector<4x128xf32>
    %2380 = vector.broadcast %2327 : vector<1x128xf32> to vector<4x128xf32>
    %2381 = arith.mulf %2379, %2380 : vector<4x128xf32>
    %2382 = arith.addf %2378, %2381 : vector<4x128xf32>
    %c5_763 = arith.constant 5 : index
    %c0_764 = arith.constant 0 : index
    %c0_765 = arith.constant 0 : index
    %2383 = vector.load %arg5[%c5_763, %c0_764, %c0_765] : memref<9x8x4xbf16, #tpu.memory_space<vmem>>, vector<1x8x4xbf16>
    %2384 = vector.shape_cast %2383 : vector<1x8x4xbf16> to vector<8x4xbf16>
    %2385 = arith.truncf %2382 : vector<4x128xf32> to vector<4x128xbf16>
    %cst_766 = arith.constant dense<0.000000e+00> : vector<8x128xf32>
    %2386 = tpu.matmul %2384, %2385, %cst_766 {dimension_numbers = #tpu.dot_dimension_numbers<[1], [0], [0], [1], [0, 0, 1, 1], [], []>} : vector<8x4xbf16>, vector<4x128xbf16>, vector<8x128xf32> -> vector<8x128xf32>
    %2387 = arith.addf %2367, %2386 : vector<8x128xf32>
    %cst_767 = arith.constant 2.000000e+00 : f32
    %2388 = vector.broadcast %cst_767 : f32 to vector<1x128xf32>
    %2389 = arith.mulf %2388, %2154 : vector<1x128xf32>
    %2390 = vector.broadcast %2197 : f32 to vector<1x128xf32>
    %2391 = arith.addf %2390, %2389 : vector<1x128xf32>
    %2392 = vector.broadcast %2198 : f32 to vector<1x128xf32>
    %2393 = arith.subf %2392, %2391 : vector<1x128xf32>
    %cst_768 = arith.constant 0.000000e+00 : f32
    %2394 = vector.broadcast %cst_768 : f32 to vector<1x128xf32>
    %2395 = arith.addf %2393, %2394 : vector<1x128xf32>
    %2396 = math.absf %2395 : vector<1x128xf32>
    %cst_769 = arith.constant 1.000000e+00 : f32
    %2397 = vector.broadcast %cst_769 : f32 to vector<1x128xf32>
    %2398 = arith.subf %2397, %2396 : vector<1x128xf32>
    %cst_770 = arith.constant 0.000000e+00 : f32
    %2399 = vector.broadcast %cst_770 : f32 to vector<1x128xf32>
    %2400 = arith.maximumf %2399, %2398 : vector<1x128xf32>
    %cst_771 = arith.constant 1.000000e+00 : f32
    %2401 = vector.broadcast %cst_771 : f32 to vector<1x128xf32>
    %2402 = arith.addf %2393, %2401 : vector<1x128xf32>
    %2403 = math.absf %2402 : vector<1x128xf32>
    %cst_772 = arith.constant 1.000000e+00 : f32
    %2404 = vector.broadcast %cst_772 : f32 to vector<1x128xf32>
    %2405 = arith.subf %2404, %2403 : vector<1x128xf32>
    %cst_773 = arith.constant 0.000000e+00 : f32
    %2406 = vector.broadcast %cst_773 : f32 to vector<1x128xf32>
    %2407 = arith.maximumf %2406, %2405 : vector<1x128xf32>
    %cst_774 = arith.constant 2.000000e+00 : f32
    %2408 = vector.broadcast %cst_774 : f32 to vector<1x128xf32>
    %2409 = arith.addf %2393, %2408 : vector<1x128xf32>
    %2410 = math.absf %2409 : vector<1x128xf32>
    %cst_775 = arith.constant 1.000000e+00 : f32
    %2411 = vector.broadcast %cst_775 : f32 to vector<1x128xf32>
    %2412 = arith.subf %2411, %2410 : vector<1x128xf32>
    %cst_776 = arith.constant 0.000000e+00 : f32
    %2413 = vector.broadcast %cst_776 : f32 to vector<1x128xf32>
    %2414 = arith.maximumf %2413, %2412 : vector<1x128xf32>
    %cst_777 = arith.constant 3.000000e+00 : f32
    %2415 = vector.broadcast %cst_777 : f32 to vector<1x128xf32>
    %2416 = arith.addf %2393, %2415 : vector<1x128xf32>
    %2417 = math.absf %2416 : vector<1x128xf32>
    %cst_778 = arith.constant 1.000000e+00 : f32
    %2418 = vector.broadcast %cst_778 : f32 to vector<1x128xf32>
    %2419 = arith.subf %2418, %2417 : vector<1x128xf32>
    %cst_779 = arith.constant 0.000000e+00 : f32
    %2420 = vector.broadcast %cst_779 : f32 to vector<1x128xf32>
    %2421 = arith.maximumf %2420, %2419 : vector<1x128xf32>
    %2422 = vector.extract_strided_slice %2169 {offsets = [0, 0], sizes = [4, 128], strides = [1, 1]} : vector<16x128xf32> to vector<4x128xf32>
    %2423 = vector.broadcast %2400 : vector<1x128xf32> to vector<4x128xf32>
    %2424 = arith.mulf %2422, %2423 : vector<4x128xf32>
    %2425 = vector.extract_strided_slice %2169 {offsets = [4, 0], sizes = [4, 128], strides = [1, 1]} : vector<16x128xf32> to vector<4x128xf32>
    %2426 = vector.broadcast %2407 : vector<1x128xf32> to vector<4x128xf32>
    %2427 = arith.mulf %2425, %2426 : vector<4x128xf32>
    %2428 = arith.addf %2424, %2427 : vector<4x128xf32>
    %2429 = vector.extract_strided_slice %2169 {offsets = [8, 0], sizes = [4, 128], strides = [1, 1]} : vector<16x128xf32> to vector<4x128xf32>
    %2430 = vector.broadcast %2414 : vector<1x128xf32> to vector<4x128xf32>
    %2431 = arith.mulf %2429, %2430 : vector<4x128xf32>
    %2432 = arith.addf %2428, %2431 : vector<4x128xf32>
    %2433 = vector.extract_strided_slice %2169 {offsets = [12, 0], sizes = [4, 128], strides = [1, 1]} : vector<16x128xf32> to vector<4x128xf32>
    %2434 = vector.broadcast %2421 : vector<1x128xf32> to vector<4x128xf32>
    %2435 = arith.mulf %2433, %2434 : vector<4x128xf32>
    %2436 = arith.addf %2432, %2435 : vector<4x128xf32>
    %c6_780 = arith.constant 6 : index
    %c0_781 = arith.constant 0 : index
    %c0_782 = arith.constant 0 : index
    %2437 = vector.load %arg5[%c6_780, %c0_781, %c0_782] : memref<9x8x4xbf16, #tpu.memory_space<vmem>>, vector<1x8x4xbf16>
    %2438 = vector.shape_cast %2437 : vector<1x8x4xbf16> to vector<8x4xbf16>
    %2439 = arith.truncf %2436 : vector<4x128xf32> to vector<4x128xbf16>
    %cst_783 = arith.constant dense<0.000000e+00> : vector<8x128xf32>
    %2440 = tpu.matmul %2438, %2439, %cst_783 {dimension_numbers = #tpu.dot_dimension_numbers<[1], [0], [0], [1], [0, 0, 1, 1], [], []>} : vector<8x4xbf16>, vector<4x128xbf16>, vector<8x128xf32> -> vector<8x128xf32>
    %2441 = arith.addf %2387, %2440 : vector<8x128xf32>
    %2442 = vector.extract_strided_slice %2182 {offsets = [0, 0], sizes = [4, 128], strides = [1, 1]} : vector<16x128xf32> to vector<4x128xf32>
    %2443 = vector.broadcast %2400 : vector<1x128xf32> to vector<4x128xf32>
    %2444 = arith.mulf %2442, %2443 : vector<4x128xf32>
    %2445 = vector.extract_strided_slice %2182 {offsets = [4, 0], sizes = [4, 128], strides = [1, 1]} : vector<16x128xf32> to vector<4x128xf32>
    %2446 = vector.broadcast %2407 : vector<1x128xf32> to vector<4x128xf32>
    %2447 = arith.mulf %2445, %2446 : vector<4x128xf32>
    %2448 = arith.addf %2444, %2447 : vector<4x128xf32>
    %2449 = vector.extract_strided_slice %2182 {offsets = [8, 0], sizes = [4, 128], strides = [1, 1]} : vector<16x128xf32> to vector<4x128xf32>
    %2450 = vector.broadcast %2414 : vector<1x128xf32> to vector<4x128xf32>
    %2451 = arith.mulf %2449, %2450 : vector<4x128xf32>
    %2452 = arith.addf %2448, %2451 : vector<4x128xf32>
    %2453 = vector.extract_strided_slice %2182 {offsets = [12, 0], sizes = [4, 128], strides = [1, 1]} : vector<16x128xf32> to vector<4x128xf32>
    %2454 = vector.broadcast %2421 : vector<1x128xf32> to vector<4x128xf32>
    %2455 = arith.mulf %2453, %2454 : vector<4x128xf32>
    %2456 = arith.addf %2452, %2455 : vector<4x128xf32>
    %c7_784 = arith.constant 7 : index
    %c0_785 = arith.constant 0 : index
    %c0_786 = arith.constant 0 : index
    %2457 = vector.load %arg5[%c7_784, %c0_785, %c0_786] : memref<9x8x4xbf16, #tpu.memory_space<vmem>>, vector<1x8x4xbf16>
    %2458 = vector.shape_cast %2457 : vector<1x8x4xbf16> to vector<8x4xbf16>
    %2459 = arith.truncf %2456 : vector<4x128xf32> to vector<4x128xbf16>
    %cst_787 = arith.constant dense<0.000000e+00> : vector<8x128xf32>
    %2460 = tpu.matmul %2458, %2459, %cst_787 {dimension_numbers = #tpu.dot_dimension_numbers<[1], [0], [0], [1], [0, 0, 1, 1], [], []>} : vector<8x4xbf16>, vector<4x128xbf16>, vector<8x128xf32> -> vector<8x128xf32>
    %2461 = arith.addf %2441, %2460 : vector<8x128xf32>
    %2462 = vector.extract_strided_slice %2195 {offsets = [0, 0], sizes = [4, 128], strides = [1, 1]} : vector<16x128xf32> to vector<4x128xf32>
    %2463 = vector.broadcast %2400 : vector<1x128xf32> to vector<4x128xf32>
    %2464 = arith.mulf %2462, %2463 : vector<4x128xf32>
    %2465 = vector.extract_strided_slice %2195 {offsets = [4, 0], sizes = [4, 128], strides = [1, 1]} : vector<16x128xf32> to vector<4x128xf32>
    %2466 = vector.broadcast %2407 : vector<1x128xf32> to vector<4x128xf32>
    %2467 = arith.mulf %2465, %2466 : vector<4x128xf32>
    %2468 = arith.addf %2464, %2467 : vector<4x128xf32>
    %2469 = vector.extract_strided_slice %2195 {offsets = [8, 0], sizes = [4, 128], strides = [1, 1]} : vector<16x128xf32> to vector<4x128xf32>
    %2470 = vector.broadcast %2414 : vector<1x128xf32> to vector<4x128xf32>
    %2471 = arith.mulf %2469, %2470 : vector<4x128xf32>
    %2472 = arith.addf %2468, %2471 : vector<4x128xf32>
    %2473 = vector.extract_strided_slice %2195 {offsets = [12, 0], sizes = [4, 128], strides = [1, 1]} : vector<16x128xf32> to vector<4x128xf32>
    %2474 = vector.broadcast %2421 : vector<1x128xf32> to vector<4x128xf32>
    %2475 = arith.mulf %2473, %2474 : vector<4x128xf32>
    %2476 = arith.addf %2472, %2475 : vector<4x128xf32>
    %c8_788 = arith.constant 8 : index
    %c0_789 = arith.constant 0 : index
    %c0_790 = arith.constant 0 : index
    %2477 = vector.load %arg5[%c8_788, %c0_789, %c0_790] : memref<9x8x4xbf16, #tpu.memory_space<vmem>>, vector<1x8x4xbf16>
    %2478 = vector.shape_cast %2477 : vector<1x8x4xbf16> to vector<8x4xbf16>
    %2479 = arith.truncf %2476 : vector<4x128xf32> to vector<4x128xbf16>
    %cst_791 = arith.constant dense<0.000000e+00> : vector<8x128xf32>
    %2480 = tpu.matmul %2478, %2479, %cst_791 {dimension_numbers = #tpu.dot_dimension_numbers<[1], [0], [0], [1], [0, 0, 1, 1], [], []>} : vector<8x4xbf16>, vector<4x128xbf16>, vector<8x128xf32> -> vector<8x128xf32>
    %2481 = arith.addf %2461, %2480 : vector<8x128xf32>
    %2482 = vector.broadcast %8 : vector<8x1xf32> to vector<8x128xf32>
    %2483 = arith.addf %2481, %2482 : vector<8x128xf32>
    %c0_792 = arith.constant 0 : index
    %c0_793 = arith.constant 0 : index
    %c6_794 = arith.constant 6 : index
    %c0_795 = arith.constant 0 : index
    %2484 = vector.load %arg7[%c0_792, %c0_793, %c6_794, %c0_795] : memref<1x8x8x128xf32, #tpu.memory_space<vmem>>, vector<1x8x1x128xf32>
    %2485 = vector.shape_cast %2484 : vector<1x8x1x128xf32> to vector<8x128xf32>
    %2486 = vector.shape_cast %2483 : vector<8x128xf32> to vector<1x8x1x128xf32>
    tpu.vector_store %arg7[%c0_792, %c0_793, %c6_794, %c0_795], %2486 {strides = array<i32>} : memref<1x8x8x128xf32, #tpu.memory_space<vmem>>, vector<1x8x1x128xf32>,
    %c7_i32 = arith.constant 7 : i32
    %2487 = arith.addi %0, %c7_i32 : i32
    %c1_i32_796 = arith.constant 1 : i32
    %2488 = arith.muli %2487, %c1_i32_796 : i32
    %c0_i32_797 = arith.constant 0 : i32
    %c14_i32_798 = arith.constant 14 : i32
    %2489 = arith.maxsi %c0_i32_797, %2488 : i32
    %2490 = arith.minsi %c14_i32_798, %2489 : i32
    %c0_i32_799 = arith.constant 0 : i32
    %2491 = arith.addi %2490, %c0_i32_799 : i32
    %c0_800 = arith.constant 0 : index
    %2492 = arith.index_cast %2491 : i32 to index
    %c0_801 = arith.constant 0 : index
    %c0_802 = arith.constant 0 : index
    %2493 = vector.load %arg3[%c0_800, %2492, %c0_801, %c0_802] : memref<1x18x4x18xbf16, #tpu.memory_space<vmem>>, vector<1x1x4x18xbf16>
    %2494 = vector.shape_cast %2493 : vector<1x1x4x18xbf16> to vector<4x18xbf16>
    %c1_i32_803 = arith.constant 1 : i32
    %2495 = arith.addi %2490, %c1_i32_803 : i32
    %c0_804 = arith.constant 0 : index
    %2496 = arith.index_cast %2495 : i32 to index
    %c0_805 = arith.constant 0 : index
    %c0_806 = arith.constant 0 : index
    %2497 = vector.load %arg3[%c0_804, %2496, %c0_805, %c0_806] : memref<1x18x4x18xbf16, #tpu.memory_space<vmem>>, vector<1x1x4x18xbf16>
    %2498 = vector.shape_cast %2497 : vector<1x1x4x18xbf16> to vector<4x18xbf16>
    %c2_i32_807 = arith.constant 2 : i32
    %2499 = arith.addi %2490, %c2_i32_807 : i32
    %c0_808 = arith.constant 0 : index
    %2500 = arith.index_cast %2499 : i32 to index
    %c0_809 = arith.constant 0 : index
    %c0_810 = arith.constant 0 : index
    %2501 = vector.load %arg3[%c0_808, %2500, %c0_809, %c0_810] : memref<1x18x4x18xbf16, #tpu.memory_space<vmem>>, vector<1x1x4x18xbf16>
    %2502 = vector.shape_cast %2501 : vector<1x1x4x18xbf16> to vector<4x18xbf16>
    %c3_i32_811 = arith.constant 3 : i32
    %2503 = arith.addi %2490, %c3_i32_811 : i32
    %c0_812 = arith.constant 0 : index
    %2504 = arith.index_cast %2503 : i32 to index
    %c0_813 = arith.constant 0 : index
    %c0_814 = arith.constant 0 : index
    %2505 = vector.load %arg3[%c0_812, %2504, %c0_813, %c0_814] : memref<1x18x4x18xbf16, #tpu.memory_space<vmem>>, vector<1x1x4x18xbf16>
    %2506 = vector.shape_cast %2505 : vector<1x1x4x18xbf16> to vector<4x18xbf16>
    %2507 = tpu.concatenate %2494, %2498, %2502, %2506 in 0 : vector<4x18xbf16>, vector<4x18xbf16>, vector<4x18xbf16>, vector<4x18xbf16> -> vector<16x18xbf16>
    %c7_815 = arith.constant 7 : index
    %c0_816 = arith.constant 0 : index
    %2508 = vector.load %arg4[%c7_815, %c0_816] : memref<8x128xf32, #tpu.memory_space<vmem>>, vector<1x128xf32>
    %cst_817 = arith.constant 1.000000e+00 : f32
    %2509 = vector.broadcast %cst_817 : f32 to vector<1x128xf32>
    %2510 = arith.mulf %5, %2509 : vector<1x128xf32>
    %cst_818 = arith.constant 0.000000e+00 : f32
    %2511 = vector.broadcast %cst_818 : f32 to vector<1x128xf32>
    %2512 = arith.mulf %2511, %2508 : vector<1x128xf32>
    %2513 = arith.addf %2510, %2512 : vector<1x128xf32>
    %2514 = vector.broadcast %7 : vector<18x1xf32> to vector<18x128xf32>
    %2515 = vector.broadcast %2513 : vector<1x128xf32> to vector<18x128xf32>
    %2516 = arith.subf %2514, %2515 : vector<18x128xf32>
    %2517 = math.absf %2516 : vector<18x128xf32>
    %cst_819 = arith.constant 1.000000e+00 : f32
    %2518 = vector.broadcast %cst_819 : f32 to vector<18x128xf32>
    %2519 = arith.subf %2518, %2517 : vector<18x128xf32>
    %cst_820 = arith.constant 0.000000e+00 : f32
    %2520 = vector.broadcast %cst_820 : f32 to vector<18x128xf32>
    %2521 = arith.maximumf %2520, %2519 : vector<18x128xf32>
    %2522 = arith.truncf %2521 : vector<18x128xf32> to vector<18x128xbf16>
    %cst_821 = arith.constant dense<0.000000e+00> : vector<16x128xf32>
    %2523 = tpu.matmul %2507, %2522, %cst_821 {dimension_numbers = #tpu.dot_dimension_numbers<[1], [0], [0], [1], [0, 0, 1, 1], [], []>} : vector<16x18xbf16>, vector<18x128xbf16>, vector<16x128xf32> -> vector<16x128xf32>
    %cst_822 = arith.constant 1.000000e+00 : f32
    %2524 = vector.broadcast %cst_822 : f32 to vector<1x128xf32>
    %2525 = arith.mulf %2524, %2508 : vector<1x128xf32>
    %2526 = arith.addf %2510, %2525 : vector<1x128xf32>
    %2527 = vector.broadcast %7 : vector<18x1xf32> to vector<18x128xf32>
    %2528 = vector.broadcast %2526 : vector<1x128xf32> to vector<18x128xf32>
    %2529 = arith.subf %2527, %2528 : vector<18x128xf32>
    %2530 = math.absf %2529 : vector<18x128xf32>
    %cst_823 = arith.constant 1.000000e+00 : f32
    %2531 = vector.broadcast %cst_823 : f32 to vector<18x128xf32>
    %2532 = arith.subf %2531, %2530 : vector<18x128xf32>
    %cst_824 = arith.constant 0.000000e+00 : f32
    %2533 = vector.broadcast %cst_824 : f32 to vector<18x128xf32>
    %2534 = arith.maximumf %2533, %2532 : vector<18x128xf32>
    %2535 = arith.truncf %2534 : vector<18x128xf32> to vector<18x128xbf16>
    %cst_825 = arith.constant dense<0.000000e+00> : vector<16x128xf32>
    %2536 = tpu.matmul %2507, %2535, %cst_825 {dimension_numbers = #tpu.dot_dimension_numbers<[1], [0], [0], [1], [0, 0, 1, 1], [], []>} : vector<16x18xbf16>, vector<18x128xbf16>, vector<16x128xf32> -> vector<16x128xf32>
    %cst_826 = arith.constant 2.000000e+00 : f32
    %2537 = vector.broadcast %cst_826 : f32 to vector<1x128xf32>
    %2538 = arith.mulf %2537, %2508 : vector<1x128xf32>
    %2539 = arith.addf %2510, %2538 : vector<1x128xf32>
    %2540 = vector.broadcast %7 : vector<18x1xf32> to vector<18x128xf32>
    %2541 = vector.broadcast %2539 : vector<1x128xf32> to vector<18x128xf32>
    %2542 = arith.subf %2540, %2541 : vector<18x128xf32>
    %2543 = math.absf %2542 : vector<18x128xf32>
    %cst_827 = arith.constant 1.000000e+00 : f32
    %2544 = vector.broadcast %cst_827 : f32 to vector<18x128xf32>
    %2545 = arith.subf %2544, %2543 : vector<18x128xf32>
    %cst_828 = arith.constant 0.000000e+00 : f32
    %2546 = vector.broadcast %cst_828 : f32 to vector<18x128xf32>
    %2547 = arith.maximumf %2546, %2545 : vector<18x128xf32>
    %2548 = arith.truncf %2547 : vector<18x128xf32> to vector<18x128xbf16>
    %cst_829 = arith.constant dense<0.000000e+00> : vector<16x128xf32>
    %2549 = tpu.matmul %2507, %2548, %cst_829 {dimension_numbers = #tpu.dot_dimension_numbers<[1], [0], [0], [1], [0, 0, 1, 1], [], []>} : vector<16x18xbf16>, vector<18x128xbf16>, vector<16x128xf32> -> vector<16x128xf32>
    %c1_i32_830 = arith.constant 1 : i32
    %2550 = arith.muli %2487, %c1_i32_830 : i32
    %2551 = arith.sitofp %2550 : i32 to f32
    %2552 = arith.sitofp %2490 : i32 to f32
    %cst_831 = arith.constant 0.000000e+00 : f32
    %2553 = vector.broadcast %cst_831 : f32 to vector<8x128xf32>
    %cst_832 = arith.constant 0.000000e+00 : f32
    %2554 = vector.broadcast %cst_832 : f32 to vector<1x128xf32>
    %2555 = arith.mulf %2554, %2508 : vector<1x128xf32>
    %2556 = vector.broadcast %2551 : f32 to vector<1x128xf32>
    %2557 = arith.addf %2556, %2555 : vector<1x128xf32>
    %2558 = vector.broadcast %2552 : f32 to vector<1x128xf32>
    %2559 = arith.subf %2558, %2557 : vector<1x128xf32>
    %cst_833 = arith.constant 0.000000e+00 : f32
    %2560 = vector.broadcast %cst_833 : f32 to vector<1x128xf32>
    %2561 = arith.addf %2559, %2560 : vector<1x128xf32>
    %2562 = math.absf %2561 : vector<1x128xf32>
    %cst_834 = arith.constant 1.000000e+00 : f32
    %2563 = vector.broadcast %cst_834 : f32 to vector<1x128xf32>
    %2564 = arith.subf %2563, %2562 : vector<1x128xf32>
    %cst_835 = arith.constant 0.000000e+00 : f32
    %2565 = vector.broadcast %cst_835 : f32 to vector<1x128xf32>
    %2566 = arith.maximumf %2565, %2564 : vector<1x128xf32>
    %cst_836 = arith.constant 1.000000e+00 : f32
    %2567 = vector.broadcast %cst_836 : f32 to vector<1x128xf32>
    %2568 = arith.addf %2559, %2567 : vector<1x128xf32>
    %2569 = math.absf %2568 : vector<1x128xf32>
    %cst_837 = arith.constant 1.000000e+00 : f32
    %2570 = vector.broadcast %cst_837 : f32 to vector<1x128xf32>
    %2571 = arith.subf %2570, %2569 : vector<1x128xf32>
    %cst_838 = arith.constant 0.000000e+00 : f32
    %2572 = vector.broadcast %cst_838 : f32 to vector<1x128xf32>
    %2573 = arith.maximumf %2572, %2571 : vector<1x128xf32>
    %cst_839 = arith.constant 2.000000e+00 : f32
    %2574 = vector.broadcast %cst_839 : f32 to vector<1x128xf32>
    %2575 = arith.addf %2559, %2574 : vector<1x128xf32>
    %2576 = math.absf %2575 : vector<1x128xf32>
    %cst_840 = arith.constant 1.000000e+00 : f32
    %2577 = vector.broadcast %cst_840 : f32 to vector<1x128xf32>
    %2578 = arith.subf %2577, %2576 : vector<1x128xf32>
    %cst_841 = arith.constant 0.000000e+00 : f32
    %2579 = vector.broadcast %cst_841 : f32 to vector<1x128xf32>
    %2580 = arith.maximumf %2579, %2578 : vector<1x128xf32>
    %cst_842 = arith.constant 3.000000e+00 : f32
    %2581 = vector.broadcast %cst_842 : f32 to vector<1x128xf32>
    %2582 = arith.addf %2559, %2581 : vector<1x128xf32>
    %2583 = math.absf %2582 : vector<1x128xf32>
    %cst_843 = arith.constant 1.000000e+00 : f32
    %2584 = vector.broadcast %cst_843 : f32 to vector<1x128xf32>
    %2585 = arith.subf %2584, %2583 : vector<1x128xf32>
    %cst_844 = arith.constant 0.000000e+00 : f32
    %2586 = vector.broadcast %cst_844 : f32 to vector<1x128xf32>
    %2587 = arith.maximumf %2586, %2585 : vector<1x128xf32>
    %2588 = vector.extract_strided_slice %2523 {offsets = [0, 0], sizes = [4, 128], strides = [1, 1]} : vector<16x128xf32> to vector<4x128xf32>
    %2589 = vector.broadcast %2566 : vector<1x128xf32> to vector<4x128xf32>
    %2590 = arith.mulf %2588, %2589 : vector<4x128xf32>
    %2591 = vector.extract_strided_slice %2523 {offsets = [4, 0], sizes = [4, 128], strides = [1, 1]} : vector<16x128xf32> to vector<4x128xf32>
    %2592 = vector.broadcast %2573 : vector<1x128xf32> to vector<4x128xf32>
    %2593 = arith.mulf %2591, %2592 : vector<4x128xf32>
    %2594 = arith.addf %2590, %2593 : vector<4x128xf32>
    %2595 = vector.extract_strided_slice %2523 {offsets = [8, 0], sizes = [4, 128], strides = [1, 1]} : vector<16x128xf32> to vector<4x128xf32>
    %2596 = vector.broadcast %2580 : vector<1x128xf32> to vector<4x128xf32>
    %2597 = arith.mulf %2595, %2596 : vector<4x128xf32>
    %2598 = arith.addf %2594, %2597 : vector<4x128xf32>
    %2599 = vector.extract_strided_slice %2523 {offsets = [12, 0], sizes = [4, 128], strides = [1, 1]} : vector<16x128xf32> to vector<4x128xf32>
    %2600 = vector.broadcast %2587 : vector<1x128xf32> to vector<4x128xf32>
    %2601 = arith.mulf %2599, %2600 : vector<4x128xf32>
    %2602 = arith.addf %2598, %2601 : vector<4x128xf32>
    %c0_845 = arith.constant 0 : index
    %c0_846 = arith.constant 0 : index
    %c0_847 = arith.constant 0 : index
    %2603 = vector.load %arg5[%c0_845, %c0_846, %c0_847] : memref<9x8x4xbf16, #tpu.memory_space<vmem>>, vector<1x8x4xbf16>
    %2604 = vector.shape_cast %2603 : vector<1x8x4xbf16> to vector<8x4xbf16>
    %2605 = arith.truncf %2602 : vector<4x128xf32> to vector<4x128xbf16>
    %cst_848 = arith.constant dense<0.000000e+00> : vector<8x128xf32>
    %2606 = tpu.matmul %2604, %2605, %cst_848 {dimension_numbers = #tpu.dot_dimension_numbers<[1], [0], [0], [1], [0, 0, 1, 1], [], []>} : vector<8x4xbf16>, vector<4x128xbf16>, vector<8x128xf32> -> vector<8x128xf32>
    %2607 = arith.addf %2553, %2606 : vector<8x128xf32>
    %2608 = vector.extract_strided_slice %2536 {offsets = [0, 0], sizes = [4, 128], strides = [1, 1]} : vector<16x128xf32> to vector<4x128xf32>
    %2609 = vector.broadcast %2566 : vector<1x128xf32> to vector<4x128xf32>
    %2610 = arith.mulf %2608, %2609 : vector<4x128xf32>
    %2611 = vector.extract_strided_slice %2536 {offsets = [4, 0], sizes = [4, 128], strides = [1, 1]} : vector<16x128xf32> to vector<4x128xf32>
    %2612 = vector.broadcast %2573 : vector<1x128xf32> to vector<4x128xf32>
    %2613 = arith.mulf %2611, %2612 : vector<4x128xf32>
    %2614 = arith.addf %2610, %2613 : vector<4x128xf32>
    %2615 = vector.extract_strided_slice %2536 {offsets = [8, 0], sizes = [4, 128], strides = [1, 1]} : vector<16x128xf32> to vector<4x128xf32>
    %2616 = vector.broadcast %2580 : vector<1x128xf32> to vector<4x128xf32>
    %2617 = arith.mulf %2615, %2616 : vector<4x128xf32>
    %2618 = arith.addf %2614, %2617 : vector<4x128xf32>
    %2619 = vector.extract_strided_slice %2536 {offsets = [12, 0], sizes = [4, 128], strides = [1, 1]} : vector<16x128xf32> to vector<4x128xf32>
    %2620 = vector.broadcast %2587 : vector<1x128xf32> to vector<4x128xf32>
    %2621 = arith.mulf %2619, %2620 : vector<4x128xf32>
    %2622 = arith.addf %2618, %2621 : vector<4x128xf32>
    %c1_849 = arith.constant 1 : index
    %c0_850 = arith.constant 0 : index
    %c0_851 = arith.constant 0 : index
    %2623 = vector.load %arg5[%c1_849, %c0_850, %c0_851] : memref<9x8x4xbf16, #tpu.memory_space<vmem>>, vector<1x8x4xbf16>
    %2624 = vector.shape_cast %2623 : vector<1x8x4xbf16> to vector<8x4xbf16>
    %2625 = arith.truncf %2622 : vector<4x128xf32> to vector<4x128xbf16>
    %cst_852 = arith.constant dense<0.000000e+00> : vector<8x128xf32>
    %2626 = tpu.matmul %2624, %2625, %cst_852 {dimension_numbers = #tpu.dot_dimension_numbers<[1], [0], [0], [1], [0, 0, 1, 1], [], []>} : vector<8x4xbf16>, vector<4x128xbf16>, vector<8x128xf32> -> vector<8x128xf32>
    %2627 = arith.addf %2607, %2626 : vector<8x128xf32>
    %2628 = vector.extract_strided_slice %2549 {offsets = [0, 0], sizes = [4, 128], strides = [1, 1]} : vector<16x128xf32> to vector<4x128xf32>
    %2629 = vector.broadcast %2566 : vector<1x128xf32> to vector<4x128xf32>
    %2630 = arith.mulf %2628, %2629 : vector<4x128xf32>
    %2631 = vector.extract_strided_slice %2549 {offsets = [4, 0], sizes = [4, 128], strides = [1, 1]} : vector<16x128xf32> to vector<4x128xf32>
    %2632 = vector.broadcast %2573 : vector<1x128xf32> to vector<4x128xf32>
    %2633 = arith.mulf %2631, %2632 : vector<4x128xf32>
    %2634 = arith.addf %2630, %2633 : vector<4x128xf32>
    %2635 = vector.extract_strided_slice %2549 {offsets = [8, 0], sizes = [4, 128], strides = [1, 1]} : vector<16x128xf32> to vector<4x128xf32>
    %2636 = vector.broadcast %2580 : vector<1x128xf32> to vector<4x128xf32>
    %2637 = arith.mulf %2635, %2636 : vector<4x128xf32>
    %2638 = arith.addf %2634, %2637 : vector<4x128xf32>
    %2639 = vector.extract_strided_slice %2549 {offsets = [12, 0], sizes = [4, 128], strides = [1, 1]} : vector<16x128xf32> to vector<4x128xf32>
    %2640 = vector.broadcast %2587 : vector<1x128xf32> to vector<4x128xf32>
    %2641 = arith.mulf %2639, %2640 : vector<4x128xf32>
    %2642 = arith.addf %2638, %2641 : vector<4x128xf32>
    %c2_853 = arith.constant 2 : index
    %c0_854 = arith.constant 0 : index
    %c0_855 = arith.constant 0 : index
    %2643 = vector.load %arg5[%c2_853, %c0_854, %c0_855] : memref<9x8x4xbf16, #tpu.memory_space<vmem>>, vector<1x8x4xbf16>
    %2644 = vector.shape_cast %2643 : vector<1x8x4xbf16> to vector<8x4xbf16>
    %2645 = arith.truncf %2642 : vector<4x128xf32> to vector<4x128xbf16>
    %cst_856 = arith.constant dense<0.000000e+00> : vector<8x128xf32>
    %2646 = tpu.matmul %2644, %2645, %cst_856 {dimension_numbers = #tpu.dot_dimension_numbers<[1], [0], [0], [1], [0, 0, 1, 1], [], []>} : vector<8x4xbf16>, vector<4x128xbf16>, vector<8x128xf32> -> vector<8x128xf32>
    %2647 = arith.addf %2627, %2646 : vector<8x128xf32>
    %cst_857 = arith.constant 1.000000e+00 : f32
    %2648 = vector.broadcast %cst_857 : f32 to vector<1x128xf32>
    %2649 = arith.mulf %2648, %2508 : vector<1x128xf32>
    %2650 = vector.broadcast %2551 : f32 to vector<1x128xf32>
    %2651 = arith.addf %2650, %2649 : vector<1x128xf32>
    %2652 = vector.broadcast %2552 : f32 to vector<1x128xf32>
    %2653 = arith.subf %2652, %2651 : vector<1x128xf32>
    %cst_858 = arith.constant 0.000000e+00 : f32
    %2654 = vector.broadcast %cst_858 : f32 to vector<1x128xf32>
    %2655 = arith.addf %2653, %2654 : vector<1x128xf32>
    %2656 = math.absf %2655 : vector<1x128xf32>
    %cst_859 = arith.constant 1.000000e+00 : f32
    %2657 = vector.broadcast %cst_859 : f32 to vector<1x128xf32>
    %2658 = arith.subf %2657, %2656 : vector<1x128xf32>
    %cst_860 = arith.constant 0.000000e+00 : f32
    %2659 = vector.broadcast %cst_860 : f32 to vector<1x128xf32>
    %2660 = arith.maximumf %2659, %2658 : vector<1x128xf32>
    %cst_861 = arith.constant 1.000000e+00 : f32
    %2661 = vector.broadcast %cst_861 : f32 to vector<1x128xf32>
    %2662 = arith.addf %2653, %2661 : vector<1x128xf32>
    %2663 = math.absf %2662 : vector<1x128xf32>
    %cst_862 = arith.constant 1.000000e+00 : f32
    %2664 = vector.broadcast %cst_862 : f32 to vector<1x128xf32>
    %2665 = arith.subf %2664, %2663 : vector<1x128xf32>
    %cst_863 = arith.constant 0.000000e+00 : f32
    %2666 = vector.broadcast %cst_863 : f32 to vector<1x128xf32>
    %2667 = arith.maximumf %2666, %2665 : vector<1x128xf32>
    %cst_864 = arith.constant 2.000000e+00 : f32
    %2668 = vector.broadcast %cst_864 : f32 to vector<1x128xf32>
    %2669 = arith.addf %2653, %2668 : vector<1x128xf32>
    %2670 = math.absf %2669 : vector<1x128xf32>
    %cst_865 = arith.constant 1.000000e+00 : f32
    %2671 = vector.broadcast %cst_865 : f32 to vector<1x128xf32>
    %2672 = arith.subf %2671, %2670 : vector<1x128xf32>
    %cst_866 = arith.constant 0.000000e+00 : f32
    %2673 = vector.broadcast %cst_866 : f32 to vector<1x128xf32>
    %2674 = arith.maximumf %2673, %2672 : vector<1x128xf32>
    %cst_867 = arith.constant 3.000000e+00 : f32
    %2675 = vector.broadcast %cst_867 : f32 to vector<1x128xf32>
    %2676 = arith.addf %2653, %2675 : vector<1x128xf32>
    %2677 = math.absf %2676 : vector<1x128xf32>
    %cst_868 = arith.constant 1.000000e+00 : f32
    %2678 = vector.broadcast %cst_868 : f32 to vector<1x128xf32>
    %2679 = arith.subf %2678, %2677 : vector<1x128xf32>
    %cst_869 = arith.constant 0.000000e+00 : f32
    %2680 = vector.broadcast %cst_869 : f32 to vector<1x128xf32>
    %2681 = arith.maximumf %2680, %2679 : vector<1x128xf32>
    %2682 = vector.extract_strided_slice %2523 {offsets = [0, 0], sizes = [4, 128], strides = [1, 1]} : vector<16x128xf32> to vector<4x128xf32>
    %2683 = vector.broadcast %2660 : vector<1x128xf32> to vector<4x128xf32>
    %2684 = arith.mulf %2682, %2683 : vector<4x128xf32>
    %2685 = vector.extract_strided_slice %2523 {offsets = [4, 0], sizes = [4, 128], strides = [1, 1]} : vector<16x128xf32> to vector<4x128xf32>
    %2686 = vector.broadcast %2667 : vector<1x128xf32> to vector<4x128xf32>
    %2687 = arith.mulf %2685, %2686 : vector<4x128xf32>
    %2688 = arith.addf %2684, %2687 : vector<4x128xf32>
    %2689 = vector.extract_strided_slice %2523 {offsets = [8, 0], sizes = [4, 128], strides = [1, 1]} : vector<16x128xf32> to vector<4x128xf32>
    %2690 = vector.broadcast %2674 : vector<1x128xf32> to vector<4x128xf32>
    %2691 = arith.mulf %2689, %2690 : vector<4x128xf32>
    %2692 = arith.addf %2688, %2691 : vector<4x128xf32>
    %2693 = vector.extract_strided_slice %2523 {offsets = [12, 0], sizes = [4, 128], strides = [1, 1]} : vector<16x128xf32> to vector<4x128xf32>
    %2694 = vector.broadcast %2681 : vector<1x128xf32> to vector<4x128xf32>
    %2695 = arith.mulf %2693, %2694 : vector<4x128xf32>
    %2696 = arith.addf %2692, %2695 : vector<4x128xf32>
    %c3_870 = arith.constant 3 : index
    %c0_871 = arith.constant 0 : index
    %c0_872 = arith.constant 0 : index
    %2697 = vector.load %arg5[%c3_870, %c0_871, %c0_872] : memref<9x8x4xbf16, #tpu.memory_space<vmem>>, vector<1x8x4xbf16>
    %2698 = vector.shape_cast %2697 : vector<1x8x4xbf16> to vector<8x4xbf16>
    %2699 = arith.truncf %2696 : vector<4x128xf32> to vector<4x128xbf16>
    %cst_873 = arith.constant dense<0.000000e+00> : vector<8x128xf32>
    %2700 = tpu.matmul %2698, %2699, %cst_873 {dimension_numbers = #tpu.dot_dimension_numbers<[1], [0], [0], [1], [0, 0, 1, 1], [], []>} : vector<8x4xbf16>, vector<4x128xbf16>, vector<8x128xf32> -> vector<8x128xf32>
    %2701 = arith.addf %2647, %2700 : vector<8x128xf32>
    %2702 = vector.extract_strided_slice %2536 {offsets = [0, 0], sizes = [4, 128], strides = [1, 1]} : vector<16x128xf32> to vector<4x128xf32>
    %2703 = vector.broadcast %2660 : vector<1x128xf32> to vector<4x128xf32>
    %2704 = arith.mulf %2702, %2703 : vector<4x128xf32>
    %2705 = vector.extract_strided_slice %2536 {offsets = [4, 0], sizes = [4, 128], strides = [1, 1]} : vector<16x128xf32> to vector<4x128xf32>
    %2706 = vector.broadcast %2667 : vector<1x128xf32> to vector<4x128xf32>
    %2707 = arith.mulf %2705, %2706 : vector<4x128xf32>
    %2708 = arith.addf %2704, %2707 : vector<4x128xf32>
    %2709 = vector.extract_strided_slice %2536 {offsets = [8, 0], sizes = [4, 128], strides = [1, 1]} : vector<16x128xf32> to vector<4x128xf32>
    %2710 = vector.broadcast %2674 : vector<1x128xf32> to vector<4x128xf32>
    %2711 = arith.mulf %2709, %2710 : vector<4x128xf32>
    %2712 = arith.addf %2708, %2711 : vector<4x128xf32>
    %2713 = vector.extract_strided_slice %2536 {offsets = [12, 0], sizes = [4, 128], strides = [1, 1]} : vector<16x128xf32> to vector<4x128xf32>
    %2714 = vector.broadcast %2681 : vector<1x128xf32> to vector<4x128xf32>
    %2715 = arith.mulf %2713, %2714 : vector<4x128xf32>
    %2716 = arith.addf %2712, %2715 : vector<4x128xf32>
    %c4_874 = arith.constant 4 : index
    %c0_875 = arith.constant 0 : index
    %c0_876 = arith.constant 0 : index
    %2717 = vector.load %arg5[%c4_874, %c0_875, %c0_876] : memref<9x8x4xbf16, #tpu.memory_space<vmem>>, vector<1x8x4xbf16>
    %2718 = vector.shape_cast %2717 : vector<1x8x4xbf16> to vector<8x4xbf16>
    %2719 = arith.truncf %2716 : vector<4x128xf32> to vector<4x128xbf16>
    %cst_877 = arith.constant dense<0.000000e+00> : vector<8x128xf32>
    %2720 = tpu.matmul %2718, %2719, %cst_877 {dimension_numbers = #tpu.dot_dimension_numbers<[1], [0], [0], [1], [0, 0, 1, 1], [], []>} : vector<8x4xbf16>, vector<4x128xbf16>, vector<8x128xf32> -> vector<8x128xf32>
    %2721 = arith.addf %2701, %2720 : vector<8x128xf32>
    %2722 = vector.extract_strided_slice %2549 {offsets = [0, 0], sizes = [4, 128], strides = [1, 1]} : vector<16x128xf32> to vector<4x128xf32>
    %2723 = vector.broadcast %2660 : vector<1x128xf32> to vector<4x128xf32>
    %2724 = arith.mulf %2722, %2723 : vector<4x128xf32>
    %2725 = vector.extract_strided_slice %2549 {offsets = [4, 0], sizes = [4, 128], strides = [1, 1]} : vector<16x128xf32> to vector<4x128xf32>
    %2726 = vector.broadcast %2667 : vector<1x128xf32> to vector<4x128xf32>
    %2727 = arith.mulf %2725, %2726 : vector<4x128xf32>
    %2728 = arith.addf %2724, %2727 : vector<4x128xf32>
    %2729 = vector.extract_strided_slice %2549 {offsets = [8, 0], sizes = [4, 128], strides = [1, 1]} : vector<16x128xf32> to vector<4x128xf32>
    %2730 = vector.broadcast %2674 : vector<1x128xf32> to vector<4x128xf32>
    %2731 = arith.mulf %2729, %2730 : vector<4x128xf32>
    %2732 = arith.addf %2728, %2731 : vector<4x128xf32>
    %2733 = vector.extract_strided_slice %2549 {offsets = [12, 0], sizes = [4, 128], strides = [1, 1]} : vector<16x128xf32> to vector<4x128xf32>
    %2734 = vector.broadcast %2681 : vector<1x128xf32> to vector<4x128xf32>
    %2735 = arith.mulf %2733, %2734 : vector<4x128xf32>
    %2736 = arith.addf %2732, %2735 : vector<4x128xf32>
    %c5_878 = arith.constant 5 : index
    %c0_879 = arith.constant 0 : index
    %c0_880 = arith.constant 0 : index
    %2737 = vector.load %arg5[%c5_878, %c0_879, %c0_880] : memref<9x8x4xbf16, #tpu.memory_space<vmem>>, vector<1x8x4xbf16>
    %2738 = vector.shape_cast %2737 : vector<1x8x4xbf16> to vector<8x4xbf16>
    %2739 = arith.truncf %2736 : vector<4x128xf32> to vector<4x128xbf16>
    %cst_881 = arith.constant dense<0.000000e+00> : vector<8x128xf32>
    %2740 = tpu.matmul %2738, %2739, %cst_881 {dimension_numbers = #tpu.dot_dimension_numbers<[1], [0], [0], [1], [0, 0, 1, 1], [], []>} : vector<8x4xbf16>, vector<4x128xbf16>, vector<8x128xf32> -> vector<8x128xf32>
    %2741 = arith.addf %2721, %2740 : vector<8x128xf32>
    %cst_882 = arith.constant 2.000000e+00 : f32
    %2742 = vector.broadcast %cst_882 : f32 to vector<1x128xf32>
    %2743 = arith.mulf %2742, %2508 : vector<1x128xf32>
    %2744 = vector.broadcast %2551 : f32 to vector<1x128xf32>
    %2745 = arith.addf %2744, %2743 : vector<1x128xf32>
    %2746 = vector.broadcast %2552 : f32 to vector<1x128xf32>
    %2747 = arith.subf %2746, %2745 : vector<1x128xf32>
    %cst_883 = arith.constant 0.000000e+00 : f32
    %2748 = vector.broadcast %cst_883 : f32 to vector<1x128xf32>
    %2749 = arith.addf %2747, %2748 : vector<1x128xf32>
    %2750 = math.absf %2749 : vector<1x128xf32>
    %cst_884 = arith.constant 1.000000e+00 : f32
    %2751 = vector.broadcast %cst_884 : f32 to vector<1x128xf32>
    %2752 = arith.subf %2751, %2750 : vector<1x128xf32>
    %cst_885 = arith.constant 0.000000e+00 : f32
    %2753 = vector.broadcast %cst_885 : f32 to vector<1x128xf32>
    %2754 = arith.maximumf %2753, %2752 : vector<1x128xf32>
    %cst_886 = arith.constant 1.000000e+00 : f32
    %2755 = vector.broadcast %cst_886 : f32 to vector<1x128xf32>
    %2756 = arith.addf %2747, %2755 : vector<1x128xf32>
    %2757 = math.absf %2756 : vector<1x128xf32>
    %cst_887 = arith.constant 1.000000e+00 : f32
    %2758 = vector.broadcast %cst_887 : f32 to vector<1x128xf32>
    %2759 = arith.subf %2758, %2757 : vector<1x128xf32>
    %cst_888 = arith.constant 0.000000e+00 : f32
    %2760 = vector.broadcast %cst_888 : f32 to vector<1x128xf32>
    %2761 = arith.maximumf %2760, %2759 : vector<1x128xf32>
    %cst_889 = arith.constant 2.000000e+00 : f32
    %2762 = vector.broadcast %cst_889 : f32 to vector<1x128xf32>
    %2763 = arith.addf %2747, %2762 : vector<1x128xf32>
    %2764 = math.absf %2763 : vector<1x128xf32>
    %cst_890 = arith.constant 1.000000e+00 : f32
    %2765 = vector.broadcast %cst_890 : f32 to vector<1x128xf32>
    %2766 = arith.subf %2765, %2764 : vector<1x128xf32>
    %cst_891 = arith.constant 0.000000e+00 : f32
    %2767 = vector.broadcast %cst_891 : f32 to vector<1x128xf32>
    %2768 = arith.maximumf %2767, %2766 : vector<1x128xf32>
    %cst_892 = arith.constant 3.000000e+00 : f32
    %2769 = vector.broadcast %cst_892 : f32 to vector<1x128xf32>
    %2770 = arith.addf %2747, %2769 : vector<1x128xf32>
    %2771 = math.absf %2770 : vector<1x128xf32>
    %cst_893 = arith.constant 1.000000e+00 : f32
    %2772 = vector.broadcast %cst_893 : f32 to vector<1x128xf32>
    %2773 = arith.subf %2772, %2771 : vector<1x128xf32>
    %cst_894 = arith.constant 0.000000e+00 : f32
    %2774 = vector.broadcast %cst_894 : f32 to vector<1x128xf32>
    %2775 = arith.maximumf %2774, %2773 : vector<1x128xf32>
    %2776 = vector.extract_strided_slice %2523 {offsets = [0, 0], sizes = [4, 128], strides = [1, 1]} : vector<16x128xf32> to vector<4x128xf32>
    %2777 = vector.broadcast %2754 : vector<1x128xf32> to vector<4x128xf32>
    %2778 = arith.mulf %2776, %2777 : vector<4x128xf32>
    %2779 = vector.extract_strided_slice %2523 {offsets = [4, 0], sizes = [4, 128], strides = [1, 1]} : vector<16x128xf32> to vector<4x128xf32>
    %2780 = vector.broadcast %2761 : vector<1x128xf32> to vector<4x128xf32>
    %2781 = arith.mulf %2779, %2780 : vector<4x128xf32>
    %2782 = arith.addf %2778, %2781 : vector<4x128xf32>
    %2783 = vector.extract_strided_slice %2523 {offsets = [8, 0], sizes = [4, 128], strides = [1, 1]} : vector<16x128xf32> to vector<4x128xf32>
    %2784 = vector.broadcast %2768 : vector<1x128xf32> to vector<4x128xf32>
    %2785 = arith.mulf %2783, %2784 : vector<4x128xf32>
    %2786 = arith.addf %2782, %2785 : vector<4x128xf32>
    %2787 = vector.extract_strided_slice %2523 {offsets = [12, 0], sizes = [4, 128], strides = [1, 1]} : vector<16x128xf32> to vector<4x128xf32>
    %2788 = vector.broadcast %2775 : vector<1x128xf32> to vector<4x128xf32>
    %2789 = arith.mulf %2787, %2788 : vector<4x128xf32>
    %2790 = arith.addf %2786, %2789 : vector<4x128xf32>
    %c6_895 = arith.constant 6 : index
    %c0_896 = arith.constant 0 : index
    %c0_897 = arith.constant 0 : index
    %2791 = vector.load %arg5[%c6_895, %c0_896, %c0_897] : memref<9x8x4xbf16, #tpu.memory_space<vmem>>, vector<1x8x4xbf16>
    %2792 = vector.shape_cast %2791 : vector<1x8x4xbf16> to vector<8x4xbf16>
    %2793 = arith.truncf %2790 : vector<4x128xf32> to vector<4x128xbf16>
    %cst_898 = arith.constant dense<0.000000e+00> : vector<8x128xf32>
    %2794 = tpu.matmul %2792, %2793, %cst_898 {dimension_numbers = #tpu.dot_dimension_numbers<[1], [0], [0], [1], [0, 0, 1, 1], [], []>} : vector<8x4xbf16>, vector<4x128xbf16>, vector<8x128xf32> -> vector<8x128xf32>
    %2795 = arith.addf %2741, %2794 : vector<8x128xf32>
    %2796 = vector.extract_strided_slice %2536 {offsets = [0, 0], sizes = [4, 128], strides = [1, 1]} : vector<16x128xf32> to vector<4x128xf32>
    %2797 = vector.broadcast %2754 : vector<1x128xf32> to vector<4x128xf32>
    %2798 = arith.mulf %2796, %2797 : vector<4x128xf32>
    %2799 = vector.extract_strided_slice %2536 {offsets = [4, 0], sizes = [4, 128], strides = [1, 1]} : vector<16x128xf32> to vector<4x128xf32>
    %2800 = vector.broadcast %2761 : vector<1x128xf32> to vector<4x128xf32>
    %2801 = arith.mulf %2799, %2800 : vector<4x128xf32>
    %2802 = arith.addf %2798, %2801 : vector<4x128xf32>
    %2803 = vector.extract_strided_slice %2536 {offsets = [8, 0], sizes = [4, 128], strides = [1, 1]} : vector<16x128xf32> to vector<4x128xf32>
    %2804 = vector.broadcast %2768 : vector<1x128xf32> to vector<4x128xf32>
    %2805 = arith.mulf %2803, %2804 : vector<4x128xf32>
    %2806 = arith.addf %2802, %2805 : vector<4x128xf32>
    %2807 = vector.extract_strided_slice %2536 {offsets = [12, 0], sizes = [4, 128], strides = [1, 1]} : vector<16x128xf32> to vector<4x128xf32>
    %2808 = vector.broadcast %2775 : vector<1x128xf32> to vector<4x128xf32>
    %2809 = arith.mulf %2807, %2808 : vector<4x128xf32>
    %2810 = arith.addf %2806, %2809 : vector<4x128xf32>
    %c7_899 = arith.constant 7 : index
    %c0_900 = arith.constant 0 : index
    %c0_901 = arith.constant 0 : index
    %2811 = vector.load %arg5[%c7_899, %c0_900, %c0_901] : memref<9x8x4xbf16, #tpu.memory_space<vmem>>, vector<1x8x4xbf16>
    %2812 = vector.shape_cast %2811 : vector<1x8x4xbf16> to vector<8x4xbf16>
    %2813 = arith.truncf %2810 : vector<4x128xf32> to vector<4x128xbf16>
    %cst_902 = arith.constant dense<0.000000e+00> : vector<8x128xf32>
    %2814 = tpu.matmul %2812, %2813, %cst_902 {dimension_numbers = #tpu.dot_dimension_numbers<[1], [0], [0], [1], [0, 0, 1, 1], [], []>} : vector<8x4xbf16>, vector<4x128xbf16>, vector<8x128xf32> -> vector<8x128xf32>
    %2815 = arith.addf %2795, %2814 : vector<8x128xf32>
    %2816 = vector.extract_strided_slice %2549 {offsets = [0, 0], sizes = [4, 128], strides = [1, 1]} : vector<16x128xf32> to vector<4x128xf32>
    %2817 = vector.broadcast %2754 : vector<1x128xf32> to vector<4x128xf32>
    %2818 = arith.mulf %2816, %2817 : vector<4x128xf32>
    %2819 = vector.extract_strided_slice %2549 {offsets = [4, 0], sizes = [4, 128], strides = [1, 1]} : vector<16x128xf32> to vector<4x128xf32>
    %2820 = vector.broadcast %2761 : vector<1x128xf32> to vector<4x128xf32>
    %2821 = arith.mulf %2819, %2820 : vector<4x128xf32>
    %2822 = arith.addf %2818, %2821 : vector<4x128xf32>
    %2823 = vector.extract_strided_slice %2549 {offsets = [8, 0], sizes = [4, 128], strides = [1, 1]} : vector<16x128xf32> to vector<4x128xf32>
    %2824 = vector.broadcast %2768 : vector<1x128xf32> to vector<4x128xf32>
    %2825 = arith.mulf %2823, %2824 : vector<4x128xf32>
    %2826 = arith.addf %2822, %2825 : vector<4x128xf32>
    %2827 = vector.extract_strided_slice %2549 {offsets = [12, 0], sizes = [4, 128], strides = [1, 1]} : vector<16x128xf32> to vector<4x128xf32>
    %2828 = vector.broadcast %2775 : vector<1x128xf32> to vector<4x128xf32>
    %2829 = arith.mulf %2827, %2828 : vector<4x128xf32>
    %2830 = arith.addf %2826, %2829 : vector<4x128xf32>
    %c8_903 = arith.constant 8 : index
    %c0_904 = arith.constant 0 : index
    %c0_905 = arith.constant 0 : index
    %2831 = vector.load %arg5[%c8_903, %c0_904, %c0_905] : memref<9x8x4xbf16, #tpu.memory_space<vmem>>, vector<1x8x4xbf16>
    %2832 = vector.shape_cast %2831 : vector<1x8x4xbf16> to vector<8x4xbf16>
    %2833 = arith.truncf %2830 : vector<4x128xf32> to vector<4x128xbf16>
    %cst_906 = arith.constant dense<0.000000e+00> : vector<8x128xf32>
    %2834 = tpu.matmul %2832, %2833, %cst_906 {dimension_numbers = #tpu.dot_dimension_numbers<[1], [0], [0], [1], [0, 0, 1, 1], [], []>} : vector<8x4xbf16>, vector<4x128xbf16>, vector<8x128xf32> -> vector<8x128xf32>
    %2835 = arith.addf %2815, %2834 : vector<8x128xf32>
    %2836 = vector.broadcast %8 : vector<8x1xf32> to vector<8x128xf32>
    %2837 = arith.addf %2835, %2836 : vector<8x128xf32>
    %c0_907 = arith.constant 0 : index
    %c0_908 = arith.constant 0 : index
    %c7_909 = arith.constant 7 : index
    %c0_910 = arith.constant 0 : index
    %2838 = vector.load %arg7[%c0_907, %c0_908, %c7_909, %c0_910] : memref<1x8x8x128xf32, #tpu.memory_space<vmem>>, vector<1x8x1x128xf32>
    %2839 = vector.shape_cast %2838 : vector<1x8x1x128xf32> to vector<8x128xf32>
    %2840 = vector.shape_cast %2837 : vector<8x128xf32> to vector<1x8x1x128xf32>
    tpu.vector_store %arg7[%c0_907, %c0_908, %c7_909, %c0_910], %2840 {strides = array<i32>} : memref<1x8x8x128xf32, #tpu.memory_space<vmem>>, vector<1x8x1x128xf32>,
    return
  }
  func.func @transform_0(%arg0: i32, %arg1: i32, %arg2: i32) -> (i32, i32, i32, i32) {
    %c0_i32 = arith.constant 0 : i32
    %c0_i32_0 = arith.constant 0 : i32
    %c0_i32_1 = arith.constant 0 : i32
    %c0_i32_2 = arith.constant 0 : i32
    return %arg0, %c0_i32, %c0_i32_0, %c0_i32_1 : i32, i32, i32, i32
  }
  func.func @transform_1(%arg0: i32, %arg1: i32, %arg2: i32) -> (i32, i32) {
    %c0_i32 = arith.constant 0 : i32
    return %arg1, %arg2 : i32, i32
  }
  func.func @transform_2(%arg0: i32, %arg1: i32, %arg2: i32) -> (i32, i32, i32) {
    %c0_i32 = arith.constant 0 : i32
    %c0_i32_0 = arith.constant 0 : i32
    %c0_i32_1 = arith.constant 0 : i32
    %c0_i32_2 = arith.constant 0 : i32
    return %c0_i32, %c0_i32_0, %c0_i32_1 : i32, i32, i32
  }
  func.func @transform_3(%arg0: i32, %arg1: i32, %arg2: i32) -> (i32, i32) {
    %c0_i32 = arith.constant 0 : i32
    %c0_i32_0 = arith.constant 0 : i32
    %c0_i32_1 = arith.constant 0 : i32
    return %c0_i32, %c0_i32_0 : i32, i32
  }
  func.func @transform_4(%arg0: i32, %arg1: i32, %arg2: i32) -> (i32, i32, i32, i32) {
    %c0_i32 = arith.constant 0 : i32
    %c0_i32_0 = arith.constant 0 : i32
    return %arg0, %c0_i32, %arg1, %arg2 : i32, i32, i32, i32
  }
}

</mosaic_0001>

<bundles_post_ra>
// kernel: tpu_custom_call.1
= control target key start
LH: loop header
LB: loop body
LE: loop exit
PB: predicated region body
PF: predicated region fallthrough
CT: control target
= control target key end

     0   :  { %9 = vsyncpa [#allocation3], 0  ;;  %s7206_s0 = inlined_call_operand.hbm [shape: bf16[2,18,4,18], index: 0, kind: input, shape index: {}]   ;;  %s7207_s1 = inlined_call_operand.vmem [shape: f32[16,128], index: 1, kind: input, shape index: {}]   ;;  %s7208_s2 = inlined_call_operand.vmem [shape: bf16[9,8,4], index: 2, kind: input, shape index: {}]   ;;  %s7209_s3 = inlined_call_operand.vmem [shape: f32[8,1], index: 3, kind: input, shape index: {}]   ;;  %s7210_s4 = inlined_call_operand.hbm [shape: f32[2,8,16,128], index: 4, kind: output, shape index: {}]  }
   0x1   :  { %11 = vsyncpa [#allocation3 + $0x1], 0 }
   0x2   :  { %12 = vsyncpa [#allocation4], 0 }
   0x3   :  { %14 = vsyncpa [#allocation4 + $0x1], 0  ;;  %s5473_s15 = smov 0   ;;  %s5475_s16 = smov 0  }
   0x4   :  { %s5477_s17 = smov 0   ;;  %s5479_s18 = smov 0  }
   0x5   :  { %s5481_s19 = smov 0   ;;  %s5483_s20 = smov 0  }
   0x6   :  { %s5485_s21 = smov 0   ;;  %s5487_s22 = smov 0  }
   0x7   :  { %s5489_s23 = smov 0   ;;  %s5491_s24 = smov 0  }
   0x8   :  { %s5493_s25 = smov 0  }
   0x9 LB: > { %7216 = sst [smem:[#allocation8_spill]] %s5420_s20  ;;  %s4890_s26 = sadd.s32 4294967295, %s5440_s25   ;;  %s5440_s25 = sphi %s5493_s25, %s20_s25   ;;  %s5436_s24 = sphi %s5491_s24, %s7231_s24   ;;  %s5432_s23 = sphi %s5489_s23, %s7230_s23   ;;  %s5428_s22 = sphi %s5487_s22, %s7229_s22   ;;  %s5424_s21 = sphi %s5485_s21, %s7228_s21   ;;  %s5420_s20 = sphi %s5483_s20, %s7227_s20   ;;  %s5416_s19 = sphi %s5481_s19, %s7236_s19   ;;  %s5412_s18 = sphi %s5479_s18, %s7235_s18   ;;  %s5408_s17 = sphi %s5477_s17, %s7234_s17   ;;  %s5404_s16 = sphi %s5475_s16, %s7233_s16   ;;  %s5400_s15 = sphi %s5473_s15, %s7232_s15  }
   0xa   : > { %7217 = sst [smem:[#allocation9_spill]] %s5432_s23  ;;  %s4891_s27 = sadd.s32 4294967294, %s5440_s25  }
   0xb   : > { %7218 = sst [smem:[#allocation10_spill]] %s5436_s24  ;;  %s35_s28 = sadd.s32 1, %s5432_s23 }
   0xc   : > { %s39_s29 = sadd.s32 1, %s5436_s24  ;;  %p37_p0 = scmp.ge.s32.totalorder %s35_s28, 2 }
   0xd   : > { %s46_s30 = sadd.s32 1, %s5420_s20  ;;  %p53_p1 = scmp.ne.s32.totalorder %s5420_s20, %s5416_s19 }
   0xe   : > { %p54_p2 = scmp.eq.s32.totalorder %s5440_s25, 0  ;;  %s7238_s28 = smov (%p37_p0, %s35_s28), 0 }
   0xf   : > { %7219 = sst [smem:[#allocation11_spill]] %s7238_s28  ;;  %s7240_s29 = smov (!%p37_p0, %s39_s29), %s5436_s24 }
  0x10   : > { %p5537_p3 = por %p54_p2, %p53_p1  ;;  %p59_p4 = scmp.ne.s32.totalorder %s5416_s19, %s5412_s18 }
  0x11   : > { %p41_p5 = scmp.ge.s32.totalorder %s7240_s29, 2  ;;  %p60_p6 = scmp.eq.s32.totalorder %s4890_s26, 0 }
  0x12   : > { %s140_s6 = ssub.s32 %s5432_s23, %s7238_s28  ;;  %s146_s7 = sadd.s32 1, %s5408_s17 }
  0x13   : > { %s7242_s29 = smov (%p41_p5, %s7240_s29), 0  ;;  %p5547_p7 = por %p60_p6, %p59_p4 }
  0x14   : > { %7221 = sst [smem:[#allocation12_spill]] %s7242_s29  ;;  %p156_p8 = scmp.ne.s32.totalorder %s5408_s17, %s5404_s16 }
  0x15   : > { %s43_s9 = ssub.s32 %s5436_s24, %s7242_s29  ;;  %p157_p9 = scmp.eq.s32.totalorder %s4890_s26, 3 }
  0x16   : > { %p44_p10 = scmp.eq.s32.totalorder %s43_s9, 0  ;;  %s141_s10 = sor.u32 %s140_s6, %s43_s9 }
  0x17   : > { %p144_p11 = scmp.eq.s32.totalorder %s141_s10, 0  ;;  %p5555_p12 = por %p157_p9, %p156_p8 }
  0x18   : > { %s5560_s12 = scalar_select %p44_p10, %s5420_s20, %s46_s30  }
  0x19   : > { %s5563_s13 = scalar_select %p144_p11, %s5408_s17, %s146_s7  }
  0x1a   : > { %7224 = sst [smem:[#allocation13_spill]] %s5560_s12  ;;  %p162_p13 = scmp.ne.s32.totalorder %s5404_s16, %s5400_s15 }
  0x1b   : > { %p163_p0 = scmp.eq.s32.totalorder %s4891_s27, 3  ;;  %p5191_p1 = scmp.lt.s32.totalorder %s5440_s25, 4 }
  0x1c   : > { %s189_s18 = sand.u32 1, %s5420_s20   ;;  %s5177_s6 = smul.u32 36, %s5436_s24 }
  0x1d   : > { %p5568_p2 = por %p163_p0, %p162_p13  ;;  %s5176_s26 = smul.u32 36, %s189_s18 }
  0x1e   : > { %p5184_p4 = pnand %p5191_p1, %p5537_p3  ;;  %s198_s30 = scalar_lea.hbm %s7206_s0, %s5177_s6 }
  0x1f   : > { %s193_s29 = scalar_lea.vmem [#allocation2], %s5176_s26  ;;  %s199_s28 = sshll.u32 %s198_s30, 4  ;;  %s200_s28 = int_to_ptr.hbm [resolvable:$true] %s199_s28 }
  0x20   : > { %s201_s7 = sshll.u32 %s193_s29, 4  ;;  %p4895_p5 = scmp.ge.s32.totalorder %s5440_s25, 1  ;;  %s202_s7 = int_to_ptr.vmem [resolvable:$true] %s201_s7 }
  0x21   : > { %s190_s27 = scalar_lea.sflag [#allocation3], %s189_s18  ;;  %s5442_s23 = smov 32  }
  0x22   : > { %s5443_s12 = smov 2   ;;  %p219_p6 = scmp.lt.s32.totalorder %s5440_s25, 5 }
  0x23   : > { %5186 = dma.hbm_to_vmem [thread:$0]  (!%p5184_p4), %s200_s28, 576, %s202_s7, %s190_s27, %s5442_s23, %s5442_s23, %s5443_s12  }
  0x24   : > { %p220_p8 = pnand %p4895_p5, %p219_p6 }
  0x25   : > { %s225_s5 = sand.u32 (!%p220_p8), 1, %s5416_s19  }
  0x26   : > { %223 = sbr.rel (%p220_p8) target bundleno = 1704 (0x6a8), region = 36  ;;  %s226_s20 = scalar_lea.sflag (!%p220_p8), [#allocation3], %s225_s5 }
  0x27   : > { %s5178_s24 = smul.u32 (!%p220_p8), 36, %s225_s5 }
  0x29   : > { %s5582_s9 = scalar_lea.vmem (!%p220_p8), [#allocation2], %s5178_s24 }
  0x2b   : > { %5391 = dma.done.wait (%p5547_p7), %s226_s20, 576  }
  0x2c   : > { %5393 = vsyncadd (%p5547_p7), %s226_s20, 4294966720  ;;  %p262_p3 = scmp.lt.s32.totalorder %s5424_s21, 1  ;;  %s5590_s23 = sshll.u32 %s5424_s21, 3  ;;  %v272_v0 = vlaneseq  ;;  %vm344_vm0 = vcmask 1040384   ;;  %vm316_vm1 = vcmask 1041408   ;;  %vm319_vm2 = vcmask 1043456  }
  0x2d   : > { %p285_p9 = scmp.gt.s32.totalorder %s5590_s23, 0  ;;  %p4899_p10 = scmp.lt.s32.totalorder %s5590_s23, 14  ;;  %vm321_vm3 = vcmask 1045504   ;;  %vm341_vm4 = vcmask 146432   ;;  %vm486_vm5 = vcmask 31744  }
  0x2e   : > { %s263_s24 = scalar_select %p262_p3, %s5424_s21, 1  ;;  %v273_v1 = vand.u32 127, %v272_v0  ;;  %v278_v2 = vshrl.u32 %v272_v0, 7 }
  0x2f   : > { %s286_s28 = scalar_select %p285_p9, %s5590_s23, 0 }
  0x30   : > { %s4897_s29 = sshll.u32 %s263_s24, 3  ;;  %v5596_v3 = vcvt.s32.f32 %v273_v1  ;;  %v280_v4 = vadd.s32 16, %v278_v2  ;;  %s429_s20 = scvt.s32.f32 %s5590_s23  ;;  %v279_v5 = vadd.s32 8, %v278_v2  ;;  %v5607_v9 = vcvt.s32.f32 %v278_v2 }
  0x31   : > { %s5602_s18 = scalar_lea.vmem %s7207_s1, %s4897_s29  ;;  %s7244_s28 = smov (!%p4899_p10, %s286_s28), 14 }
  0x32   : > { %v431_v6 = vstv %s429_s20  ;;  %v5604_v7 = vcvt.s32.f32 %v280_v4  ;;  %v323_v8 = vld [vmem:[%s5602_s18] sm:$0x1]  ;;  %s430_s26 = scvt.s32.f32 %s7244_s28  ;;  %s4904_s6 = sshll.u32 %s7244_s28, 1  ;;  %v5610_v14 = vcvt.s32.f32 %v279_v5 }
  0x33   : > { %v324_v10 = vmul.f32 0.0, %v323_v8  ;;  %v561_v11 = vadd.f32 %v431_v6, %v323_v8  ;;  %v362_v12 = vadd.f32 %v323_v8, %v5596_v3  ;;  %v395_v13 = vmul.f32 2.0, %v323_v8  ;;  %s5613_s10 = scalar_lea.vmem %s5582_s9, %s4904_s6 [#allocation2]  ;;  %s5653_s30 = sadd.s32 1, %s5590_s23 }
  0x34   : > { %v433_v17 = vstv %s430_s26  ;;  %v4906_v19 = vld [vmem:[%s5613_s10 + $0x2] sm:$0x3]  ;;  %v4908_v54 = vld [vmem:[%s5613_s10 + $0x4] sm:$0x3]  ;;  %p851_p7 = scmp.gt.s32.totalorder %s5653_s30, 0  ;;  %p4931_p11 = scmp.lt.s32.totalorder %s5653_s30, 14 }
  0x35   : > { %v325_v15 = vadd.f32 %v324_v10, %v5596_v3  ;;  %v432_v16 = vadd.f32 %v431_v6, %v324_v10  ;;  %v363_v18 = vperm.slane %v362_v12, 0  ;;  %v5617_v20 = vsub.f32 %v433_v17, %v561_v11  ;;  %306 = vst [vmem:[#allocation1 + $0x1] ss:$4 sm:$0xff] %v4906_v19  ;;  %s990_s26 = scvt.s32.f32 %s5653_s30 }
  0x36   : > { %v396_v21 = vadd.f32 %v395_v13, %v5596_v3  ;;  %v691_v22 = vadd.f32 %v431_v6, %v395_v13  ;;  %v4910_v13 = vld [vmem:[%s5613_s10 + $0x6] sm:$0x3]  ;;  %s852_s7 = scalar_select %p851_p7, %s5653_s30, 0 }
  0x37   : > { %v326_v23 = vperm.slane %v325_v15, 0  ;;  %v5620_v24 = vsub.f32 %v433_v17, %v432_v16  ;;  %v366_v25 = vsub.f32 %v5604_v7, %v363_v18  ;;  %v364_v26 = vsub.f32 %v5607_v9, %v363_v18  ;;  %v291_v15 = vld [vmem:[%s5613_s10] sm:$0x3] }
  0x38   : > { %v397_v27 = vperm.slane %v396_v21, 0  ;;  %v5624_v28 = vsub.f32 %v433_v17, %v691_v22  ;;  %v365_v29 = vsub.f32 %v5610_v14, %v363_v18  ;;  %s7246_s7 = smov (!%p4931_p11, %s852_s7), 14 }
  0x39   : > { %v329_v30 = vsub.f32 %v5604_v7, %v326_v23  ;;  %v369_v31 = vand.u32 2147483647, %v366_v25  ;;  %v327_v32 = vsub.f32 %v5607_v9, %v326_v23  ;;  %v328_v33 = vsub.f32 %v5610_v14, %v326_v23  ;;  %s4936_s27 = sshll.u32 %s7246_s7, 1  ;;  %s991_s6 = scvt.s32.f32 %s7246_s7 }
  0x3a   : > { %v400_v34 = vsub.f32 %v5604_v7, %v397_v27  ;;  %v367_v35 = vand.u32 2147483647, %v364_v26  ;;  %v368_v36 = vand.u32 2147483647, %v365_v29  ;;  %v398_v37 = vsub.f32 %v5607_v9, %v397_v27  ;;  %s5687_s5 = scalar_lea.vmem %s5582_s9, %s4936_s27 [#allocation2]  ;;  %s259_s7 = sand.u32 1, %s5404_s16  }
  0x3b   : > { %v332_v38 = vand.u32 2147483647, %v329_v30  ;;  %v372_v39 = vsub.f32 1.0, %v369_v31  ;;  %v330_v40 = vand.u32 2147483647, %v327_v32  ;;  %v399_v41 = vsub.f32 %v5610_v14, %v397_v27  ;;  %s5883_s24 = sshll.u32 %s259_s7, 6 }
  0x3c   : > { %v403_v42 = vand.u32 2147483647, %v400_v34  ;;  %v331_v43 = vand.u32 2147483647, %v328_v33  ;;  %v370_v44 = vsub.f32 1.0, %v367_v35  ;;  %v371_v45 = vsub.f32 1.0, %v368_v36 }
  0x3d   : > { %v335_v46 = vsub.f32 1.0, %v332_v38  ;;  %v375_v47 = vmax.f32 %v372_v39, 0.0  ;;  %v333_v48 = vsub.f32 1.0, %v330_v40  ;;  %v401_v49 = vand.u32 2147483647, %v398_v37  ;;  %s5902_s28 = scalar_lea.vmem [#allocation5], %s5883_s24 }
  0x3e   : > { %v406_v50 = vsub.f32 1.0, %v403_v42  ;;  %v334_v51 = vsub.f32 1.0, %v331_v43  ;;  %v373_v52 = vmax.f32 %v370_v44, 0.0  ;;  %v374_v53 = vmax.f32 %v371_v45, 0.0 }
  0x3f   : > { %v338_v55 = vmax.f32 %v335_v46, 0.0  ;;  %v377_v56 = vpack.c.bf16 %v375_v47, %v375_v47  ;;  %v336_v57 = vmax.f32 %v333_v48, 0.0  ;;  %v402_v58 = vand.u32 2147483647, %v399_v41 }
  0x40   : > { %v409_v59 = vmax.f32 %v406_v50, 0.0  ;;  %v337_v60 = vmax.f32 %v334_v51, 0.0  ;;  %v404_v61 = vsub.f32 1.0, %v401_v49  ;;  %v307_v62 = vld.sshfl [vmem:[#allocation1] sm:$0xff pattern:$0x73625140]  ;;  %v376_v4 = vpack.c.bf16 %v374_v53, %v373_v52 }
  0x41   : > { %v340_v63 = vpack.c.bf16 %v338_v55, %v338_v55  ;;  %v379_v0 = vsel %vm344_vm0, %v377_v56, 0  ;;  %v405_v1 = vsub.f32 1.0, %v402_v58  ;;  %310 = vst [vmem:[#allocation1 + $0x2] ss:$4 sm:$0xff] %v4908_v54  ;;  %v318_v17 = vsel %vm316_vm1, %v291_v15, %v307_v62 }
  0x42   : > { %387 = vmatpush.bf16.msra.mxu1 %v379_v0  ;;  %v411_v2 = vpack.c.bf16 %v409_v59, %v409_v59  ;;  %v407_v5 = vmax.f32 %v404_v61, 0.0  ;;  %v339_v11 = vpack.c.bf16 %v337_v60, %v336_v57  ;;  %v697_v22 = vadd.f32 1.0, %v5624_v28 }
  0x43   : > { %v346_v6 = vsel %vm344_vm0, %v340_v63, 0  ;;  %v408_v8 = vmax.f32 %v405_v1, 0.0  ;;  %v439_v23 = vadd.f32 1.0, %v5620_v24  ;;  %v567_v25 = vadd.f32 1.0, %v5617_v20 }
  0x44   : > { %354 = vmatpush.bf16.msra.mxu0 %v346_v6  ;;  %v413_v10 = vsel %vm344_vm0, %v411_v2, 0  ;;  %v443_v26 = vadd.f32 2.0, %v5620_v24  ;;  %v447_v27 = vadd.f32 3.0, %v5620_v24  ;;  %v698_v29 = vand.u32 2147483647, %v697_v22 }
  0x45   : > { %421 = vmatpush.bf16.msra.mxu2 %v413_v10  ;;  %v410_v12 = vpack.c.bf16 %v408_v8, %v407_v5  ;;  %v571_v30 = vadd.f32 2.0, %v5617_v20  ;;  %v694_v31 = vand.u32 2147483647, %v5624_v28  ;;  %v440_v32 = vand.u32 2147483647, %v439_v23 }
  0x46   : > { %388 = vmatpush.bf16.msra.mxu1 %v376_v4  ;;  %v564_v33 = vand.u32 2147483647, %v5617_v20  ;;  %v568_v34 = vand.u32 2147483647, %v567_v25  ;;  %v436_v35 = vand.u32 2147483647, %v5620_v24 }
  0x47   : > { %v444_v36 = vand.u32 2147483647, %v443_v26  ;;  %v448_v37 = vand.u32 2147483647, %v447_v27  ;;  %v575_v38 = vadd.f32 3.0, %v5617_v20  ;;  %v701_v39 = vadd.f32 2.0, %v5624_v28 }
  0x48   : > { %355 = vmatpush.bf16.msra.mxu0 %v339_v11  ;;  %v311_v16 = vld.sshfl [vmem:[#allocation1] sm:$0xff pattern:$0x73625140]  ;;  %v699_v40 = vsub.f32 1.0, %v698_v29  ;;  %v572_v41 = vand.u32 2147483647, %v571_v30 }
  0x49   : > { %422 = vmatpush.bf16.msra.mxu2 %v410_v12  ;;  %314 = vst [vmem:[#allocation1 + $0x3] ss:$4 sm:$0xff] %v4910_v13  ;;  %v320_v18 = vsel %vm319_vm2, %v318_v17, %v311_v16  ;;  %v705_v42 = vadd.f32 3.0, %v5624_v28  ;;  %v695_v43 = vsub.f32 1.0, %v694_v31  ;;  %v441_v44 = vsub.f32 1.0, %v440_v32 }
  0x4a   : > { %v565_v45 = vsub.f32 1.0, %v564_v33  ;;  %v569_v46 = vsub.f32 1.0, %v568_v34  ;;  %v437_v47 = vsub.f32 1.0, %v436_v35  ;;  %v445_v48 = vsub.f32 1.0, %v444_v36 }
  0x4b   : > { %v449_v24 = vsub.f32 1.0, %v448_v37  ;;  %v576_v49 = vand.u32 2147483647, %v575_v38  ;;  %v702_v50 = vand.u32 2147483647, %v701_v39  ;;  %v700_v51 = vmax.f32 %v699_v40, 0.0 }
  0x4c   : > { %v573_v20 = vsub.f32 1.0, %v572_v41  ;;  %v706_v52 = vand.u32 2147483647, %v705_v42  ;;  %v696_v53 = vmax.f32 %v695_v43, 0.0  ;;  %v442_v54 = vmax.f32 %v441_v44, 0.0 }
  0x4d   : > { %v566_v55 = vmax.f32 %v565_v45, 0.0  ;;  %v570_v28 = vmax.f32 %v569_v46, 0.0  ;;  %v438_v56 = vmax.f32 %v437_v47, 0.0  ;;  %v446_v57 = vmax.f32 %v445_v48, 0.0 }
  0x4e   : > { %v450_v58 = vmax.f32 %v449_v24, 0.0  ;;  %v577_v59 = vsub.f32 1.0, %v576_v49  ;;  %v703_v60 = vsub.f32 1.0, %v702_v50  ;;  %v711_v61 = vperm.slane %v700_v51, 0 }
  0x4f   : > { %v574_v62 = vmax.f32 %v573_v20, 0.0  ;;  %v707_v63 = vsub.f32 1.0, %v706_v52  ;;  %v709_v0 = vperm.slane %v696_v53, 0  ;;  %v5663_v1 = vperm.slane %v442_v54, 0 }
  0x50   : > { %v315_v19 = vld.sshfl [vmem:[#allocation1] sm:$0xff pattern:$0x73625140]  ;;  %v579_v2 = vperm.slane %v566_v55, 0  ;;  %v581_v4 = vperm.slane %v570_v28, 0  ;;  %v5665_v5 = vperm.slane %v438_v56, 0 }
  0x51   : > { %v322_v21 = vsel %vm321_vm3, %v320_v18, %v315_v19  ;;  %v5669_v10 = vperm.slane %v446_v57, 0  ;;  %v5671_v11 = vperm.slane %v450_v58, 0  ;;  %v578_v12 = vmax.f32 %v577_v59, 0.0  ;;  %v4938_v55 = vld [vmem:[%s5687_s5 + $0x2] sm:$0x3] }
  0x52   : > { %4911 = vmatmul.msk.bf16.vlgmr.msra.gmra.mxu0 %vm341_vm4, %v322_v21  ;;  %4912 = vmatmul.msk.bf16.vlgmr.msra.gmra.mxu1 %vm341_vm4, %v322_v21  ;;  %v704_v13 = vmax.f32 %v703_v60, 0.0  ;;  %v5673_v17 = vperm.slane %v574_v62, 0  ;;  %v708_v18 = vmax.f32 %v707_v63, 0.0  ;;  %872 = vst [vmem:[#allocation1 + $0x1] ss:$4 sm:$0xff] %v4938_v55 }
  0x53   : > { %4913 = vmatmul.msk.bf16.vlgmr.msra.gmra.mxu2 %vm341_vm4, %v322_v21  ;;  %v5679_v34 = vperm.slane %v578_v12, 0 }
  0x54   : > { %v5681_v37 = vperm.slane %v704_v13, 0  ;;  %v5683_v39 = vperm.slane %v708_v18, 0 }
  0xcf   : > { %v357_v6 = vpop.f32.mrf.mxu0  ;;  %v390_v8 = vpop.f32.mrf.mxu1 }
  0xd0   : > { %v712_v15 = vmul.f32 %v711_v61, %v357_v6  ;;  %v750_v16 = vmul.f32 %v711_v61, %v390_v8  ;;  %v710_v19 = vmul.f32 %v709_v0, %v357_v6  ;;  %v749_v21 = vmul.f32 %v709_v0, %v390_v8 }
  0xd1   : > { %v471_v22 = vmul.f32 %v5663_v1, %v390_v8  ;;  %v582_v23 = vmul.f32 %v581_v4, %v357_v6  ;;  %v470_v25 = vmul.f32 %v5665_v5, %v390_v8  ;;  %v580_v26 = vmul.f32 %v579_v2, %v357_v6 }
  0xd2   : > { %v620_v27 = vmul.f32 %v581_v4, %v390_v8  ;;  %v752_v29 = vrot.slane %v750_v16, 4  ;;  %v454_v32 = vmul.f32 %v5663_v1, %v357_v6  ;;  %v714_v33 = vrot.slane %v712_v15, 4 }
  0xd3   : > { %v473_v30 = vrot.slane %v471_v22, 4  ;;  %v584_v31 = vrot.slane %v582_v23, 4  ;;  %v619_v35 = vmul.f32 %v579_v2, %v390_v8  ;;  %v452_v41 = vmul.f32 %v5665_v5, %v357_v6 }
  0xd4   : > { %v622_v36 = vrot.slane %v620_v27, 4  ;;  %v754_v40 = vadd.f32 %v752_v29, %v749_v21  ;;  %v456_v45 = vrot.slane %v454_v32, 4  ;;  %v5689_v46 = vadd.f32 %v714_v33, %v710_v19  ;;  %v4914_v32 = vld [vmem:[%s7208_s2 + $0x4] sm:$0xf] }
  0xd5   : > { %v475_v38 = vadd.f32 %v473_v30, %v470_v25  ;;  %v586_v43 = vadd.f32 %v584_v31, %v580_v26 }
  0xd6   : > { %v424_v42 = vpop.f32.mrf.mxu2  ;;  %v624_v44 = vadd.f32 %v622_v36, %v619_v35  ;;  %v458_v18 = vadd.f32 %v456_v45, %v452_v41  ;;  %v4940_v36 = vld [vmem:[%s5687_s5 + $0x4] sm:$0x3] }
  0xd7   : > { %v5691_v47 = vmul.f32 %v579_v2, %v424_v42  ;;  %v5693_v48 = vmul.f32 %v581_v4, %v424_v42  ;;  %v5695_v24 = vmul.f32 %v709_v0, %v424_v42  ;;  %v5697_v49 = vmul.f32 %v711_v61, %v424_v42  ;;  %v359_v50 = vpop.f32.mrf.mxu0  ;;  %v392_v51 = vpop.f32.mrf.mxu1 }
  0xd8   : > { %v476_v20 = vmul.f32 %v5669_v10, %v392_v51  ;;  %v478_v52 = vmul.f32 %v5671_v11, %v392_v51  ;;  %v588_v53 = vmul.f32 %v5673_v17, %v359_v50  ;;  %v591_v54 = vmul.f32 %v5679_v34, %v359_v50 }
  0xd9   : > { %v625_v28 = vmul.f32 %v5673_v17, %v392_v51  ;;  %v627_v56 = vmul.f32 %v5679_v34, %v392_v51  ;;  %v755_v57 = vmul.f32 %v5681_v37, %v392_v51  ;;  %v757_v58 = vmul.f32 %v5683_v39, %v392_v51  ;;  %v4921_v51 = vld [vmem:[%s7208_s2 + $0x10] sm:$0xf] }
  0xda   : > { %v477_v59 = vadd.f32 %v476_v20, %v475_v38  ;;  %v480_v60 = vrot.slane %v478_v52, 4  ;;  %v589_v61 = vadd.f32 %v588_v53, %v586_v43  ;;  %v593_v62 = vrot.slane %v591_v54, 4  ;;  %v5731_v20 = vld.sshfl [vmem:[#allocation1] sm:$0xff pattern:$0x73625140] }
  0xdb   : > { %v626_v63 = vadd.f32 %v625_v28, %v624_v44  ;;  %v629_v0 = vrot.slane %v627_v56, 4  ;;  %v756_v2 = vadd.f32 %v755_v57, %v754_v40  ;;  %v759_v4 = vrot.slane %v757_v58, 4  ;;  %876 = vst [vmem:[#allocation1 + $0x2] ss:$4 sm:$0xff] %v4940_v36  ;;  %v886_v57 = vld [vmem:[%s5602_s18 + $0x1] sm:$0x1] }
  0xdc   : > { %v482_v6 = vadd.f32 %v480_v60, %v477_v59  ;;  %v595_v8 = vadd.f32 %v593_v62, %v589_v61  ;;  %v525_v12 = vmul.f32 %v5665_v5, %v424_v42  ;;  %v526_v13 = vmul.f32 %v5663_v1, %v424_v42 }
  0xdd   : > { %v631_v15 = vadd.f32 %v629_v0, %v626_v63  ;;  %v761_v16 = vadd.f32 %v759_v4, %v756_v2  ;;  %v460_v19 = vmul.f32 %v5669_v10, %v359_v50  ;;  %v463_v26 = vmul.f32 %v5671_v11, %v359_v50 }
  0xde   : > { %v426_v21 = vpop.f32.mrf.mxu2  ;;  %v485_v22 = vpack.c.bf16 %v482_v6, %v482_v6  ;;  %v598_v23 = vpack.c.bf16 %v595_v8, %v595_v8  ;;  %v528_v25 = vrot.slane %v526_v13, 4  ;;  %v718_v43 = vmul.f32 %v5681_v37, %v359_v50  ;;  %v4942_v6 = vld [vmem:[%s5687_s5 + $0x6] sm:$0x3]  ;;  %v4917_v8 = vld [vmem:[%s7208_s2 + $0x8] sm:$0xf] }
  0xdf   : > { %v634_v27 = vpack.c.bf16 %v631_v15, %v631_v15  ;;  %v764_v29 = vpack.c.bf16 %v761_v16, %v761_v16  ;;  %v531_v30 = vmul.f32 %v5669_v10, %v426_v21  ;;  %v533_v5 = vmul.f32 %v5671_v11, %v426_v21  ;;  %v4919_v11 = vld [vmem:[%s7208_s2 + $0xc] sm:$0xf] }
  0xe0   : > { %v491_v1 = vsel %vm316_vm1, %v485_v22, 0  ;;  %v603_v31 = vsel %vm316_vm1, %v598_v23, 0  ;;  %v530_v33 = vadd.f32 %v528_v25, %v525_v12  ;;  %v461_v35 = vadd.f32 %v460_v19, %v458_v18 }
  0xe1   : > { %500 = vmatpush.bf16.msra.mxu3 %v491_v1  ;;  %612 = vmatpush.bf16.msrb.mxu1 %v603_v31  ;;  %v639_v38 = vsel %vm316_vm1, %v634_v27, 0  ;;  %v769_v40 = vsel %vm316_vm1, %v764_v29, 0  ;;  %v535_v10 = vrot.slane %v533_v5, 4  ;;  %v465_v41 = vrot.slane %v463_v26, 4 }
  0xe2   : > { %648 = vmatpush.bf16.msrb.mxu2 %v639_v38  ;;  %v532_v42 = vadd.f32 %v531_v30, %v530_v33  ;;  %v721_v44 = vmul.f32 %v5683_v39, %v359_v50  ;;  %v658_v45 = vrot.slane %v5693_v48, 4  ;;  %v661_v53 = vmul.f32 %v5673_v17, %v426_v21  ;;  %v5756_v22 = vld.sshfl [vmem:[#allocation1] sm:$0xff pattern:$0x73625140] }
  0xe3   : > { %v467_v52 = vadd.f32 %v465_v41, %v461_v35  ;;  %v663_v54 = vmul.f32 %v5679_v34, %v426_v21  ;;  %v788_v55 = vrot.slane %v5697_v49, 4  ;;  %v719_v48 = vadd.f32 %v718_v43, %v5689_v46  ;;  %880 = vst [vmem:[#allocation1 + $0x3] ss:$4 sm:$0xff] %v4942_v6 }
  0xe4   : > { %4915 = vmatmul.msk.bf16.vlgmr.msra.gmra.mxu3 %vm486_vm5, %v4914_v32  ;;  %v537_v50 = vadd.f32 %v535_v10, %v532_v42  ;;  %v723_v28 = vrot.slane %v721_v44, 4  ;;  %4920 = vmatmul.msk.bf16.vlgmr.msrb.gmra.mxu1 %vm486_vm5, %v4919_v11  ;;  %v660_v56 = vadd.f32 %v658_v45, %v5691_v47  ;;  %v791_v34 = vmul.f32 %v5681_v37, %v426_v21  ;;  %v468_v42 = vld [vmem:[%s7208_s2] sm:$0xf] }
  0xe5   : > { %778 = vmatpush.bf16.msra.mxu1 %v769_v40  ;;  %v469_v58 = vpack.c.bf16 %v467_v52, %v467_v52  ;;  %v665_v17 = vrot.slane %v663_v54, 4  ;;  %v790_v59 = vadd.f32 %v788_v55, %v5695_v24  ;;  %4922 = vmatmul.msk.bf16.vlgmr.msrb.gmra.mxu2 %vm486_vm5, %v4921_v51  ;;  %v793_v61 = vmul.f32 %v5683_v39, %v426_v21  ;;  %v4927_v52 = vld [vmem:[%s7208_s2 + $0x1c] sm:$0xf] }
  0xe6   : > { %v540_v49 = vpack.c.bf16 %v537_v50, %v537_v50  ;;  %v725_v60 = vadd.f32 %v723_v28, %v719_v48  ;;  %v662_v46 = vadd.f32 %v661_v53, %v660_v56  ;;  %v923_v63 = vadd.f32 %v886_v57, %v5596_v3  ;;  %v4929_v48 = vld [vmem:[%s7208_s2 + $0x20] sm:$0xf] }
  0xe7   : > { %v510_v62 = vsel %vm316_vm1, %v469_v58, 0  ;;  %v792_v47 = vadd.f32 %v791_v34, %v790_v59  ;;  %v887_v0 = vmul.f32 0.0, %v886_v57  ;;  %v795_v4 = vrot.slane %v793_v61, 4 }
  0xe8   : > { %v545_v24 = vsel %vm316_vm1, %v540_v49, 0  ;;  %519 = vmatpush.bf16.msrb.mxu3 %v510_v62  ;;  %v728_v37 = vpack.c.bf16 %v725_v60, %v725_v60  ;;  %v667_v2 = vadd.f32 %v665_v17, %v662_v46  ;;  %v924_v12 = vperm.slane %v923_v63, 0 }
  0xe9   : > { %554 = vmatpush.bf16.msrb.mxu0 %v545_v24  ;;  %v888_v39 = vadd.f32 %v887_v0, %v5596_v3  ;;  %v992_v13 = vstv %s990_s26  ;;  %v994_v15 = vstv %s991_s6  ;;  %v797_v19 = vadd.f32 %v795_v4, %v792_v47 }
  0xea   : > { %v733_v16 = vsel %vm316_vm1, %v728_v37, 0  ;;  %v670_v18 = vpack.c.bf16 %v667_v2, %v667_v2  ;;  %v993_v21 = vadd.f32 %v992_v13, %v887_v0  ;;  %v927_v23 = vsub.f32 %v5604_v7, %v924_v12  ;;  %v284_v0 = vld [vmem:[%s7209_s3] sm:$0xff] }
  0xeb   : > { %v889_v25 = vperm.slane %v888_v39, 0  ;;  %v1119_v26 = vadd.f32 %v992_v13, %v886_v57  ;;  %v925_v27 = vsub.f32 %v5607_v9, %v924_v12  ;;  %v800_v30 = vpack.c.bf16 %v797_v19, %v797_v19 }
  0xec   : > { %4918 = vmatmul.msk.bf16.vlgmr.msrb.gmra.mxu0 %vm486_vm5, %v4917_v8  ;;  %v675_v29 = vsel %vm316_vm1, %v670_v18, 0  ;;  %v5762_v5 = vsub.f32 %v994_v15, %v993_v21  ;;  %v926_v1 = vsub.f32 %v5610_v14, %v924_v12  ;;  %v930_v31 = vand.u32 2147483647, %v927_v23 }
  0xed   : > { %742 = vmatpush.bf16.msra.mxu0 %v733_v16  ;;  %684 = vmatpush.bf16.msra.mxu3 %v675_v29  ;;  %v892_v32 = vsub.f32 %v5604_v7, %v889_v25  ;;  %v5766_v33 = vsub.f32 %v994_v15, %v1119_v26  ;;  %v928_v35 = vand.u32 2147483647, %v925_v27  ;;  %v805_v36 = vsel %vm316_vm1, %v800_v30, 0  ;;  %v4925_v16 = vld [vmem:[%s7208_s2 + $0x18] sm:$0xf] }
  0xee   : > { %v929_v38 = vand.u32 2147483647, %v926_v1  ;;  %v956_v40 = vmul.f32 2.0, %v886_v57  ;;  %814 = vmatpush.bf16.msra.mxu2 %v805_v36  ;;  %v933_v10 = vsub.f32 1.0, %v930_v31  ;;  %v890_v51 = vsub.f32 %v5607_v9, %v889_v25  ;;  %v857_v27 = vld [vmem:[%s5687_s5] sm:$0x3] }
  0xef   : > { %v895_v41 = vand.u32 2147483647, %v892_v32  ;;  %v931_v11 = vsub.f32 1.0, %v928_v35  ;;  %v891_v50 = vsub.f32 %v5610_v14, %v889_v25  ;;  %v5444_v12 = vmov 0   ;;  %v4923_v31 = vld [vmem:[%s7208_s2 + $0x14] sm:$0xf] }
  0xf0   : > { %v932_v43 = vsub.f32 1.0, %v929_v38  ;;  %v957_v44 = vadd.f32 %v956_v40, %v5596_v3  ;;  %v1246_v45 = vadd.f32 %v992_v13, %v956_v40  ;;  %v936_v53 = vmax.f32 %v933_v10, 0.0  ;;  %5287 = vset.pattern.permute.xlu0 %v5444_v12  ;;  %v881_v32 = vld.sshfl [vmem:[#allocation1] sm:$0xff pattern:$0x73625140]  ;;  %s5835_s5 = sadd.s32 2, %s5590_s23 }
  0xf1   : > { %v898_v54 = vsub.f32 1.0, %v895_v41  ;;  %v934_v55 = vmax.f32 %v931_v11, 0.0  ;;  %v893_v59 = vand.u32 2147483647, %v890_v51  ;;  %v894_v60 = vand.u32 2147483647, %v891_v50  ;;  %823 = vperm.xlu0 %5287, %v284_v0   ;;  %s1537_s10 = scvt.s32.f32 %s5835_s5 }
  0xf2   : > { %v935_v28 = vmax.f32 %v932_v43, 0.0  ;;  %v958_v56 = vperm.slane %v957_v44, 0  ;;  %v5781_v57 = vsub.f32 %v994_v15, %v1246_v45  ;;  %v938_v58 = vpack.c.bf16 %v936_v53, %v936_v53  ;;  %p1398_p13 = scmp.gt.s32.totalorder %s5835_s5, 0  ;;  %p4963_p0 = scmp.lt.s32.totalorder %s5835_s5, 14 }
  0xf3   : > { %v901_v17 = vmax.f32 %v898_v54, 0.0  ;;  %v896_v47 = vsub.f32 1.0, %v893_v59  ;;  %v897_v37 = vsub.f32 1.0, %v894_v60  ;;  %v883_v30 = vsel %vm316_vm1, %v857_v27, %v5731_v20 }
  0xf4   : > { %4916 = vmatmul.msk.bf16.vlgmr.msrb.gmra.mxu3 %vm486_vm5, %v468_v42  ;;  %4928 = vmatmul.msk.bf16.vlgmr.msra.gmra.mxu1 %vm486_vm5, %v4927_v52  ;;  %v937_v34 = vpack.c.bf16 %v935_v28, %v934_v55  ;;  %v961_v49 = vsub.f32 %v5604_v7, %v958_v56  ;;  %v959_v46 = vsub.f32 %v5607_v9, %v958_v56  ;;  %v940_v61 = vsel %vm344_vm0, %v938_v58, 0  ;;  %s1399_s27 = scalar_select %p1398_p13, %s5835_s5, 0 }
  0xf5   : > { %4930 = vmatmul.msk.bf16.vlgmr.msra.gmra.mxu2 %vm486_vm5, %v4929_v48  ;;  %v903_v62 = vpack.c.bf16 %v901_v17, %v901_v17  ;;  %v960_v63 = vsub.f32 %v5610_v14, %v958_v56  ;;  %948 = vmatpush.bf16.msrb.mxu0 %v940_v61  ;;  %v899_v6 = vmax.f32 %v896_v47, 0.0  ;;  %v900_v13 = vmax.f32 %v897_v37, 0.0 }
  0xf6   : > { %v964_v24 = vand.u32 2147483647, %v961_v49  ;;  %v962_v2 = vand.u32 2147483647, %v959_v46  ;;  %v884_v35 = vsel %vm319_vm2, %v883_v30, %v5756_v22  ;;  %v1000_v44 = vadd.f32 1.0, %v5762_v5  ;;  %s7248_s27 = smov (!%p4963_p0, %s1399_s27), 14 }
  0xf7   : > { %v907_v4 = vsel %vm344_vm0, %v903_v62, 0  ;;  %v963_v8 = vand.u32 2147483647, %v960_v63  ;;  %v902_v21 = vpack.c.bf16 %v900_v13, %v899_v6  ;;  %v885_v36 = vsel %vm321_vm3, %v884_v35, %v881_v32  ;;  %s4968_s29 = sshll.u32 %s7248_s27, 1  ;;  %s1538_s30 = scvt.s32.f32 %s7248_s27 }
  0xf8   : > { %915 = vmatpush.bf16.msrb.mxu3 %v907_v4  ;;  %v967_v39 = vsub.f32 1.0, %v964_v24  ;;  %v965_v15 = vsub.f32 1.0, %v962_v2  ;;  %v1001_v45 = vand.u32 2147483647, %v1000_v44  ;;  %v1125_v51 = vadd.f32 1.0, %v5766_v33  ;;  %s5913_s20 = scalar_lea.vmem %s5582_s9, %s4968_s29 [#allocation2]  ;;  %s6037_s29 = sadd.s32 3, %s5590_s23 }
  0xf9   : > { %v966_v18 = vsub.f32 1.0, %v963_v8  ;;  %949 = vmatpush.bf16.msrb.mxu0 %v937_v34  ;;  %v997_v52 = vand.u32 2147483647, %v5762_v5  ;;  %v1122_v53 = vand.u32 2147483647, %v5766_v33  ;;  %v1252_v55 = vadd.f32 1.0, %v5781_v57 }
  0xfa   : > { %v970_v19 = vmax.f32 %v967_v39, 0.0  ;;  %v968_v23 = vmax.f32 %v965_v15, 0.0  ;;  %v1004_v50 = vadd.f32 2.0, %v5762_v5  ;;  %v1008_v48 = vadd.f32 3.0, %v5762_v5  ;;  %p1945_p1 = scmp.gt.s32.totalorder %s6037_s29, 0  ;;  %p4995_p4 = scmp.lt.s32.totalorder %s6037_s29, 14 }
  0xfb   : > { %v969_v25 = vmax.f32 %v966_v18, 0.0  ;;  %v1249_v56 = vand.u32 2147483647, %v5781_v57  ;;  %v1002_v59 = vsub.f32 1.0, %v1001_v45  ;;  %v1126_v34 = vand.u32 2147483647, %v1125_v51 }
  0xfc   : > { %4926 = vmatmul.msk.bf16.vlgmr.msra.gmra.mxu0 %vm486_vm5, %v4925_v16  ;;  %v972_v26 = vpack.c.bf16 %v970_v19, %v970_v19  ;;  %916 = vmatpush.bf16.msrb.mxu3 %v902_v21  ;;  %v998_v60 = vsub.f32 1.0, %v997_v52  ;;  %v1123_v46 = vsub.f32 1.0, %v1122_v53  ;;  %v1253_v61 = vand.u32 2147483647, %v1252_v55  ;;  %s1946_s8 = scalar_select %p1945_p1, %s6037_s29, 0 }
  0xfd   : > { %v971_v1 = vpack.c.bf16 %v969_v25, %v968_v23  ;;  %v1005_v62 = vand.u32 2147483647, %v1004_v50  ;;  %v1009_v47 = vand.u32 2147483647, %v1008_v48  ;;  %v1250_v63 = vsub.f32 1.0, %v1249_v56 }
  0xfe   : > { %v974_v29 = vsel %vm344_vm0, %v972_v26, 0  ;;  %v1129_v0 = vadd.f32 2.0, %v5766_v33  ;;  %v1133_v5 = vadd.f32 3.0, %v5766_v33  ;;  %v1256_v24 = vadd.f32 2.0, %v5781_v57  ;;  %s7250_s8 = smov (!%p4995_p4, %s1946_s8), 14 }
  0xff   : > { %982 = vmatpush.bf16.msrb.mxu1 %v974_v29  ;;  %v1003_v37 = vmax.f32 %v1002_v59, 0.0  ;;  %v1127_v2 = vsub.f32 1.0, %v1126_v34  ;;  %v1260_v4 = vadd.f32 3.0, %v5781_v57  ;;  %v1254_v15 = vsub.f32 1.0, %v1253_v61  ;;  %s5000_s12 = sshll.u32 %s7250_s8, 1  ;;  %s2085_s27 = scvt.s32.f32 %s7250_s8 }
 0x100   : > { %v1130_v8 = vand.u32 2147483647, %v1129_v0  ;;  %v1134_v12 = vand.u32 2147483647, %v1133_v5  ;;  %v1257_v39 = vand.u32 2147483647, %v1256_v24 }
 0x101   : > { %v1006_v16 = vsub.f32 1.0, %v1005_v62  ;;  %v1010_v18 = vsub.f32 1.0, %v1009_v47  ;;  %v1261_v19 = vand.u32 2147483647, %v1260_v4  ;;  %v999_v21 = vmax.f32 %v998_v60, 0.0 }
 0x102   : > { %v1124_v23 = vmax.f32 %v1123_v46, 0.0  ;;  %v1251_v25 = vmax.f32 %v1250_v63, 0.0  ;;  %v1128_v27 = vmax.f32 %v1127_v2, 0.0  ;;  %v1131_v29 = vsub.f32 1.0, %v1130_v8 }
 0x103   : > { %983 = vmatpush.bf16.msrb.mxu1 %v971_v1  ;;  %v1135_v30 = vsub.f32 1.0, %v1134_v12  ;;  %v1258_v1 = vsub.f32 1.0, %v1257_v39  ;;  %v1262_v32 = vsub.f32 1.0, %v1261_v19  ;;  %v1255_v35 = vmax.f32 %v1254_v15, 0.0 }
 0x104   : > { %4924 = vmatmul.msk.bf16.vlgmr.msra.gmra.mxu3 %vm486_vm5, %v4923_v31  ;;  %v5832_v31 = vperm.slane %v1003_v37, 0  ;;  %v1132_v44 = vmax.f32 %v1131_v29, 0.0 }
 0x105   : > { %v1136_v45 = vmax.f32 %v1135_v30, 0.0  ;;  %v1259_v51 = vmax.f32 %v1258_v1, 0.0  ;;  %v1263_v55 = vmax.f32 %v1262_v32, 0.0  ;;  %v5849_v48 = vperm.slane %v1255_v35, 0 }
 0x106   : > { %4945 = vmatmul.msk.bf16.vlgmr.msrb.gmra.mxu1 %vm341_vm4, %v885_v36  ;;  %v5860_v61 = vperm.slane %v1132_v44, 0 }
 0x107   : > { %v5862_v62 = vperm.slane %v1136_v45, 0  ;;  %v5864_v47 = vperm.slane %v1259_v51, 0  ;;  %v5871_v24 = vperm.slane %v1263_v55, 0 }
 0x10c   : > { %4944 = vmatmul.msk.bf16.vlgmr.msrb.gmra.mxu0 %vm341_vm4, %v885_v36 }
 0x114   : > { %4943 = vmatmul.msk.bf16.vlgmr.msrb.gmra.mxu3 %vm341_vm4, %v885_v36 }
 0x161   : > { %v614_v20 = vpop.f32.mrf.mxu1 }
 0x163   : > { %v5887_v15 = vpop.permute.xlu0 %823 }
 0x167   : > { %v502_v38 = vpop.f32.mrf.mxu3 }
 0x168   : > { %v5812_v40 = vpop.f32.mrf.mxu2 }
 0x169   : > { %v556_v10 = vpop.f32.mrf.mxu0  ;;  %v616_v41 = vpop.f32.mrf.mxu1 }
 0x16a   : > { %v5837_v41 = vperm.slane %v999_v21, 0 }
 0x16f   : > { %v504_v11 = vpop.f32.mrf.mxu3 }
 0x170   : > { %v652_v42 = vpop.f32.mrf.mxu2  ;;  %v5839_v11 = vperm.slane %v1124_v23, 0 }
 0x171   : > { %v558_v22 = vpop.f32.mrf.mxu0  ;;  %v5814_v43 = vpop.f32.mrf.mxu1  ;;  %v5841_v42 = vperm.slane %v1251_v25, 0 }
 0x177   : > { %v521_v54 = vpop.f32.mrf.mxu3 }
 0x178   : > { %v5823_v28 = vpop.f32.mrf.mxu2  ;;  %v522_v49 = vadd.f32 %v521_v54, %v502_v38  ;;  %v1007_v38 = vmax.f32 %v1006_v16, 0.0 }
 0x179   : > { %v5826_v58 = vpop.f32.mrf.mxu0  ;;  %v782_v17 = vpop.f32.mrf.mxu1 }
 0x17a   : > { %v560_v6 = vadd.f32 %v556_v10, %v522_v49  ;;  %v1011_v10 = vmax.f32 %v1010_v18, 0.0  ;;  %v5851_v56 = vperm.slane %v1007_v38, 0 }
 0x17c   : > { %v618_v57 = vadd.f32 %v614_v20, %v560_v6  ;;  %v5844_v20 = vperm.slane %v1128_v27, 0  ;;  %v5853_v17 = vperm.slane %v1011_v10, 0 }
 0x17e   : > { %v654_v52 = vadd.f32 %v5812_v40, %v618_v57 }
 0x17f   : > { %v523_v13 = vpop.f32.mrf.mxu3 }
 0x180   : > { %v818_v33 = vpop.f32.mrf.mxu2 }
 0x181   : > { %v746_v26 = vpop.f32.mrf.mxu0 }
 0x183   : > { %v985_v36 = vpop.f32.mrf.mxu1 }
 0x184   : > { %v1085_v22 = vmul.f32 %v5832_v31, %v985_v36  ;;  %v1084_v53 = vmul.f32 %v5837_v41, %v985_v36  ;;  %v1211_v34 = vmul.f32 %v5839_v11, %v985_v36  ;;  %v1212_v40 = vmul.f32 %v5844_v20, %v985_v36 }
 0x185   : > { %v1338_v49 = vmul.f32 %v5841_v42, %v985_v36  ;;  %v1339_v46 = vmul.f32 %v5849_v48, %v985_v36 }
 0x186   : > { %v1087_v54 = vrot.slane %v1085_v22, 4  ;;  %v1214_v18 = vrot.slane %v1212_v40, 4 }
 0x187   : > { %v686_v50 = vpop.f32.mrf.mxu3  ;;  %v1341_v1 = vrot.slane %v1339_v46, 4 }
 0x188   : > { %v690_v59 = vadd.f32 %v686_v50, %v654_v52  ;;  %v1089_v5 = vadd.f32 %v1087_v54, %v1084_v53  ;;  %v1216_v30 = vadd.f32 %v1214_v18, %v1211_v34  ;;  %v4970_v18 = vld [vmem:[%s5913_s20 + $0x2] sm:$0x3] }
 0x189   : > { %v951_v60 = vpop.f32.mrf.mxu0  ;;  %v1343_v10 = vadd.f32 %v1341_v1, %v1338_v49  ;;  %v1433_v1 = vld [vmem:[%s5602_s18 + $0x2] sm:$0x1]  ;;  %1419 = vst [vmem:[#allocation1 + $0x1] ss:$4 sm:$0xff] %v4970_v18 }
 0x18a   : > { %v748_v63 = vadd.f32 %v5826_v58, %v690_v59  ;;  %v1032_v0 = vmul.f32 %v5832_v31, %v951_v60  ;;  %v1031_v37 = vmul.f32 %v5837_v41, %v951_v60  ;;  %v1176_v2 = vmul.f32 %v5839_v11, %v951_v60 }
 0x18b   : > { %v1177_v4 = vmul.f32 %v5844_v20, %v951_v60  ;;  %v5878_v6 = vmul.f32 %v5849_v48, %v951_v60  ;;  %v987_v8 = vpop.f32.mrf.mxu1 }
 0x18c   : > { %v784_v12 = vadd.f32 %v5814_v43, %v748_v63  ;;  %v1034_v58 = vrot.slane %v1032_v0, 4  ;;  %v1090_v39 = vmul.f32 %v5851_v56, %v987_v8  ;;  %v1092_v13 = vmul.f32 %v5853_v17, %v987_v8 }
 0x18d   : > { %v1179_v16 = vrot.slane %v1177_v4, 4  ;;  %v1217_v19 = vmul.f32 %v5860_v61, %v987_v8  ;;  %v1219_v21 = vmul.f32 %v5862_v62, %v987_v8  ;;  %v1303_v43 = vmul.f32 %v5841_v42, %v951_v60 }
 0x18e   : > { %v820_v23 = vadd.f32 %v5823_v28, %v784_v12  ;;  %v1091_v25 = vadd.f32 %v1090_v39, %v1089_v5  ;;  %v1094_v33 = vrot.slane %v1092_v13, 4  ;;  %v1036_v27 = vadd.f32 %v1034_v58, %v1031_v37  ;;  %v4949_v12 = vld [vmem:[%s7208_s2 + $0x8] sm:$0xf] }
 0x18f   : > { %v688_v26 = vpop.f32.mrf.mxu3  ;;  %v1181_v29 = vadd.f32 %v1179_v16, %v1176_v2  ;;  %v1221_v35 = vrot.slane %v1219_v21, 4  ;;  %v1344_v28 = vmul.f32 %v5864_v47, %v987_v8  ;;  %v1218_v38 = vadd.f32 %v1217_v19, %v1216_v30 }
 0x190   : > { %v826_v57 = vadd.f32 %v5887_v15, %v820_v23  ;;  %v1096_v32 = vadd.f32 %v1094_v33, %v1091_v25  ;;  %v1346_v22 = vmul.f32 %v5871_v24, %v987_v8  ;;  %v1306_v44 = vrot.slane %v5878_v6, 4 }
 0x191   : > { %v953_v36 = vpop.f32.mrf.mxu0  ;;  %v1223_v63 = vadd.f32 %v1221_v35, %v1218_v38  ;;  %v1345_v0 = vadd.f32 %v1344_v28, %v1343_v10 }
 0x192   : > { %v828_v45 = vrot.slane %v826_v57, 1  ;;  %v829_v51 = vrot.slane %v826_v57, 2  ;;  %v830_v52 = vrot.slane %v826_v57, 3  ;;  %v831_v53 = vrot.slane %v826_v57, 4  ;;  %842 = vst [vmem:[%s5902_s28] sm:$0x1] %v826_v57 }
 0x193   : > { %v832_v54 = vrot.slane %v826_v57, 5  ;;  %v833_v55 = vrot.slane %v826_v57, 6  ;;  %v834_v50 = vrot.slane %v826_v57, 7  ;;  %v1037_v59 = vmul.f32 %v5851_v56, %v953_v36 }
 0x194   : > { %843 = vst [vmem:[%s5902_s28 + $0x8] sm:$0x1] %v828_v45  ;;  %v1039_v34 = vmul.f32 %v5853_v17, %v953_v36  ;;  %v1098_v40 = vpack.c.bf16 %v1096_v32, %v1096_v32  ;;  %v1182_v49 = vmul.f32 %v5860_v61, %v953_v36  ;;  %v1184_v60 = vmul.f32 %v5862_v62, %v953_v36 }
 0x195   : > { %844 = vst [vmem:[%s5902_s28 + $0x10] sm:$0x1] %v829_v51  ;;  %v1038_v46 = vadd.f32 %v1037_v59, %v1036_v27  ;;  %v1348_v5 = vrot.slane %v1346_v22, 4  ;;  %v1225_v16 = vpack.c.bf16 %v1223_v63, %v1223_v63  ;;  %v1308_v25 = vadd.f32 %v1306_v44, %v1303_v43 }
 0x196   : > { %845 = vst [vmem:[%s5902_s28 + $0x18] sm:$0x1] %v830_v52  ;;  %v1041_v37 = vrot.slane %v1039_v34, 4  ;;  %v1103_v2 = vsel %vm316_vm1, %v1098_v40, 0  ;;  %v1183_v4 = vadd.f32 %v1182_v49, %v1181_v29  ;;  %v1186_v6 = vrot.slane %v1184_v60, 4 }
 0x197   : > { %846 = vst [vmem:[%s5902_s28 + $0x20] sm:$0x1] %v831_v53  ;;  %v918_v8 = vpop.f32.mrf.mxu3  ;;  %1112 = vmatpush.bf16.msra.mxu0 %v1103_v2  ;;  %v1350_v58 = vadd.f32 %v1348_v5, %v1345_v0  ;;  %v1311_v43 = vmul.f32 %v5871_v24, %v953_v36  ;;  %v5938_v38 = vsel %vm316_vm1, %v1225_v16, 0  ;;  %v1434_v52 = vmul.f32 0.0, %v1433_v1  ;;  %v4972_v34 = vld [vmem:[%s5913_s20 + $0x4] sm:$0x3] }
 0x198   : > { %847 = vst [vmem:[%s5902_s28 + $0x28] sm:$0x1] %v832_v54  ;;  %v1015_v39 = vmul.f32 %v5832_v31, %v918_v8  ;;  %v1140_v13 = vmul.f32 %v5844_v20, %v918_v8  ;;  %v1267_v19 = vmul.f32 %v5849_v48, %v918_v8  ;;  %v1043_v21 = vadd.f32 %v1041_v37, %v1038_v46 }
 0x199   : > { %848 = vst [vmem:[%s5902_s28 + $0x30] sm:$0x1] %v833_v55  ;;  %v1188_v23 = vadd.f32 %v1186_v6, %v1183_v4  ;;  %v1352_v27 = vpack.c.bf16 %v1350_v58, %v1350_v58  ;;  %v1309_v20 = vmul.f32 %v5864_v47, %v953_v36  ;;  %v1013_v57 = vmul.f32 %v5837_v41, %v918_v8  ;;  %v4946_v41 = vld [vmem:[%s7208_s2 + $0x4] sm:$0xf] }
 0x19a   : > { %849 = vst [vmem:[%s5902_s28 + $0x38] sm:$0x1] %v834_v50  ;;  %4950 = vmatmul.msk.bf16.vlgmr.msra.gmra.mxu0 %vm486_vm5, %v4949_v12  ;;  %v1017_v33 = vrot.slane %v1015_v39, 4  ;;  %v1142_v26 = vrot.slane %v1140_v13, 4  ;;  %v1045_v29 = vpack.c.bf16 %v1043_v21, %v1043_v21  ;;  %v1269_v30 = vrot.slane %v1267_v19, 4 }
 0x19b   : > { %v1190_v31 = vpack.c.bf16 %v1188_v23, %v1188_v23  ;;  %v1138_v48 = vmul.f32 %v5839_v11, %v918_v8  ;;  %v1265_v32 = vmul.f32 %v5841_v42, %v918_v8  ;;  %v1310_v10 = vadd.f32 %v1309_v20, %v1308_v25 }
 0x19c   : > { %v1050_v35 = vsel %vm316_vm1, %v1045_v29, 0  ;;  %v1019_v11 = vadd.f32 %v1017_v33, %v1013_v57  ;;  %v1313_v42 = vrot.slane %v1311_v43, 4  ;;  %v1470_v36 = vadd.f32 %v1433_v1, %v5596_v3  ;;  %v1029_v29 = vld [vmem:[%s7208_s2] sm:$0xf]  ;;  %v4974_v43 = vld [vmem:[%s5913_s20 + $0x6] sm:$0x3] }
 0x19d   : > { %v1195_v28 = vsel %vm316_vm1, %v1190_v31, 0  ;;  %1059 = vmatpush.bf16.msrb.mxu2 %v1050_v35  ;;  %v1144_v22 = vadd.f32 %v1142_v26, %v1138_v48  ;;  %v1271_v45 = vadd.f32 %v1269_v30, %v1265_v32  ;;  %v1357_v51 = vsel %vm316_vm1, %v1352_v27, 0  ;;  %v4957_v35 = vld [vmem:[%s7208_s2 + $0x18] sm:$0xf] }
 0x19e   : > { %v1503_v53 = vmul.f32 2.0, %v1433_v1  ;;  %v1315_v60 = vadd.f32 %v1313_v42, %v1310_v10  ;;  %v1471_v46 = vperm.slane %v1470_v36, 0  ;;  %v1539_v6 = vstv %s1537_s10  ;;  %s2084_s10 = scvt.s32.f32 %s6037_s29 }
 0x19f   : > { %v920_v44 = vpop.f32.mrf.mxu3  ;;  %v1540_v39 = vadd.f32 %v1539_v6, %v1434_v52  ;;  %v1541_v19 = vstv %s1538_s30  ;;  %v1666_v33 = vadd.f32 %v1539_v6, %v1433_v1  ;;  %v4951_v1 = vld [vmem:[%s7208_s2 + $0xc] sm:$0xf] }
 0x1a0   : > { %v1021_v54 = vmul.f32 %v5851_v56, %v920_v44  ;;  %v1024_v55 = vmul.f32 %v5853_v17, %v920_v44  ;;  %v1146_v50 = vmul.f32 %v5860_v61, %v920_v44  ;;  %v1149_v59 = vmul.f32 %v5862_v62, %v920_v44  ;;  %4947 = vmatmul.msk.bf16.vlgmr.msrb.gmra.mxu2 %vm486_vm5, %v4946_v41  ;;  %v5955_v17 = vld.sshfl [vmem:[#allocation1] sm:$0xff pattern:$0x73625140] }
 0x1a1   : > { %1204 = vmatpush.bf16.msra.mxu2 %v1195_v28  ;;  %v1273_v40 = vmul.f32 %v5864_v47, %v920_v44  ;;  %v1276_v49 = vmul.f32 %v5871_v24, %v920_v44  ;;  %v1317_v37 = vpack.c.bf16 %v1315_v60, %v1315_v60  ;;  %v1474_v2 = vsub.f32 %v5604_v7, %v1471_v46 }
 0x1a2   : > { %v1022_v63 = vadd.f32 %v1021_v54, %v1019_v11  ;;  %v1026_v0 = vrot.slane %v1024_v55, 4  ;;  %v1147_v56 = vadd.f32 %v1146_v50, %v1144_v22  ;;  %v1151_v5 = vrot.slane %v1149_v59, 4  ;;  %1423 = vst [vmem:[#allocation1 + $0x2] ss:$4 sm:$0xff] %v4972_v34  ;;  %v4953_v50 = vld [vmem:[%s7208_s2 + $0x10] sm:$0xf] }
 0x1a3   : > { %v1274_v61 = vadd.f32 %v1273_v40, %v1271_v45  ;;  %v1278_v62 = vrot.slane %v1276_v49, 4  ;;  %v1435_v24 = vadd.f32 %v1434_v52, %v5596_v3  ;;  %v1322_v12 = vsel %vm316_vm1, %v1317_v37, 0 }
 0x1a4   : > { %v1028_v4 = vadd.f32 %v1026_v0, %v1022_v63  ;;  %v1153_v47 = vadd.f32 %v1151_v5, %v1147_v56  ;;  %v1477_v58 = vand.u32 2147483647, %v1474_v2  ;;  %v5960_v25 = vsub.f32 %v1541_v19, %v1540_v39 }
 0x1a5   : > { %1366 = vmatpush.bf16.msrb.mxu2 %v1357_v51  ;;  %v1280_v8 = vadd.f32 %v1278_v62, %v1274_v61  ;;  %v1436_v18 = vperm.slane %v1435_v24, 0  ;;  %v1472_v31 = vsub.f32 %v5607_v9, %v1471_v46  ;;  %v5973_v48 = vsub.f32 %v1541_v19, %v1666_v33  ;;  %v1404_v61 = vld [vmem:[%s5913_s20] sm:$0x3]  ;;  %s6098_s20 = scalar_lea.vmem %s5582_s9, %s5000_s12 [#allocation2] }
 0x1a6   : > { %v1030_v13 = vpack.c.bf16 %v1028_v4, %v1028_v4  ;;  %v1155_v16 = vpack.c.bf16 %v1153_v47, %v1153_v47  ;;  %v1480_v23 = vsub.f32 1.0, %v1477_v58  ;;  %v1473_v32 = vsub.f32 %v5610_v14, %v1471_v46 }
 0x1a7   : > { %v1282_v21 = vpack.c.bf16 %v1280_v8, %v1280_v8  ;;  %v1439_v30 = vsub.f32 %v5604_v7, %v1436_v18  ;;  %v1475_v10 = vand.u32 2147483647, %v1472_v31  ;;  %v1504_v41 = vadd.f32 %v1503_v53, %v5596_v3 }
 0x1a8   : > { %v1069_v26 = vsel %vm316_vm1, %v1030_v13, 0  ;;  %v1160_v27 = vsel %vm316_vm1, %v1155_v16, 0  ;;  %v1483_v57 = vmax.f32 %v1480_v23, 0.0  ;;  %v1793_v11 = vadd.f32 %v1539_v6, %v1503_v53 }
 0x1a9   : > { %1078 = vmatpush.bf16.msra.mxu3 %v1069_v26  ;;  %1169 = vmatpush.bf16.msra.mxu1 %v1160_v27  ;;  %v1287_v20 = vsel %vm316_vm1, %v1282_v21, 0  ;;  %v1442_v28 = vand.u32 2147483647, %v1439_v30  ;;  %v1476_v42 = vand.u32 2147483647, %v1473_v32  ;;  %v1437_v44 = vsub.f32 %v5607_v9, %v1436_v18 }
 0x1aa   : > { %1296 = vmatpush.bf16.msrb.mxu0 %v1287_v20  ;;  %v1485_v22 = vpack.c.bf16 %v1483_v57, %v1483_v57  ;;  %v1424_v36 = vld.sshfl [vmem:[#allocation1] sm:$0xff pattern:$0x73625140]  ;;  %v1478_v45 = vsub.f32 1.0, %v1475_v10  ;;  %v1505_v51 = vperm.slane %v1504_v41, 0  ;;  %v5985_v52 = vsub.f32 %v1541_v19, %v1793_v11 }
 0x1ab   : > { %1427 = vst [vmem:[#allocation1 + $0x3] ss:$4 sm:$0xff] %v4974_v43  ;;  %v1479_v54 = vsub.f32 1.0, %v1476_v42  ;;  %v1438_v55 = vsub.f32 %v5610_v14, %v1436_v18  ;;  %v1440_v49 = vand.u32 2147483647, %v1437_v44  ;;  %v1430_v16 = vsel %vm316_vm1, %v1404_v61, %v5955_v17 }
 0x1ac   : > { %4948 = vmatmul.msk.bf16.vlgmr.msra.gmra.mxu3 %vm486_vm5, %v1029_v29  ;;  %4952 = vmatmul.msk.bf16.vlgmr.msra.gmra.mxu1 %vm486_vm5, %v4951_v1  ;;  %v1487_v53 = vsel %vm344_vm0, %v1485_v22, 0  ;;  %v1481_v34 = vmax.f32 %v1478_v45, 0.0  ;;  %v1508_v40 = vsub.f32 %v5604_v7, %v1505_v51  ;;  %v1506_v63 = vsub.f32 %v5607_v9, %v1505_v51  ;;  %v4955_v29 = vld [vmem:[%s7208_s2 + $0x14] sm:$0xf]  ;;  %v4959_v30 = vld [vmem:[%s7208_s2 + $0x1c] sm:$0xf] }
 0x1ad   : > { %1239 = vmatpush.bf16.msrb.mxu3 %v5938_v38  ;;  %1331 = vmatpush.bf16.msrb.mxu1 %v1322_v12  ;;  %v1445_v38 = vsub.f32 1.0, %v1442_v28  ;;  %v1482_v60 = vmax.f32 %v1479_v54, 0.0  ;;  %v1441_v46 = vand.u32 2147483647, %v1438_v55  ;;  %v1507_v0 = vsub.f32 %v5610_v14, %v1505_v51  ;;  %v4961_v20 = vld [vmem:[%s7208_s2 + $0x20] sm:$0xf] }
 0x1ae   : > { %4958 = vmatmul.msk.bf16.vlgmr.msrb.gmra.mxu0 %vm486_vm5, %v4957_v35  ;;  %v1511_v5 = vand.u32 2147483647, %v1508_v40  ;;  %v1443_v62 = vsub.f32 1.0, %v1440_v49  ;;  %v1509_v4 = vand.u32 2147483647, %v1506_v63  ;;  %v1431_v26 = vsel %vm319_vm2, %v1430_v16, %v1424_v36 }
 0x1af   : > { %1495 = vmatpush.bf16.msra.mxu0 %v1487_v53  ;;  %v1448_v59 = vmax.f32 %v1445_v38, 0.0  ;;  %v1484_v37 = vpack.c.bf16 %v1482_v60, %v1481_v34  ;;  %v1444_v2 = vsub.f32 1.0, %v1441_v46  ;;  %v1510_v47 = vand.u32 2147483647, %v1507_v0 }
 0x1b0   : > { %4954 = vmatmul.msk.bf16.vlgmr.msra.gmra.mxu2 %vm486_vm5, %v4953_v50  ;;  %v1514_v6 = vsub.f32 1.0, %v1511_v5  ;;  %v1446_v8 = vmax.f32 %v1443_v62, 0.0  ;;  %v1512_v58 = vsub.f32 1.0, %v1509_v4  ;;  %v1547_v43 = vadd.f32 1.0, %v5960_v25 }
 0x1b1   : > { %v1450_v56 = vpack.c.bf16 %v1448_v59, %v1448_v59  ;;  %v1447_v12 = vmax.f32 %v1444_v2, 0.0  ;;  %v1513_v39 = vsub.f32 1.0, %v1510_v47  ;;  %v1672_v11 = vadd.f32 1.0, %v5973_v48 }
 0x1b2   : > { %v1517_v13 = vmax.f32 %v1514_v6, 0.0  ;;  %v1515_v19 = vmax.f32 %v1512_v58, 0.0  ;;  %v1428_v33 = vld.sshfl [vmem:[#allocation1] sm:$0xff pattern:$0x73625140]  ;;  %v1551_v44 = vadd.f32 2.0, %v5960_v25 }
 0x1b3   : > { %v1454_v24 = vsel %vm344_vm0, %v1450_v56, 0  ;;  %1496 = vmatpush.bf16.msra.mxu0 %v1484_v37  ;;  %v1449_v18 = vpack.c.bf16 %v1447_v12, %v1446_v8  ;;  %v1516_v21 = vmax.f32 %v1513_v39, 0.0  ;;  %v1432_v31 = vsel %vm321_vm3, %v1431_v26, %v1428_v33 }
 0x1b4   : > { %1462 = vmatpush.bf16.msra.mxu3 %v1454_v24  ;;  %v1519_v23 = vpack.c.bf16 %v1517_v13, %v1517_v13  ;;  %v1548_v10 = vand.u32 2147483647, %v1547_v43  ;;  %v1544_v22 = vand.u32 2147483647, %v5960_v25  ;;  %v1555_v38 = vadd.f32 3.0, %v5960_v25 }
 0x1b5   : > { %v1518_v17 = vpack.c.bf16 %v1516_v21, %v1515_v19  ;;  %v1673_v45 = vand.u32 2147483647, %v1672_v11  ;;  %v1669_v54 = vand.u32 2147483647, %v5973_v48  ;;  %v1552_v34 = vand.u32 2147483647, %v1551_v44 }
 0x1b6   : > { %v1521_v27 = vsel %vm344_vm0, %v1519_v23, 0  ;;  %v1549_v36 = vsub.f32 1.0, %v1548_v10  ;;  %v1545_v53 = vsub.f32 1.0, %v1544_v22  ;;  %v1556_v40 = vand.u32 2147483647, %v1555_v38 }
 0x1b7   : > { %1529 = vmatpush.bf16.msra.mxu1 %v1521_v27  ;;  %v1674_v60 = vsub.f32 1.0, %v1673_v45  ;;  %v1676_v46 = vadd.f32 2.0, %v5973_v48  ;;  %v1670_v0 = vsub.f32 1.0, %v1669_v54  ;;  %v1680_v56 = vadd.f32 3.0, %v5973_v48 }
 0x1b8   : > { %1463 = vmatpush.bf16.msra.mxu3 %v1449_v18  ;;  %v1550_v59 = vmax.f32 %v1549_v36, 0.0  ;;  %v1546_v63 = vmax.f32 %v1545_v53, 0.0  ;;  %v1799_v5 = vadd.f32 1.0, %v5985_v52  ;;  %v1553_v2 = vsub.f32 1.0, %v1552_v34 }
 0x1b9   : > { %v1677_v61 = vand.u32 2147483647, %v1676_v46  ;;  %v1557_v4 = vsub.f32 1.0, %v1556_v40  ;;  %v1681_v47 = vand.u32 2147483647, %v1680_v56  ;;  %v1675_v24 = vmax.f32 %v1674_v60, 0.0 }
 0x1ba   : > { %v6030_v37 = vperm.slane %v1550_v59, 0  ;;  %v1796_v6 = vand.u32 2147483647, %v5985_v52  ;;  %v6033_v12 = vperm.slane %v1546_v63, 0  ;;  %v1671_v58 = vmax.f32 %v1670_v0, 0.0 }
 0x1bb   : > { %1530 = vmatpush.bf16.msra.mxu1 %v1518_v17  ;;  %v1803_v39 = vadd.f32 2.0, %v5985_v52  ;;  %v1800_v16 = vand.u32 2147483647, %v1799_v5  ;;  %v1678_v18 = vsub.f32 1.0, %v1677_v61  ;;  %v1682_v19 = vsub.f32 1.0, %v1681_v47 }
 0x1bc   : > { %4956 = vmatmul.msk.bf16.vlgmr.msrb.gmra.mxu3 %vm486_vm5, %v4955_v29  ;;  %4960 = vmatmul.msk.bf16.vlgmr.msrb.gmra.mxu1 %vm486_vm5, %v4959_v30  ;;  %v1554_v23 = vmax.f32 %v1553_v2, 0.0  ;;  %v1558_v33 = vmax.f32 %v1557_v4, 0.0  ;;  %v1807_v26 = vadd.f32 3.0, %v5985_v52  ;;  %v6041_v29 = vperm.slane %v1675_v24, 0 }
 0x1bd   : > { %v1797_v30 = vsub.f32 1.0, %v1796_v6  ;;  %v1679_v43 = vmax.f32 %v1678_v18, 0.0  ;;  %v1801_v10 = vsub.f32 1.0, %v1800_v16 }
 0x1be   : > { %4976 = vmatmul.msk.bf16.vlgmr.msra.gmra.mxu0 %vm341_vm4, %v1432_v31  ;;  %v6050_v11 = vperm.slane %v1558_v33, 0  ;;  %v1808_v22 = vand.u32 2147483647, %v1807_v26 }
 0x1bf   : > { %v1798_v38 = vmax.f32 %v1797_v30, 0.0  ;;  %v1802_v34 = vmax.f32 %v1801_v10, 0.0 }
 0x1c0   : > { %4962 = vmatmul.msk.bf16.vlgmr.msrb.gmra.mxu2 %vm486_vm5, %v4961_v20  ;;  %v1809_v60 = vsub.f32 1.0, %v1808_v22 }
 0x1c1   : > { %v1811_v47 = vperm.slane %v1798_v38, 0  ;;  %v1813_v24 = vperm.slane %v1802_v34, 0 }
 0x1cc   : > { %4975 = vmatmul.msk.bf16.vlgmr.msra.gmra.mxu3 %vm341_vm4, %v1432_v31  ;;  %4977 = vmatmul.msk.bf16.vlgmr.msra.gmra.mxu1 %vm341_vm4, %v1432_v31  ;;  %v6045_v31 = vperm.slane %v1671_v58, 0  ;;  %v1810_v58 = vmax.f32 %v1809_v60, 0.0 }
 0x217   : > { %v1114_v1 = vpop.f32.mrf.mxu0 }
 0x21f   : > { %v1116_v57 = vpop.f32.mrf.mxu0 }
 0x223   : > { %v1061_v32 = vpop.f32.mrf.mxu2 }
 0x229   : > { %v1171_v35 = vpop.f32.mrf.mxu1 }
 0x22b   : > { %v6020_v28 = vpop.f32.mrf.mxu0  ;;  %v1063_v41 = vpop.f32.mrf.mxu2 }
 0x22c   : > { %v6048_v41 = vperm.slane %v1554_v23, 0 }
 0x22f   : > { %v1080_v42 = vpop.f32.mrf.mxu3 }
 0x230   : > { %v1081_v55 = vadd.f32 %v1080_v42, %v1061_v32 }
 0x231   : > { %v1173_v51 = vpop.f32.mrf.mxu1 }
 0x232   : > { %v1118_v25 = vadd.f32 %v1114_v1, %v1081_v55  ;;  %v1804_v1 = vand.u32 2147483647, %v1803_v39  ;;  %v6060_v55 = vperm.slane %v1679_v43, 0 }
 0x233   : > { %v1300_v50 = vpop.f32.mrf.mxu0  ;;  %v1206_v49 = vpop.f32.mrf.mxu2 }
 0x234   : > { %v1175_v48 = vadd.f32 %v1171_v35, %v1118_v25  ;;  %v1683_v35 = vmax.f32 %v1682_v19, 0.0  ;;  %v1805_v51 = vsub.f32 1.0, %v1804_v1  ;;  %v6085_v1 = vperm.slane %v1810_v58, 0 }
 0x236   : > { %v1210_v57 = vadd.f32 %v1206_v49, %v1175_v48  ;;  %v6062_v50 = vperm.slane %v1683_v35, 0 }
 0x237   : > { %v1082_v62 = vpop.f32.mrf.mxu3 }
 0x238   : > { %v1806_v62 = vmax.f32 %v1805_v51, 0.0 }
 0x239   : > { %v1333_v8 = vpop.f32.mrf.mxu1 }
 0x23b   : > { %v1498_v13 = vpop.f32.mrf.mxu0  ;;  %v1208_v27 = vpop.f32.mrf.mxu2 }
 0x23c   : > { %v1579_v21 = vmul.f32 %v6030_v37, %v1498_v13  ;;  %v1578_v17 = vmul.f32 %v6033_v12, %v1498_v13  ;;  %v1724_v32 = vmul.f32 %v6041_v29, %v1498_v13  ;;  %v1723_v36 = vmul.f32 %v6045_v31, %v1498_v13 }
 0x23d   : > { %v6077_v48 = vmul.f32 %v1811_v47, %v1498_v13  ;;  %v6079_v16 = vmul.f32 %v1813_v24, %v1498_v13  ;;  %v6083_v27 = vperm.slane %v1806_v62, 0 }
 0x23e   : > { %v1581_v20 = vrot.slane %v1579_v21, 4  ;;  %v1726_v59 = vrot.slane %v1724_v32, 4 }
 0x23f   : > { %v1241_v52 = vpop.f32.mrf.mxu3  ;;  %v1853_v51 = vrot.slane %v6079_v16, 4 }
 0x240   : > { %v1245_v42 = vadd.f32 %v1241_v52, %v1210_v57  ;;  %v1583_v45 = vadd.f32 %v1581_v20, %v1578_v17  ;;  %v1728_v0 = vadd.f32 %v1726_v59, %v1723_v36 }
 0x241   : > { %v1335_v44 = vpop.f32.mrf.mxu1 }
 0x242   : > { %v1302_v53 = vadd.f32 %v6020_v28, %v1245_v42  ;;  %v4978_v42 = vld [vmem:[%s7208_s2 + $0x4] sm:$0xf] }
 0x243   : > { %v6058_v54 = vpop.f32.mrf.mxu0  ;;  %v1368_v63 = vpop.f32.mrf.mxu2 }
 0x244   : > { %v1584_v40 = vmul.f32 %v6048_v41, %v6058_v54  ;;  %v1586_v49 = vmul.f32 %v6050_v11, %v6058_v54  ;;  %v1337_v46 = vadd.f32 %v1333_v8, %v1302_v53  ;;  %v1729_v28 = vmul.f32 %v6060_v55, %v6058_v54 }
 0x245   : > { %v1731_v56 = vmul.f32 %v6062_v50, %v6058_v54 }
 0x246   : > { %v1585_v25 = vadd.f32 %v1584_v40, %v1583_v45  ;;  %v1588_v5 = vrot.slane %v1586_v49, 4  ;;  %v1372_v61 = vadd.f32 %v1368_v63, %v1337_v46  ;;  %v1730_v2 = vadd.f32 %v1729_v28, %v1728_v0  ;;  %v5002_v28 = vld [vmem:[%s6098_s20 + $0x2] sm:$0x3] }
 0x247   : > { %v1733_v4 = vrot.slane %v1731_v56, 4  ;;  %v1243_v6 = vpop.f32.mrf.mxu3  ;;  %v6106_v40 = vmul.f32 %v6083_v27, %v6058_v54  ;;  %v6110_v49 = vmul.f32 %v6085_v1, %v6058_v54  ;;  %1966 = vst [vmem:[#allocation1 + $0x1] ss:$4 sm:$0xff] %v5002_v28 }
 0x248   : > { %v1590_v8 = vadd.f32 %v1588_v5, %v1585_v25  ;;  %v1373_v39 = vadd.f32 %v1372_v61, %v5887_v15 }
 0x249   : > { %v1532_v18 = vpop.f32.mrf.mxu1  ;;  %v1735_v21 = vadd.f32 %v1733_v4, %v1730_v2  ;;  %v1860_v54 = vrot.slane %v6110_v49, 4 }
 0x24a   : > { %v1592_v19 = vpack.c.bf16 %v1590_v8, %v1590_v8  ;;  %v1375_v23 = vrot.slane %v1373_v39, 1  ;;  %v1376_v33 = vrot.slane %v1373_v39, 2  ;;  %v1377_v26 = vrot.slane %v1373_v39, 3  ;;  %1389 = vst [vmem:[%s5902_s28 + $0x1] sm:$0x1] %v1373_v39 }
 0x24b   : > { %v1378_v30 = vrot.slane %v1373_v39, 4  ;;  %v1379_v17 = vrot.slane %v1373_v39, 5  ;;  %v1380_v20 = vrot.slane %v1373_v39, 6  ;;  %v1381_v13 = vrot.slane %v1373_v39, 7  ;;  %v1370_v35 = vpop.f32.mrf.mxu2  ;;  %v6128_v39 = vld [vmem:[%s5602_s18 + $0x3] sm:$0x1] }
 0x24c   : > { %1390 = vst [vmem:[%s5902_s28 + $0x9] sm:$0x1] %v1375_v23  ;;  %v1631_v57 = vmul.f32 %v6033_v12, %v1532_v18  ;;  %v1632_v32 = vmul.f32 %v6030_v37, %v1532_v18  ;;  %v1759_v43 = vmul.f32 %v6041_v29, %v1532_v18  ;;  %v1758_v52 = vmul.f32 %v6045_v31, %v1532_v18 }
 0x24d   : > { %1391 = vst [vmem:[%s5902_s28 + $0x11] sm:$0x1] %v1376_v33  ;;  %v1886_v10 = vmul.f32 %v1813_v24, %v1532_v18  ;;  %v1597_v22 = vsel %vm316_vm1, %v1592_v19, 0  ;;  %v1737_v36 = vpack.c.bf16 %v1735_v21, %v1735_v21  ;;  %v1885_v44 = vmul.f32 %v1811_v47, %v1532_v18 }
 0x24e   : > { %1392 = vst [vmem:[%s5902_s28 + $0x19] sm:$0x1] %v1377_v26  ;;  %1606 = vmatpush.bf16.msra.mxu2 %v1597_v22  ;;  %v1634_v38 = vrot.slane %v1632_v32, 4  ;;  %v1761_v45 = vrot.slane %v1759_v43, 4  ;;  %v6136_v32 = vstv %s2084_s10  ;;  %v5004_v22 = vld [vmem:[%s6098_s20 + $0x4] sm:$0x3] }
 0x24f   : > { %1393 = vst [vmem:[%s5902_s28 + $0x21] sm:$0x1] %v1378_v30  ;;  %v1465_v53 = vpop.f32.mrf.mxu3  ;;  %v1742_v59 = vsel %vm316_vm1, %v1737_v36, 0  ;;  %v1888_v34 = vrot.slane %v1886_v10, 4  ;;  %v1855_v30 = vadd.f32 %v1853_v51, %v6077_v48  ;;  %v4981_v48 = vld [vmem:[%s7208_s2 + $0x8] sm:$0xf] }
 0x250   : > { %1394 = vst [vmem:[%s5902_s28 + $0x29] sm:$0x1] %v1379_v17  ;;  %v1560_v60 = vmul.f32 %v6033_v12, %v1465_v53  ;;  %v1562_v46 = vmul.f32 %v6030_v37, %v1465_v53  ;;  %v1685_v63 = vmul.f32 %v6045_v31, %v1465_v53  ;;  %v1687_v0 = vmul.f32 %v6041_v29, %v1465_v53 }
 0x251   : > { %1395 = vst [vmem:[%s5902_s28 + $0x31] sm:$0x1] %v1380_v20  ;;  %v1812_v56 = vmul.f32 %v1811_v47, %v1465_v53  ;;  %v1814_v25 = vmul.f32 %v1813_v24, %v1465_v53  ;;  %v1534_v5 = vpop.f32.mrf.mxu1  ;;  %4979 = vmatmul.msk.bf16.vlgmr.msra.gmra.mxu2 %vm486_vm5, %v4978_v42  ;;  %v1636_v61 = vadd.f32 %v1634_v38, %v1631_v57  ;;  %v1981_v57 = vmul.f32 0.0, %v6128_v39  ;;  %v6149_v53 = vld.sshfl [vmem:[#allocation1] sm:$0xff pattern:$0x73625140] }
 0x252   : > { %1396 = vst [vmem:[%s5902_s28 + $0x39] sm:$0x1] %v1381_v13  ;;  %v1637_v12 = vmul.f32 %v6048_v41, %v1534_v5  ;;  %v1639_v37 = vmul.f32 %v6050_v11, %v1534_v5  ;;  %v1564_v31 = vrot.slane %v1562_v46, 4  ;;  %v1689_v62 = vrot.slane %v1687_v0, 4  ;;  %1751 = vmatpush.bf16.msrb.mxu2 %v1742_v59 }
 0x253   : > { %v1816_v29 = vrot.slane %v1814_v25, 4  ;;  %v1763_v2 = vadd.f32 %v1761_v45, %v1758_v52  ;;  %v1764_v4 = vmul.f32 %v6060_v55, %v1534_v5  ;;  %v1766_v47 = vmul.f32 %v6062_v50, %v1534_v5  ;;  %1970 = vst [vmem:[#allocation1 + $0x2] ss:$4 sm:$0xff] %v5004_v22 }
 0x254   : > { %v1638_v24 = vadd.f32 %v1637_v12, %v1636_v61  ;;  %v1641_v6 = vrot.slane %v1639_v37, 4  ;;  %v1566_v8 = vadd.f32 %v1564_v31, %v1560_v60  ;;  %v1691_v58 = vadd.f32 %v1689_v62, %v1685_v63  ;;  %v4985_v61 = vld [vmem:[%s7208_s2 + $0x10] sm:$0xf] }
 0x255   : > { %v1818_v16 = vadd.f32 %v1816_v29, %v1812_v56  ;;  %v1765_v18 = vadd.f32 %v1764_v4, %v1763_v2  ;;  %v1768_v19 = vrot.slane %v1766_v47, 4  ;;  %v1890_v21 = vadd.f32 %v1888_v34, %v1885_v44  ;;  %v1576_v4 = vld [vmem:[%s7208_s2] sm:$0xf] }
 0x256   : > { %v1643_v23 = vadd.f32 %v1641_v6, %v1638_v24  ;;  %v1891_v33 = vmul.f32 %v6083_v27, %v1534_v5  ;;  %v1893_v26 = vmul.f32 %v6085_v1, %v1534_v5  ;;  %v2017_v13 = vadd.f32 %v6128_v39, %v5596_v3 }
 0x257   : > { %v1467_v17 = vpop.f32.mrf.mxu3  ;;  %v1770_v20 = vadd.f32 %v1768_v19, %v1765_v18  ;;  %v1982_v56 = vadd.f32 %v1981_v57, %v5596_v3  ;;  %v2088_v6 = vstv %s2085_s27 }
 0x258   : > { %v1645_v43 = vpack.c.bf16 %v1643_v23, %v1643_v23  ;;  %v1568_v35 = vmul.f32 %v6048_v41, %v1467_v17  ;;  %v1571_v52 = vmul.f32 %v6050_v11, %v1467_v17  ;;  %v1693_v10 = vmul.f32 %v6060_v55, %v1467_v17 }
 0x259   : > { %v1696_v42 = vmul.f32 %v6062_v50, %v1467_v17  ;;  %v1820_v36 = vmul.f32 %v6083_v27, %v1467_v17  ;;  %v1823_v44 = vmul.f32 %v6085_v1, %v1467_v17  ;;  %v1772_v38 = vpack.c.bf16 %v1770_v20, %v1770_v20 }
 0x25a   : > { %v1650_v45 = vsel %vm316_vm1, %v1645_v43, 0  ;;  %v1569_v41 = vadd.f32 %v1568_v35, %v1566_v8  ;;  %v1573_v51 = vrot.slane %v1571_v52, 4  ;;  %v1694_v11 = vadd.f32 %v1693_v10, %v1691_v58  ;;  %v5006_v8 = vld [vmem:[%s6098_s20 + $0x6] sm:$0x3]  ;;  %v4983_v58 = vld [vmem:[%s7208_s2 + $0xc] sm:$0xf] }
 0x25b   : > { %1659 = vmatpush.bf16.msrb.mxu0 %v1650_v45  ;;  %v1698_v55 = vrot.slane %v1696_v42, 4  ;;  %v1821_v59 = vadd.f32 %v1820_v36, %v1818_v16  ;;  %v1825_v34 = vrot.slane %v1823_v44, 4  ;;  %v1777_v60 = vsel %vm316_vm1, %v1772_v38, 0 }
 0x25c   : > { %v1575_v50 = vadd.f32 %v1573_v51, %v1569_v41  ;;  %v1892_v27 = vadd.f32 %v1891_v33, %v1890_v21  ;;  %v1895_v46 = vrot.slane %v1893_v26, 4  ;;  %v1857_v1 = vadd.f32 %v6106_v40, %v1855_v30  ;;  %v6181_v26 = vld.sshfl [vmem:[#allocation1] sm:$0xff pattern:$0x73625140] }
 0x25d   : > { %v1700_v63 = vadd.f32 %v1698_v55, %v1694_v11  ;;  %v1827_v0 = vadd.f32 %v1825_v34, %v1821_v59  ;;  %v2018_v28 = vperm.slane %v2017_v13, 0  ;;  %v2087_v40 = vadd.f32 %v6136_v32, %v1981_v57  ;;  %1974 = vst [vmem:[#allocation1 + $0x3] ss:$4 sm:$0xff] %v5006_v8 }
 0x25e   : > { %4982 = vmatmul.msk.bf16.vlgmr.msrb.gmra.mxu0 %vm486_vm5, %v4981_v48  ;;  %v1577_v25 = vpack.c.bf16 %v1575_v50, %v1575_v50  ;;  %v1897_v5 = vadd.f32 %v1895_v46, %v1892_v27  ;;  %v1862_v12 = vadd.f32 %v1860_v54, %v1857_v1  ;;  %v1983_v29 = vperm.slane %v1982_v56, 0 }
 0x25f   : > { %v1702_v37 = vpack.c.bf16 %v1700_v63, %v1700_v63  ;;  %v1829_v31 = vpack.c.bf16 %v1827_v0, %v1827_v0  ;;  %v2021_v62 = vsub.f32 %v5604_v7, %v2018_v28  ;;  %v6177_v23 = vsub.f32 %v2088_v6, %v2087_v40  ;;  %v4989_v0 = vld [vmem:[%s7208_s2 + $0x18] sm:$0xf] }
 0x260   : > { %v1616_v2 = vsel %vm316_vm1, %v1577_v25, 0  ;;  %v1899_v47 = vpack.c.bf16 %v1897_v5, %v1897_v5  ;;  %v1864_v24 = vpack.c.bf16 %v1862_v12, %v1862_v12  ;;  %v1986_v18 = vsub.f32 %v5604_v7, %v1983_v29 }
 0x261   : > { %1625 = vmatpush.bf16.msrb.mxu3 %v1616_v2  ;;  %v1707_v49 = vsel %vm316_vm1, %v1702_v37, 0  ;;  %v1834_v54 = vsel %vm316_vm1, %v1829_v31, 0  ;;  %4986 = vmatmul.msk.bf16.vlgmr.msrb.gmra.mxu2 %vm486_vm5, %v4985_v61  ;;  %v2024_v16 = vand.u32 2147483647, %v2021_v62  ;;  %v2213_v33 = vadd.f32 %v6136_v32, %v6128_v39  ;;  %v4993_v31 = vld [vmem:[%s7208_s2 + $0x20] sm:$0xf] }
 0x262   : > { %1716 = vmatpush.bf16.msrb.mxu1 %v1707_v49  ;;  %1843 = vmatpush.bf16.msra.mxu0 %v1834_v54  ;;  %v1904_v19 = vsel %vm316_vm1, %v1899_v47, 0  ;;  %v1869_v21 = vsel %vm316_vm1, %v1864_v24, 0  ;;  %v1989_v17 = vand.u32 2147483647, %v1986_v18  ;;  %v2019_v20 = vsub.f32 %v5607_v9, %v2018_v28  ;;  %v4987_v24 = vld [vmem:[%s7208_s2 + $0x14] sm:$0xf] }
 0x263   : > { %1913 = vmatpush.bf16.msra.mxu2 %v1904_v19  ;;  %v2027_v30 = vsub.f32 1.0, %v2024_v16  ;;  %v2020_v13 = vsub.f32 %v5610_v14, %v2018_v28  ;;  %v6186_v57 = vsub.f32 %v2088_v6, %v2213_v33  ;;  %v2050_v43 = vmul.f32 2.0, %v6128_v39  ;;  %v1951_v49 = vld [vmem:[%s6098_s20] sm:$0x3]  ;;  %s6239_s20 = sadd.s32 4, %s5590_s23 }
 0x264   : > { %4980 = vmatmul.msk.bf16.vlgmr.msrb.gmra.mxu3 %vm486_vm5, %v1576_v4  ;;  %v1984_v35 = vsub.f32 %v5607_v9, %v1983_v29  ;;  %v1992_v10 = vsub.f32 1.0, %v1989_v17  ;;  %v2022_v22 = vand.u32 2147483647, %v2019_v20  ;;  %v1985_v44 = vsub.f32 %v5610_v14, %v1983_v29  ;;  %p2492_p5 = scmp.gt.s32.totalorder %s6239_s20, 0  ;;  %p5027_p6 = scmp.lt.s32.totalorder %s6239_s20, 14 }
 0x265   : > { %1786 = vmatpush.bf16.msra.mxu3 %v1777_v60  ;;  %4984 = vmatmul.msk.bf16.vlgmr.msrb.gmra.mxu1 %vm486_vm5, %v4983_v58  ;;  %v2030_v52 = vmax.f32 %v2027_v30, 0.0  ;;  %v2023_v48 = vand.u32 2147483647, %v2020_v13  ;;  %v2051_v42 = vadd.f32 %v2050_v43, %v5596_v3  ;;  %v2340_v36 = vadd.f32 %v6136_v32, %v2050_v43  ;;  %s2631_s29 = scvt.s32.f32 %s6239_s20 }
 0x266   : > { %1878 = vmatpush.bf16.msra.mxu1 %v1869_v21  ;;  %v1995_v45 = vmax.f32 %v1992_v10, 0.0  ;;  %v2025_v41 = vsub.f32 1.0, %v2022_v22  ;;  %v1987_v55 = vand.u32 2147483647, %v1984_v35  ;;  %v1988_v59 = vand.u32 2147483647, %v1985_v44 }
 0x267   : > { %v2032_v38 = vpack.c.bf16 %v2030_v52, %v2030_v52  ;;  %v2026_v51 = vsub.f32 1.0, %v2023_v48  ;;  %v2052_v11 = vperm.slane %v2051_v42, 0  ;;  %v6194_v39 = vsub.f32 %v2088_v6, %v2340_v36  ;;  %v4991_v6 = vld [vmem:[%s7208_s2 + $0x1c] sm:$0xf]  ;;  %s2493_s26 = scalar_select %p2492_p5, %s6239_s20, 0 }
 0x268   : > { %v1997_v60 = vpack.c.bf16 %v1995_v45, %v1995_v45  ;;  %v2028_v50 = vmax.f32 %v2025_v41, 0.0  ;;  %v1990_v32 = vsub.f32 1.0, %v1987_v55  ;;  %v1991_v1 = vsub.f32 1.0, %v1988_v59  ;;  %v1975_v21 = vld.sshfl [vmem:[#allocation1] sm:$0xff pattern:$0x73625140] }
 0x269   : > { %v2034_v34 = vsel %vm344_vm0, %v2032_v38, 0  ;;  %v2029_v27 = vmax.f32 %v2026_v51, 0.0  ;;  %v2055_v46 = vsub.f32 %v5604_v7, %v2052_v11  ;;  %v2053_v63 = vsub.f32 %v5607_v9, %v2052_v11  ;;  %s7252_s26 = smov (!%p5027_p6, %s2493_s26), 14 }
 0x26a   : > { %2042 = vmatpush.bf16.msrb.mxu0 %v2034_v34  ;;  %v2001_v28 = vsel %vm344_vm0, %v1997_v60, 0  ;;  %v2054_v25 = vsub.f32 %v5610_v14, %v2052_v11  ;;  %v1993_v61 = vmax.f32 %v1990_v32, 0.0  ;;  %v1994_v12 = vmax.f32 %v1991_v1, 0.0  ;;  %s5032_s6 = sshll.u32 %s7252_s26, 1  ;;  %s2632_s8 = scvt.s32.f32 %s7252_s26 }
 0x26b   : > { %v2031_v56 = vpack.c.bf16 %v2029_v27, %v2028_v50  ;;  %2009 = vmatpush.bf16.msrb.mxu3 %v2001_v28  ;;  %v2058_v5 = vand.u32 2147483647, %v2055_v46  ;;  %v2056_v40 = vand.u32 2147483647, %v2053_v63  ;;  %v1977_v18 = vsel %vm316_vm1, %v1951_v49, %v6149_v53  ;;  %s6297_s10 = scalar_lea.vmem %s5582_s9, %s5032_s6 [#allocation2] }
 0x26c   : > { %v2057_v37 = vand.u32 2147483647, %v2054_v25  ;;  %v1996_v29 = vpack.c.bf16 %v1994_v12, %v1993_v61  ;;  %v1978_v33 = vsel %vm319_vm2, %v1977_v18, %v6181_v26  ;;  %v2094_v10 = vadd.f32 1.0, %v6177_v23 }
 0x26d   : > { %v2061_v62 = vsub.f32 1.0, %v2058_v5  ;;  %v2059_v2 = vsub.f32 1.0, %v2056_v40  ;;  %v1979_v30 = vsel %vm321_vm3, %v1978_v33, %v1975_v21  ;;  %v2219_v42 = vadd.f32 1.0, %v6186_v57 }
 0x26e   : > { %4990 = vmatmul.msk.bf16.vlgmr.msra.gmra.mxu0 %vm486_vm5, %v4989_v0  ;;  %v2060_v4 = vsub.f32 1.0, %v2057_v37  ;;  %v2095_v44 = vand.u32 2147483647, %v2094_v10  ;;  %v2091_v38 = vand.u32 2147483647, %v6177_v23  ;;  %v2098_v45 = vadd.f32 2.0, %v6177_v23 }
 0x26f   : > { %2043 = vmatpush.bf16.msrb.mxu0 %v2031_v56  ;;  %v2064_v47 = vmax.f32 %v2061_v62, 0.0  ;;  %2010 = vmatpush.bf16.msrb.mxu3 %v1996_v29  ;;  %v2062_v54 = vmax.f32 %v2059_v2, 0.0  ;;  %v2346_v51 = vadd.f32 1.0, %v6194_v39  ;;  %v2102_v11 = vadd.f32 3.0, %v6177_v23 }
 0x270   : > { %v2063_v58 = vmax.f32 %v2060_v4, 0.0  ;;  %v2216_v59 = vand.u32 2147483647, %v6186_v57  ;;  %v2220_v34 = vand.u32 2147483647, %v2219_v42  ;;  %v2223_v60 = vadd.f32 2.0, %v6186_v57 }
 0x271   : > { %4994 = vmatmul.msk.bf16.vlgmr.msra.gmra.mxu2 %vm486_vm5, %v4993_v31  ;;  %v2066_v8 = vpack.c.bf16 %v2064_v47, %v2064_v47  ;;  %v2227_v50 = vadd.f32 3.0, %v6186_v57  ;;  %v2096_v27 = vsub.f32 1.0, %v2095_v44  ;;  %v2350_v46 = vadd.f32 2.0, %v6194_v39 }
 0x272   : > { %v2065_v19 = vpack.c.bf16 %v2063_v58, %v2062_v54  ;;  %v2354_v32 = vadd.f32 3.0, %v6194_v39  ;;  %v2092_v1 = vsub.f32 1.0, %v2091_v38  ;;  %v2099_v63 = vand.u32 2147483647, %v2098_v45 }
 0x273   : > { %v2068_v16 = vsel %vm344_vm0, %v2066_v8, 0  ;;  %v2343_v28 = vand.u32 2147483647, %v6194_v39  ;;  %v2347_v56 = vand.u32 2147483647, %v2346_v51  ;;  %v2217_v61 = vsub.f32 1.0, %v2216_v59 }
 0x274   : > { %4988 = vmatmul.msk.bf16.vlgmr.msra.gmra.mxu3 %vm486_vm5, %v4987_v24  ;;  %2076 = vmatpush.bf16.msrb.mxu1 %v2068_v16  ;;  %v2103_v25 = vand.u32 2147483647, %v2102_v11  ;;  %v2221_v12 = vsub.f32 1.0, %v2220_v34  ;;  %v2224_v57 = vand.u32 2147483647, %v2223_v60  ;;  %v2097_v31 = vmax.f32 %v2096_v27, 0.0 }
 0x275   : > { %4992 = vmatmul.msk.bf16.vlgmr.msra.gmra.mxu1 %vm486_vm5, %v4991_v6  ;;  %v2228_v40 = vand.u32 2147483647, %v2227_v50  ;;  %v2351_v62 = vand.u32 2147483647, %v2350_v46  ;;  %v2355_v29 = vand.u32 2147483647, %v2354_v32 }
 0x276   : > { %v2093_v2 = vmax.f32 %v2092_v1, 0.0  ;;  %v2100_v4 = vsub.f32 1.0, %v2099_v63  ;;  %v2344_v24 = vsub.f32 1.0, %v2343_v28  ;;  %v2348_v39 = vsub.f32 1.0, %v2347_v56 }
 0x277   : > { %v2104_v6 = vsub.f32 1.0, %v2103_v25  ;;  %v2218_v49 = vmax.f32 %v2217_v61, 0.0  ;;  %v2222_v54 = vmax.f32 %v2221_v12, 0.0  ;;  %v2225_v58 = vsub.f32 1.0, %v2224_v57 }
 0x278   : > { %2077 = vmatpush.bf16.msrb.mxu1 %v2065_v19  ;;  %v2229_v16 = vsub.f32 1.0, %v2228_v40  ;;  %v6243_v19 = vperm.slane %v2097_v31, 0  ;;  %v2352_v21 = vsub.f32 1.0, %v2351_v62  ;;  %v2356_v33 = vsub.f32 1.0, %v2355_v29 }
 0x279   : > { %v6251_v10 = vperm.slane %v2218_v49, 0 }
 0x27a   : > { %v2230_v42 = vmax.f32 %v2229_v16, 0.0  ;;  %v2353_v38 = vmax.f32 %v2352_v21, 0.0  ;;  %v2357_v45 = vmax.f32 %v2356_v33, 0.0 }
 0x27c   : > { %v6274_v28 = vperm.slane %v2357_v45, 0 }
 0x27e   : > { %5008 = vmatmul.msk.bf16.vlgmr.msrb.gmra.mxu0 %vm341_vm4, %v1979_v30 }
 0x284   : > { %5007 = vmatmul.msk.bf16.vlgmr.msrb.gmra.mxu3 %vm341_vm4, %v1979_v30 }
 0x285   : > { %5009 = vmatmul.msk.bf16.vlgmr.msrb.gmra.mxu1 %vm341_vm4, %v1979_v30  ;;  %v6248_v30 = vperm.slane %v2093_v2, 0 }
 0x2d4   : > { %v1608_v17 = vpop.f32.mrf.mxu2 }
 0x2db   : > { %v1661_v20 = vpop.f32.mrf.mxu0 }
 0x2dc   : > { %v1610_v13 = vpop.f32.mrf.mxu2 }
 0x2e2   : > { %v1718_v43 = vpop.f32.mrf.mxu1 }
 0x2e3   : > { %v1663_v53 = vpop.f32.mrf.mxu0 }
 0x2e4   : > { %v1753_v35 = vpop.f32.mrf.mxu2  ;;  %v2349_v53 = vmax.f32 %v2348_v39, 0.0 }
 0x2e6   : > { %v2360_v27 = vperm.slane %v2349_v53, 0 }
 0x2e7   : > { %v1627_v52 = vpop.f32.mrf.mxu3 }
 0x2e8   : > { %v1628_v22 = vadd.f32 %v1627_v52, %v1608_v17  ;;  %v2101_v17 = vmax.f32 %v2100_v4, 0.0 }
 0x2ea   : > { %v1720_v26 = vpop.f32.mrf.mxu1  ;;  %v1665_v41 = vadd.f32 %v1661_v20, %v1628_v22  ;;  %v6253_v22 = vperm.slane %v2222_v54, 0  ;;  %v6263_v59 = vperm.slane %v2101_v17, 0 }
 0x2eb   : > { %v1845_v48 = vpop.f32.mrf.mxu0  ;;  %v2226_v26 = vmax.f32 %v2225_v58, 0.0 }
 0x2ec   : > { %v1755_v36 = vpop.f32.mrf.mxu2  ;;  %v1722_v0 = vadd.f32 %v1718_v43, %v1665_v41  ;;  %v2345_v43 = vmax.f32 %v2344_v24, 0.0 }
 0x2ed   : > { %v6267_v32 = vperm.slane %v2226_v26, 0 }
 0x2ee   : > { %v1757_v47 = vadd.f32 %v1753_v35, %v1722_v0  ;;  %v2105_v35 = vmax.f32 %v2104_v6, 0.0  ;;  %v2358_v50 = vperm.slane %v2345_v43, 0  ;;  %v6270_v0 = vperm.slane %v2230_v42, 0 }
 0x2ef   : > { %v1629_v55 = vpop.f32.mrf.mxu3 }
 0x2f0   : > { %v6265_v34 = vperm.slane %v2105_v35, 0 }
 0x2f2   : > { %v1880_v23 = vpop.f32.mrf.mxu1 }
 0x2f3   : > { %v1847_v5 = vpop.f32.mrf.mxu0 }
 0x2f4   : > { %v1915_v37 = vpop.f32.mrf.mxu2 }
 0x2f7   : > { %v1788_v8 = vpop.f32.mrf.mxu3 }
 0x2f8   : > { %v1792_v18 = vadd.f32 %v1788_v8, %v1757_v47 }
 0x2fa   : > { %v1849_v20 = vadd.f32 %v1845_v48, %v1792_v18  ;;  %v1882_v13 = vpop.f32.mrf.mxu1 }
 0x2fb   : > { %v2045_v52 = vpop.f32.mrf.mxu0 }
 0x2fc   : > { %v1884_v36 = vadd.f32 %v1880_v23, %v1849_v20  ;;  %v2126_v44 = vmul.f32 %v6243_v19, %v2045_v52  ;;  %v1917_v41 = vpop.f32.mrf.mxu2  ;;  %v2125_v48 = vmul.f32 %v6248_v30, %v2045_v52  ;;  %v2270_v51 = vmul.f32 %v6251_v10, %v2045_v52 }
 0x2fd   : > { %v2271_v11 = vmul.f32 %v6253_v22, %v2045_v52  ;;  %v6272_v23 = vperm.slane %v2353_v38, 0  ;;  %v6276_v56 = vmul.f32 %v2358_v50, %v2045_v52  ;;  %v6278_v25 = vmul.f32 %v2360_v27, %v2045_v52 }
 0x2fe   : > { %v1919_v55 = vadd.f32 %v1915_v37, %v1884_v36  ;;  %v2128_v60 = vrot.slane %v2126_v44, 4  ;;  %v5034_v44 = vld [vmem:[%s6297_s10 + $0x2] sm:$0x3] }
 0x2ff   : > { %v1790_v46 = vpop.f32.mrf.mxu3  ;;  %v2273_v1 = vrot.slane %v2271_v11, 4  ;;  %v2400_v17 = vrot.slane %v6278_v25, 4  ;;  %2513 = vst [vmem:[#allocation1 + $0x1] ss:$4 sm:$0xff] %v5034_v44 }
 0x300   : > { %v1920_v63 = vadd.f32 %v1919_v55, %v5887_v15  ;;  %v2130_v5 = vadd.f32 %v2128_v60, %v2125_v48 }
 0x301   : > { %v2275_v61 = vadd.f32 %v2273_v1, %v2270_v51 }
 0x302   : > { %v1922_v12 = vrot.slane %v1920_v63, 1  ;;  %v1923_v57 = vrot.slane %v1920_v63, 2  ;;  %v1924_v40 = vrot.slane %v1920_v63, 3  ;;  %v1925_v37 = vrot.slane %v1920_v63, 4  ;;  %1936 = vst [vmem:[%s5902_s28 + $0x2] sm:$0x1] %v1920_v63  ;;  %v2079_v31 = vpop.f32.mrf.mxu1 }
 0x303   : > { %v1926_v62 = vrot.slane %v1920_v63, 5  ;;  %v1927_v29 = vrot.slane %v1920_v63, 6  ;;  %v1928_v2 = vrot.slane %v1920_v63, 7  ;;  %v2178_v4 = vmul.f32 %v6248_v30, %v2079_v31  ;;  %v6283_v47 = vpop.f32.mrf.mxu0 }
 0x304   : > { %1937 = vst [vmem:[%s5902_s28 + $0xa] sm:$0x1] %v1922_v12  ;;  %v2179_v24 = vmul.f32 %v6243_v19, %v2079_v31  ;;  %v2305_v39 = vmul.f32 %v6251_v10, %v2079_v31  ;;  %v2306_v6 = vmul.f32 %v6253_v22, %v2079_v31  ;;  %v2432_v8 = vmul.f32 %v2358_v50, %v2079_v31 }
 0x305   : > { %1938 = vst [vmem:[%s5902_s28 + $0x12] sm:$0x1] %v1923_v57  ;;  %v2433_v49 = vmul.f32 %v2360_v27, %v2079_v31  ;;  %v2131_v54 = vmul.f32 %v6263_v59, %v6283_v47  ;;  %v2133_v58 = vmul.f32 %v6265_v34, %v6283_v47  ;;  %v2276_v16 = vmul.f32 %v6267_v32, %v6283_v47  ;;  %v5010_v57 = vld [vmem:[%s7208_s2 + $0x4] sm:$0xf] }
 0x306   : > { %1939 = vst [vmem:[%s5902_s28 + $0x1a] sm:$0x1] %v1924_v40  ;;  %v2181_v18 = vrot.slane %v2179_v24, 4  ;;  %v2278_v21 = vmul.f32 %v6270_v0, %v6283_v47  ;;  %v2308_v33 = vrot.slane %v2306_v6, 4 }
 0x307   : > { %1940 = vst [vmem:[%s5902_s28 + $0x22] sm:$0x1] %v1925_v37  ;;  %v2012_v20 = vpop.f32.mrf.mxu3  ;;  %v2132_v13 = vadd.f32 %v2131_v54, %v2130_v5  ;;  %v2135_v43 = vrot.slane %v2133_v58, 4  ;;  %v2277_v53 = vadd.f32 %v2276_v16, %v2275_v61  ;;  %v2435_v35 = vrot.slane %v2433_v49, 4  ;;  %v5036_v16 = vld [vmem:[%s6297_s10 + $0x4] sm:$0x3] }
 0x308   : > { %1941 = vst [vmem:[%s5902_s28 + $0x2a] sm:$0x1] %v1926_v62  ;;  %v2107_v52 = vmul.f32 %v6248_v30, %v2012_v20  ;;  %v2109_v26 = vmul.f32 %v6243_v19, %v2012_v20  ;;  %v2232_v42 = vmul.f32 %v6251_v10, %v2012_v20  ;;  %v2234_v36 = vmul.f32 %v6253_v22, %v2012_v20 }
 0x309   : > { %1942 = vst [vmem:[%s5902_s28 + $0x32] sm:$0x1] %v1927_v29  ;;  %v2359_v38 = vmul.f32 %v2358_v50, %v2012_v20  ;;  %v2361_v45 = vmul.f32 %v2360_v27, %v2012_v20  ;;  %v2137_v41 = vadd.f32 %v2135_v43, %v2132_v13  ;;  %v2183_v48 = vadd.f32 %v2181_v18, %v2178_v4  ;;  %v6333_v20 = vld [vmem:[%s5602_s18 + $0x4] sm:$0x1] }
 0x30a   : > { %1943 = vst [vmem:[%s5902_s28 + $0x3a] sm:$0x1] %v1928_v2  ;;  %v2081_v51 = vpop.f32.mrf.mxu1  ;;  %v2111_v11 = vrot.slane %v2109_v26, 4  ;;  %v2236_v55 = vrot.slane %v2234_v36, 4  ;;  %v2280_v60 = vrot.slane %v2278_v21, 4  ;;  %v2310_v46 = vadd.f32 %v2308_v33, %v2305_v39 }
 0x30b   : > { %v2139_v1 = vpack.c.bf16 %v2137_v41, %v2137_v41  ;;  %v2184_v30 = vmul.f32 %v6263_v59, %v2081_v51  ;;  %v2186_v19 = vmul.f32 %v6265_v34, %v2081_v51  ;;  %v2363_v10 = vrot.slane %v2361_v45, 4 }
 0x30c   : > { %v2113_v22 = vadd.f32 %v2111_v11, %v2107_v52  ;;  %v2238_v63 = vadd.f32 %v2236_v55, %v2232_v42  ;;  %v2282_v25 = vadd.f32 %v2280_v60, %v2277_v53  ;;  %v2311_v50 = vmul.f32 %v6267_v32, %v2081_v51 }
 0x30d   : > { %v2144_v27 = vsel %vm316_vm1, %v2139_v1, 0  ;;  %v2185_v5 = vadd.f32 %v2184_v30, %v2183_v48  ;;  %v2188_v61 = vrot.slane %v2186_v19, 4  ;;  %v2365_v12 = vadd.f32 %v2363_v10, %v2359_v38  ;;  %v5015_v19 = vld [vmem:[%s7208_s2 + $0xc] sm:$0xf] }
 0x30e   : > { %2153 = vmatpush.bf16.msrb.mxu2 %v2144_v27  ;;  %v2284_v40 = vpack.c.bf16 %v2282_v25, %v2282_v25  ;;  %v2312_v37 = vadd.f32 %v2311_v50, %v2310_v46  ;;  %v2313_v31 = vmul.f32 %v6270_v0, %v2081_v51  ;;  %v2437_v62 = vadd.f32 %v2435_v35, %v2432_v8  ;;  %v5013_v35 = vld [vmem:[%s7208_s2 + $0x8] sm:$0xf]  ;;  %v2123_v46 = vld [vmem:[%s7208_s2] sm:$0xf] }
 0x30f   : > { %v2014_v29 = vpop.f32.mrf.mxu3  ;;  %v2190_v2 = vadd.f32 %v2188_v61, %v2185_v5  ;;  %v2438_v4 = vmul.f32 %v6272_v23, %v2081_v51  ;;  %v2440_v24 = vmul.f32 %v6274_v28, %v2081_v51  ;;  %v2402_v39 = vadd.f32 %v2400_v17, %v6276_v56  ;;  %v5038_v5 = vld [vmem:[%s6297_s10 + $0x6] sm:$0x3] }
 0x310   : > { %v2115_v6 = vmul.f32 %v6263_v59, %v2014_v29  ;;  %v2118_v49 = vmul.f32 %v6265_v34, %v2014_v29  ;;  %v2240_v54 = vmul.f32 %v6267_v32, %v2014_v29  ;;  %v2243_v58 = vmul.f32 %v6270_v0, %v2014_v29  ;;  %v6335_v32 = vld.sshfl [vmem:[#allocation1] sm:$0xff pattern:$0x73625140] }
 0x311   : > { %5011 = vmatmul.msk.bf16.vlgmr.msrb.gmra.mxu2 %vm486_vm5, %v5010_v57  ;;  %v2192_v8 = vpack.c.bf16 %v2190_v2, %v2190_v2  ;;  %v2367_v18 = vmul.f32 %v6272_v23, %v2014_v29  ;;  %v2370_v21 = vmul.f32 %v6274_v28, %v2014_v29  ;;  %v2289_v33 = vsel %vm316_vm1, %v2284_v40, 0  ;;  %2517 = vst [vmem:[#allocation1 + $0x2] ss:$4 sm:$0xff] %v5036_v16 }
 0x312   : > { %v2116_v56 = vadd.f32 %v2115_v6, %v2113_v22  ;;  %v2120_v59 = vrot.slane %v2118_v49, 4  ;;  %v2241_v17 = vadd.f32 %v2240_v54, %v2238_v63  ;;  %v2245_v34 = vrot.slane %v2243_v58, 4  ;;  %2298 = vmatpush.bf16.msra.mxu2 %v2289_v33  ;;  %v5017_v49 = vld [vmem:[%s7208_s2 + $0x10] sm:$0xf] }
 0x313   : > { %v2197_v0 = vsel %vm316_vm1, %v2192_v8, 0  ;;  %v2368_v13 = vadd.f32 %v2367_v18, %v2365_v12  ;;  %v2372_v43 = vrot.slane %v2370_v21, 4  ;;  %v2315_v53 = vrot.slane %v2313_v31, 4 }
 0x314   : > { %2206 = vmatpush.bf16.msra.mxu0 %v2197_v0  ;;  %v2122_v52 = vadd.f32 %v2120_v59, %v2116_v56  ;;  %v2247_v26 = vadd.f32 %v2245_v34, %v2241_v17  ;;  %v2439_v42 = vadd.f32 %v2438_v4, %v2437_v62  ;;  %v2442_v36 = vrot.slane %v2440_v24, 4 }
 0x315   : > { %v2374_v44 = vadd.f32 %v2372_v43, %v2368_v13  ;;  %v2317_v38 = vadd.f32 %v2315_v53, %v2312_v37  ;;  %v2403_v45 = vmul.f32 %v6272_v23, %v6283_v47  ;;  %v2405_v41 = vmul.f32 %v6274_v28, %v6283_v47 }
 0x316   : > { %v2124_v48 = vpack.c.bf16 %v2122_v52, %v2122_v52  ;;  %v2249_v51 = vpack.c.bf16 %v2247_v26, %v2247_v26  ;;  %v2444_v11 = vadd.f32 %v2442_v36, %v2439_v42  ;;  %v2564_v55 = vadd.f32 %v6333_v20, %v5596_v3 }
 0x317   : > { %5014 = vmatmul.msk.bf16.vlgmr.msra.gmra.mxu0 %vm486_vm5, %v5013_v35  ;;  %v2376_v60 = vpack.c.bf16 %v2374_v44, %v2374_v44  ;;  %v2319_v23 = vpack.c.bf16 %v2317_v38, %v2317_v38  ;;  %v2404_v1 = vadd.f32 %v2403_v45, %v2402_v39  ;;  %v2407_v30 = vrot.slane %v2405_v41, 4 }
 0x318   : > { %v2163_v28 = vsel %vm316_vm1, %v2124_v48, 0  ;;  %v2254_v47 = vsel %vm316_vm1, %v2249_v51, 0  ;;  %v2446_v10 = vpack.c.bf16 %v2444_v11, %v2444_v11  ;;  %v2565_v22 = vperm.slane %v2564_v55, 0  ;;  %v6364_v37 = vld.sshfl [vmem:[#allocation1] sm:$0xff pattern:$0x73625140] }
 0x319   : > { %2172 = vmatpush.bf16.msra.mxu3 %v2163_v28  ;;  %2263 = vmatpush.bf16.msra.mxu1 %v2254_v47  ;;  %v2381_v63 = vsel %vm316_vm1, %v2376_v60, 0  ;;  %v2324_v25 = vsel %vm316_vm1, %v2319_v23, 0  ;;  %v2409_v50 = vadd.f32 %v2407_v30, %v2404_v1  ;;  %v2528_v27 = vmul.f32 0.0, %v6333_v20  ;;  %2521 = vst [vmem:[#allocation1 + $0x3] ss:$4 sm:$0xff] %v5038_v5 }
 0x31a   : > { %2390 = vmatpush.bf16.msrb.mxu0 %v2381_v63  ;;  %v2451_v61 = vsel %vm316_vm1, %v2446_v10, 0  ;;  %v2568_v12 = vsub.f32 %v5604_v7, %v2565_v22  ;;  %v2633_v57 = vstv %s2631_s29  ;;  %v2635_v40 = vstv %s2632_s8  ;;  %v5021_v51 = vld [vmem:[%s7208_s2 + $0x18] sm:$0xf]  ;;  %v5023_v5 = vld [vmem:[%s7208_s2 + $0x1c] sm:$0xf] }
 0x31b   : > { %2460 = vmatpush.bf16.msrb.mxu2 %v2451_v61  ;;  %v2411_v31 = vpack.c.bf16 %v2409_v50, %v2409_v50  ;;  %v2529_v62 = vadd.f32 %v2528_v27, %v5596_v3  ;;  %v2634_v29 = vadd.f32 %v2633_v57, %v2528_v27  ;;  %v2760_v2 = vadd.f32 %v2633_v57, %v6333_v20 }
 0x31c   : > { %5012 = vmatmul.msk.bf16.vlgmr.msra.gmra.mxu3 %vm486_vm5, %v2123_v46  ;;  %5016 = vmatmul.msk.bf16.vlgmr.msra.gmra.mxu1 %vm486_vm5, %v5015_v19  ;;  %v2571_v4 = vand.u32 2147483647, %v2568_v12  ;;  %v2566_v24 = vsub.f32 %v5607_v9, %v2565_v22  ;;  %v2567_v39 = vsub.f32 %v5610_v14, %v2565_v22  ;;  %v2597_v6 = vmul.f32 2.0, %v6333_v20 }
 0x31d   : > { %2333 = vmatpush.bf16.msrb.mxu3 %v2324_v25  ;;  %v2416_v54 = vsel %vm316_vm1, %v2411_v31, 0  ;;  %v2530_v58 = vperm.slane %v2529_v62, 0  ;;  %v6377_v16 = vsub.f32 %v2635_v40, %v2634_v29  ;;  %v6379_v8 = vsub.f32 %v2635_v40, %v2760_v2  ;;  %v5019_v25 = vld [vmem:[%s7208_s2 + $0x14] sm:$0xf]  ;;  %v2498_v62 = vld [vmem:[%s6297_s10] sm:$0x3] }
 0x31e   : > { %2425 = vmatpush.bf16.msrb.mxu1 %v2416_v54  ;;  %v2574_v18 = vsub.f32 1.0, %v2571_v4  ;;  %v2569_v21 = vand.u32 2147483647, %v2566_v24  ;;  %v2570_v33 = vand.u32 2147483647, %v2567_v39  ;;  %v2598_v56 = vadd.f32 %v2597_v6, %v5596_v3  ;;  %s6425_s10 = sadd.s32 5, %s5590_s23 }
 0x31f   : > { %v2533_v20 = vsub.f32 %v5604_v7, %v2530_v58  ;;  %v2887_v59 = vadd.f32 %v2633_v57, %v2597_v6  ;;  %v2531_v17 = vsub.f32 %v5607_v9, %v2530_v58  ;;  %v2532_v52 = vsub.f32 %v5610_v14, %v2530_v58  ;;  %v5025_v24 = vld [vmem:[%s7208_s2 + $0x20] sm:$0xf]  ;;  %p3039_p8 = scmp.gt.s32.totalorder %s6425_s10, 0  ;;  %p5059_p3 = scmp.lt.s32.totalorder %s6425_s10, 14 }
 0x320   : > { %v2577_v34 = vmax.f32 %v2574_v18, 0.0  ;;  %v2572_v0 = vsub.f32 1.0, %v2569_v21  ;;  %v2573_v13 = vsub.f32 1.0, %v2570_v33  ;;  %v2599_v43 = vperm.slane %v2598_v56, 0  ;;  %s3178_s6 = scvt.s32.f32 %s6425_s10 }
 0x321   : > { %5018 = vmatmul.msk.bf16.vlgmr.msra.gmra.mxu2 %vm486_vm5, %v5017_v49  ;;  %v2536_v53 = vand.u32 2147483647, %v2533_v20  ;;  %v6385_v35 = vsub.f32 %v2635_v40, %v2887_v59  ;;  %v2534_v45 = vand.u32 2147483647, %v2531_v17  ;;  %v2535_v23 = vand.u32 2147483647, %v2532_v52 }
 0x322   : > { %v2579_v26 = vpack.c.bf16 %v2577_v34, %v2577_v34  ;;  %v2575_v42 = vmax.f32 %v2572_v0, 0.0  ;;  %v2576_v36 = vmax.f32 %v2573_v13, 0.0  ;;  %v2602_v44 = vsub.f32 %v5604_v7, %v2599_v43  ;;  %v2522_v6 = vld.sshfl [vmem:[#allocation1] sm:$0xff pattern:$0x73625140]  ;;  %s3040_s20 = scalar_select %p3039_p8, %s6425_s10, 0 }
 0x323   : > { %v2539_v38 = vsub.f32 1.0, %v2536_v53  ;;  %v2600_v41 = vsub.f32 %v5607_v9, %v2599_v43  ;;  %v2601_v48 = vsub.f32 %v5610_v14, %v2599_v43  ;;  %v2537_v1 = vsub.f32 1.0, %v2534_v45 }
 0x324   : > { %v2581_v11 = vsel %vm344_vm0, %v2579_v26, 0  ;;  %v2578_v55 = vpack.c.bf16 %v2576_v36, %v2575_v42  ;;  %v2605_v60 = vand.u32 2147483647, %v2602_v44  ;;  %v2538_v10 = vsub.f32 1.0, %v2535_v23  ;;  %s7254_s20 = smov (!%p5059_p3, %s3040_s20), 14 }
 0x325   : > { %2589 = vmatpush.bf16.msra.mxu0 %v2581_v11  ;;  %v2542_v46 = vmax.f32 %v2539_v38, 0.0  ;;  %v2603_v30 = vand.u32 2147483647, %v2600_v41  ;;  %v2604_v47 = vand.u32 2147483647, %v2601_v48  ;;  %v2540_v22 = vmax.f32 %v2537_v1, 0.0  ;;  %s3179_s30 = scvt.s32.f32 %s7254_s20 }
 0x326   : > { %v2608_v28 = vsub.f32 1.0, %v2605_v60  ;;  %v2541_v12 = vmax.f32 %v2538_v10, 0.0  ;;  %v2524_v39 = vsel %vm316_vm1, %v2498_v62, %v6335_v32  ;;  %v2641_v59 = vadd.f32 1.0, %v6377_v16  ;;  %s5064_s26 = sshll.u32 %s7254_s20, 1 }
 0x327   : > { %5022 = vmatmul.msk.bf16.vlgmr.msrb.gmra.mxu0 %vm486_vm5, %v5021_v51  ;;  %v2544_v19 = vpack.c.bf16 %v2542_v46, %v2542_v46  ;;  %v2606_v63 = vsub.f32 1.0, %v2603_v30  ;;  %v2607_v27 = vsub.f32 1.0, %v2604_v47  ;;  %v2525_v49 = vsel %vm319_vm2, %v2524_v39, %v6364_v37  ;;  %s6489_s27 = scalar_lea.vmem %s5582_s9, %s5064_s26 [#allocation2] }
 0x328   : > { %v2611_v50 = vmax.f32 %v2608_v28, 0.0  ;;  %v2543_v29 = vpack.c.bf16 %v2541_v12, %v2540_v22  ;;  %v2526_v54 = vsel %vm321_vm3, %v2525_v49, %v2522_v6  ;;  %v2766_v17 = vadd.f32 1.0, %v6379_v8 }
 0x329   : > { %v2548_v61 = vsel %vm344_vm0, %v2544_v19, 0  ;;  %2590 = vmatpush.bf16.msra.mxu0 %v2578_v55  ;;  %v2609_v57 = vmax.f32 %v2606_v63, 0.0  ;;  %v2610_v31 = vmax.f32 %v2607_v27, 0.0  ;;  %v2638_v13 = vand.u32 2147483647, %v6377_v16 }
 0x32a   : > { %2556 = vmatpush.bf16.msra.mxu3 %v2548_v61  ;;  %v2613_v40 = vpack.c.bf16 %v2611_v50, %v2611_v50  ;;  %v2642_v43 = vand.u32 2147483647, %v2641_v59  ;;  %v2645_v52 = vadd.f32 2.0, %v6377_v16  ;;  %v2649_v26 = vadd.f32 3.0, %v6377_v16 }
 0x32b   : > { %v2612_v4 = vpack.c.bf16 %v2610_v31, %v2609_v57  ;;  %v2763_v36 = vand.u32 2147483647, %v6379_v8  ;;  %v2767_v44 = vand.u32 2147483647, %v2766_v17  ;;  %v2893_v38 = vadd.f32 1.0, %v6385_v35 }
 0x32c   : > { %5020 = vmatmul.msk.bf16.vlgmr.msrb.gmra.mxu3 %vm486_vm5, %v5019_v25  ;;  %5024 = vmatmul.msk.bf16.vlgmr.msrb.gmra.mxu1 %vm486_vm5, %v5023_v5  ;;  %v2615_v2 = vsel %vm344_vm0, %v2613_v40, 0  ;;  %v2770_v45 = vadd.f32 2.0, %v6379_v8  ;;  %v2774_v41 = vadd.f32 3.0, %v6379_v8  ;;  %v2897_v48 = vadd.f32 2.0, %v6385_v35 }
 0x32d   : > { %2623 = vmatpush.bf16.msra.mxu1 %v2615_v2  ;;  %v2901_v51 = vadd.f32 3.0, %v6385_v35  ;;  %v2639_v55 = vsub.f32 1.0, %v2638_v13  ;;  %v2643_v16 = vsub.f32 1.0, %v2642_v43  ;;  %v2890_v46 = vand.u32 2147483647, %v6385_v35 }
 0x32e   : > { %2557 = vmatpush.bf16.msra.mxu3 %v2543_v29  ;;  %v2646_v23 = vand.u32 2147483647, %v2645_v52  ;;  %v2650_v1 = vand.u32 2147483647, %v2649_v26  ;;  %v2764_v30 = vsub.f32 1.0, %v2763_v36  ;;  %v2768_v28 = vsub.f32 1.0, %v2767_v44 }
 0x32f   : > { %v2894_v47 = vand.u32 2147483647, %v2893_v38  ;;  %v2771_v19 = vand.u32 2147483647, %v2770_v45  ;;  %v2775_v8 = vand.u32 2147483647, %v2774_v41 }
 0x330   : > { %v2898_v63 = vand.u32 2147483647, %v2897_v48  ;;  %v2902_v25 = vand.u32 2147483647, %v2901_v51  ;;  %v2640_v50 = vmax.f32 %v2639_v55, 0.0  ;;  %v2644_v27 = vmax.f32 %v2643_v16, 0.0 }
 0x331   : > { %5026 = vmatmul.msk.bf16.vlgmr.msrb.gmra.mxu2 %vm486_vm5, %v5025_v24  ;;  %2624 = vmatpush.bf16.msra.mxu1 %v2612_v4  ;;  %v2891_v61 = vsub.f32 1.0, %v2890_v46  ;;  %v2647_v12 = vsub.f32 1.0, %v2646_v23  ;;  %v2651_v35 = vsub.f32 1.0, %v2650_v1  ;;  %v2765_v40 = vmax.f32 %v2764_v30, 0.0 }
 0x332   : > { %v2769_v31 = vmax.f32 %v2768_v28, 0.0  ;;  %v2895_v62 = vsub.f32 1.0, %v2894_v47  ;;  %v2772_v29 = vsub.f32 1.0, %v2771_v19  ;;  %v2776_v4 = vsub.f32 1.0, %v2775_v8 }
 0x333   : > { %v2899_v24 = vsub.f32 1.0, %v2898_v63  ;;  %v2903_v39 = vsub.f32 1.0, %v2902_v25  ;;  %v6438_v49 = vperm.slane %v2640_v50, 0 }
 0x334   : > { %v2773_v59 = vmax.f32 %v2772_v29, 0.0  ;;  %v2777_v13 = vmax.f32 %v2776_v4, 0.0 }
 0x335   : > { %v2900_v43 = vmax.f32 %v2899_v24, 0.0 }
 0x337   : > { %5040 = vmatmul.msk.bf16.vlgmr.msra.gmra.mxu0 %vm341_vm4, %v2526_v54  ;;  %v6464_v46 = vperm.slane %v2900_v43, 0  ;;  %v5066_v43 = vld [vmem:[%s6489_s27 + $0x2] sm:$0x3] }
 0x338   : > { %3060 = vst [vmem:[#allocation1 + $0x1] ss:$4 sm:$0xff] %v5066_v43 }
 0x33c   : > { %5039 = vmatmul.msk.bf16.vlgmr.msra.gmra.mxu3 %vm341_vm4, %v2526_v54  ;;  %5041 = vmatmul.msk.bf16.vlgmr.msra.gmra.mxu1 %vm341_vm4, %v2526_v54  ;;  %v6440_v54 = vperm.slane %v2644_v27, 0 }
 0x394   : > { %v2155_v58 = vpop.f32.mrf.mxu2  ;;  %v2208_v18 = vpop.f32.mrf.mxu0 }
 0x399   : > { %v2265_v32 = vpop.f32.mrf.mxu1 }
 0x39c   : > { %v2157_v21 = vpop.f32.mrf.mxu2  ;;  %v2210_v33 = vpop.f32.mrf.mxu0 }
 0x39d   : > { %v2652_v21 = vmax.f32 %v2651_v35, 0.0  ;;  %v6443_v33 = vperm.slane %v2765_v40, 0 }
 0x39f   : > { %v2174_v56 = vpop.f32.mrf.mxu3  ;;  %v6457_v45 = vperm.slane %v2652_v21, 0 }
 0x3a0   : > { %v2175_v37 = vadd.f32 %v2174_v56, %v2155_v58  ;;  %v6445_v56 = vperm.slane %v2769_v31, 0 }
 0x3a1   : > { %v2267_v20 = vpop.f32.mrf.mxu1 }
 0x3a2   : > { %v2212_v53 = vadd.f32 %v2208_v18, %v2175_v37  ;;  %v2892_v18 = vmax.f32 %v2891_v61, 0.0  ;;  %v2896_v20 = vmax.f32 %v2895_v62, 0.0 }
 0x3a4   : > { %v2300_v34 = vpop.f32.mrf.mxu2  ;;  %v2392_v0 = vpop.f32.mrf.mxu0  ;;  %v2269_v60 = vadd.f32 %v2265_v32, %v2212_v53  ;;  %v2648_v32 = vmax.f32 %v2647_v12, 0.0  ;;  %v2904_v53 = vmax.f32 %v2903_v39, 0.0  ;;  %v2905_v44 = vperm.slane %v2892_v18, 0 }
 0x3a5   : > { %v2907_v41 = vperm.slane %v2896_v20, 0 }
 0x3a6   : > { %v2304_v5 = vadd.f32 %v2300_v34, %v2269_v60  ;;  %v6455_v38 = vperm.slane %v2648_v32, 0  ;;  %v6462_v60 = vperm.slane %v2777_v13, 0  ;;  %v6466_v23 = vperm.slane %v2904_v53, 0 }
 0x3a7   : > { %v2176_v42 = vpop.f32.mrf.mxu3 }
 0x3a9   : > { %v2427_v11 = vpop.f32.mrf.mxu1 }
 0x3ac   : > { %v2302_v10 = vpop.f32.mrf.mxu2  ;;  %v2394_v22 = vpop.f32.mrf.mxu0 }
 0x3af   : > { %v2335_v57 = vpop.f32.mrf.mxu3 }
 0x3b0   : > { %v2339_v2 = vadd.f32 %v2335_v57, %v2304_v5 }
 0x3b1   : > { %v2429_v6 = vpop.f32.mrf.mxu1 }
 0x3b2   : > { %v2396_v58 = vadd.f32 %v2392_v0, %v2339_v2 }
 0x3b4   : > { %v2431_v37 = vadd.f32 %v2427_v11, %v2396_v58  ;;  %v2462_v17 = vpop.f32.mrf.mxu2  ;;  %v2592_v34 = vpop.f32.mrf.mxu0  ;;  %v6459_v11 = vperm.slane %v2773_v59, 0 }
 0x3b5   : > { %v2672_v52 = vmul.f32 %v6438_v49, %v2592_v34  ;;  %v2673_v0 = vmul.f32 %v6440_v54, %v2592_v34  ;;  %v2817_v26 = vmul.f32 %v6443_v33, %v2592_v34  ;;  %v2818_v42 = vmul.f32 %v6445_v56, %v2592_v34 }
 0x3b6   : > { %v2466_v36 = vadd.f32 %v2462_v17, %v2431_v37  ;;  %v6468_v1 = vmul.f32 %v2905_v44, %v2592_v34  ;;  %v6470_v30 = vmul.f32 %v2907_v41, %v2592_v34 }
 0x3b7   : > { %v2337_v48 = vpop.f32.mrf.mxu3  ;;  %v2675_v51 = vrot.slane %v2673_v0, 4  ;;  %v2820_v55 = vrot.slane %v2818_v42, 4 }
 0x3b8   : > { %v2467_v16 = vadd.f32 %v2466_v36, %v5887_v15  ;;  %v2947_v58 = vrot.slane %v6470_v30, 4 }
 0x3b9   : > { %v2626_v28 = vpop.f32.mrf.mxu1  ;;  %v2677_v47 = vadd.f32 %v2675_v51, %v2672_v52  ;;  %v2822_v19 = vadd.f32 %v2820_v55, %v2817_v26 }
 0x3ba   : > { %v2469_v10 = vrot.slane %v2467_v16, 1  ;;  %v2470_v22 = vrot.slane %v2467_v16, 2  ;;  %v2471_v8 = vrot.slane %v2467_v16, 3  ;;  %v2472_v63 = vrot.slane %v2467_v16, 4  ;;  %2483 = vst [vmem:[%s5902_s28 + $0x3] sm:$0x1] %v2467_v16 }
 0x3bb   : > { %v2473_v25 = vrot.slane %v2467_v16, 5  ;;  %v2474_v50 = vrot.slane %v2467_v16, 6  ;;  %v2475_v27 = vrot.slane %v2467_v16, 7  ;;  %v2725_v5 = vmul.f32 %v6438_v49, %v2626_v28 }
 0x3bc   : > { %2484 = vst [vmem:[%s5902_s28 + $0xb] sm:$0x1] %v2469_v10  ;;  %v2726_v61 = vmul.f32 %v6440_v54, %v2626_v28  ;;  %v2852_v12 = vmul.f32 %v6443_v33, %v2626_v28  ;;  %v2853_v35 = vmul.f32 %v6445_v56, %v2626_v28  ;;  %v2979_v57 = vmul.f32 %v2905_v44, %v2626_v28  ;;  %v6479_v40 = vpop.f32.mrf.mxu0  ;;  %v2464_v31 = vpop.f32.mrf.mxu2 }
 0x3bd   : > { %2485 = vst [vmem:[%s5902_s28 + $0x13] sm:$0x1] %v2470_v22  ;;  %v2980_v62 = vmul.f32 %v2907_v41, %v2626_v28  ;;  %v2678_v29 = vmul.f32 %v6455_v38, %v6479_v40  ;;  %v2680_v2 = vmul.f32 %v6457_v45, %v6479_v40  ;;  %v2823_v4 = vmul.f32 %v6459_v11, %v6479_v40  ;;  %v5042_v22 = vld [vmem:[%s7208_s2 + $0x4] sm:$0xf] }
 0x3be   : > { %2486 = vst [vmem:[%s5902_s28 + $0x1b] sm:$0x1] %v2471_v8  ;;  %v2728_v24 = vrot.slane %v2726_v61, 4  ;;  %v2825_v39 = vmul.f32 %v6462_v60, %v6479_v40  ;;  %v2855_v6 = vrot.slane %v2853_v35, 4  ;;  %v2949_v35 = vadd.f32 %v2947_v58, %v6468_v1 }
 0x3bf   : > { %2487 = vst [vmem:[%s5902_s28 + $0x23] sm:$0x1] %v2472_v63  ;;  %v2559_v18 = vpop.f32.mrf.mxu3  ;;  %v2679_v32 = vadd.f32 %v2678_v29, %v2677_v47  ;;  %v2682_v21 = vrot.slane %v2680_v2, 4  ;;  %v2824_v20 = vadd.f32 %v2823_v4, %v2822_v19  ;;  %v2982_v59 = vrot.slane %v2980_v62, 4  ;;  %v5068_v4 = vld [vmem:[%s6489_s27 + $0x4] sm:$0x3] }
 0x3c0   : > { %2488 = vst [vmem:[%s5902_s28 + $0x2b] sm:$0x1] %v2473_v25  ;;  %v2654_v37 = vmul.f32 %v6438_v49, %v2559_v18  ;;  %v2656_v17 = vmul.f32 %v6440_v54, %v2559_v18  ;;  %v2779_v34 = vmul.f32 %v6443_v33, %v2559_v18  ;;  %v2781_v13 = vmul.f32 %v6445_v56, %v2559_v18 }
 0x3c1   : > { %2489 = vst [vmem:[%s5902_s28 + $0x33] sm:$0x1] %v2474_v50  ;;  %v2906_v53 = vmul.f32 %v2905_v44, %v2559_v18  ;;  %v2908_v52 = vmul.f32 %v2907_v41, %v2559_v18  ;;  %v2628_v0 = vpop.f32.mrf.mxu1  ;;  %v2684_v26 = vadd.f32 %v2682_v21, %v2679_v32  ;;  %v2730_v42 = vadd.f32 %v2728_v24, %v2725_v5  ;;  %v6531_v32 = vld.sshfl [vmem:[#allocation1] sm:$0xff pattern:$0x73625140] }
 0x3c2   : > { %2490 = vst [vmem:[%s5902_s28 + $0x3b] sm:$0x1] %v2475_v27  ;;  %v2731_v36 = vmul.f32 %v6455_v38, %v2628_v0  ;;  %v2733_v48 = vmul.f32 %v6457_v45, %v2628_v0  ;;  %v2658_v51 = vrot.slane %v2656_v17, 4  ;;  %v2783_v49 = vrot.slane %v2781_v13, 4 }
 0x3c3   : > { %v2686_v55 = vpack.c.bf16 %v2684_v26, %v2684_v26  ;;  %v2910_v54 = vrot.slane %v2908_v52, 4  ;;  %v2827_v16 = vrot.slane %v2825_v39, 4  ;;  %v2857_v33 = vadd.f32 %v2855_v6, %v2852_v12  ;;  %3064 = vst [vmem:[#allocation1 + $0x2] ss:$4 sm:$0xff] %v5068_v4 }
 0x3c4   : > { %v2732_v56 = vadd.f32 %v2731_v36, %v2730_v42  ;;  %v2735_v30 = vrot.slane %v2733_v48, 4  ;;  %v2660_v28 = vadd.f32 %v2658_v51, %v2654_v37  ;;  %v2785_v44 = vadd.f32 %v2783_v49, %v2779_v34 }
 0x3c5   : > { %v2691_v41 = vsel %vm316_vm1, %v2686_v55, 0  ;;  %v2912_v47 = vadd.f32 %v2910_v54, %v2906_v53  ;;  %v2829_v19 = vadd.f32 %v2827_v16, %v2824_v20  ;;  %v2858_v10 = vmul.f32 %v6459_v11, %v2628_v0 }
 0x3c6   : > { %2700 = vmatpush.bf16.msra.mxu2 %v2691_v41  ;;  %v2737_v8 = vadd.f32 %v2735_v30, %v2732_v56  ;;  %v2860_v63 = vmul.f32 %v6462_v60, %v2628_v0  ;;  %v2984_v25 = vadd.f32 %v2982_v59, %v2979_v57  ;;  %v2985_v50 = vmul.f32 %v6464_v46, %v2628_v0  ;;  %v5045_v57 = vld [vmem:[%s7208_s2 + $0x8] sm:$0xf]  ;;  %v5070_v41 = vld [vmem:[%s6489_s27 + $0x6] sm:$0x3] }
 0x3c7   : > { %v2561_v27 = vpop.f32.mrf.mxu3  ;;  %v2831_v5 = vpack.c.bf16 %v2829_v19, %v2829_v19  ;;  %v2859_v61 = vadd.f32 %v2858_v10, %v2857_v33  ;;  %v2987_v12 = vmul.f32 %v6466_v23, %v2628_v0  ;;  %v2950_v13 = vmul.f32 %v6464_v46, %v6479_v40 }
 0x3c8   : > { %v2739_v31 = vpack.c.bf16 %v2737_v8, %v2737_v8  ;;  %v2662_v62 = vmul.f32 %v6455_v38, %v2561_v27  ;;  %v2665_v29 = vmul.f32 %v6457_v45, %v2561_v27  ;;  %v2787_v2 = vmul.f32 %v6459_v11, %v2561_v27  ;;  %v6528_v38 = vld [vmem:[%s5602_s18 + $0x5] sm:$0x1] }
 0x3c9   : > { %5043 = vmatmul.msk.bf16.vlgmr.msra.gmra.mxu2 %vm486_vm5, %v5042_v22  ;;  %v2790_v24 = vmul.f32 %v6462_v60, %v2561_v27  ;;  %v2914_v39 = vmul.f32 %v6464_v46, %v2561_v27  ;;  %v2917_v1 = vmul.f32 %v6466_v23, %v2561_v27  ;;  %v2836_v6 = vsel %vm316_vm1, %v2831_v5, 0 }
 0x3ca   : > { %v2744_v45 = vsel %vm316_vm1, %v2739_v31, 0  ;;  %v2663_v11 = vadd.f32 %v2662_v62, %v2660_v28  ;;  %v2667_v58 = vrot.slane %v2665_v29, 4  ;;  %v2788_v18 = vadd.f32 %v2787_v2, %v2785_v44  ;;  %2845 = vmatpush.bf16.msrb.mxu2 %v2836_v6  ;;  %v5049_v62 = vld [vmem:[%s7208_s2 + $0x10] sm:$0xf] }
 0x3cb   : > { %2753 = vmatpush.bf16.msrb.mxu0 %v2744_v45  ;;  %v2792_v21 = vrot.slane %v2790_v24, 4  ;;  %v2915_v20 = vadd.f32 %v2914_v39, %v2912_v47  ;;  %v2919_v60 = vrot.slane %v2917_v1, 4  ;;  %v2862_v59 = vrot.slane %v2860_v63, 4  ;;  %v5047_v47 = vld [vmem:[%s7208_s2 + $0xc] sm:$0xf] }
 0x3cc   : > { %v2669_v37 = vadd.f32 %v2667_v58, %v2663_v11  ;;  %v2986_v17 = vadd.f32 %v2985_v50, %v2984_v25  ;;  %v2989_v34 = vrot.slane %v2987_v12, 4  ;;  %v2952_v0 = vmul.f32 %v6466_v23, %v6479_v40  ;;  %v2670_v23 = vld [vmem:[%s7208_s2] sm:$0xf] }
 0x3cd   : > { %v2794_v43 = vadd.f32 %v2792_v21, %v2788_v18  ;;  %v2921_v53 = vadd.f32 %v2919_v60, %v2915_v20  ;;  %v2864_v52 = vadd.f32 %v2862_v59, %v2859_v61  ;;  %v2951_v36 = vadd.f32 %v2950_v13, %v2949_v35  ;;  %v6557_v63 = vld.sshfl [vmem:[#allocation1] sm:$0xff pattern:$0x73625140] }
 0x3ce   : > { %5046 = vmatmul.msk.bf16.vlgmr.msrb.gmra.mxu0 %vm486_vm5, %v5045_v57  ;;  %v2671_v26 = vpack.c.bf16 %v2669_v37, %v2669_v37  ;;  %v2991_v42 = vadd.f32 %v2989_v34, %v2986_v17  ;;  %v3111_v48 = vadd.f32 %v6528_v38, %v5596_v3  ;;  %v2954_v46 = vrot.slane %v2952_v0, 4  ;;  %3068 = vst [vmem:[#allocation1 + $0x3] ss:$4 sm:$0xff] %v5070_v41  ;;  %v5051_v41 = vld [vmem:[%s7208_s2 + $0x14] sm:$0xf] }
 0x3cf   : > { %v2796_v51 = vpack.c.bf16 %v2794_v43, %v2794_v43  ;;  %v2923_v49 = vpack.c.bf16 %v2921_v53, %v2921_v53  ;;  %v2866_v55 = vpack.c.bf16 %v2864_v52, %v2864_v52  ;;  %v3075_v33 = vmul.f32 0.0, %v6528_v38  ;;  %v5053_v53 = vld [vmem:[%s7208_s2 + $0x18] sm:$0xf] }
 0x3d0   : > { %v2710_v54 = vsel %vm316_vm1, %v2671_v26, 0  ;;  %v2993_v40 = vpack.c.bf16 %v2991_v42, %v2991_v42  ;;  %v3112_v16 = vperm.slane %v3111_v48, 0  ;;  %v2956_v44 = vadd.f32 %v2954_v46, %v2951_v36 }
 0x3d1   : > { %2719 = vmatpush.bf16.msrb.mxu3 %v2710_v54  ;;  %v2801_v56 = vsel %vm316_vm1, %v2796_v51, 0  ;;  %v2928_v30 = vsel %vm316_vm1, %v2923_v49, 0  ;;  %v2871_v28 = vsel %vm316_vm1, %v2866_v55, 0  ;;  %v3076_v22 = vadd.f32 %v3075_v33, %v5596_v3 }
 0x3d2   : > { %2810 = vmatpush.bf16.msrb.mxu1 %v2801_v56  ;;  %2937 = vmatpush.bf16.msra.mxu0 %v2928_v30  ;;  %v2998_v19 = vsel %vm316_vm1, %v2993_v40, 0  ;;  %v3115_v10 = vsub.f32 %v5604_v7, %v3112_v16  ;;  %v3180_v8 = vstv %s3178_s6  ;;  %v2958_v25 = vpack.c.bf16 %v2956_v44, %v2956_v44 }
 0x3d3   : > { %3007 = vmatpush.bf16.msra.mxu2 %v2998_v19  ;;  %v3181_v50 = vadd.f32 %v3180_v8, %v3075_v33  ;;  %v3182_v27 = vstv %s3179_s30  ;;  %v3307_v5 = vadd.f32 %v3180_v8, %v6528_v38  ;;  %v3077_v12 = vperm.slane %v3076_v22, 0  ;;  %v3045_v22 = vld [vmem:[%s6489_s27] sm:$0x3]  ;;  %s6624_s27 = sadd.s32 6, %s5590_s23 }
 0x3d4   : > { %5044 = vmatmul.msk.bf16.vlgmr.msrb.gmra.mxu3 %vm486_vm5, %v2670_v23  ;;  %v3118_v61 = vand.u32 2147483647, %v3115_v10  ;;  %v3113_v35 = vsub.f32 %v5607_v9, %v3112_v16  ;;  %v3114_v31 = vsub.f32 %v5610_v14, %v3112_v16  ;;  %v2963_v29 = vsel %vm316_vm1, %v2958_v25, 0  ;;  %v5055_v10 = vld [vmem:[%s7208_s2 + $0x1c] sm:$0xf]  ;;  %p3586_p9 = scmp.gt.s32.totalorder %s6624_s27, 0  ;;  %s3725_s26 = scvt.s32.f32 %s6624_s27 }
 0x3d5   : > { %2880 = vmatpush.bf16.msra.mxu3 %v2871_v28  ;;  %5048 = vmatmul.msk.bf16.vlgmr.msrb.gmra.mxu1 %vm486_vm5, %v5047_v47  ;;  %v6568_v2 = vsub.f32 %v3182_v27, %v3181_v50  ;;  %v6570_v4 = vsub.f32 %v3182_v27, %v3307_v5  ;;  %v3144_v57 = vmul.f32 2.0, %v6528_v38  ;;  %v3080_v39 = vsub.f32 %v5604_v7, %v3077_v12  ;;  %p5091_p10 = scmp.lt.s32.totalorder %s6624_s27, 14 }
 0x3d6   : > { %2972 = vmatpush.bf16.msra.mxu1 %v2963_v29  ;;  %v3121_v24 = vsub.f32 1.0, %v3118_v61  ;;  %v3116_v1 = vand.u32 2147483647, %v3113_v35  ;;  %v3117_v6 = vand.u32 2147483647, %v3114_v31  ;;  %v3078_v58 = vsub.f32 %v5607_v9, %v3077_v12  ;;  %s3587_s24 = scalar_select %p3586_p9, %s6624_s27, 0 }
 0x3d7   : > { %v3145_v45 = vadd.f32 %v3144_v57, %v5596_v3  ;;  %v3434_v11 = vadd.f32 %v3180_v8, %v3144_v57  ;;  %v3083_v21 = vand.u32 2147483647, %v3080_v39  ;;  %v3079_v38 = vsub.f32 %v5610_v14, %v3077_v12  ;;  %v5057_v12 = vld [vmem:[%s7208_s2 + $0x20] sm:$0xf] }
 0x3d8   : > { %v3124_v18 = vmax.f32 %v3121_v24, 0.0  ;;  %v3119_v20 = vsub.f32 1.0, %v3116_v1  ;;  %v3120_v60 = vsub.f32 1.0, %v3117_v6  ;;  %v3081_v0 = vand.u32 2147483647, %v3078_v58  ;;  %s7256_s24 = smov (!%p5091_p10, %s3587_s24), 14 }
 0x3d9   : > { %5050 = vmatmul.msk.bf16.vlgmr.msrb.gmra.mxu2 %vm486_vm5, %v5049_v62  ;;  %v3146_v59 = vperm.slane %v3145_v45, 0  ;;  %v6577_v37 = vsub.f32 %v3182_v27, %v3434_v11  ;;  %v3086_v34 = vsub.f32 1.0, %v3083_v21  ;;  %v3082_v55 = vand.u32 2147483647, %v3079_v38  ;;  %s5096_s29 = sshll.u32 %s7256_s24, 1  ;;  %s3726_s10 = scvt.s32.f32 %s7256_s24 }
 0x3da   : > { %v3126_v17 = vpack.c.bf16 %v3124_v18, %v3124_v18  ;;  %v3122_v13 = vmax.f32 %v3119_v20, 0.0  ;;  %v3123_v43 = vmax.f32 %v3120_v60, 0.0  ;;  %v3084_v46 = vsub.f32 1.0, %v3081_v0  ;;  %v3069_v31 = vld.sshfl [vmem:[#allocation1] sm:$0xff pattern:$0x73625140]  ;;  %s6687_s8 = scalar_lea.vmem %s5582_s9, %s5096_s29 [#allocation2] }
 0x3db   : > { %v3149_v52 = vsub.f32 %v5604_v7, %v3146_v59  ;;  %v3147_v26 = vsub.f32 %v5607_v9, %v3146_v59  ;;  %v3148_v42 = vsub.f32 %v5610_v14, %v3146_v59  ;;  %v3089_v48 = vmax.f32 %v3086_v34, 0.0 }
 0x3dc   : > { %v3128_v36 = vsel %vm344_vm0, %v3126_v17, 0  ;;  %v3125_v51 = vpack.c.bf16 %v3123_v43, %v3122_v13  ;;  %v3085_v33 = vsub.f32 1.0, %v3082_v55  ;;  %v3087_v56 = vmax.f32 %v3084_v46, 0.0 }
 0x3dd   : > { %3136 = vmatpush.bf16.msrb.mxu0 %v3128_v36  ;;  %v3152_v49 = vand.u32 2147483647, %v3149_v52  ;;  %v3091_v54 = vpack.c.bf16 %v3089_v48, %v3089_v48  ;;  %v3150_v23 = vand.u32 2147483647, %v3147_v26  ;;  %v3151_v40 = vand.u32 2147483647, %v3148_v42 }
 0x3de   : > { %5054 = vmatmul.msk.bf16.vlgmr.msra.gmra.mxu0 %vm486_vm5, %v5053_v53  ;;  %v3088_v19 = vmax.f32 %v3085_v33, 0.0  ;;  %v3071_v61 = vsel %vm316_vm1, %v3045_v22, %v6531_v32  ;;  %v3188_v45 = vadd.f32 1.0, %v6568_v2  ;;  %v3313_v58 = vadd.f32 1.0, %v6570_v4 }
 0x3df   : > { %v3155_v16 = vsub.f32 1.0, %v3152_v49  ;;  %v3095_v30 = vsel %vm344_vm0, %v3091_v54, 0  ;;  %v3153_v28 = vsub.f32 1.0, %v3150_v23  ;;  %v3154_v44 = vsub.f32 1.0, %v3151_v40 }
 0x3e0   : > { %3103 = vmatpush.bf16.msrb.mxu3 %v3095_v30  ;;  %v3090_v27 = vpack.c.bf16 %v3088_v19, %v3087_v56  ;;  %v3072_v62 = vsel %vm319_vm2, %v3071_v61, %v6557_v63  ;;  %v3440_v18 = vadd.f32 1.0, %v6577_v37  ;;  %v3185_v60 = vand.u32 2147483647, %v6568_v2 }
 0x3e1   : > { %3137 = vmatpush.bf16.msrb.mxu0 %v3125_v51  ;;  %v3158_v47 = vmax.f32 %v3155_v16, 0.0  ;;  %v3156_v8 = vmax.f32 %v3153_v28, 0.0  ;;  %v3157_v25 = vmax.f32 %v3154_v44, 0.0  ;;  %v3073_v29 = vsel %vm321_vm3, %v3072_v62, %v3069_v31 }
 0x3e2   : > { %v3189_v59 = vand.u32 2147483647, %v3188_v45  ;;  %v3310_v38 = vand.u32 2147483647, %v6570_v4  ;;  %v3192_v17 = vadd.f32 2.0, %v6568_v2  ;;  %v3196_v34 = vadd.f32 3.0, %v6568_v2 }
 0x3e3   : > { %v3160_v50 = vpack.c.bf16 %v3158_v47, %v3158_v47  ;;  %v3159_v35 = vpack.c.bf16 %v3157_v25, %v3156_v8  ;;  %v3314_v43 = vand.u32 2147483647, %v3313_v58  ;;  %v3437_v53 = vand.u32 2147483647, %v6577_v37 }
 0x3e4   : > { %5052 = vmatmul.msk.bf16.vlgmr.msra.gmra.mxu3 %vm486_vm5, %v5051_v41  ;;  %v3441_v52 = vand.u32 2147483647, %v3440_v18  ;;  %v3317_v26 = vadd.f32 2.0, %v6570_v4  ;;  %v3321_v42 = vadd.f32 3.0, %v6570_v4  ;;  %v3444_v36 = vadd.f32 2.0, %v6577_v37 }
 0x3e5   : > { %5056 = vmatmul.msk.bf16.vlgmr.msra.gmra.mxu1 %vm486_vm5, %v5055_v10  ;;  %v3162_v5 = vsel %vm344_vm0, %v3160_v50, 0  ;;  %3104 = vmatpush.bf16.msrb.mxu3 %v3090_v27  ;;  %v3186_v48 = vsub.f32 1.0, %v3185_v60  ;;  %v3190_v51 = vsub.f32 1.0, %v3189_v59  ;;  %v3448_v49 = vadd.f32 3.0, %v6577_v37 }
 0x3e6   : > { %3170 = vmatpush.bf16.msrb.mxu1 %v3162_v5  ;;  %v3311_v55 = vsub.f32 1.0, %v3310_v38  ;;  %v3193_v46 = vand.u32 2147483647, %v3192_v17  ;;  %v3197_v54 = vand.u32 2147483647, %v3196_v34  ;;  %v3315_v40 = vsub.f32 1.0, %v3314_v43 }
 0x3e7   : > { %v3438_v16 = vsub.f32 1.0, %v3437_v53  ;;  %v3442_v33 = vsub.f32 1.0, %v3441_v52  ;;  %v3318_v30 = vand.u32 2147483647, %v3317_v26  ;;  %v3322_v4 = vand.u32 2147483647, %v3321_v42 }
 0x3e8   : > { %v3445_v28 = vand.u32 2147483647, %v3444_v36  ;;  %v3187_v41 = vmax.f32 %v3186_v48, 0.0  ;;  %v3191_v47 = vmax.f32 %v3190_v51, 0.0  ;;  %v3449_v19 = vand.u32 2147483647, %v3448_v49 }
 0x3e9   : > { %5058 = vmatmul.msk.bf16.vlgmr.msra.gmra.mxu2 %vm486_vm5, %v5057_v12  ;;  %v3194_v37 = vsub.f32 1.0, %v3193_v46  ;;  %v3198_v10 = vsub.f32 1.0, %v3197_v54  ;;  %v3312_v8 = vmax.f32 %v3311_v55, 0.0  ;;  %v3316_v25 = vmax.f32 %v3315_v40, 0.0 }
 0x3ea   : > { %3171 = vmatpush.bf16.msrb.mxu1 %v3159_v35  ;;  %v3439_v50 = vmax.f32 %v3438_v16, 0.0  ;;  %v3443_v5 = vmax.f32 %v3442_v33, 0.0  ;;  %v3319_v61 = vsub.f32 1.0, %v3318_v30  ;;  %v3323_v12 = vsub.f32 1.0, %v3322_v4 }
 0x3eb   : > { %v3446_v35 = vsub.f32 1.0, %v3445_v28  ;;  %v6627_v62 = vperm.slane %v3187_v41, 0  ;;  %v6637_v45 = vperm.slane %v3316_v25, 0 }
 0x3ec   : > { %v6641_v58 = vperm.slane %v3443_v5, 0  ;;  %v3320_v18 = vmax.f32 %v3319_v61, 0.0 }
 0x3ed   : > { %v3447_v60 = vmax.f32 %v3446_v35, 0.0 }
 0x3ee   : > { %5072 = vmatmul.msk.bf16.vlgmr.msrb.gmra.mxu0 %vm341_vm4, %v3073_v29  ;;  %v6658_v46 = vperm.slane %v3320_v18, 0 }
 0x3f4   : > { %5071 = vmatmul.msk.bf16.vlgmr.msrb.gmra.mxu3 %vm341_vm4, %v3073_v29 }
 0x3f5   : > { %5073 = vmatmul.msk.bf16.vlgmr.msrb.gmra.mxu1 %vm341_vm4, %v3073_v29  ;;  %v6629_v29 = vperm.slane %v3191_v47, 0 }
 0x44b   : > { %v2755_v32 = vpop.f32.mrf.mxu0 }
 0x44c   : > { %v2702_v57 = vpop.f32.mrf.mxu2 }
 0x452   : > { %v2812_v24 = vpop.f32.mrf.mxu1 }
 0x453   : > { %v2757_v39 = vpop.f32.mrf.mxu0 }
 0x454   : > { %v2704_v1 = vpop.f32.mrf.mxu2 }
 0x457   : > { %v2721_v6 = vpop.f32.mrf.mxu3 }
 0x458   : > { %v2722_v63 = vadd.f32 %v2721_v6, %v2702_v57  ;;  %v3195_v57 = vmax.f32 %v3194_v37, 0.0  ;;  %v6635_v6 = vperm.slane %v3312_v8, 0 }
 0x45a   : > { %v2814_v11 = vpop.f32.mrf.mxu1  ;;  %v2759_v13 = vadd.f32 %v2755_v32, %v2722_v63  ;;  %v3450_v32 = vsub.f32 1.0, %v3449_v19  ;;  %v6639_v63 = vperm.slane %v3439_v50, 0  ;;  %v6653_v36 = vperm.slane %v3195_v57, 0 }
 0x45b   : > { %v2939_v21 = vpop.f32.mrf.mxu0 }
 0x45c   : > { %v2847_v20 = vpop.f32.mrf.mxu2  ;;  %v2816_v2 = vadd.f32 %v2812_v24, %v2759_v13  ;;  %v3199_v24 = vmax.f32 %v3198_v10, 0.0  ;;  %v3451_v34 = vmax.f32 %v3450_v32, 0.0 }
 0x45e   : > { %v2851_v22 = vadd.f32 %v2847_v20, %v2816_v2  ;;  %v3324_v20 = vmax.f32 %v3323_v12, 0.0  ;;  %v6655_v48 = vperm.slane %v3199_v24, 0  ;;  %v6662_v2 = vperm.slane %v3447_v60, 0 }
 0x45f   : > { %v2723_v0 = vpop.f32.mrf.mxu3  ;;  %v6664_v40 = vperm.slane %v3451_v34, 0 }
 0x460   : > { %v6660_v54 = vperm.slane %v3324_v20, 0 }
 0x462   : > { %v2974_v23 = vpop.f32.mrf.mxu1 }
 0x463   : > { %v2941_v56 = vpop.f32.mrf.mxu0 }
 0x464   : > { %v2849_v44 = vpop.f32.mrf.mxu2 }
 0x467   : > { %v2882_v27 = vpop.f32.mrf.mxu3 }
 0x468   : > { %v2886_v31 = vadd.f32 %v2882_v27, %v2851_v22 }
 0x46a   : > { %v2943_v39 = vadd.f32 %v2939_v21, %v2886_v31  ;;  %v2976_v1 = vpop.f32.mrf.mxu1 }
 0x46b   : > { %v3139_v11 = vpop.f32.mrf.mxu0 }
 0x46c   : > { %v2978_v59 = vadd.f32 %v2974_v23, %v2943_v39  ;;  %v3009_v38 = vpop.f32.mrf.mxu2  ;;  %v3219_v17 = vmul.f32 %v6627_v62, %v3139_v11  ;;  %v3220_v21 = vmul.f32 %v6629_v29, %v3139_v11  ;;  %v3364_v13 = vmul.f32 %v6635_v6, %v3139_v11 }
 0x46d   : > { %v3365_v43 = vmul.f32 %v6637_v45, %v3139_v11  ;;  %v3491_v53 = vmul.f32 %v6639_v63, %v3139_v11  ;;  %v3492_v52 = vmul.f32 %v6641_v58, %v3139_v11 }
 0x46e   : > { %v3013_v0 = vadd.f32 %v3009_v38, %v2978_v59  ;;  %v3222_v26 = vrot.slane %v3220_v21, 4  ;;  %v5098_v21 = vld [vmem:[%s6687_s8 + $0x2] sm:$0x3] }
 0x46f   : > { %v2884_v42 = vpop.f32.mrf.mxu3  ;;  %v3367_v51 = vrot.slane %v3365_v43, 4  ;;  %v3494_v49 = vrot.slane %v3492_v52, 4  ;;  %3607 = vst [vmem:[#allocation1 + $0x1] ss:$4 sm:$0xff] %v5098_v21 }
 0x470   : > { %v3014_v55 = vadd.f32 %v3013_v0, %v5887_v15  ;;  %v3224_v23 = vadd.f32 %v3222_v26, %v3219_v17 }
 0x471   : > { %v3369_v16 = vadd.f32 %v3367_v51, %v3364_v13  ;;  %v6666_v33 = vadd.f32 %v3494_v49, %v3491_v53 }
 0x472   : > { %v3016_v56 = vrot.slane %v3014_v55, 1  ;;  %v3017_v30 = vrot.slane %v3014_v55, 2  ;;  %v3018_v4 = vrot.slane %v3014_v55, 3  ;;  %v3019_v28 = vrot.slane %v3014_v55, 4  ;;  %3030 = vst [vmem:[%s5902_s28 + $0x4] sm:$0x1] %v3014_v55  ;;  %v3173_v44 = vpop.f32.mrf.mxu1 }
 0x473   : > { %v3020_v41 = vrot.slane %v3014_v55, 5  ;;  %v3021_v47 = vrot.slane %v3014_v55, 6  ;;  %v3022_v19 = vrot.slane %v3014_v55, 7  ;;  %v3272_v37 = vmul.f32 %v6627_v62, %v3173_v44  ;;  %v6671_v10 = vpop.f32.mrf.mxu0 }
 0x474   : > { %3031 = vst [vmem:[%s5902_s28 + $0xc] sm:$0x1] %v3016_v56  ;;  %v3273_v22 = vmul.f32 %v6629_v29, %v3173_v44  ;;  %v3399_v8 = vmul.f32 %v6635_v6, %v3173_v44  ;;  %v3400_v25 = vmul.f32 %v6637_v45, %v3173_v44  ;;  %v3526_v50 = vmul.f32 %v6639_v63, %v3173_v44  ;;  %v3011_v27 = vpop.f32.mrf.mxu2 }
 0x475   : > { %3032 = vst [vmem:[%s5902_s28 + $0x14] sm:$0x1] %v3017_v30  ;;  %v3527_v5 = vmul.f32 %v6641_v58, %v3173_v44  ;;  %v3225_v61 = vmul.f32 %v6653_v36, %v6671_v10  ;;  %v3227_v12 = vmul.f32 %v6655_v48, %v6671_v10  ;;  %v3370_v35 = vmul.f32 %v6658_v46, %v6671_v10 }
 0x476   : > { %3033 = vst [vmem:[%s5902_s28 + $0x1c] sm:$0x1] %v3018_v4  ;;  %v3275_v31 = vrot.slane %v3273_v22, 4  ;;  %v3372_v32 = vmul.f32 %v6660_v54, %v6671_v10  ;;  %v3402_v57 = vrot.slane %v3400_v25, 4  ;;  %v3497_v24 = vmul.f32 %v6662_v2, %v6671_v10  ;;  %v5074_v4 = vld [vmem:[%s7208_s2 + $0x4] sm:$0xf] }
 0x477   : > { %3034 = vst [vmem:[%s5902_s28 + $0x24] sm:$0x1] %v3019_v28  ;;  %v3106_v39 = vpop.f32.mrf.mxu3  ;;  %v3226_v1 = vadd.f32 %v3225_v61, %v3224_v23  ;;  %v3229_v11 = vrot.slane %v3227_v12, 4  ;;  %v3371_v18 = vadd.f32 %v3370_v35, %v3369_v16  ;;  %v3529_v20 = vrot.slane %v3527_v5, 4  ;;  %v5100_v35 = vld [vmem:[%s6687_s8 + $0x4] sm:$0x3] }
 0x478   : > { %3035 = vst [vmem:[%s5902_s28 + $0x2c] sm:$0x1] %v3020_v41  ;;  %v3201_v60 = vmul.f32 %v6627_v62, %v3106_v39  ;;  %v3203_v59 = vmul.f32 %v6629_v29, %v3106_v39  ;;  %v3326_v38 = vmul.f32 %v6635_v6, %v3106_v39  ;;  %v3328_v17 = vmul.f32 %v6637_v45, %v3106_v39 }
 0x479   : > { %3036 = vst [vmem:[%s5902_s28 + $0x34] sm:$0x1] %v3021_v47  ;;  %v3453_v34 = vmul.f32 %v6639_v63, %v3106_v39  ;;  %v3455_v13 = vmul.f32 %v6641_v58, %v3106_v39  ;;  %v3231_v43 = vadd.f32 %v3229_v11, %v3226_v1  ;;  %v3277_v53 = vadd.f32 %v3275_v31, %v3272_v37  ;;  %v6726_v39 = vld [vmem:[%s5602_s18 + $0x6] sm:$0x1] }
 0x47a   : > { %3037 = vst [vmem:[%s5902_s28 + $0x3c] sm:$0x1] %v3022_v19  ;;  %v3175_v52 = vpop.f32.mrf.mxu1  ;;  %v3205_v0 = vrot.slane %v3203_v59, 4  ;;  %v3330_v26 = vrot.slane %v3328_v17, 4  ;;  %v3374_v42 = vrot.slane %v3372_v32, 4  ;;  %v3404_v62 = vadd.f32 %v3402_v57, %v3399_v8 }
 0x47b   : > { %v3233_v51 = vpack.c.bf16 %v3231_v43, %v3231_v43  ;;  %v3278_v29 = vmul.f32 %v6653_v36, %v3175_v52  ;;  %v3280_v6 = vmul.f32 %v6655_v48, %v3175_v52  ;;  %v3457_v45 = vrot.slane %v3455_v13, 4 }
 0x47c   : > { %v3207_v49 = vadd.f32 %v3205_v0, %v3201_v60  ;;  %v3332_v55 = vadd.f32 %v3330_v26, %v3326_v38  ;;  %v3376_v63 = vadd.f32 %v3374_v42, %v3371_v18  ;;  %v3405_v58 = vmul.f32 %v6658_v46, %v3175_v52 }
 0x47d   : > { %v3238_v23 = vsel %vm316_vm1, %v3233_v51, 0  ;;  %v3279_v16 = vadd.f32 %v3278_v29, %v3277_v53  ;;  %v3282_v56 = vrot.slane %v3280_v6, 4  ;;  %v3459_v30 = vadd.f32 %v3457_v45, %v3453_v34  ;;  %v5102_v45 = vld [vmem:[%s6687_s8 + $0x6] sm:$0x3] }
 0x47e   : > { %3247 = vmatpush.bf16.msrb.mxu2 %v3238_v23  ;;  %v3378_v28 = vpack.c.bf16 %v3376_v63, %v3376_v63  ;;  %v3406_v44 = vadd.f32 %v3405_v58, %v3404_v62  ;;  %v3407_v41 = vmul.f32 %v6660_v54, %v3175_v52  ;;  %v3531_v47 = vadd.f32 %v3529_v20, %v3526_v50  ;;  %v5079_v63 = vld [vmem:[%s7208_s2 + $0xc] sm:$0xf] }
 0x47f   : > { %v3108_v19 = vpop.f32.mrf.mxu3  ;;  %v3284_v37 = vadd.f32 %v3282_v56, %v3279_v16  ;;  %v3532_v22 = vmul.f32 %v6662_v2, %v3175_v52  ;;  %v3534_v8 = vmul.f32 %v6664_v40, %v3175_v52  ;;  %v3498_v25 = vadd.f32 %v3497_v24, %v6666_v33 }
 0x480   : > { %v3209_v27 = vmul.f32 %v6653_v36, %v3108_v19  ;;  %v3212_v5 = vmul.f32 %v6655_v48, %v3108_v19  ;;  %v3334_v61 = vmul.f32 %v6658_v46, %v3108_v19  ;;  %v3337_v12 = vmul.f32 %v6660_v54, %v3108_v19  ;;  %v6728_v46 = vld.sshfl [vmem:[#allocation1] sm:$0xff pattern:$0x73625140] }
 0x481   : > { %5075 = vmatmul.msk.bf16.vlgmr.msrb.gmra.mxu2 %vm486_vm5, %v5074_v4  ;;  %v3286_v50 = vpack.c.bf16 %v3284_v37, %v3284_v37  ;;  %v3461_v31 = vmul.f32 %v6662_v2, %v3108_v19  ;;  %v3464_v32 = vmul.f32 %v6664_v40, %v3108_v19  ;;  %v3383_v57 = vsel %vm316_vm1, %v3378_v28, 0  ;;  %3611 = vst [vmem:[#allocation1 + $0x2] ss:$4 sm:$0xff] %v5100_v35  ;;  %v5077_v2 = vld [vmem:[%s7208_s2 + $0x8] sm:$0xf] }
 0x482   : > { %v3210_v33 = vadd.f32 %v3209_v27, %v3207_v49  ;;  %v3214_v36 = vrot.slane %v3212_v5, 4  ;;  %v3335_v24 = vadd.f32 %v3334_v61, %v3332_v55  ;;  %v3339_v48 = vrot.slane %v3337_v12, 4  ;;  %3392 = vmatpush.bf16.msra.mxu2 %v3383_v57  ;;  %v3217_v55 = vld [vmem:[%s7208_s2] sm:$0xf]  ;;  %v5081_v5 = vld [vmem:[%s7208_s2 + $0x10] sm:$0xf] }
 0x483   : > { %v3291_v54 = vsel %vm316_vm1, %v3286_v50, 0  ;;  %v3462_v1 = vadd.f32 %v3461_v31, %v3459_v30  ;;  %v3466_v11 = vrot.slane %v3464_v32, 4  ;;  %v3409_v18 = vrot.slane %v3407_v41, 4 }
 0x484   : > { %3300 = vmatpush.bf16.msra.mxu0 %v3291_v54  ;;  %v3216_v20 = vadd.f32 %v3214_v36, %v3210_v33  ;;  %v3341_v60 = vadd.f32 %v3339_v48, %v3335_v24  ;;  %v3533_v59 = vadd.f32 %v3532_v22, %v3531_v47  ;;  %v3536_v38 = vrot.slane %v3534_v8, 4 }
 0x485   : > { %v3468_v17 = vadd.f32 %v3466_v11, %v3462_v1  ;;  %v3411_v21 = vadd.f32 %v3409_v18, %v3406_v44  ;;  %v3499_v34 = vmul.f32 %v6664_v40, %v6671_v10  ;;  %v3658_v13 = vadd.f32 %v6726_v39, %v5596_v3 }
 0x486   : > { %v3218_v43 = vpack.c.bf16 %v3216_v20, %v3216_v20  ;;  %v3343_v53 = vpack.c.bf16 %v3341_v60, %v3341_v60  ;;  %v3538_v52 = vadd.f32 %v3536_v38, %v3533_v59  ;;  %v3622_v0 = vmul.f32 0.0, %v6726_v39 }
 0x487   : > { %5078 = vmatmul.msk.bf16.vlgmr.msra.gmra.mxu0 %vm486_vm5, %v5077_v2  ;;  %v3470_v26 = vpack.c.bf16 %v3468_v17, %v3468_v17  ;;  %v3413_v42 = vpack.c.bf16 %v3411_v21, %v3411_v21  ;;  %v3501_v62 = vrot.slane %v3499_v34, 4  ;;  %v3659_v51 = vperm.slane %v3658_v13, 0 }
 0x488   : > { %v3257_v29 = vsel %vm316_vm1, %v3218_v43, 0  ;;  %v3348_v40 = vsel %vm316_vm1, %v3343_v53, 0  ;;  %v3540_v10 = vpack.c.bf16 %v3538_v52, %v3538_v52  ;;  %v3623_v6 = vadd.f32 %v3622_v0, %v5596_v3  ;;  %v6756_v44 = vld.sshfl [vmem:[#allocation1] sm:$0xff pattern:$0x73625140] }
 0x489   : > { %3266 = vmatpush.bf16.msra.mxu3 %v3257_v29  ;;  %3357 = vmatpush.bf16.msra.mxu1 %v3348_v40  ;;  %v3475_v49 = vsel %vm316_vm1, %v3470_v26, 0  ;;  %v3418_v58 = vsel %vm316_vm1, %v3413_v42, 0  ;;  %v3503_v23 = vadd.f32 %v3501_v62, %v3498_v25  ;;  %v3662_v16 = vsub.f32 %v5604_v7, %v3659_v51  ;;  %3615 = vst [vmem:[#allocation1 + $0x3] ss:$4 sm:$0xff] %v5102_v45  ;;  %v5085_v43 = vld [vmem:[%s7208_s2 + $0x18] sm:$0xf] }
 0x48a   : > { %3484 = vmatpush.bf16.msrb.mxu0 %v3475_v49  ;;  %v3545_v56 = vsel %vm316_vm1, %v3540_v10, 0  ;;  %v3624_v30 = vperm.slane %v3623_v6, 0  ;;  %v3727_v4 = vstv %s3725_s26  ;;  %v3729_v28 = vstv %s3726_s10  ;;  %s4680_s26 = scalar_lea.sflag [#allocation4], %s259_s7 }
 0x48b   : > { %3554 = vmatpush.bf16.msrb.mxu2 %v3545_v56  ;;  %v3505_v41 = vpack.c.bf16 %v3503_v23, %v3503_v23  ;;  %v3665_v47 = vand.u32 2147483647, %v3662_v16  ;;  %v3728_v19 = vadd.f32 %v3727_v4, %v3622_v0  ;;  %v3854_v37 = vadd.f32 %v3727_v4, %v6726_v39  ;;  %v5087_v23 = vld [vmem:[%s7208_s2 + $0x1c] sm:$0xf] }
 0x48c   : > { %5076 = vmatmul.msk.bf16.vlgmr.msra.gmra.mxu3 %vm486_vm5, %v3217_v55  ;;  %5080 = vmatmul.msk.bf16.vlgmr.msra.gmra.mxu1 %vm486_vm5, %v5079_v63  ;;  %v3627_v22 = vsub.f32 %v5604_v7, %v3624_v30  ;;  %v3660_v8 = vsub.f32 %v5607_v9, %v3659_v51  ;;  %v3661_v25 = vsub.f32 %v5610_v14, %v3659_v51  ;;  %v3691_v27 = vmul.f32 2.0, %v6726_v39 }
 0x48d   : > { %3427 = vmatpush.bf16.msrb.mxu3 %v3418_v58  ;;  %v3510_v61 = vsel %vm316_vm1, %v3505_v41, 0  ;;  %v3668_v12 = vsub.f32 1.0, %v3665_v47  ;;  %v6769_v35 = vsub.f32 %v3729_v28, %v3728_v19  ;;  %v6771_v50 = vsub.f32 %v3729_v28, %v3854_v37  ;;  %v5083_v58 = vld [vmem:[%s7208_s2 + $0x14] sm:$0xf]  ;;  %v5089_v37 = vld [vmem:[%s7208_s2 + $0x20] sm:$0xf] }
 0x48e   : > { %3519 = vmatpush.bf16.msrb.mxu1 %v3510_v61  ;;  %v3630_v31 = vand.u32 2147483647, %v3627_v22  ;;  %v3663_v32 = vand.u32 2147483647, %v3660_v8  ;;  %v3664_v57 = vand.u32 2147483647, %v3661_v25  ;;  %v3692_v33 = vadd.f32 %v3691_v27, %v5596_v3 }
 0x48f   : > { %v3671_v36 = vmax.f32 %v3668_v12, 0.0  ;;  %v3981_v24 = vadd.f32 %v3727_v4, %v3691_v27  ;;  %v3625_v39 = vsub.f32 %v5607_v9, %v3624_v30  ;;  %v3626_v20 = vsub.f32 %v5610_v14, %v3624_v30 }
 0x490   : > { %v3633_v48 = vsub.f32 1.0, %v3630_v31  ;;  %v3666_v54 = vsub.f32 1.0, %v3663_v32  ;;  %v3667_v1 = vsub.f32 1.0, %v3664_v57  ;;  %v3693_v11 = vperm.slane %v3692_v33, 0 }
 0x491   : > { %5082 = vmatmul.msk.bf16.vlgmr.msra.gmra.mxu2 %vm486_vm5, %v5081_v5  ;;  %v3673_v18 = vpack.c.bf16 %v3671_v36, %v3671_v36  ;;  %v6776_v2 = vsub.f32 %v3729_v28, %v3981_v24  ;;  %v3628_v34 = vand.u32 2147483647, %v3625_v39  ;;  %v3629_v13 = vand.u32 2147483647, %v3626_v20  ;;  %v3592_v28 = vld [vmem:[%s6687_s8] sm:$0x3] }
 0x492   : > { %v3636_v60 = vmax.f32 %v3633_v48, 0.0  ;;  %v3669_v59 = vmax.f32 %v3666_v54, 0.0  ;;  %v3670_v38 = vmax.f32 %v3667_v1, 0.0  ;;  %v3696_v17 = vsub.f32 %v5604_v7, %v3693_v11  ;;  %v3616_v8 = vld.sshfl [vmem:[#allocation1] sm:$0xff pattern:$0x73625140] }
 0x493   : > { %v3675_v21 = vsel %vm344_vm0, %v3673_v18, 0  ;;  %v3694_v26 = vsub.f32 %v5607_v9, %v3693_v11  ;;  %v3631_v42 = vsub.f32 1.0, %v3628_v34  ;;  %v3632_v62 = vsub.f32 1.0, %v3629_v13  ;;  %s6823_s8 = sadd.s32 7, %s5590_s23 }
 0x494   : > { %3683 = vmatpush.bf16.msra.mxu0 %v3675_v21  ;;  %v3638_v53 = vpack.c.bf16 %v3636_v60, %v3636_v60  ;;  %v3672_v52 = vpack.c.bf16 %v3670_v38, %v3669_v59  ;;  %v3699_v0 = vand.u32 2147483647, %v3696_v17  ;;  %v3695_v51 = vsub.f32 %v5610_v14, %v3693_v11  ;;  %p4133_p7 = scmp.gt.s32.totalorder %s6823_s8, 0  ;;  %p5123_p11 = scmp.lt.s32.totalorder %s6823_s8, 14 }
 0x495   : > { %v3697_v10 = vand.u32 2147483647, %v3694_v26  ;;  %v3634_v6 = vmax.f32 %v3631_v42, 0.0  ;;  %v3635_v45 = vmax.f32 %v3632_v62, 0.0  ;;  %v3618_v22 = vsel %vm316_vm1, %v3592_v28, %v6728_v46  ;;  %s4272_s10 = scvt.s32.f32 %s6823_s8 }
 0x496   : > { %v3642_v29 = vsel %vm344_vm0, %v3638_v53, 0  ;;  %v3702_v40 = vsub.f32 1.0, %v3699_v0  ;;  %v3698_v49 = vand.u32 2147483647, %v3695_v51  ;;  %v3619_v25 = vsel %vm319_vm2, %v3618_v22, %v6756_v44  ;;  %s4134_s23 = scalar_select %p4133_p7, %s6823_s8, 0 }
 0x497   : > { %5086 = vmatmul.msk.bf16.vlgmr.msrb.gmra.mxu0 %vm486_vm5, %v5085_v43  ;;  %3650 = vmatpush.bf16.msra.mxu3 %v3642_v29  ;;  %v3700_v63 = vsub.f32 1.0, %v3697_v10  ;;  %v3637_v16 = vpack.c.bf16 %v3635_v45, %v3634_v6  ;;  %v3620_v27 = vsel %vm321_vm3, %v3619_v25, %v3616_v8  ;;  %v3735_v33 = vadd.f32 1.0, %v6769_v35  ;;  %s5156_s8 = sshll.u32 %s5428_s22, 4 }
 0x498   : > { %3684 = vmatpush.bf16.msra.mxu0 %v3672_v52  ;;  %v3705_v55 = vmax.f32 %v3702_v40, 0.0  ;;  %v3701_v56 = vsub.f32 1.0, %v3698_v49  ;;  %v3860_v44 = vadd.f32 1.0, %v6771_v50  ;;  %v3732_v48 = vand.u32 2147483647, %v6769_v35  ;;  %s7258_s23 = smov (!%p5123_p11, %s4134_s23), 14 }
 0x499   : > { %v3703_v4 = vmax.f32 %v3700_v63, 0.0  ;;  %v3736_v54 = vand.u32 2147483647, %v3735_v33  ;;  %v3987_v11 = vadd.f32 1.0, %v6776_v2  ;;  %v3857_v20 = vand.u32 2147483647, %v6771_v50  ;;  %s4273_s27 = scvt.s32.f32 %s7258_s23 }
 0x49a   : > { %v3707_v30 = vpack.c.bf16 %v3705_v55, %v3705_v55  ;;  %v3704_v41 = vmax.f32 %v3701_v56, 0.0  ;;  %v3861_v60 = vand.u32 2147483647, %v3860_v44  ;;  %v3739_v59 = vadd.f32 2.0, %v6769_v35  ;;  %s5128_s12 = sshll.u32 %s7258_s23, 1  ;;  %s4691_s23 = sadd.s32 %s5424_s21, %s5156_s8 }
 0x49b   : > { %3651 = vmatpush.bf16.msra.mxu3 %v3637_v16  ;;  %v3743_v38 = vadd.f32 3.0, %v6769_v35  ;;  %v3864_v17 = vadd.f32 2.0, %v6771_v50  ;;  %v3868_v21 = vadd.f32 3.0, %v6771_v50  ;;  %v3991_v34 = vadd.f32 2.0, %v6776_v2  ;;  %s6880_s6 = scalar_lea.vmem %s5582_s9, %s5128_s12 [#allocation2]  ;;  %s5157_s12 = sshll.u32 %s4691_s23, 3 }
 0x49c   : > { %5084 = vmatmul.msk.bf16.vlgmr.msrb.gmra.mxu3 %vm486_vm5, %v5083_v58  ;;  %5088 = vmatmul.msk.bf16.vlgmr.msrb.gmra.mxu1 %vm486_vm5, %v5087_v23  ;;  %v3709_v47 = vsel %vm344_vm0, %v3707_v30, 0  ;;  %v3706_v19 = vpack.c.bf16 %v3704_v41, %v3703_v4  ;;  %v3733_v43 = vsub.f32 1.0, %v3732_v48  ;;  %v3737_v53 = vsub.f32 1.0, %v3736_v54  ;;  %s4693_s22 = scalar_lea.hbm %s7210_s4, %s5157_s12  ;;  %s4694_s21 = sshll.u32 %s5902_s28, 4  ;;  %s4695_s21 = int_to_ptr.vmem [resolvable:$true] %s4694_s21 }
 0x49d   : > { %3717 = vmatpush.bf16.msra.mxu1 %v3709_v47  ;;  %v3995_v52 = vadd.f32 3.0, %v6776_v2  ;;  %v3984_v26 = vand.u32 2147483647, %v6776_v2  ;;  %v3988_v42 = vand.u32 2147483647, %v3987_v11  ;;  %v3858_v62 = vsub.f32 1.0, %v3857_v20 }
 0x49e   : > { %v3862_v35 = vsub.f32 1.0, %v3861_v60  ;;  %v3740_v51 = vand.u32 2147483647, %v3739_v59  ;;  %v3744_v29 = vand.u32 2147483647, %v3743_v38  ;;  %v3734_v49 = vmax.f32 %v3733_v43, 0.0 }
 0x49f   : > { %v3865_v10 = vand.u32 2147483647, %v3864_v17  ;;  %v3869_v6 = vand.u32 2147483647, %v3868_v21  ;;  %v3992_v45 = vand.u32 2147483647, %v3991_v34 }
 0x4a0   : > { %v3738_v55 = vmax.f32 %v3737_v53, 0.0  ;;  %v3996_v63 = vand.u32 2147483647, %v3995_v52  ;;  %v3985_v2 = vsub.f32 1.0, %v3984_v26  ;;  %v3989_v23 = vsub.f32 1.0, %v3988_v42  ;;  %s4696_s5 = sshll.u32 %s4693_s22, 4  ;;  %s4697_s5 = int_to_ptr.hbm [resolvable:$true] %s4696_s5 }
 0x4a1   : > { %5090 = vmatmul.msk.bf16.vlgmr.msrb.gmra.mxu2 %vm486_vm5, %v5089_v37  ;;  %3718 = vmatpush.bf16.msra.mxu1 %v3706_v19  ;;  %v3859_v56 = vmax.f32 %v3858_v62, 0.0  ;;  %v3863_v30 = vmax.f32 %v3862_v35, 0.0  ;;  %v3741_v4 = vsub.f32 1.0, %v3740_v51  ;;  %v3745_v28 = vsub.f32 1.0, %v3744_v29 }
 0x4a2   : > { %v3866_v47 = vsub.f32 1.0, %v3865_v10  ;;  %v3870_v19 = vsub.f32 1.0, %v3869_v6  ;;  %v3993_v37 = vsub.f32 1.0, %v3992_v45  ;;  %v6826_v8 = vperm.slane %v3734_v49, 0 }
 0x4a3   : > { %v6828_v25 = vperm.slane %v3738_v55, 0 }
 0x4a4   : > { %v3871_v48 = vmax.f32 %v3870_v19, 0.0  ;;  %v3994_v54 = vmax.f32 %v3993_v37, 0.0 }
 0x4a6   : > { %v6855_v26 = vperm.slane %v3994_v54, 0 }
 0x4a7   : > { %5104 = vmatmul.msk.bf16.vlgmr.msra.gmra.mxu0 %vm341_vm4, %v3620_v27 }
 0x4ac   : > { %5103 = vmatmul.msk.bf16.vlgmr.msra.gmra.mxu3 %vm341_vm4, %v3620_v27  ;;  %5105 = vmatmul.msk.bf16.vlgmr.msra.gmra.mxu1 %vm341_vm4, %v3620_v27  ;;  %v3997_v27 = vsub.f32 1.0, %v3996_v63 }
 0x504   : > { %v3249_v5 = vpop.f32.mrf.mxu2  ;;  %v3302_v61 = vpop.f32.mrf.mxu0 }
 0x509   : > { %v3359_v12 = vpop.f32.mrf.mxu1 }
 0x50c   : > { %v3251_v31 = vpop.f32.mrf.mxu2  ;;  %v3304_v46 = vpop.f32.mrf.mxu0 }
 0x50d   : > { %v6834_v31 = vperm.slane %v3859_v56, 0  ;;  %v6836_v46 = vperm.slane %v3863_v30, 0 }
 0x50f   : > { %v3268_v32 = vpop.f32.mrf.mxu3 }
 0x510   : > { %v3269_v36 = vadd.f32 %v3268_v32, %v3249_v5  ;;  %v3742_v32 = vmax.f32 %v3741_v4, 0.0 }
 0x511   : > { %v3361_v57 = vpop.f32.mrf.mxu1 }
 0x512   : > { %v3306_v1 = vadd.f32 %v3302_v61, %v3269_v36  ;;  %v3986_v61 = vmax.f32 %v3985_v2, 0.0  ;;  %v3746_v57 = vmax.f32 %v3745_v28, 0.0  ;;  %v6846_v21 = vperm.slane %v3742_v32, 0 }
 0x514   : > { %v3394_v24 = vpop.f32.mrf.mxu2  ;;  %v3486_v39 = vpop.f32.mrf.mxu0  ;;  %v3363_v0 = vadd.f32 %v3359_v12, %v3306_v1  ;;  %v3990_v12 = vmax.f32 %v3989_v23, 0.0  ;;  %v3999_v59 = vperm.slane %v3986_v61, 0  ;;  %v6848_v34 = vperm.slane %v3746_v57, 0 }
 0x516   : > { %v3398_v58 = vadd.f32 %v3394_v24, %v3363_v0  ;;  %v3867_v24 = vmax.f32 %v3866_v47, 0.0  ;;  %v4001_v38 = vperm.slane %v3990_v12, 0  ;;  %v6853_v0 = vperm.slane %v3871_v48, 0  ;;  %v5130_v48 = vld [vmem:[%s6880_s6 + $0x2] sm:$0x3] }
 0x517   : > { %v3270_v18 = vpop.f32.mrf.mxu3  ;;  %4154 = vst [vmem:[#allocation1 + $0x1] ss:$4 sm:$0xff] %v5130_v48 }
 0x518   : > { %v3998_v18 = vmax.f32 %v3997_v27, 0.0  ;;  %v6851_v52 = vperm.slane %v3867_v24, 0 }
 0x519   : > { %v3521_v13 = vpop.f32.mrf.mxu1 }
 0x51a   : > { %v6861_v29 = vperm.slane %v3998_v18, 0 }
 0x51c   : > { %v3396_v40 = vpop.f32.mrf.mxu2  ;;  %v3488_v50 = vpop.f32.mrf.mxu0 }
 0x51f   : > { %v3429_v16 = vpop.f32.mrf.mxu3 }
 0x520   : > { %v3433_v41 = vadd.f32 %v3429_v16, %v3398_v58 }
 0x521   : > { %v3523_v22 = vpop.f32.mrf.mxu1 }
 0x522   : > { %v3490_v5 = vadd.f32 %v3486_v39, %v3433_v41 }
 0x524   : > { %v3525_v33 = vadd.f32 %v3521_v13, %v3490_v5  ;;  %v3556_v36 = vpop.f32.mrf.mxu2  ;;  %v3686_v44 = vpop.f32.mrf.mxu0 }
 0x525   : > { %v3766_v1 = vmul.f32 %v6826_v8, %v3686_v44  ;;  %v3767_v39 = vmul.f32 %v6828_v25, %v3686_v44  ;;  %v3912_v11 = vmul.f32 %v6836_v46, %v3686_v44  ;;  %v3911_v60 = vmul.f32 %v6834_v31, %v3686_v44 }
 0x526   : > { %v3560_v20 = vadd.f32 %v3556_v36, %v3525_v33  ;;  %v6857_v42 = vmul.f32 %v3999_v59, %v3686_v44  ;;  %v6859_v62 = vmul.f32 %v4001_v38, %v3686_v44 }
 0x527   : > { %v3431_v17 = vpop.f32.mrf.mxu3  ;;  %v3769_v13 = vrot.slane %v3767_v39, 4  ;;  %v3914_v43 = vrot.slane %v3912_v11, 4 }
 0x528   : > { %v3561_v53 = vadd.f32 %v3560_v20, %v5887_v15 }
 0x529   : > { %v3720_v35 = vpop.f32.mrf.mxu1  ;;  %v3771_v51 = vadd.f32 %v3769_v13, %v3766_v1  ;;  %v3916_v6 = vadd.f32 %v3914_v43, %v3911_v60 }
 0x52a   : > { %v3563_v40 = vrot.slane %v3561_v53, 1  ;;  %v3564_v50 = vrot.slane %v3561_v53, 2  ;;  %v3565_v10 = vrot.slane %v3561_v53, 3  ;;  %3577 = vst [vmem:[%s5902_s28 + $0x5] sm:$0x1] %v3561_v53  ;;  %v3566_v45 = vrot.slane %v3561_v53, 4 }
 0x52b   : > { %v3567_v49 = vrot.slane %v3561_v53, 5  ;;  %v3568_v55 = vrot.slane %v3561_v53, 6  ;;  %v3569_v63 = vrot.slane %v3561_v53, 7  ;;  %v3819_v58 = vmul.f32 %v6826_v8, %v3720_v35 }
 0x52c   : > { %3578 = vst [vmem:[%s5902_s28 + $0xd] sm:$0x1] %v3563_v40  ;;  %v3820_v2 = vmul.f32 %v6828_v25, %v3720_v35  ;;  %v3946_v23 = vmul.f32 %v6834_v31, %v3720_v35  ;;  %v3947_v16 = vmul.f32 %v6836_v46, %v3720_v35  ;;  %v6870_v56 = vpop.f32.mrf.mxu0  ;;  %v3558_v30 = vpop.f32.mrf.mxu2  ;;  %v4074_v4 = vmul.f32 %v4001_v38, %v3720_v35 }
 0x52d   : > { %3579 = vst [vmem:[%s5902_s28 + $0x15] sm:$0x1] %v3564_v50  ;;  %v3772_v28 = vmul.f32 %v6846_v21, %v6870_v56  ;;  %v3774_v41 = vmul.f32 %v6848_v34, %v6870_v56  ;;  %v3917_v47 = vmul.f32 %v6851_v52, %v6870_v56  ;;  %v4073_v19 = vmul.f32 %v3999_v59, %v3720_v35 }
 0x52e   : > { %3580 = vst [vmem:[%s5902_s28 + $0x1d] sm:$0x1] %v3565_v10  ;;  %v3919_v37 = vmul.f32 %v6853_v0, %v6870_v56  ;;  %v3822_v22 = vrot.slane %v3820_v2, 4  ;;  %v3949_v27 = vrot.slane %v3947_v16, 4  ;;  %v4076_v57 = vrot.slane %v4074_v4, 4 }
 0x52f   : > { %3581 = vst [vmem:[%s5902_s28 + $0x25] sm:$0x1] %v3566_v45  ;;  %v3653_v5 = vpop.f32.mrf.mxu3  ;;  %v3773_v61 = vadd.f32 %v3772_v28, %v3771_v51  ;;  %v3776_v12 = vrot.slane %v3774_v41, 4  ;;  %v3918_v32 = vadd.f32 %v3917_v47, %v3916_v6  ;;  %v5106_v10 = vld [vmem:[%s7208_s2 + $0x4] sm:$0xf] }
 0x530   : > { %3582 = vst [vmem:[%s5902_s28 + $0x2d] sm:$0x1] %v3567_v49  ;;  %v3748_v33 = vmul.f32 %v6826_v8, %v3653_v5  ;;  %v3750_v36 = vmul.f32 %v6828_v25, %v3653_v5  ;;  %v3873_v44 = vmul.f32 %v6834_v31, %v3653_v5  ;;  %v3875_v24 = vmul.f32 %v6836_v46, %v3653_v5 }
 0x531   : > { %3583 = vst [vmem:[%s5902_s28 + $0x35] sm:$0x1] %v3568_v55  ;;  %v4000_v54 = vmul.f32 %v3999_v59, %v3653_v5  ;;  %v4002_v1 = vmul.f32 %v4001_v38, %v3653_v5  ;;  %v3722_v39 = vpop.f32.mrf.mxu1  ;;  %v3778_v11 = vadd.f32 %v3776_v12, %v3773_v61  ;;  %v3921_v18 = vrot.slane %v3919_v37, 4 }
 0x532   : > { %3584 = vst [vmem:[%s5902_s28 + $0x3d] sm:$0x1] %v3569_v63  ;;  %v3824_v20 = vadd.f32 %v3822_v22, %v3819_v58  ;;  %v3825_v60 = vmul.f32 %v6846_v21, %v3722_v39  ;;  %v3827_v17 = vmul.f32 %v6848_v34, %v3722_v39  ;;  %v4078_v8 = vadd.f32 %v4076_v57, %v4073_v19  ;;  %v5132_v19 = vld [vmem:[%s6880_s6 + $0x4] sm:$0x3]  ;;  %v5109_v22 = vld [vmem:[%s7208_s2 + $0x8] sm:$0xf] }
 0x533   : > { %v3780_v13 = vpack.c.bf16 %v3778_v11, %v3778_v11  ;;  %v3923_v25 = vadd.f32 %v3921_v18, %v3918_v32  ;;  %v4079_v31 = vmul.f32 %v6855_v26, %v3722_v39  ;;  %v4081_v46 = vmul.f32 %v6861_v29, %v3722_v39 }
 0x534   : > { %v3826_v43 = vadd.f32 %v3825_v60, %v3824_v20  ;;  %v3829_v59 = vrot.slane %v3827_v17, 4  ;;  %v3752_v38 = vrot.slane %v3750_v36, 4  ;;  %v3877_v53 = vrot.slane %v3875_v24, 4 }
 0x535   : > { %v3785_v35 = vsel %vm316_vm1, %v3780_v13, 0  ;;  %v3925_v51 = vpack.c.bf16 %v3923_v25, %v3923_v25  ;;  %v4080_v40 = vadd.f32 %v4079_v31, %v4078_v8  ;;  %v4083_v50 = vrot.slane %v4081_v46, 4 }
 0x536   : > { %3794 = vmatpush.bf16.msra.mxu2 %v3785_v35  ;;  %v3831_v6 = vadd.f32 %v3829_v59, %v3826_v43  ;;  %v3754_v45 = vadd.f32 %v3752_v38, %v3748_v33  ;;  %v3879_v49 = vadd.f32 %v3877_v53, %v3873_v44  ;;  %v4004_v55 = vrot.slane %v4002_v1, 4  ;;  %v6920_v44 = vld [vmem:[%s5602_s18 + $0x7] sm:$0x1] }
 0x537   : > { %v3655_v63 = vpop.f32.mrf.mxu3  ;;  %v3930_v58 = vsel %vm316_vm1, %v3925_v51, 0  ;;  %v4085_v2 = vadd.f32 %v4083_v50, %v4080_v40  ;;  %v3951_v16 = vadd.f32 %v3949_v27, %v3946_v23  ;;  %v3952_v30 = vmul.f32 %v6851_v52, %v3722_v39  ;;  %v5134_v43 = vld [vmem:[%s6880_s6 + $0x6] sm:$0x3]  ;;  %v5111_v40 = vld [vmem:[%s7208_s2 + $0xc] sm:$0xf] }
 0x538   : > { %v3833_v4 = vpack.c.bf16 %v3831_v6, %v3831_v6  ;;  %v3756_v28 = vmul.f32 %v6846_v21, %v3655_v63  ;;  %v3759_v41 = vmul.f32 %v6848_v34, %v3655_v63  ;;  %v3881_v47 = vmul.f32 %v6851_v52, %v3655_v63  ;;  %v6915_v52 = vld.sshfl [vmem:[#allocation1] sm:$0xff pattern:$0x73625140] }
 0x539   : > { %5107 = vmatmul.msk.bf16.vlgmr.msra.gmra.mxu2 %vm486_vm5, %v5106_v10  ;;  %v4087_v37 = vpack.c.bf16 %v4085_v2, %v4085_v2  ;;  %v3884_v23 = vmul.f32 %v6853_v0, %v3655_v63  ;;  %v4006_v27 = vadd.f32 %v4004_v55, %v4000_v54  ;;  %v4008_v5 = vmul.f32 %v6855_v26, %v3655_v63 }
 0x53a   : > { %3939 = vmatpush.bf16.msrb.mxu2 %v3930_v58  ;;  %v3838_v21 = vsel %vm316_vm1, %v3833_v4, 0  ;;  %v3757_v61 = vadd.f32 %v3756_v28, %v3754_v45  ;;  %v3761_v34 = vrot.slane %v3759_v41, 4  ;;  %v3882_v12 = vadd.f32 %v3881_v47, %v3879_v49  ;;  %4158 = vst [vmem:[#allocation1 + $0x2] ss:$4 sm:$0xff] %v5132_v19 }
 0x53b   : > { %3847 = vmatpush.bf16.msrb.mxu0 %v3838_v21  ;;  %v4092_v32 = vsel %vm316_vm1, %v4087_v37, 0  ;;  %v3886_v57 = vrot.slane %v3884_v23, 4  ;;  %v4009_v33 = vadd.f32 %v4008_v5, %v4006_v27  ;;  %v4011_v36 = vmul.f32 %v6861_v29, %v3655_v63  ;;  %v5113_v37 = vld [vmem:[%s7208_s2 + $0x10] sm:$0xf] }
 0x53c   : > { %v3763_v24 = vadd.f32 %v3761_v34, %v3757_v61  ;;  %v3953_v48 = vadd.f32 %v3952_v30, %v3951_v16  ;;  %v3954_v54 = vmul.f32 %v6853_v0, %v3722_v39  ;;  %v4041_v1 = vrot.slane %v6859_v62, 4 }
 0x53d   : > { %v3888_v11 = vadd.f32 %v3886_v57, %v3882_v12  ;;  %v4013_v18 = vrot.slane %v4011_v36, 4  ;;  %v4044_v20 = vmul.f32 %v6855_v26, %v6870_v56  ;;  %v4046_v60 = vmul.f32 %v6861_v29, %v6870_v56 }
 0x53e   : > { %4101 = vmatpush.bf16.msra.mxu2 %v4092_v32  ;;  %5110 = vmatmul.msk.bf16.vlgmr.msrb.gmra.mxu0 %vm486_vm5, %v5109_v22  ;;  %v3765_v17 = vpack.c.bf16 %v3763_v24, %v3763_v24  ;;  %v3956_v8 = vrot.slane %v3954_v54, 4  ;;  %v4043_v13 = vadd.f32 %v4041_v1, %v6857_v42  ;;  %v4205_v0 = vadd.f32 %v6920_v44, %v5596_v3  ;;  %v3764_v42 = vld [vmem:[%s7208_s2] sm:$0xf] }
 0x53f   : > { %v3890_v62 = vpack.c.bf16 %v3888_v11, %v3888_v11  ;;  %v4015_v39 = vadd.f32 %v4013_v18, %v4009_v33  ;;  %v4048_v25 = vrot.slane %v4046_v60, 4  ;;  %v4169_v26 = vmul.f32 0.0, %v6920_v44  ;;  %v5117_v11 = vld [vmem:[%s7208_s2 + $0x18] sm:$0xf] }
 0x540   : > { %v3804_v31 = vsel %vm316_vm1, %v3765_v17, 0  ;;  %v3958_v46 = vadd.f32 %v3956_v8, %v3953_v48  ;;  %v4045_v29 = vadd.f32 %v4044_v20, %v4043_v13  ;;  %v4206_v56 = vperm.slane %v4205_v0, 0 }
 0x541   : > { %3813 = vmatpush.bf16.msrb.mxu3 %v3804_v31  ;;  %v3895_v59 = vsel %vm316_vm1, %v3890_v62, 0  ;;  %v4017_v38 = vpack.c.bf16 %v4015_v39, %v4015_v39  ;;  %v4170_v53 = vadd.f32 %v4169_v26, %v5596_v3  ;;  %v4274_v35 = vstv %s4272_s10  ;;  %v6947_v45 = vld.sshfl [vmem:[#allocation1] sm:$0xff pattern:$0x73625140]  ;;  %s5332_s10 = sshra.s32 %s4697_s5, 4  ;;  %s5333_s10 = int_to_ptr.hbm [resolvable:$true] %s5332_s10 }
 0x542   : > { %3904 = vmatpush.bf16.msrb.mxu1 %v3895_v59  ;;  %v3960_v51 = vpack.c.bf16 %v3958_v46, %v3958_v46  ;;  %v4050_v50 = vadd.f32 %v4048_v25, %v4045_v29  ;;  %v4209_v10 = vsub.f32 %v5604_v7, %v4206_v56  ;;  %v4207_v6 = vsub.f32 %v5607_v9, %v4206_v56  ;;  %v5119_v59 = vld [vmem:[%s7208_s2 + $0x1c] sm:$0xf]  ;;  %s5334_s18 = scalar_lea.hbm %s5333_s10, 64  ;;  %p5339_p4 = scmp.lt.s32.totalorder %s5333_s10, %s7210_s4 }
 0x543   : > { %v4022_v49 = vsel %vm316_vm1, %v4017_v38, 0  ;;  %v4208_v55 = vsub.f32 %v5610_v14, %v4206_v56  ;;  %v4171_v63 = vperm.slane %v4170_v53, 0  ;;  %v4275_v58 = vadd.f32 %v4274_v35, %v4169_v26  ;;  %4162 = vst [vmem:[#allocation1 + $0x3] ss:$4 sm:$0xff] %v5134_v43  ;;  %v5115_v43 = vld [vmem:[%s7208_s2 + $0x14] sm:$0xf]  ;;  %p5335_p13 = scmp.ne.s32.totalorder %s5333_s10, %s5334_s18 }
 0x544   : > { %4031 = vmatpush.bf16.msra.mxu0 %v4022_v49  ;;  %v3965_v2 = vsel %vm316_vm1, %v3960_v51, 0  ;;  %5108 = vmatmul.msk.bf16.vlgmr.msrb.gmra.mxu3 %vm486_vm5, %v3764_v42  ;;  %v4052_v16 = vpack.c.bf16 %v4050_v50, %v4050_v50  ;;  %v4212_v30 = vand.u32 2147483647, %v4209_v10  ;;  %v4210_v4 = vand.u32 2147483647, %v4207_v6 }
 0x545   : > { %3974 = vmatpush.bf16.msra.mxu3 %v3965_v2  ;;  %5112 = vmatmul.msk.bf16.vlgmr.msrb.gmra.mxu1 %vm486_vm5, %v5111_v40  ;;  %v4211_v28 = vand.u32 2147483647, %v4208_v55  ;;  %v4174_v41 = vsub.f32 %v5604_v7, %v4171_v63  ;;  %v4276_v47 = vstv %s4273_s27  ;;  %v4401_v19 = vadd.f32 %v4274_v35, %v6920_v44  ;;  %v4139_v38 = vld [vmem:[%s6880_s6] sm:$0x3]  ;;  %p5336_p0 = pnand %p5335_p13, %p5555_p12  ;;  %s5338_s27 = scalar_lea.hbm %s7210_s4, 256 }
 0x546   : > { %v4057_v22 = vsel %vm316_vm1, %v4052_v16, 0  ;;  %v4215_v23 = vsub.f32 1.0, %v4212_v30  ;;  %v4213_v27 = vsub.f32 1.0, %v4210_v4  ;;  %v6960_v5 = vsub.f32 %v4276_v47, %v4275_v58  ;;  %v5121_v50 = vld [vmem:[%s7208_s2 + $0x20] sm:$0xf]  ;;  %p5340_p5 = scmp.lt.s32.totalorder %s5338_s27, %s5334_s18 }
 0x547   : > { %4066 = vmatpush.bf16.msra.mxu1 %v4057_v22  ;;  %v4214_v21 = vsub.f32 1.0, %v4211_v28  ;;  %v4177_v61 = vand.u32 2147483647, %v4174_v41  ;;  %v6962_v34 = vsub.f32 %v4276_v47, %v4401_v19  ;;  %v4172_v57 = vsub.f32 %v5607_v9, %v4171_v63  ;;  %p5337_p1 = pneg %p5336_p0 }
 0x548   : > { %v4218_v12 = vmax.f32 %v4215_v23, 0.0  ;;  %v4216_v32 = vmax.f32 %v4213_v27, 0.0  ;;  %v4173_v24 = vsub.f32 %v5610_v14, %v4171_v63  ;;  %v4238_v48 = vmul.f32 2.0, %v6920_v44  ;;  %p5341_p6 = por %p5340_p5, %p5339_p4 }
 0x549   : > { %5114 = vmatmul.msk.bf16.vlgmr.msrb.gmra.mxu2 %vm486_vm5, %v5113_v37  ;;  %v4217_v33 = vmax.f32 %v4214_v21, 0.0  ;;  %v4180_v36 = vsub.f32 1.0, %v4177_v61  ;;  %v4175_v1 = vand.u32 2147483647, %v4172_v57  ;;  %v4407_v37 = vadd.f32 1.0, %v6962_v34 }
 0x54a   : > { %v4220_v54 = vpack.c.bf16 %v4218_v12, %v4218_v12  ;;  %v4176_v20 = vand.u32 2147483647, %v4173_v24  ;;  %v4239_v8 = vadd.f32 %v4238_v48, %v5596_v3  ;;  %v4528_v13 = vadd.f32 %v4274_v35, %v4238_v48  ;;  %v4163_v55 = vld.sshfl [vmem:[#allocation1] sm:$0xff pattern:$0x73625140]  ;;  %p5342_p8 = pnand %p5341_p6, %p5337_p1 }
 0x54b   : > { %v4183_v18 = vmax.f32 %v4180_v36, 0.0  ;;  %v4178_v17 = vsub.f32 1.0, %v4175_v1  ;;  %v4219_v0 = vpack.c.bf16 %v4217_v33, %v4216_v32  ;;  %v4408_v32 = vand.u32 2147483647, %v4407_v37 }
 0x54c   : > { %v4222_v60 = vsel %vm344_vm0, %v4220_v54, 0  ;;  %v4179_v39 = vsub.f32 1.0, %v4176_v20  ;;  %v4240_v25 = vperm.slane %v4239_v8, 0  ;;  %v6974_v26 = vsub.f32 %v4276_v47, %v4528_v13 }
 0x54d   : > { %4230 = vmatpush.bf16.msrb.mxu0 %v4222_v60  ;;  %v4185_v62 = vpack.c.bf16 %v4183_v18, %v4183_v18  ;;  %v4181_v44 = vmax.f32 %v4178_v17, 0.0  ;;  %v4282_v47 = vadd.f32 1.0, %v6960_v5  ;;  %v4279_v57 = vand.u32 2147483647, %v6960_v5 }
 0x54e   : > { %5118 = vmatmul.msk.bf16.vlgmr.msra.gmra.mxu0 %vm486_vm5, %v5117_v11  ;;  %v4182_v46 = vmax.f32 %v4179_v39, 0.0  ;;  %v4243_v29 = vsub.f32 %v5604_v7, %v4240_v25  ;;  %v4241_v3 = vsub.f32 %v5607_v9, %v4240_v25  ;;  %v4242_v56 = vsub.f32 %v5610_v14, %v4240_v25 }
 0x54f   : > { %v4189_v31 = vsel %vm344_vm0, %v4185_v62, 0  ;;  %v4165_v14 = vsel %vm316_vm1, %v4139_v38, %v6915_v52  ;;  %v4534_v22 = vadd.f32 1.0, %v6974_v26  ;;  %v4283_v21 = vand.u32 2147483647, %v4282_v47 }
 0x550   : > { %4197 = vmatpush.bf16.msrb.mxu3 %v4189_v31  ;;  %v4184_v42 = vpack.c.bf16 %v4182_v46, %v4181_v44  ;;  %v4246_v53 = vand.u32 2147483647, %v4243_v29  ;;  %v4244_v35 = vand.u32 2147483647, %v4241_v3  ;;  %v4245_v51 = vand.u32 2147483647, %v4242_v56 }
 0x551   : > { %4231 = vmatpush.bf16.msrb.mxu0 %v4219_v0  ;;  %v4166_v63 = vsel %vm319_vm2, %v4165_v14, %v6947_v45  ;;  %v4535_v33 = vand.u32 2147483647, %v4534_v22  ;;  %v4284_v24 = vsub.f32 1.0, %v4283_v21  ;;  %v4404_v48 = vand.u32 2147483647, %v6962_v34 }
 0x552   : > { %v4249_v7 = vsub.f32 1.0, %v4246_v53  ;;  %v4247_v9 = vsub.f32 1.0, %v4244_v35  ;;  %v4248_v40 = vsub.f32 1.0, %v4245_v51  ;;  %v4167_v16 = vsel %vm321_vm3, %v4166_v63, %v4163_v55 }
 0x553   : > { %v4531_v54 = vand.u32 2147483647, %v6974_v26  ;;  %v4286_v11 = vadd.f32 2.0, %v6960_v5  ;;  %v4290_v18 = vadd.f32 3.0, %v6960_v5  ;;  %v4411_v20 = vadd.f32 2.0, %v6962_v34 }
 0x554   : > { %5116 = vmatmul.msk.bf16.vlgmr.msra.gmra.mxu3 %vm486_vm5, %v5115_v43  ;;  %v4252_v10 = vmax.f32 %v4249_v7, 0.0  ;;  %v4250_v6 = vmax.f32 %v4247_v9, 0.0  ;;  %v4251_v49 = vmax.f32 %v4248_v40, 0.0  ;;  %v4409_v60 = vsub.f32 1.0, %v4408_v32 }
 0x555   : > { %5120 = vmatmul.msk.bf16.vlgmr.msra.gmra.mxu1 %vm486_vm5, %v5119_v59  ;;  %4198 = vmatpush.bf16.msrb.mxu3 %v4184_v42  ;;  %v4415_v17 = vadd.f32 3.0, %v6962_v34  ;;  %v4538_v8 = vadd.f32 2.0, %v6974_v26  ;;  %v4280_v13 = vsub.f32 1.0, %v4279_v57  ;;  %v4536_v0 = vsub.f32 1.0, %v4535_v33 }
 0x556   : > { %v4254_v58 = vpack.c.bf16 %v4252_v10, %v4252_v10  ;;  %v4253_v52 = vpack.c.bf16 %v4251_v49, %v4250_v6  ;;  %v4542_v62 = vadd.f32 3.0, %v6974_v26  ;;  %v4285_v25 = vmax.f32 %v4284_v24, 0.0 }
 0x557   : > { %v4405_v31 = vsub.f32 1.0, %v4404_v48  ;;  %v4532_v46 = vsub.f32 1.0, %v4531_v54  ;;  %v4287_v3 = vand.u32 2147483647, %v4286_v11  ;;  %v4291_v56 = vand.u32 2147483647, %v4290_v18 }
 0x558   : > { %v4256_v2 = vsel %vm344_vm0, %v4254_v58, 0  ;;  %v4412_v5 = vand.u32 2147483647, %v4411_v20  ;;  %v4410_v59 = vmax.f32 %v4409_v60, 0.0  ;;  %v4416_v38 = vand.u32 2147483647, %v4415_v17 }
 0x559   : > { %5122 = vmatmul.msk.bf16.vlgmr.msra.gmra.mxu2 %vm486_vm5, %v5121_v50  ;;  %4264 = vmatpush.bf16.msrb.mxu1 %v4256_v2  ;;  %v4539_v42 = vand.u32 2147483647, %v4538_v8  ;;  %v4281_v34 = vmax.f32 %v4280_v13, 0.0  ;;  %v4537_v53 = vmax.f32 %v4536_v0, 0.0  ;;  %v4543_v35 = vand.u32 2147483647, %v4542_v62 }
 0x55a   : > { %v4406_v7 = vmax.f32 %v4405_v31, 0.0  ;;  %v4533_v9 = vmax.f32 %v4532_v46, 0.0  ;;  %v7014_v40 = vperm.slane %v4285_v25, 0  ;;  %v4288_v14 = vsub.f32 1.0, %v4287_v3 }
 0x55b   : > { %v4292_v50 = vsub.f32 1.0, %v4291_v56  ;;  %v4413_v10 = vsub.f32 1.0, %v4412_v5  ;;  %v7016_v49 = vperm.slane %v4410_v59, 0  ;;  %v4417_v55 = vsub.f32 1.0, %v4416_v38 }
 0x55c   : > { %v4540_v63 = vsub.f32 1.0, %v4539_v42  ;;  %v7018_v58 = vperm.slane %v4281_v34, 0  ;;  %v7020_v2 = vperm.slane %v4537_v53, 0 }
 0x55d   : > { %4265 = vmatpush.bf16.msrb.mxu1 %v4253_v52  ;;  %v4293_v47 = vmax.f32 %v4292_v50, 0.0 }
 0x55e   : > { %5136 = vmatmul.msk.bf16.vlgmr.msrb.gmra.mxu0 %vm341_vm4, %v4167_v16  ;;  %v4541_v21 = vmax.f32 %v4540_v63, 0.0 }
 0x55f   : > { %v7034_v20 = vperm.slane %v4293_v47, 0 }
 0x560   : > { %v7041_v13 = vperm.slane %v4541_v21, 0 }
 0x564   : > { %5135 = vmatmul.msk.bf16.vlgmr.msrb.gmra.mxu3 %vm341_vm4, %v4167_v16 }
 0x565   : > { %5137 = vmatmul.msk.bf16.vlgmr.msrb.gmra.mxu1 %vm341_vm4, %v4167_v16  ;;  %v4544_v16 = vsub.f32 1.0, %v4543_v35 }
 0x567   : > { %v4545_v57 = vmax.f32 %v4544_v16, 0.0 }
 0x5bb   : > { %v3849_v30 = vpop.f32.mrf.mxu0 }
 0x5bc   : > { %v3796_v4 = vpop.f32.mrf.mxu2 }
 0x5c2   : > { %v3906_v28 = vpop.f32.mrf.mxu1 }
 0x5c3   : > { %v3851_v45 = vpop.f32.mrf.mxu0 }
 0x5c4   : > { %v3798_v41 = vpop.f32.mrf.mxu2 }
 0x5c5   : > { %v4289_v41 = vmax.f32 %v4288_v14, 0.0 }
 0x5c7   : > { %v3815_v19 = vpop.f32.mrf.mxu3  ;;  %v7032_v18 = vperm.slane %v4289_v41, 0 }
 0x5c8   : > { %v3816_v23 = vadd.f32 %v3815_v19, %v3796_v4  ;;  %v7024_v4 = vperm.slane %v4533_v9, 0  ;;  %v4414_v19 = vmax.f32 %v4413_v10, 0.0 }
 0x5ca   : > { %v3908_v27 = vpop.f32.mrf.mxu1  ;;  %v3853_v36 = vadd.f32 %v3849_v30, %v3816_v23  ;;  %v7022_v30 = vperm.slane %v4406_v7, 0  ;;  %v7037_v17 = vperm.slane %v4414_v19, 0 }
 0x5cb   : > { %v4033_v61 = vpop.f32.mrf.mxu0  ;;  %v4418_v27 = vmax.f32 %v4417_v55, 0.0 }
 0x5cc   : > { %v3941_v12 = vpop.f32.mrf.mxu2  ;;  %v3910_v39 = vadd.f32 %v3906_v28, %v3853_v36 }
 0x5cd   : > { %v7039_v8 = vperm.slane %v4418_v27, 0 }
 0x5ce   : > { %v3945_v51 = vadd.f32 %v3941_v12, %v3910_v39 }
 0x5cf   : > { %v3817_v1 = vpop.f32.mrf.mxu3 }
 0x5d2   : > { %v4068_v44 = vpop.f32.mrf.mxu1 }
 0x5d3   : > { %v4035_v29 = vpop.f32.mrf.mxu0 }
 0x5d4   : > { %v3943_v43 = vpop.f32.mrf.mxu2 }
 0x5d7   : > { %v3976_v26 = vpop.f32.mrf.mxu3 }
 0x5d8   : > { %v3980_v6 = vadd.f32 %v3976_v26, %v3945_v51 }
 0x5da   : > { %v4037_v52 = vadd.f32 %v4033_v61, %v3980_v6  ;;  %v4070_v28 = vpop.f32.mrf.mxu1 }
 0x5db   : > { %v4233_v45 = vpop.f32.mrf.mxu0 }
 0x5dc   : > { %v4314_v37 = vmul.f32 %v7014_v40, %v4233_v45  ;;  %v4459_v22 = vmul.f32 %v7016_v49, %v4233_v45  ;;  %v4103_v23 = vpop.f32.mrf.mxu2  ;;  %v4313_v12 = vmul.f32 %v7018_v58, %v4233_v45  ;;  %v4586_v61 = vmul.f32 %v7020_v2, %v4233_v45 }
 0x5dd   : > { %v4072_v32 = vadd.f32 %v4068_v44, %v4037_v52  ;;  %v4458_v33 = vmul.f32 %v7022_v30, %v4233_v45  ;;  %v4585_v36 = vmul.f32 %v7024_v4, %v4233_v45  ;;  %v7043_v44 = vperm.slane %v4545_v57, 0 }
 0x5de   : > { %v4316_v24 = vrot.slane %v4314_v37, 4  ;;  %v4461_v48 = vrot.slane %v4459_v22, 4  ;;  %v4588_v11 = vrot.slane %v4586_v61, 4 }
 0x5df   : > { %v4107_v54 = vadd.f32 %v4103_v23, %v4072_v32  ;;  %v3978_v1 = vpop.f32.mrf.mxu3 }
 0x5e0   : > { %v4318_v62 = vadd.f32 %v4316_v24, %v4313_v12  ;;  %v4463_v39 = vadd.f32 %v4461_v48, %v4458_v33  ;;  %v7045_v25 = vadd.f32 %v4588_v11, %v4585_v36 }
 0x5e1   : > { %v4108_v60 = vadd.f32 %v4107_v54, %v5887_v15 }
 0x5e2   : > { %v4267_v0 = vpop.f32.mrf.mxu1 }
 0x5e3   : > { %v4110_v31 = vrot.slane %v4108_v60, 1  ;;  %v4111_v46 = vrot.slane %v4108_v60, 2  ;;  %v4112_v29 = vrot.slane %v4108_v60, 3  ;;  %v4113_v3 = vrot.slane %v4108_v60, 4  ;;  %4124 = vst [vmem:[%s5902_s28 + $0x6] sm:$0x1] %v4108_v60  ;;  %v7048_v56 = vpop.f32.mrf.mxu0 }
 0x5e4   : > { %v4114_v5 = vrot.slane %v4108_v60, 5  ;;  %v4115_v43 = vrot.slane %v4108_v60, 6  ;;  %v4116_v59 = vrot.slane %v4108_v60, 7  ;;  %v4366_v38 = vmul.f32 %v7018_v58, %v4267_v0  ;;  %v4105_v42 = vpop.f32.mrf.mxu2 }
 0x5e5   : > { %4125 = vst [vmem:[%s5902_s28 + $0xe] sm:$0x1] %v4110_v31  ;;  %v4367_v34 = vmul.f32 %v7014_v40, %v4267_v0  ;;  %v4493_v53 = vmul.f32 %v7022_v30, %v4267_v0  ;;  %v4494_v35 = vmul.f32 %v7016_v49, %v4267_v0  ;;  %v4620_v51 = vmul.f32 %v7024_v4, %v4267_v0 }
 0x5e6   : > { %4126 = vst [vmem:[%s5902_s28 + $0x16] sm:$0x1] %v4111_v46  ;;  %v4621_v7 = vmul.f32 %v7020_v2, %v4267_v0  ;;  %v4319_v9 = vmul.f32 %v7032_v18, %v7048_v56  ;;  %v4321_v26 = vmul.f32 %v7034_v20, %v7048_v56  ;;  %v4464_v14 = vmul.f32 %v7037_v17, %v7048_v56 }
 0x5e7   : > { %4127 = vst [vmem:[%s5902_s28 + $0x1e] sm:$0x1] %v4112_v29  ;;  %v4200_v50 = vpop.f32.mrf.mxu3  ;;  %v4466_v10 = vmul.f32 %v7039_v8, %v7048_v56  ;;  %v4369_v6 = vrot.slane %v4367_v34, 4  ;;  %v4496_v55 = vrot.slane %v4494_v35, 4  ;;  %v7069_v63 = vmul.f32 %v7041_v13, %v7048_v56  ;;  %v5138_v29 = vld [vmem:[%s7208_s2 + $0x4] sm:$0xf] }
 0x5e8   : > { %4128 = vst [vmem:[%s5902_s28 + $0x26] sm:$0x1] %v4113_v3  ;;  %v4295_v16 = vmul.f32 %v7018_v58, %v4200_v50  ;;  %v4297_v52 = vmul.f32 %v7014_v40, %v4200_v50  ;;  %v4420_v28 = vmul.f32 %v7022_v30, %v4200_v50  ;;  %v4422_v45 = vmul.f32 %v7016_v49, %v4200_v50 }
 0x5e9   : > { %4129 = vst [vmem:[%s5902_s28 + $0x2e] sm:$0x1] %v4114_v5  ;;  %v4547_v41 = vmul.f32 %v7024_v4, %v4200_v50  ;;  %v4549_v47 = vmul.f32 %v7020_v2, %v4200_v50  ;;  %v4320_v19 = vadd.f32 %v4319_v9, %v4318_v62  ;;  %v4323_v37 = vrot.slane %v4321_v26, 4 }
 0x5ea   : > { %4130 = vst [vmem:[%s5902_s28 + $0x36] sm:$0x1] %v4115_v43  ;;  %v4269_v22 = vpop.f32.mrf.mxu1  ;;  %v4465_v23 = vadd.f32 %v4464_v14, %v4463_v39  ;;  %v4468_v27 = vrot.slane %v4466_v10, 4  ;;  %v4371_v21 = vadd.f32 %v4369_v6, %v4366_v38  ;;  %v4299_v12 = vrot.slane %v4297_v52, 4  ;;  %v5141_v6 = vld [vmem:[%s7208_s2 + $0x8] sm:$0xf] }
 0x5eb   : > { %4131 = vst [vmem:[%s5902_s28 + $0x3e] sm:$0x1] %v4116_v59  ;;  %v4325_v58 = vadd.f32 %v4323_v37, %v4320_v19  ;;  %v4372_v40 = vmul.f32 %v7032_v18, %v4269_v22  ;;  %v4374_v30 = vmul.f32 %v7034_v20, %v4269_v22  ;;  %v4424_v49 = vrot.slane %v4422_v45, 4 }
 0x5ec   : > { %v4470_v61 = vadd.f32 %v4468_v27, %v4465_v23  ;;  %v4301_v32 = vadd.f32 %v4299_v12, %v4295_v16  ;;  %v4551_v4 = vrot.slane %v4549_v47, 4  ;;  %v4623_v57 = vrot.slane %v4621_v7, 4 }
 0x5ed   : > { %v4327_v2 = vpack.c.bf16 %v4325_v58, %v4325_v58  ;;  %v4373_v33 = vadd.f32 %v4372_v40, %v4371_v21  ;;  %v4376_v36 = vrot.slane %v4374_v30, 4  ;;  %v4426_v24 = vadd.f32 %v4424_v49, %v4420_v28  ;;  %v5143_v58 = vld [vmem:[%s7208_s2 + $0xc] sm:$0xf] }
 0x5ee   : > { %v4472_v48 = vpack.c.bf16 %v4470_v61, %v4470_v61  ;;  %v4553_v54 = vadd.f32 %v4551_v4, %v4547_v41  ;;  %v4625_v1 = vadd.f32 %v4623_v57, %v4620_v51  ;;  %v4626_v11 = vmul.f32 %v7041_v13, %v4269_v22  ;;  %v5145_v61 = vld [vmem:[%s7208_s2 + $0x10] sm:$0xf]  ;;  %v5147_v4 = vld [vmem:[%s7208_s2 + $0x14] sm:$0xf]  ;;  %v5151_v57 = vld [vmem:[%s7208_s2 + $0x1c] sm:$0xf] }
 0x5ef   : > { %v4332_v60 = vsel %vm316_vm1, %v4327_v2, 0  ;;  %v4202_v0 = vpop.f32.mrf.mxu3  ;;  %v4378_v62 = vadd.f32 %v4376_v36, %v4373_v33  ;;  %v4628_v39 = vmul.f32 %v7043_v44, %v4269_v22  ;;  %v4498_v31 = vadd.f32 %v4496_v55, %v4493_v53  ;;  %v5153_v2 = vld [vmem:[%s7208_s2 + $0x20] sm:$0xf] }
 0x5f0   : > { %4341 = vmatpush.bf16.msrb.mxu2 %v4332_v60  ;;  %v4477_v46 = vsel %vm316_vm1, %v4472_v48, 0  ;;  %v4303_v3 = vmul.f32 %v7032_v18, %v4202_v0  ;;  %v4306_v5 = vmul.f32 %v7034_v20, %v4202_v0  ;;  %v4428_v43 = vmul.f32 %v7037_v17, %v4202_v0 }
 0x5f1   : > { %v4380_v59 = vpack.c.bf16 %v4378_v62, %v4378_v62  ;;  %v4431_v38 = vmul.f32 %v7039_v8, %v4202_v0  ;;  %v4555_v42 = vmul.f32 %v7041_v13, %v4202_v0  ;;  %v4558_v34 = vmul.f32 %v7043_v44, %v4202_v0 }
 0x5f2   : > { %v4304_v53 = vadd.f32 %v4303_v3, %v4301_v32  ;;  %v4308_v35 = vrot.slane %v4306_v5, 4  ;;  %v4429_v51 = vadd.f32 %v4428_v43, %v4426_v24  ;;  %v4627_v7 = vadd.f32 %v4626_v11, %v4625_v1  ;;  %v5149_v32 = vld [vmem:[%s7208_s2 + $0x18] sm:$0xf] }
 0x5f3   : > { %5139 = vmatmul.msk.bf16.vlgmr.msrb.gmra.mxu2 %vm486_vm5, %v5138_v29  ;;  %v4385_v18 = vsel %vm316_vm1, %v4380_v59, 0  ;;  %v4433_v9 = vrot.slane %v4431_v38, 4  ;;  %v4556_v20 = vadd.f32 %v4555_v42, %v4553_v54  ;;  %v4560_v26 = vrot.slane %v4558_v34, 4 }
 0x5f4   : > { %4486 = vmatpush.bf16.msra.mxu2 %v4477_v46  ;;  %4394 = vmatpush.bf16.msra.mxu0 %v4385_v18  ;;  %v4310_v14 = vadd.f32 %v4308_v35, %v4304_v53  ;;  %v4630_v50 = vrot.slane %v4628_v39, 4  ;;  %v4499_v10 = vmul.f32 %v7037_v17, %v4269_v22  ;;  %v4501_v13 = vmul.f32 %v7039_v8, %v4269_v22 }
 0x5f5   : > { %v4435_v55 = vadd.f32 %v4433_v9, %v4429_v51  ;;  %v4562_v16 = vadd.f32 %v4560_v26, %v4556_v20  ;;  %v4592_v52 = vadd.f32 %v7069_v63, %v7045_v25  ;;  %v4593_v28 = vmul.f32 %v7043_v44, %v7048_v56  ;;  %v4311_v44 = vld [vmem:[%s7208_s2] sm:$0xf] }
 0x5f6   : > { %v4312_v45 = vpack.c.bf16 %v4310_v14, %v4310_v14  ;;  %v4632_v41 = vadd.f32 %v4630_v50, %v4627_v7  ;;  %v4500_v47 = vadd.f32 %v4499_v10, %v4498_v31  ;;  %v4503_v19 = vrot.slane %v4501_v13, 4 }
 0x5f7   : > { %v4437_v37 = vpack.c.bf16 %v4435_v55, %v4435_v55  ;;  %v4564_v17 = vpack.c.bf16 %v4562_v16, %v4562_v16  ;;  %v4595_v23 = vrot.slane %v4593_v28, 4  ;;  %5142 = vmatmul.msk.bf16.vlgmr.msra.gmra.mxu0 %vm486_vm5, %v5141_v6 }
 0x5f8   : > { %v4351_v8 = vsel %vm316_vm1, %v4312_v45, 0  ;;  %v4634_v22 = vpack.c.bf16 %v4632_v41, %v4632_v41  ;;  %v4505_v27 = vadd.f32 %v4503_v19, %v4500_v47 }
 0x5f9   : > { %4360 = vmatpush.bf16.msra.mxu3 %v4351_v8  ;;  %v4442_v21 = vsel %vm316_vm1, %v4437_v37, 0  ;;  %v4569_v25 = vsel %vm316_vm1, %v4564_v17, 0  ;;  %v4597_v63 = vadd.f32 %v4595_v23, %v4592_v52 }
 0x5fa   : > { %4451 = vmatpush.bf16.msra.mxu1 %v4442_v21  ;;  %4578 = vmatpush.bf16.msrb.mxu0 %v4569_v25  ;;  %v4639_v56 = vsel %vm316_vm1, %v4634_v22, 0  ;;  %v4507_v12 = vpack.c.bf16 %v4505_v27, %v4505_v27 }
 0x5fb   : > { %4648 = vmatpush.bf16.msrb.mxu2 %v4639_v56  ;;  %v4599_v40 = vpack.c.bf16 %v4597_v63, %v4597_v63 }
 0x5fc   : > { %v4512_v30 = vsel %vm316_vm1, %v4507_v12, 0  ;;  %5140 = vmatmul.msk.bf16.vlgmr.msra.gmra.mxu3 %vm486_vm5, %v4311_v44 }
 0x5fd   : > { %4521 = vmatpush.bf16.msrb.mxu3 %v4512_v30  ;;  %v4604_v49 = vsel %vm316_vm1, %v4599_v40, 0  ;;  %5144 = vmatmul.msk.bf16.vlgmr.msra.gmra.mxu1 %vm486_vm5, %v5143_v58 }
 0x5fe   : > { %4613 = vmatpush.bf16.msrb.mxu1 %v4604_v49 }
 0x603   : > { %5146 = vmatmul.msk.bf16.vlgmr.msra.gmra.mxu2 %vm486_vm5, %v5145_v61 }
 0x607   : > { %5150 = vmatmul.msk.bf16.vlgmr.msrb.gmra.mxu0 %vm486_vm5, %v5149_v32 }
 0x60c   : > { %5148 = vmatmul.msk.bf16.vlgmr.msrb.gmra.mxu3 %vm486_vm5, %v5147_v4 }
 0x60d   : > { %5152 = vmatmul.msk.bf16.vlgmr.msrb.gmra.mxu1 %vm486_vm5, %v5151_v57 }
 0x613   : > { %5154 = vmatmul.msk.bf16.vlgmr.msrb.gmra.mxu2 %vm486_vm5, %v5153_v2 }
 0x674   : > { %v4396_v33 = vpop.f32.mrf.mxu0 }
 0x676   : > { %v4343_v36 = vpop.f32.mrf.mxu2 }
 0x67a   : > { %v4453_v24 = vpop.f32.mrf.mxu1 }
 0x67c   : > { %v4398_v48 = vpop.f32.mrf.mxu0 }
 0x67e   : > { %v4345_v54 = vpop.f32.mrf.mxu2 }
 0x67f   : > { %v4362_v1 = vpop.f32.mrf.mxu3 }
 0x680   : > { %v4363_v11 = vadd.f32 %v4362_v1, %v4343_v36 }
 0x682   : > { %v4455_v60 = vpop.f32.mrf.mxu1  ;;  %v4400_v62 = vadd.f32 %v4396_v33, %v4363_v11 }
 0x684   : > { %v4580_v0 = vpop.f32.mrf.mxu0  ;;  %v4457_v46 = vadd.f32 %v4453_v24, %v4400_v62 }
 0x686   : > { %v4488_v39 = vpop.f32.mrf.mxu2 }
 0x687   : > { %v4364_v31 = vpop.f32.mrf.mxu3  ;;  %v4492_v5 = vadd.f32 %v4488_v39, %v4457_v46 }
 0x68a   : > { %v4615_v29 = vpop.f32.mrf.mxu1 }
 0x68c   : > { %v4582_v3 = vpop.f32.mrf.mxu0 }
 0x68e   : > { %v4490_v43 = vpop.f32.mrf.mxu2 }
 0x68f   : > { %v4523_v59 = vpop.f32.mrf.mxu3 }
 0x690   : > { %v4527_v38 = vadd.f32 %v4523_v59, %v4492_v5 }
 0x692   : > { %v4584_v42 = vadd.f32 %v4580_v0, %v4527_v38  ;;  %v4617_v34 = vpop.f32.mrf.mxu1 }
 0x694   : > { %v4619_v53 = vadd.f32 %v4615_v29, %v4584_v42 }
 0x696   : > { %v4650_v35 = vpop.f32.mrf.mxu2 }
 0x697   : > { %v4654_v51 = vadd.f32 %v4650_v35, %v4619_v53  ;;  %v4525_v7 = vpop.f32.mrf.mxu3 }
 0x699   : > { %v4655_v18 = vadd.f32 %v4654_v51, %v5887_v15 }
 0x69b   : > { %v4657_v9 = vrot.slane %v4655_v18, 1  ;;  %v4658_v20 = vrot.slane %v4655_v18, 2  ;;  %v4659_v26 = vrot.slane %v4655_v18, 3  ;;  %4671 = vst [vmem:[%s5902_s28 + $0x7] sm:$0x1] %v4655_v18  ;;  %v4660_v14 = vrot.slane %v4655_v18, 4 }
 0x69c   : > { %v4661_v50 = vrot.slane %v4655_v18, 5  ;;  %v4662_v10 = vrot.slane %v4655_v18, 6  ;;  %v4663_v13 = vrot.slane %v4655_v18, 7 }
 0x69d   : > { %4672 = vst [vmem:[%s5902_s28 + $0xf] sm:$0x1] %v4657_v9 }
 0x69e   : > { %4673 = vst [vmem:[%s5902_s28 + $0x17] sm:$0x1] %v4658_v20  ;;  %v4652_v15 = vpop.f32.mrf.mxu2 }
 0x69f   : > { %4674 = vst [vmem:[%s5902_s28 + $0x1f] sm:$0x1] %v4659_v26 }
 0x6a0   : > { %4675 = vst [vmem:[%s5902_s28 + $0x27] sm:$0x1] %v4660_v14 }
 0x6a1   : > { %4676 = vst [vmem:[%s5902_s28 + $0x2f] sm:$0x1] %v4661_v50 }
 0x6a2   : > { %4677 = vst [vmem:[%s5902_s28 + $0x37] sm:$0x1] %v4662_v10 }
 0x6a3   : > { %4678 = vst [vmem:[%s5902_s28 + $0x3f] sm:$0x1] %v4663_v13 }
 0x6a4   : > { %5345 = shalt.err (!%p5342_p8)
}
 0x6a5   : > { %s5445_s7 = smov 128   ;;  %s5446_s28 = smov 256  }
 0x6a6   : > { %s5447_s8 = smov 8  }
 0x6a7   : > { %5181 = dma.vmem_to_hbm [thread:$0]  (%p5555_p12), %s4695_s21, 1024, %s4697_s5, %s4680_s26, %s5445_s7, %s5446_s28, %s5447_s8  }
 0x6a8 PF: > { %p5192_p3 = scmp.ge.s32.totalorder %s5440_s25, 2  ;;  %s4711_s23 = sand.u32 1, %s5400_s15  }
 0x6a9   : > { %s4712_s12 = scalar_lea.sflag [#allocation4], %s4711_s23 }
 0x6aa   : > { %p5188_p9 = pnand %p5192_p3, %p5568_p2 }
 0x6ac   : > { %p5189_p10 = pneg %p5188_p9 }
 0x6ae   : > { %5395 = dma.done.wait (%p5189_p10), %s4712_s12, 1024  }
 0x6af   : > { %5397 = vsyncadd (%p5189_p10), %s4712_s12, 4294966272  ;;  %s20_s25 = sadd.s32 1, %s5440_s25   ;;  %s7226_s11 = sld [smem:[#allocation8_spill]] }
 0x6b0   : > { %p17_p7 = scmp.ge.s32.totalorder %s20_s25, 6   ;;  %s7227_s20 = sld [smem:[#allocation13_spill]] }
 0x6b1   : > { %s7228_s21 = sld [smem:[#allocation9_spill]]  ;;  %s7232_s15 = smov %s5404_s16 }
 0x6b2   : > { %s7229_s22 = sld [smem:[#allocation10_spill]]  ;;  %s7233_s16 = smov %s5408_s17 }
 0x6b3   : > { %s7230_s23 = sld [smem:[#allocation11_spill]]  ;;  %s7234_s17 = smov %s5563_s13 }
 0x6b4   : > { %s7231_s24 = sld [smem:[#allocation12_spill]]  ;;  %s7235_s18 = smov %s5416_s19 }
 0x6b5   : > { %s7236_s19 = smov %s7226_s11  ;;  %19 = sbr.rel (!%p17_p7) target bundleno = 9 (0x9), region = 148 }
 0x6ba   :  { %4718 = vsyncpa [#allocation3], 1 }
 0x6bb   :  { %4720 = vsyncpa [#allocation3 + $0x1], 1 }
 0x6bc   :  { %4721 = vsyncpa [#allocation4], 1 }
 0x6bd   :  { %4723 = vsyncpa [#allocation4 + $0x1], 1 }

</bundles_post_ra>
